<compile_context>
chip_gen: v5e
topology: v5e:2x2
jax: 0.10.0
libtpu: 0.0.40
codegen_flags: <defaults>
</compile_context>

<pallas_src>
import math
import numpy as np
import jax
import jax.numpy as jnp
from jax.experimental import pallas as pl
from jax.experimental.pallas import tpu as pltpu

F32 = jnp.float32
BF16 = jnp.bfloat16
EXP_MAX = 0.0          # cfg['light_exp_max']
INNER_INIT = -0.95     # cfg['inner_init']
FEATS_DIM = 128        # cfg['app_feats_dim']
RUN_DIM = 128          # hidden width of make_predictor_3layer
DEG_VIEW = 5
LMAX = 2 ** (DEG_VIEW - 1)   # 16
POS_FREQ = 8           # cfg['light_pos_freq']  -> 51-dim embedding (3 + 48 sin rows)
DIR_FREQ = 6           # dir_enc                -> 39-dim embedding (3 + 36 sin rows)
MAT_SIN_ROWS = 18      # 3-freq material embedding = pts + first 18 sin rows


# ---------------- host-side constant construction (numpy) ----------------

def _gen_binom(a, k):
    return np.prod(a - np.arange(k)) / math.factorial(k)


def _assoc_legendre_coeff(l, m, k):
    return ((-1) ** m * 2 ** l * math.factorial(l) / math.factorial(k) /
            math.factorial(l - k - m) * _gen_binom(0.5 * (l + k + m - 1.0), l))


def _sph_harm_coeff(l, m, k):
    return (math.sqrt((2.0 * l + 1.0) * math.factorial(l - m) /
                      (4.0 * math.pi * math.factorial(l + m))) *
            _assoc_legendre_coeff(l, m, k))


def _get_ml_array(deg_view):
    ml = []
    for i in range(deg_view):
        l = 2 ** i
        for m in range(l + 1):
            ml.append((m, l))
    return np.array(ml).T          # (2, 36): row0 = m, row1 = l


def make_ide_constants():
    """Constants for generate_ide_fn(5), stored transposed for [C, N] layout."""
    ml = _get_ml_array(DEG_VIEW)
    n_coef = ml.shape[1]           # 36 -> encoding dim 72 (real + imag)
    mat = np.zeros((LMAX + 1, n_coef), np.float32)
    sel = np.zeros((LMAX + 1, n_coef), np.float32)
    sigma = np.zeros((n_coef, 1), np.float32)
    for i in range(n_coef):
        m, l = int(ml[0, i]), int(ml[1, i])
        for k in range(l - m + 1):
            mat[k, i] = _sph_harm_coeff(l, m, k)
        sel[m, i] = 1.0
        sigma[i, 0] = 0.5 * l * (l + 1)
    return np.ascontiguousarray(mat.T), np.ascontiguousarray(sel.T), sigma


def make_posenc_sin_table(num_freqs):
    """(6*num_freqs, 4) table of sin rows: cols 0..2 per-xyz scale, col 3 phase
    (0 = sin, pi/2 = cos).  The identity rows are handled separately in-kernel."""
    rows = []
    for k in range(num_freqs):
        f = 2.0 ** k
        for phase in (0.0, math.pi / 2.0):
            for c in range(3):
                row = [0.0, 0.0, 0.0, phase]
                row[c] = f
                rows.append(row)
    return np.array(rows, np.float32)


# ---------------- in-kernel helpers ----------------

def _l2norm(x):                              # F.normalize(dim=-1), channels on axis 0
    n = jnp.sqrt(jnp.sum(x * x, axis=0, keepdims=True))
    return x / jnp.maximum(n, 1e-12)


def _lin2srgb(x):
    eps = float(np.finfo(np.float32).eps)
    srgb0 = x * (323.0 / 25.0)
    xp = jnp.maximum(x, eps)
    srgb1 = (211.0 * jnp.exp((5.0 / 12.0) * jnp.log(xp)) - 11.0) / 200.0
    return jnp.where(x <= 0.0031308, srgb0, srgb1)


def _exp_act(x):                             # ExpActivation(max_light=0.0)
    return jnp.exp(jnp.minimum(x, EXP_MAX))


def posenc_sin(p, tbl):
    """sin rows of the NeRF positional encoding: sin(f * coord + phase)."""
    s = (tbl[:, 0:1] * p[0:1, :] + tbl[:, 1:2] * p[1:2, :]
         + tbl[:, 2:3] * p[2:3, :] + tbl[:, 3:4])
    return jnp.sin(s)                        # (K, n)


def ide(dirs, kappa_inv, matT, selT, sigmaT):
    """Integrated directional encoding (ref-NeRF); returns (real, imag) halves."""
    x = dirs[0:1, :]
    y = dirs[1:2, :]
    z = dirs[2:3, :]
    zp = jnp.ones_like(z)
    re = jnp.ones_like(x)
    im = jnp.zeros_like(x)
    zp_rows, re_rows, im_rows = [zp], [re], [im]
    for _ in range(LMAX):                    # powers z^p and (x+iy)^p, p = 1..16
        zp = zp * z
        re, im = re * x - im * y, re * y + im * x
        zp_rows.append(zp)
        re_rows.append(re)
        im_rows.append(im)
    vmz = jnp.concatenate(zp_rows, axis=0)   # (17, m)
    vre = jnp.concatenate(re_rows, axis=0)
    vim = jnp.concatenate(im_rows, axis=0)
    zcomp = jnp.dot(matT, vmz, preferred_element_type=F32)        # (36, m)
    atten = jnp.exp(-sigmaT * kappa_inv)                          # (36, m)
    zca = zcomp * atten
    sre = jnp.dot(selT, vre, preferred_element_type=F32) * zca
    sim = jnp.dot(selT, vim, preferred_element_type=F32) * zca
    return sre, sim


# ---------------- the Pallas kernel ----------------

def shade_kernel(pts_ref, nrm_ref, vd_ref, feat_ref,
                 t_pos_ref, t_dir_ref, ide_mat_ref, ide_sel_ref, ide_sig_ref,
                 lut_ref, w0_mat_ref, w0_ol_ref, w0_il_ref, w0_iw_ref,
                 w1_ref, w2_ref, b1_ref, b2_ref,
                 out_ref):
    pts = pts_ref[...]                       # (3, tn) f32
    nrm = _l2norm(nrm_ref[...])              # (3, tn)
    vd = _l2norm(vd_ref[...])                # (3, tn)
    feat_b = feat_ref[...]                   # (128, tn) bf16 (host-transposed)
    tn = pts.shape[1]

    # normals[normals[:, :2].sum(-1) == 0] = [0, 1e-6, 1]  (literal reference match)
    row3 = jax.lax.broadcasted_iota(jnp.int32, (3, 1), 0)
    repl = jnp.where(row3 == 1, 1e-6, jnp.where(row3 == 2, 1.0, 0.0)).astype(F32)
    nrm = jnp.where((nrm[0:1, :] + nrm[1:2, :]) == 0.0, repl, nrm)

    NoV = jnp.sum(vd * nrm, axis=0, keepdims=True)           # (1, tn)
    reflective = NoV * nrm * 2.0 - vd                         # (3, tn)

    # ---- shared positional encodings (sin rows only, computed once) ----
    pts_sin = posenc_sin(pts, t_pos_ref[...])                 # (48, tn)
    ref_sin = posenc_sin(reflective, t_dir_ref[...])          # (36, tn)
    pts_b = pts.astype(BF16)
    pts_sin_b = pts_sin.astype(BF16)
    ref_b = reflective.astype(BF16)
    ref_sin_b = ref_sin.astype(BF16)
    ones1 = jnp.ones((1, tn), BF16)          # folds layer-0 biases into the weight

    # packed hidden / head weights
    w1a = w1_ref[...]                        # (512, 128) bf16
    w2a = w2_ref[...]                        # (32, 128)  bf16
    b1a = b1_ref[...]                        # (128, 4)   f32
    b2a = b2_ref[...]                        # (32, 1)    f32

    def head(h0, j):
        # Linear-ReLU-Linear-ReLU-Linear tail (layer-0 pre-activation h0 supplied)
        h = jnp.maximum(h0, 0.0)
        w1 = w1a[j * 128:(j + 1) * 128, :]
        h = jnp.maximum(
            jnp.dot(w1, h.astype(BF16), preferred_element_type=F32)
            + b1a[:, j:j + 1], 0.0)
        w2 = w2a[j * 8:(j + 1) * 8, :]
        return (jnp.dot(w2, h.astype(BF16), preferred_element_type=F32)
                + b2a[j * 8:(j + 1) * 8, :])                  # (8, n)

    # ---- material MLP (sigmoid head): fused [feats | pts | sin18 | 1] ----
    mat_in = jnp.concatenate(
        [feat_b, pts_b, pts_sin_b[0:MAT_SIN_ROWS, :], ones1], axis=0)   # (150, tn)
    h0 = jnp.dot(w0_mat_ref[...], mat_in, preferred_element_type=F32)
    mat = jax.nn.sigmoid(head(h0, 0))                         # (8, tn)
    albedo = mat[0:3, :]
    roughness = mat[3:4, :]
    metallic = mat[4:5, :]

    # ---- batched outer_light: specular = ide(reflective, rough), diffuse = ide(nrm, 1)
    dirs_cat = jnp.concatenate([reflective, nrm], axis=1)     # (3, 2tn)
    kappa_cat = jnp.concatenate([roughness, jnp.ones_like(roughness)], axis=1)
    re_cat, im_cat = ide(dirs_cat, kappa_cat,
                         ide_mat_ref[...], ide_sel_ref[...], ide_sig_ref[...])
    re_b = re_cat.astype(BF16)
    im_b = im_cat.astype(BF16)
    ones2 = jnp.ones((1, 2 * tn), BF16)

    ol_in = jnp.concatenate([re_b, im_b, ones2], axis=0)      # (73, 2tn)
    h0 = jnp.dot(w0_ol_ref[...], ol_in, preferred_element_type=F32)
    outer = _exp_act(head(h0, 1))                             # (8, 2tn)
    direct_light = outer[0:3, :tn]
    diffuse_light = outer[0:3, tn:]
    sre_b = re_b[:, :tn]                                      # specular encodings
    sim_b = im_b[:, :tn]

    diffuse_albedo = (1.0 - metallic) * albedo
    diffuse_color = diffuse_albedo * diffuse_light
    specular_albedo = 0.04 * (1.0 - metallic) + metallic * albedo

    # ---- indirect light: fused [pts | pts_sin | sre | sim | 1] ----
    il_in = jnp.concatenate([pts_b, pts_sin_b, sre_b, sim_b, ones1], axis=0)  # (124, tn)
    h0 = jnp.dot(w0_il_ref[...], il_in, preferred_element_type=F32)
    indirect_light = _exp_act(head(h0, 2))[0:3, :]            # (3, tn)

    # ---- occlusion weight: fused [pts | pts_sin | ref | ref_sin | 1] ----
    iw_in = jnp.concatenate([pts_b, pts_sin_b, ref_b, ref_sin_b, ones1], axis=0)  # (91, tn)
    h0 = jnp.dot(w0_iw_ref[...], iw_in, preferred_element_type=F32)
    occ_prob = head(h0, 3)[0:1, :] * 0.5 + 0.5                # (1, tn), unclipped
    occ_c = jnp.clip(occ_prob, 0.0, 1.0)
    specular_light = indirect_light * occ_c + direct_light * (1.0 - occ_c)

    # ---- FG LUT bilinear lookup: abs-formula one-hots + MXU-routed reductions ----
    row256 = jax.lax.broadcasted_iota(jnp.int32, (256, 1), 0).astype(F32)

    def bilinear_w(t, dtype):
        tc = jnp.clip(t * 256.0 - 0.5, 0.0, 255.0)            # clamp addressing
        return jnp.clip(1.0 - jnp.abs(row256 - tc), 0.0, 1.0).astype(dtype)

    wu = bilinear_w(jnp.clip(NoV, 0.0, 1.0), F32)             # (256, tn) u -> LUT width
    wv = bilinear_w(jnp.clip(roughness, 0.0, 1.0), BF16)      # (256, tn) v -> LUT height
    A = jnp.dot(lut_ref[...], wv, preferred_element_type=F32)  # (512, tn)
    ones256 = jnp.ones((1, 256), F32)
    fg0 = jnp.dot(ones256, A[0:256, :] * wu, preferred_element_type=F32)    # (1, tn)
    fg1 = jnp.dot(ones256, A[256:512, :] * wu, preferred_element_type=F32)  # (1, tn)

    specular_ref = specular_albedo * fg0 + fg1
    specular_color = specular_ref * specular_light
    color = jnp.clip(_lin2srgb(diffuse_color + specular_color), 0.0, 1.0)

    # packed lane-dense output slab: color 3 | reflective 3 | occ 1 | rough 1
    out_ref[0:3, :] = color
    out_ref[3:6, :] = reflective
    out_ref[6:7, :] = occ_prob
    out_ref[7:8, :] = roughness


# ---------------- parameter / constant initialization ----------------

def init_params(key):
    ide_matT, ide_selT, ide_sigmaT = make_ide_constants()
    consts = [
        jnp.asarray(make_posenc_sin_table(POS_FREQ)),   # (48, 4)
        jnp.asarray(make_posenc_sin_table(DIR_FREQ)),   # (36, 4)
        jnp.asarray(ide_matT),                          # (36, 17)
        jnp.asarray(ide_selT),                          # (36, 17)
        jnp.asarray(ide_sigmaT),                        # (36, 1)
    ]
    kit = iter(jax.random.split(key, 32))

    def uni(shape, k):
        return jax.random.uniform(next(kit), shape, F32, -k, k)

    def layer0(in_dim):
        # nn.Linear-style init; bias folded as the last weight column (ones-row input)
        k = 1.0 / np.sqrt(in_dim)
        w = uni((RUN_DIM, in_dim), k)
        b = uni((RUN_DIM, 1), k)
        return jnp.concatenate([w, b], axis=1).astype(BF16)

    # fused layer-0 weights (column order must match the in-kernel concat order)
    w0_mat = layer0(FEATS_DIM + 21)   # (128, 150): [feat 128 | pts 3 | sin18 | bias]
    w0_ol = layer0(72)                # (128, 73) : [re 36 | im 36 | bias]
    w0_il = layer0(51 + 72)           # (128, 124): [pts 3 | sin48 | sre 36 | sim 36 | bias]
    w0_iw = layer0(51 + 39)           # (128, 91) : [pts 3 | sin48 | ref 3 | sin36 | bias]

    k128 = 1.0 / np.sqrt(RUN_DIM)
    # packed hidden weights / biases: head order 0=mat, 1=outer, 2=inner_light, 3=inner_weight
    w1_all = jnp.concatenate([uni((RUN_DIM, RUN_DIM), k128) for _ in range(4)],
                             axis=0).astype(BF16)             # (512, 128)
    b1_all = jnp.concatenate([uni((RUN_DIM, 1), k128) for _ in range(4)], axis=1)  # (128, 4)

    log_half = float(np.log(0.5))
    out_dims = (5, 3, 3, 1)
    head_b2 = (None, log_half, log_half, INNER_INIT)          # None -> default init
    w2_rows, b2_rows = [], []
    for j, od in enumerate(out_dims):
        w = jnp.zeros((8, RUN_DIM), F32).at[:od].set(uni((od, RUN_DIM), k128))
        if head_b2[j] is None:
            b = jnp.zeros((8, 1), F32).at[:od].set(uni((od, 1), k128))
        else:
            b = jnp.zeros((8, 1), F32).at[:od].set(jnp.full((od, 1), head_b2[j], F32))
        w2_rows.append(w)
        b2_rows.append(b)
    w2_all = jnp.concatenate(w2_rows, axis=0).astype(BF16)    # (32, 128)
    b2_all = jnp.concatenate(b2_rows, axis=0)                 # (32, 1)

    # synthetic FG_LUT (the real module reads assets/bsdf_256_256.bin);
    # stored as [L0^T ; L1^T] so both channels share one MXU contraction with wv.
    lut = jax.random.uniform(next(kit), (256, 256, 2), F32)
    lutT = jnp.concatenate([lut[..., 0].T, lut[..., 1].T], axis=0).astype(BF16)  # (512, 256)

    return consts + [lutT, w0_mat, w0_ol, w0_il, w0_iw, w1_all, w2_all, b1_all, b2_all]


# ---------------- wrapper ----------------

def _ceil_to(x, m):
    return ((x + m - 1) // m) * m


def shape_shading_forward(params, points, normals, view_dirs, feature_vectors,
                          human_poses=None, inter_results=False, step=None,
                          tile_n=512):
    # human_poses unused (cfg['human_light'] = False in the default config)
    del human_poses, inter_results, step
    n = points.shape[0]
    n_ceil = _ceil_to(n, 128)
    tile = max(128, min((tile_n // 128) * 128, n_ceil))
    if n_ceil >= 256:
        # keep >=2 grid steps when the batch allows it (feeds both v7x TensorCores)
        tile = min(tile, max(128, (n_ceil // 256) * 128))
    n_pad = _ceil_to(n, tile)

    def pad(x):
        return jnp.pad(x, ((0, n_pad - n), (0, 0))) if n_pad != n else x

    # feature-major kernel layout: points on lanes; features pre-cast to bf16
    pts_t = pad(points).T                           # (3, n_pad)
    nrm_t = pad(normals).T                          # (3, n_pad)
    vd_t = pad(view_dirs).T                         # (3, n_pad)
    feat_t = pad(feature_vectors).T.astype(BF16)    # (128, n_pad)

    data = [pts_t, nrm_t, vd_t, feat_t]
    in_specs = ([pl.BlockSpec((3, tile), lambda i: (0, i))] * 3
                + [pl.BlockSpec((feat_t.shape[0], tile), lambda i: (0, i))]
                + [pl.BlockSpec(p.shape, lambda i: (0, 0)) for p in params])

    vmem_bytes = (24 if tile <= 512 else 40) * 1024 * 1024
    out = pl.pallas_call(
        shade_kernel,
        out_shape=jax.ShapeDtypeStruct((8, n_pad), F32),
        grid=(n_pad // tile,),
        in_specs=in_specs,
        out_specs=pl.BlockSpec((8, tile), lambda i: (0, i)),
        compiler_params=pltpu.CompilerParams(
            dimension_semantics=("parallel",),
            vmem_limit_bytes=vmem_bytes),
    )(*data, *params)

    out = out[:, :n].T                    # (n, 8)
    color = out[:, 0:3]
    occ_info = {"reflective": out[:, 3:6],
                "occ_prob": out[:, 6:7],
                "roughness": out[:, 7:8]}
    # default cfg: has_radiance_field=False  ->  (color, None, occ_info)
    return color, None, occ_info


if __name__ == "__main__":
    key = jax.random.PRNGKey(0)
    kp, kn, kv, kf, kparam = jax.random.split(key, 5)
    N = 128
    points = jax.random.normal(kp, (N, 3), F32)
    normals = jax.random.normal(kn, (N, 3), F32)
    view_dirs = jax.random.normal(kv, (N, 3), F32)
    feature_vectors = jax.random.normal(kf, (N, FEATS_DIM), F32)
    human_poses = jnp.tile(jnp.eye(3, 4, dtype=F32)[None], (N, 1, 1))  # unused

    params = init_params(kparam)
    color, radiance, occ_info = shape_shading_forward(
        params, points, normals, view_dirs, feature_vectors, human_poses)
    jax.block_until_ready((color, occ_info))

    assert color.shape == (N, 3)
    assert occ_info["reflective"].shape == (N, 3)
    assert occ_info["occ_prob"].shape == (N, 1)
    assert occ_info["roughness"].shape == (N, 1)
    assert radiance is None
    assert bool(jnp.isfinite(color).all())
    print("KERNEL_OK")
</pallas_src>

<mosaic_0001>
module attributes {stable_mosaic.version = 11 : i64} {
  func.func @shade_kernel(%arg0: i32, %arg1: memref<3x128xf32, #tpu.memory_space<vmem>>, %arg2: memref<3x128xf32, #tpu.memory_space<vmem>>, %arg3: memref<3x128xf32, #tpu.memory_space<vmem>>, %arg4: memref<128x128xbf16, #tpu.memory_space<vmem>>, %arg5: memref<48x4xf32, #tpu.memory_space<vmem>>, %arg6: memref<36x4xf32, #tpu.memory_space<vmem>>, %arg7: memref<36x17xf32, #tpu.memory_space<vmem>>, %arg8: memref<36x17xf32, #tpu.memory_space<vmem>>, %arg9: memref<36x1xf32, #tpu.memory_space<vmem>>, %arg10: memref<512x256xbf16, #tpu.memory_space<vmem>>, %arg11: memref<128x150xbf16, #tpu.memory_space<vmem>>, %arg12: memref<128x73xbf16, #tpu.memory_space<vmem>>, %arg13: memref<128x124xbf16, #tpu.memory_space<vmem>>, %arg14: memref<128x91xbf16, #tpu.memory_space<vmem>>, %arg15: memref<512x128xbf16, #tpu.memory_space<vmem>>, %arg16: memref<32x128xbf16, #tpu.memory_space<vmem>>, %arg17: memref<128x4xf32, #tpu.memory_space<vmem>>, %arg18: memref<32x1xf32, #tpu.memory_space<vmem>>, %arg19: memref<8x128xf32, #tpu.memory_space<vmem>>) attributes {dimension_semantics = [#tpu.dimension_semantics<parallel>], iteration_bounds = array<i64: 1>, scalar_prefetch = 0 : i64, scratch_operands = 0 : i64, tpu.core_type = #tpu.core_type<tc>, window_params = [{transform_indices = @transform_0, window_bounds = array<i64: 3, 128>}, {transform_indices = @transform_1, window_bounds = array<i64: 3, 128>}, {transform_indices = @transform_2, window_bounds = array<i64: 3, 128>}, {transform_indices = @transform_3, window_bounds = array<i64: 128, 128>}, {pipeline_mode = #tpu.pipeline_mode<synchronous>, transform_indices = @transform_4, window_bounds = array<i64: 48, 4>}, {pipeline_mode = #tpu.pipeline_mode<synchronous>, transform_indices = @transform_5, window_bounds = array<i64: 36, 4>}, {pipeline_mode = #tpu.pipeline_mode<synchronous>, transform_indices = @transform_6, window_bounds = array<i64: 36, 17>}, {pipeline_mode = #tpu.pipeline_mode<synchronous>, transform_indices = @transform_7, window_bounds = array<i64: 36, 17>}, {pipeline_mode = #tpu.pipeline_mode<synchronous>, transform_indices = @transform_8, window_bounds = array<i64: 36, 1>}, {pipeline_mode = #tpu.pipeline_mode<synchronous>, transform_indices = @transform_9, window_bounds = array<i64: 512, 256>}, {pipeline_mode = #tpu.pipeline_mode<synchronous>, transform_indices = @transform_10, window_bounds = array<i64: 128, 150>}, {pipeline_mode = #tpu.pipeline_mode<synchronous>, transform_indices = @transform_11, window_bounds = array<i64: 128, 73>}, {pipeline_mode = #tpu.pipeline_mode<synchronous>, transform_indices = @transform_12, window_bounds = array<i64: 128, 124>}, {pipeline_mode = #tpu.pipeline_mode<synchronous>, transform_indices = @transform_13, window_bounds = array<i64: 128, 91>}, {pipeline_mode = #tpu.pipeline_mode<synchronous>, transform_indices = @transform_14, window_bounds = array<i64: 512, 128>}, {pipeline_mode = #tpu.pipeline_mode<synchronous>, transform_indices = @transform_15, window_bounds = array<i64: 32, 128>}, {pipeline_mode = #tpu.pipeline_mode<synchronous>, transform_indices = @transform_16, window_bounds = array<i64: 128, 4>}, {pipeline_mode = #tpu.pipeline_mode<synchronous>, transform_indices = @transform_17, window_bounds = array<i64: 32, 1>}, {transform_indices = @transform_18, window_bounds = array<i64: 8, 128>}]} {
    %c0 = arith.constant 0 : index
    %c0_0 = arith.constant 0 : index
    %0 = vector.load %arg1[%c0, %c0_0] : memref<3x128xf32, #tpu.memory_space<vmem>>, vector<3x128xf32>
    %c0_1 = arith.constant 0 : index
    %c0_2 = arith.constant 0 : index
    %1 = vector.load %arg2[%c0_1, %c0_2] : memref<3x128xf32, #tpu.memory_space<vmem>>, vector<3x128xf32>
    %2 = arith.mulf %1, %1 : vector<3x128xf32>
    %cst = arith.constant dense<0.000000e+00> : vector<128xf32>
    %3 = vector.multi_reduction <add>, %2, %cst [0] : vector<3x128xf32> to vector<128xf32>
    %4 = vector.shape_cast %3 : vector<128xf32> to vector<1x128xf32>
    %5 = math.sqrt %4 : vector<1x128xf32>
    %cst_3 = arith.constant 9.99999996E-13 : f32
    %6 = vector.broadcast %cst_3 : f32 to vector<1x128xf32>
    %7 = arith.maximumf %5, %6 : vector<1x128xf32>
    %8 = vector.broadcast %7 : vector<1x128xf32> to vector<3x128xf32>
    %9 = arith.divf %1, %8 : vector<3x128xf32>
    %c0_4 = arith.constant 0 : index
    %c0_5 = arith.constant 0 : index
    %10 = vector.load %arg3[%c0_4, %c0_5] : memref<3x128xf32, #tpu.memory_space<vmem>>, vector<3x128xf32>
    %11 = arith.mulf %10, %10 : vector<3x128xf32>
    %cst_6 = arith.constant dense<0.000000e+00> : vector<128xf32>
    %12 = vector.multi_reduction <add>, %11, %cst_6 [0] : vector<3x128xf32> to vector<128xf32>
    %13 = vector.shape_cast %12 : vector<128xf32> to vector<1x128xf32>
    %14 = math.sqrt %13 : vector<1x128xf32>
    %cst_7 = arith.constant 9.99999996E-13 : f32
    %15 = vector.broadcast %cst_7 : f32 to vector<1x128xf32>
    %16 = arith.maximumf %14, %15 : vector<1x128xf32>
    %17 = vector.broadcast %16 : vector<1x128xf32> to vector<3x128xf32>
    %18 = arith.divf %10, %17 : vector<3x128xf32>
    %c0_8 = arith.constant 0 : index
    %c0_9 = arith.constant 0 : index
    %19 = vector.load %arg4[%c0_8, %c0_9] : memref<128x128xbf16, #tpu.memory_space<vmem>>, vector<128x128xbf16>
    %20 = tpu.iota {dimensions = array<i32: 0>} : vector<3x1xi32>
    %c1_i32 = arith.constant 1 : i32
    %21 = vector.broadcast %c1_i32 : i32 to vector<3x1xi32>
    %22 = arith.cmpi eq, %20, %21 : vector<3x1xi32>
    %c2_i32 = arith.constant 2 : i32
    %23 = vector.broadcast %c2_i32 : i32 to vector<3x1xi32>
    %24 = arith.cmpi eq, %20, %23 : vector<3x1xi32>
    %cst_10 = arith.constant 1.000000e+00 : f32
    %cst_11 = arith.constant 0.000000e+00 : f32
    %25 = vector.broadcast %cst_10 : f32 to vector<3x1xf32>
    %26 = vector.broadcast %cst_11 : f32 to vector<3x1xf32>
    %27 = arith.select %24, %25, %26 : vector<3x1xi1>, vector<3x1xf32>
    %cst_12 = arith.constant 9.99999997E-7 : f32
    %28 = vector.broadcast %cst_12 : f32 to vector<3x1xf32>
    %29 = arith.select %22, %28, %27 : vector<3x1xi1>, vector<3x1xf32>
    %30 = vector.extract_strided_slice %9 {offsets = [0, 0], sizes = [1, 128], strides = [1, 1]} : vector<3x128xf32> to vector<1x128xf32>
    %31 = vector.extract_strided_slice %9 {offsets = [1, 0], sizes = [1, 128], strides = [1, 1]} : vector<3x128xf32> to vector<1x128xf32>
    %32 = arith.addf %30, %31 : vector<1x128xf32>
    %cst_13 = arith.constant 0.000000e+00 : f32
    %33 = vector.broadcast %cst_13 : f32 to vector<1x128xf32>
    %34 = arith.cmpf oeq, %32, %33 : vector<1x128xf32>
    %35 = vector.shape_cast %34 : vector<1x128xi1> to vector<1x128xi1>
    %36 = vector.broadcast %35 : vector<1x128xi1> to vector<3x128xi1>
    %37 = vector.shape_cast %29 : vector<3x1xf32> to vector<3x1xf32>
    %38 = vector.broadcast %37 : vector<3x1xf32> to vector<3x128xf32>
    %39 = arith.select %36, %38, %9 : vector<3x128xi1>, vector<3x128xf32>
    %40 = arith.mulf %18, %39 : vector<3x128xf32>
    %cst_14 = arith.constant dense<0.000000e+00> : vector<128xf32>
    %41 = vector.multi_reduction <add>, %40, %cst_14 [0] : vector<3x128xf32> to vector<128xf32>
    %42 = vector.shape_cast %41 : vector<128xf32> to vector<1x128xf32>
    %43 = vector.broadcast %42 : vector<1x128xf32> to vector<3x128xf32>
    %44 = arith.mulf %43, %39 : vector<3x128xf32>
    %cst_15 = arith.constant 2.000000e+00 : f32
    %45 = vector.broadcast %cst_15 : f32 to vector<3x128xf32>
    %46 = arith.mulf %44, %45 : vector<3x128xf32>
    %47 = arith.subf %46, %18 : vector<3x128xf32>
    %c0_16 = arith.constant 0 : index
    %c0_17 = arith.constant 0 : index
    %48 = vector.load %arg5[%c0_16, %c0_17] : memref<48x4xf32, #tpu.memory_space<vmem>>, vector<48x4xf32>
    %49 = vector.extract_strided_slice %48 {offsets = [0, 0], sizes = [48, 1], strides = [1, 1]} : vector<48x4xf32> to vector<48x1xf32>
    %50 = vector.extract_strided_slice %0 {offsets = [0, 0], sizes = [1, 128], strides = [1, 1]} : vector<3x128xf32> to vector<1x128xf32>
    %51 = vector.broadcast %49 : vector<48x1xf32> to vector<48x128xf32>
    %52 = vector.broadcast %50 : vector<1x128xf32> to vector<48x128xf32>
    %53 = arith.mulf %51, %52 : vector<48x128xf32>
    %54 = vector.extract_strided_slice %48 {offsets = [0, 1], sizes = [48, 1], strides = [1, 1]} : vector<48x4xf32> to vector<48x1xf32>
    %55 = vector.extract_strided_slice %0 {offsets = [1, 0], sizes = [1, 128], strides = [1, 1]} : vector<3x128xf32> to vector<1x128xf32>
    %56 = vector.broadcast %54 : vector<48x1xf32> to vector<48x128xf32>
    %57 = vector.broadcast %55 : vector<1x128xf32> to vector<48x128xf32>
    %58 = arith.mulf %56, %57 : vector<48x128xf32>
    %59 = arith.addf %53, %58 : vector<48x128xf32>
    %60 = vector.extract_strided_slice %48 {offsets = [0, 2], sizes = [48, 1], strides = [1, 1]} : vector<48x4xf32> to vector<48x1xf32>
    %61 = vector.extract_strided_slice %0 {offsets = [2, 0], sizes = [1, 128], strides = [1, 1]} : vector<3x128xf32> to vector<1x128xf32>
    %62 = vector.broadcast %60 : vector<48x1xf32> to vector<48x128xf32>
    %63 = vector.broadcast %61 : vector<1x128xf32> to vector<48x128xf32>
    %64 = arith.mulf %62, %63 : vector<48x128xf32>
    %65 = arith.addf %59, %64 : vector<48x128xf32>
    %66 = vector.extract_strided_slice %48 {offsets = [0, 3], sizes = [48, 1], strides = [1, 1]} : vector<48x4xf32> to vector<48x1xf32>
    %67 = vector.broadcast %66 : vector<48x1xf32> to vector<48x128xf32>
    %68 = arith.addf %65, %67 : vector<48x128xf32>
    %69 = math.sin %68 : vector<48x128xf32>
    %c0_18 = arith.constant 0 : index
    %c0_19 = arith.constant 0 : index
    %70 = vector.load %arg6[%c0_18, %c0_19] : memref<36x4xf32, #tpu.memory_space<vmem>>, vector<36x4xf32>
    %71 = vector.extract_strided_slice %70 {offsets = [0, 0], sizes = [36, 1], strides = [1, 1]} : vector<36x4xf32> to vector<36x1xf32>
    %72 = vector.extract_strided_slice %47 {offsets = [0, 0], sizes = [1, 128], strides = [1, 1]} : vector<3x128xf32> to vector<1x128xf32>
    %73 = vector.broadcast %71 : vector<36x1xf32> to vector<36x128xf32>
    %74 = vector.broadcast %72 : vector<1x128xf32> to vector<36x128xf32>
    %75 = arith.mulf %73, %74 : vector<36x128xf32>
    %76 = vector.extract_strided_slice %70 {offsets = [0, 1], sizes = [36, 1], strides = [1, 1]} : vector<36x4xf32> to vector<36x1xf32>
    %77 = vector.extract_strided_slice %47 {offsets = [1, 0], sizes = [1, 128], strides = [1, 1]} : vector<3x128xf32> to vector<1x128xf32>
    %78 = vector.broadcast %76 : vector<36x1xf32> to vector<36x128xf32>
    %79 = vector.broadcast %77 : vector<1x128xf32> to vector<36x128xf32>
    %80 = arith.mulf %78, %79 : vector<36x128xf32>
    %81 = arith.addf %75, %80 : vector<36x128xf32>
    %82 = vector.extract_strided_slice %70 {offsets = [0, 2], sizes = [36, 1], strides = [1, 1]} : vector<36x4xf32> to vector<36x1xf32>
    %83 = vector.extract_strided_slice %47 {offsets = [2, 0], sizes = [1, 128], strides = [1, 1]} : vector<3x128xf32> to vector<1x128xf32>
    %84 = vector.broadcast %82 : vector<36x1xf32> to vector<36x128xf32>
    %85 = vector.broadcast %83 : vector<1x128xf32> to vector<36x128xf32>
    %86 = arith.mulf %84, %85 : vector<36x128xf32>
    %87 = arith.addf %81, %86 : vector<36x128xf32>
    %88 = vector.extract_strided_slice %70 {offsets = [0, 3], sizes = [36, 1], strides = [1, 1]} : vector<36x4xf32> to vector<36x1xf32>
    %89 = vector.broadcast %88 : vector<36x1xf32> to vector<36x128xf32>
    %90 = arith.addf %87, %89 : vector<36x128xf32>
    %91 = math.sin %90 : vector<36x128xf32>
    %92 = arith.truncf %0 : vector<3x128xf32> to vector<3x128xbf16>
    %93 = arith.truncf %69 : vector<48x128xf32> to vector<48x128xbf16>
    %94 = arith.truncf %47 : vector<3x128xf32> to vector<3x128xbf16>
    %95 = arith.truncf %91 : vector<36x128xf32> to vector<36x128xbf16>
    %cst_20 = arith.constant 1.000000e+00 : bf16
    %96 = vector.broadcast %cst_20 : bf16 to vector<1x128xbf16>
    %c0_21 = arith.constant 0 : index
    %c0_22 = arith.constant 0 : index
    %97 = vector.load %arg15[%c0_21, %c0_22] : memref<512x128xbf16, #tpu.memory_space<vmem>>, vector<512x128xbf16>
    %c0_23 = arith.constant 0 : index
    %c0_24 = arith.constant 0 : index
    %98 = vector.load %arg16[%c0_23, %c0_24] : memref<32x128xbf16, #tpu.memory_space<vmem>>, vector<32x128xbf16>
    %c0_25 = arith.constant 0 : index
    %c0_26 = arith.constant 0 : index
    %99 = vector.load %arg17[%c0_25, %c0_26] : memref<128x4xf32, #tpu.memory_space<vmem>>, vector<128x4xf32>
    %c0_27 = arith.constant 0 : index
    %c0_28 = arith.constant 0 : index
    %100 = vector.load %arg18[%c0_27, %c0_28] : memref<32x1xf32, #tpu.memory_space<vmem>>, vector<32x1xf32>
    %101 = vector.extract_strided_slice %93 {offsets = [0, 0], sizes = [18, 128], strides = [1, 1]} : vector<48x128xbf16> to vector<18x128xbf16>
    %102 = tpu.concatenate %19, %92, %101, %96 in 0 : vector<128x128xbf16>, vector<3x128xbf16>, vector<18x128xbf16>, vector<1x128xbf16> -> vector<150x128xbf16>
    %c0_29 = arith.constant 0 : index
    %c0_30 = arith.constant 0 : index
    %103 = vector.load %arg11[%c0_29, %c0_30] : memref<128x150xbf16, #tpu.memory_space<vmem>>, vector<128x150xbf16>
    %cst_31 = arith.constant dense<0.000000e+00> : vector<128x128xf32>
    %104 = tpu.matmul %103, %102, %cst_31 {dimension_numbers = #tpu.dot_dimension_numbers<[1], [0], [0], [1], [0, 0, 1, 1], [], []>} : vector<128x150xbf16>, vector<150x128xbf16>, vector<128x128xf32> -> vector<128x128xf32>
    %cst_32 = arith.constant 0.000000e+00 : f32
    %105 = vector.broadcast %cst_32 : f32 to vector<128x128xf32>
    %106 = arith.maximumf %104, %105 : vector<128x128xf32>
    %107 = vector.extract_strided_slice %97 {offsets = [0, 0], sizes = [128, 128], strides = [1, 1]} : vector<512x128xbf16> to vector<128x128xbf16>
    %108 = arith.truncf %106 : vector<128x128xf32> to vector<128x128xbf16>
    %cst_33 = arith.constant dense<0.000000e+00> : vector<128x128xf32>
    %109 = tpu.matmul %107, %108, %cst_33 {dimension_numbers = #tpu.dot_dimension_numbers<[1], [0], [0], [1], [0, 0, 1, 1], [], []>} : vector<128x128xbf16>, vector<128x128xbf16>, vector<128x128xf32> -> vector<128x128xf32>
    %110 = vector.extract_strided_slice %99 {offsets = [0, 0], sizes = [128, 1], strides = [1, 1]} : vector<128x4xf32> to vector<128x1xf32>
    %111 = vector.broadcast %110 : vector<128x1xf32> to vector<128x128xf32>
    %112 = arith.addf %109, %111 : vector<128x128xf32>
    %cst_34 = arith.constant 0.000000e+00 : f32
    %113 = vector.broadcast %cst_34 : f32 to vector<128x128xf32>
    %114 = arith.maximumf %112, %113 : vector<128x128xf32>
    %115 = vector.extract_strided_slice %98 {offsets = [0, 0], sizes = [8, 128], strides = [1, 1]} : vector<32x128xbf16> to vector<8x128xbf16>
    %116 = arith.truncf %114 : vector<128x128xf32> to vector<128x128xbf16>
    %cst_35 = arith.constant dense<0.000000e+00> : vector<8x128xf32>
    %117 = tpu.matmul %115, %116, %cst_35 {dimension_numbers = #tpu.dot_dimension_numbers<[1], [0], [0], [1], [0, 0, 1, 1], [], []>} : vector<8x128xbf16>, vector<128x128xbf16>, vector<8x128xf32> -> vector<8x128xf32>
    %118 = vector.extract_strided_slice %100 {offsets = [0, 0], sizes = [8, 1], strides = [1, 1]} : vector<32x1xf32> to vector<8x1xf32>
    %119 = vector.broadcast %118 : vector<8x1xf32> to vector<8x128xf32>
    %120 = arith.addf %117, %119 : vector<8x128xf32>
    %121 = arith.negf %120 : vector<8x128xf32>
    %122 = math.exp %121 : vector<8x128xf32>
    %cst_36 = arith.constant 1.000000e+00 : f32
    %123 = vector.broadcast %cst_36 : f32 to vector<8x128xf32>
    %124 = arith.addf %123, %122 : vector<8x128xf32>
    %125 = arith.divf %123, %124 : vector<8x128xf32>
    %126 = vector.extract_strided_slice %125 {offsets = [0, 0], sizes = [3, 128], strides = [1, 1]} : vector<8x128xf32> to vector<3x128xf32>
    %127 = vector.extract_strided_slice %125 {offsets = [3, 0], sizes = [1, 128], strides = [1, 1]} : vector<8x128xf32> to vector<1x128xf32>
    %128 = vector.extract_strided_slice %125 {offsets = [4, 0], sizes = [1, 128], strides = [1, 1]} : vector<8x128xf32> to vector<1x128xf32>
    %129 = tpu.concatenate %47, %39 in 1 : vector<3x128xf32>, vector<3x128xf32> -> vector<3x256xf32>
    %cst_37 = arith.constant 1.000000e+00 : f32
    %130 = vector.broadcast %cst_37 : f32 to vector<1x128xf32>
    %131 = tpu.concatenate %127, %130 in 1 : vector<1x128xf32>, vector<1x128xf32> -> vector<1x256xf32>
    %c0_38 = arith.constant 0 : index
    %c0_39 = arith.constant 0 : index
    %132 = vector.load %arg7[%c0_38, %c0_39] : memref<36x17xf32, #tpu.memory_space<vmem>>, vector<36x17xf32>
    %c0_40 = arith.constant 0 : index
    %c0_41 = arith.constant 0 : index
    %133 = vector.load %arg8[%c0_40, %c0_41] : memref<36x17xf32, #tpu.memory_space<vmem>>, vector<36x17xf32>
    %c0_42 = arith.constant 0 : index
    %c0_43 = arith.constant 0 : index
    %134 = vector.load %arg9[%c0_42, %c0_43] : memref<36x1xf32, #tpu.memory_space<vmem>>, vector<36x1xf32>
    %135 = vector.extract_strided_slice %129 {offsets = [0, 0], sizes = [1, 256], strides = [1, 1]} : vector<3x256xf32> to vector<1x256xf32>
    %136 = vector.extract_strided_slice %129 {offsets = [1, 0], sizes = [1, 256], strides = [1, 1]} : vector<3x256xf32> to vector<1x256xf32>
    %137 = vector.extract_strided_slice %129 {offsets = [2, 0], sizes = [1, 256], strides = [1, 1]} : vector<3x256xf32> to vector<1x256xf32>
    %cst_44 = arith.constant 1.000000e+00 : f32
    %138 = vector.broadcast %cst_44 : f32 to vector<1x256xf32>
    %cst_45 = arith.constant 1.000000e+00 : f32
    %139 = vector.broadcast %cst_45 : f32 to vector<1x256xf32>
    %cst_46 = arith.constant 0.000000e+00 : f32
    %140 = vector.broadcast %cst_46 : f32 to vector<1x256xf32>
    %141 = arith.mulf %138, %137 : vector<1x256xf32>
    %142 = arith.mulf %139, %135 : vector<1x256xf32>
    %143 = arith.mulf %140, %136 : vector<1x256xf32>
    %144 = arith.subf %142, %143 : vector<1x256xf32>
    %145 = arith.mulf %139, %136 : vector<1x256xf32>
    %146 = arith.mulf %140, %135 : vector<1x256xf32>
    %147 = arith.addf %145, %146 : vector<1x256xf32>
    %148 = arith.mulf %141, %137 : vector<1x256xf32>
    %149 = arith.mulf %144, %135 : vector<1x256xf32>
    %150 = arith.mulf %147, %136 : vector<1x256xf32>
    %151 = arith.subf %149, %150 : vector<1x256xf32>
    %152 = arith.mulf %144, %136 : vector<1x256xf32>
    %153 = arith.mulf %147, %135 : vector<1x256xf32>
    %154 = arith.addf %152, %153 : vector<1x256xf32>
    %155 = arith.mulf %148, %137 : vector<1x256xf32>
    %156 = arith.mulf %151, %135 : vector<1x256xf32>
    %157 = arith.mulf %154, %136 : vector<1x256xf32>
    %158 = arith.subf %156, %157 : vector<1x256xf32>
    %159 = arith.mulf %151, %136 : vector<1x256xf32>
    %160 = arith.mulf %154, %135 : vector<1x256xf32>
    %161 = arith.addf %159, %160 : vector<1x256xf32>
    %162 = arith.mulf %155, %137 : vector<1x256xf32>
    %163 = arith.mulf %158, %135 : vector<1x256xf32>
    %164 = arith.mulf %161, %136 : vector<1x256xf32>
    %165 = arith.subf %163, %164 : vector<1x256xf32>
    %166 = arith.mulf %158, %136 : vector<1x256xf32>
    %167 = arith.mulf %161, %135 : vector<1x256xf32>
    %168 = arith.addf %166, %167 : vector<1x256xf32>
    %169 = arith.mulf %162, %137 : vector<1x256xf32>
    %170 = arith.mulf %165, %135 : vector<1x256xf32>
    %171 = arith.mulf %168, %136 : vector<1x256xf32>
    %172 = arith.subf %170, %171 : vector<1x256xf32>
    %173 = arith.mulf %165, %136 : vector<1x256xf32>
    %174 = arith.mulf %168, %135 : vector<1x256xf32>
    %175 = arith.addf %173, %174 : vector<1x256xf32>
    %176 = arith.mulf %169, %137 : vector<1x256xf32>
    %177 = arith.mulf %172, %135 : vector<1x256xf32>
    %178 = arith.mulf %175, %136 : vector<1x256xf32>
    %179 = arith.subf %177, %178 : vector<1x256xf32>
    %180 = arith.mulf %172, %136 : vector<1x256xf32>
    %181 = arith.mulf %175, %135 : vector<1x256xf32>
    %182 = arith.addf %180, %181 : vector<1x256xf32>
    %183 = arith.mulf %176, %137 : vector<1x256xf32>
    %184 = arith.mulf %179, %135 : vector<1x256xf32>
    %185 = arith.mulf %182, %136 : vector<1x256xf32>
    %186 = arith.subf %184, %185 : vector<1x256xf32>
    %187 = arith.mulf %179, %136 : vector<1x256xf32>
    %188 = arith.mulf %182, %135 : vector<1x256xf32>
    %189 = arith.addf %187, %188 : vector<1x256xf32>
    %190 = arith.mulf %183, %137 : vector<1x256xf32>
    %191 = arith.mulf %186, %135 : vector<1x256xf32>
    %192 = arith.mulf %189, %136 : vector<1x256xf32>
    %193 = arith.subf %191, %192 : vector<1x256xf32>
    %194 = arith.mulf %186, %136 : vector<1x256xf32>
    %195 = arith.mulf %189, %135 : vector<1x256xf32>
    %196 = arith.addf %194, %195 : vector<1x256xf32>
    %197 = arith.mulf %190, %137 : vector<1x256xf32>
    %198 = arith.mulf %193, %135 : vector<1x256xf32>
    %199 = arith.mulf %196, %136 : vector<1x256xf32>
    %200 = arith.subf %198, %199 : vector<1x256xf32>
    %201 = arith.mulf %193, %136 : vector<1x256xf32>
    %202 = arith.mulf %196, %135 : vector<1x256xf32>
    %203 = arith.addf %201, %202 : vector<1x256xf32>
    %204 = arith.mulf %197, %137 : vector<1x256xf32>
    %205 = arith.mulf %200, %135 : vector<1x256xf32>
    %206 = arith.mulf %203, %136 : vector<1x256xf32>
    %207 = arith.subf %205, %206 : vector<1x256xf32>
    %208 = arith.mulf %200, %136 : vector<1x256xf32>
    %209 = arith.mulf %203, %135 : vector<1x256xf32>
    %210 = arith.addf %208, %209 : vector<1x256xf32>
    %211 = arith.mulf %204, %137 : vector<1x256xf32>
    %212 = arith.mulf %207, %135 : vector<1x256xf32>
    %213 = arith.mulf %210, %136 : vector<1x256xf32>
    %214 = arith.subf %212, %213 : vector<1x256xf32>
    %215 = arith.mulf %207, %136 : vector<1x256xf32>
    %216 = arith.mulf %210, %135 : vector<1x256xf32>
    %217 = arith.addf %215, %216 : vector<1x256xf32>
    %218 = arith.mulf %211, %137 : vector<1x256xf32>
    %219 = arith.mulf %214, %135 : vector<1x256xf32>
    %220 = arith.mulf %217, %136 : vector<1x256xf32>
    %221 = arith.subf %219, %220 : vector<1x256xf32>
    %222 = arith.mulf %214, %136 : vector<1x256xf32>
    %223 = arith.mulf %217, %135 : vector<1x256xf32>
    %224 = arith.addf %222, %223 : vector<1x256xf32>
    %225 = arith.mulf %218, %137 : vector<1x256xf32>
    %226 = arith.mulf %221, %135 : vector<1x256xf32>
    %227 = arith.mulf %224, %136 : vector<1x256xf32>
    %228 = arith.subf %226, %227 : vector<1x256xf32>
    %229 = arith.mulf %221, %136 : vector<1x256xf32>
    %230 = arith.mulf %224, %135 : vector<1x256xf32>
    %231 = arith.addf %229, %230 : vector<1x256xf32>
    %232 = arith.mulf %225, %137 : vector<1x256xf32>
    %233 = arith.mulf %228, %135 : vector<1x256xf32>
    %234 = arith.mulf %231, %136 : vector<1x256xf32>
    %235 = arith.subf %233, %234 : vector<1x256xf32>
    %236 = arith.mulf %228, %136 : vector<1x256xf32>
    %237 = arith.mulf %231, %135 : vector<1x256xf32>
    %238 = arith.addf %236, %237 : vector<1x256xf32>
    %239 = arith.mulf %232, %137 : vector<1x256xf32>
    %240 = arith.mulf %235, %135 : vector<1x256xf32>
    %241 = arith.mulf %238, %136 : vector<1x256xf32>
    %242 = arith.subf %240, %241 : vector<1x256xf32>
    %243 = arith.mulf %235, %136 : vector<1x256xf32>
    %244 = arith.mulf %238, %135 : vector<1x256xf32>
    %245 = arith.addf %243, %244 : vector<1x256xf32>
    %246 = arith.mulf %239, %137 : vector<1x256xf32>
    %247 = arith.mulf %242, %135 : vector<1x256xf32>
    %248 = arith.mulf %245, %136 : vector<1x256xf32>
    %249 = arith.subf %247, %248 : vector<1x256xf32>
    %250 = arith.mulf %242, %136 : vector<1x256xf32>
    %251 = arith.mulf %245, %135 : vector<1x256xf32>
    %252 = arith.addf %250, %251 : vector<1x256xf32>
    %253 = tpu.concatenate %138, %141, %148, %155, %162, %169, %176, %183, %190, %197, %204, %211, %218, %225, %232, %239 in 0 : vector<1x256xf32>, vector<1x256xf32>, vector<1x256xf32>, vector<1x256xf32>, vector<1x256xf32>, vector<1x256xf32>, vector<1x256xf32>, vector<1x256xf32>, vector<1x256xf32>, vector<1x256xf32>, vector<1x256xf32>, vector<1x256xf32>, vector<1x256xf32>, vector<1x256xf32>, vector<1x256xf32>, vector<1x256xf32> -> vector<16x256xf32>
    %254 = tpu.concatenate %253, %246 in 0 : vector<16x256xf32>, vector<1x256xf32> -> vector<17x256xf32>
    %255 = tpu.concatenate %139, %144, %151, %158, %165, %172, %179, %186, %193, %200, %207, %214, %221, %228, %235, %242 in 0 : vector<1x256xf32>, vector<1x256xf32>, vector<1x256xf32>, vector<1x256xf32>, vector<1x256xf32>, vector<1x256xf32>, vector<1x256xf32>, vector<1x256xf32>, vector<1x256xf32>, vector<1x256xf32>, vector<1x256xf32>, vector<1x256xf32>, vector<1x256xf32>, vector<1x256xf32>, vector<1x256xf32>, vector<1x256xf32> -> vector<16x256xf32>
    %256 = tpu.concatenate %255, %249 in 0 : vector<16x256xf32>, vector<1x256xf32> -> vector<17x256xf32>
    %257 = tpu.concatenate %140, %147, %154, %161, %168, %175, %182, %189, %196, %203, %210, %217, %224, %231, %238, %245 in 0 : vector<1x256xf32>, vector<1x256xf32>, vector<1x256xf32>, vector<1x256xf32>, vector<1x256xf32>, vector<1x256xf32>, vector<1x256xf32>, vector<1x256xf32>, vector<1x256xf32>, vector<1x256xf32>, vector<1x256xf32>, vector<1x256xf32>, vector<1x256xf32>, vector<1x256xf32>, vector<1x256xf32>, vector<1x256xf32> -> vector<16x256xf32>
    %258 = tpu.concatenate %257, %252 in 0 : vector<16x256xf32>, vector<1x256xf32> -> vector<17x256xf32>
    %cst_47 = arith.constant dense<0.000000e+00> : vector<36x256xf32>
    %259 = tpu.matmul %132, %254, %cst_47 {dimension_numbers = #tpu.dot_dimension_numbers<[1], [0], [0], [1], [0, 0, 1, 1], [], []>} : vector<36x17xf32>, vector<17x256xf32>, vector<36x256xf32> -> vector<36x256xf32>
    %cst_48 = arith.constant 0.000000e+00 : f32
    %260 = vector.broadcast %cst_48 : f32 to vector<36x1xf32>
    %261 = arith.subf %260, %134 : vector<36x1xf32>
    %262 = vector.broadcast %261 : vector<36x1xf32> to vector<36x256xf32>
    %263 = vector.broadcast %131 : vector<1x256xf32> to vector<36x256xf32>
    %264 = arith.mulf %262, %263 : vector<36x256xf32>
    %265 = math.exp %264 : vector<36x256xf32>
    %266 = arith.mulf %259, %265 : vector<36x256xf32>
    %cst_49 = arith.constant dense<0.000000e+00> : vector<36x256xf32>
    %267 = tpu.matmul %133, %256, %cst_49 {dimension_numbers = #tpu.dot_dimension_numbers<[1], [0], [0], [1], [0, 0, 1, 1], [], []>} : vector<36x17xf32>, vector<17x256xf32>, vector<36x256xf32> -> vector<36x256xf32>
    %268 = arith.mulf %267, %266 : vector<36x256xf32>
    %cst_50 = arith.constant dense<0.000000e+00> : vector<36x256xf32>
    %269 = tpu.matmul %133, %258, %cst_50 {dimension_numbers = #tpu.dot_dimension_numbers<[1], [0], [0], [1], [0, 0, 1, 1], [], []>} : vector<36x17xf32>, vector<17x256xf32>, vector<36x256xf32> -> vector<36x256xf32>
    %270 = arith.mulf %269, %266 : vector<36x256xf32>
    %271 = arith.truncf %268 : vector<36x256xf32> to vector<36x256xbf16>
    %272 = arith.truncf %270 : vector<36x256xf32> to vector<36x256xbf16>
    %cst_51 = arith.constant 1.000000e+00 : bf16
    %273 = vector.broadcast %cst_51 : bf16 to vector<1x256xbf16>
    %274 = tpu.concatenate %271, %272, %273 in 0 : vector<36x256xbf16>, vector<36x256xbf16>, vector<1x256xbf16> -> vector<73x256xbf16>
    %c0_52 = arith.constant 0 : index
    %c0_53 = arith.constant 0 : index
    %275 = vector.load %arg12[%c0_52, %c0_53] : memref<128x73xbf16, #tpu.memory_space<vmem>>, vector<128x73xbf16>
    %cst_54 = arith.constant dense<0.000000e+00> : vector<128x256xf32>
    %276 = tpu.matmul %275, %274, %cst_54 {dimension_numbers = #tpu.dot_dimension_numbers<[1], [0], [0], [1], [0, 0, 1, 1], [], []>} : vector<128x73xbf16>, vector<73x256xbf16>, vector<128x256xf32> -> vector<128x256xf32>
    %cst_55 = arith.constant 0.000000e+00 : f32
    %277 = vector.broadcast %cst_55 : f32 to vector<128x256xf32>
    %278 = arith.maximumf %276, %277 : vector<128x256xf32>
    %279 = vector.extract_strided_slice %97 {offsets = [128, 0], sizes = [128, 128], strides = [1, 1]} : vector<512x128xbf16> to vector<128x128xbf16>
    %280 = arith.truncf %278 : vector<128x256xf32> to vector<128x256xbf16>
    %cst_56 = arith.constant dense<0.000000e+00> : vector<128x256xf32>
    %281 = tpu.matmul %279, %280, %cst_56 {dimension_numbers = #tpu.dot_dimension_numbers<[1], [0], [0], [1], [0, 0, 1, 1], [], []>} : vector<128x128xbf16>, vector<128x256xbf16>, vector<128x256xf32> -> vector<128x256xf32>
    %282 = vector.extract_strided_slice %99 {offsets = [0, 1], sizes = [128, 1], strides = [1, 1]} : vector<128x4xf32> to vector<128x1xf32>
    %283 = vector.broadcast %282 : vector<128x1xf32> to vector<128x256xf32>
    %284 = arith.addf %281, %283 : vector<128x256xf32>
    %cst_57 = arith.constant 0.000000e+00 : f32
    %285 = vector.broadcast %cst_57 : f32 to vector<128x256xf32>
    %286 = arith.maximumf %284, %285 : vector<128x256xf32>
    %287 = vector.extract_strided_slice %98 {offsets = [8, 0], sizes = [8, 128], strides = [1, 1]} : vector<32x128xbf16> to vector<8x128xbf16>
    %288 = arith.truncf %286 : vector<128x256xf32> to vector<128x256xbf16>
    %cst_58 = arith.constant dense<0.000000e+00> : vector<8x256xf32>
    %289 = tpu.matmul %287, %288, %cst_58 {dimension_numbers = #tpu.dot_dimension_numbers<[1], [0], [0], [1], [0, 0, 1, 1], [], []>} : vector<8x128xbf16>, vector<128x256xbf16>, vector<8x256xf32> -> vector<8x256xf32>
    %290 = vector.extract_strided_slice %100 {offsets = [8, 0], sizes = [8, 1], strides = [1, 1]} : vector<32x1xf32> to vector<8x1xf32>
    %291 = vector.broadcast %290 : vector<8x1xf32> to vector<8x256xf32>
    %292 = arith.addf %289, %291 : vector<8x256xf32>
    %cst_59 = arith.constant 0.000000e+00 : f32
    %293 = vector.broadcast %cst_59 : f32 to vector<8x256xf32>
    %294 = arith.minimumf %292, %293 : vector<8x256xf32>
    %295 = math.exp %294 : vector<8x256xf32>
    %296 = vector.extract_strided_slice %295 {offsets = [0, 0], sizes = [3, 128], strides = [1, 1]} : vector<8x256xf32> to vector<3x128xf32>
    %297 = vector.extract_strided_slice %295 {offsets = [0, 128], sizes = [3, 128], strides = [1, 1]} : vector<8x256xf32> to vector<3x128xf32>
    %298 = vector.extract_strided_slice %271 {offsets = [0, 0], sizes = [36, 128], strides = [1, 1]} : vector<36x256xbf16> to vector<36x128xbf16>
    %299 = vector.extract_strided_slice %272 {offsets = [0, 0], sizes = [36, 128], strides = [1, 1]} : vector<36x256xbf16> to vector<36x128xbf16>
    %cst_60 = arith.constant 1.000000e+00 : f32
    %300 = vector.broadcast %cst_60 : f32 to vector<1x128xf32>
    %301 = arith.subf %300, %128 : vector<1x128xf32>
    %302 = vector.broadcast %301 : vector<1x128xf32> to vector<3x128xf32>
    %303 = arith.mulf %302, %126 : vector<3x128xf32>
    %304 = arith.mulf %303, %297 : vector<3x128xf32>
    %cst_61 = arith.constant 1.000000e+00 : f32
    %305 = vector.broadcast %cst_61 : f32 to vector<1x128xf32>
    %306 = arith.subf %305, %128 : vector<1x128xf32>
    %cst_62 = arith.constant 4.000000e-02 : f32
    %307 = vector.broadcast %cst_62 : f32 to vector<1x128xf32>
    %308 = arith.mulf %307, %306 : vector<1x128xf32>
    %309 = vector.broadcast %128 : vector<1x128xf32> to vector<3x128xf32>
    %310 = arith.mulf %309, %126 : vector<3x128xf32>
    %311 = vector.broadcast %308 : vector<1x128xf32> to vector<3x128xf32>
    %312 = arith.addf %311, %310 : vector<3x128xf32>
    %313 = tpu.concatenate %92, %93, %298, %299, %96 in 0 : vector<3x128xbf16>, vector<48x128xbf16>, vector<36x128xbf16>, vector<36x128xbf16>, vector<1x128xbf16> -> vector<124x128xbf16>
    %c0_63 = arith.constant 0 : index
    %c0_64 = arith.constant 0 : index
    %314 = vector.load %arg13[%c0_63, %c0_64] : memref<128x124xbf16, #tpu.memory_space<vmem>>, vector<128x124xbf16>
    %cst_65 = arith.constant dense<0.000000e+00> : vector<128x128xf32>
    %315 = tpu.matmul %314, %313, %cst_65 {dimension_numbers = #tpu.dot_dimension_numbers<[1], [0], [0], [1], [0, 0, 1, 1], [], []>} : vector<128x124xbf16>, vector<124x128xbf16>, vector<128x128xf32> -> vector<128x128xf32>
    %cst_66 = arith.constant 0.000000e+00 : f32
    %316 = vector.broadcast %cst_66 : f32 to vector<128x128xf32>
    %317 = arith.maximumf %315, %316 : vector<128x128xf32>
    %318 = vector.extract_strided_slice %97 {offsets = [256, 0], sizes = [128, 128], strides = [1, 1]} : vector<512x128xbf16> to vector<128x128xbf16>
    %319 = arith.truncf %317 : vector<128x128xf32> to vector<128x128xbf16>
    %cst_67 = arith.constant dense<0.000000e+00> : vector<128x128xf32>
    %320 = tpu.matmul %318, %319, %cst_67 {dimension_numbers = #tpu.dot_dimension_numbers<[1], [0], [0], [1], [0, 0, 1, 1], [], []>} : vector<128x128xbf16>, vector<128x128xbf16>, vector<128x128xf32> -> vector<128x128xf32>
    %321 = vector.extract_strided_slice %99 {offsets = [0, 2], sizes = [128, 1], strides = [1, 1]} : vector<128x4xf32> to vector<128x1xf32>
    %322 = vector.broadcast %321 : vector<128x1xf32> to vector<128x128xf32>
    %323 = arith.addf %320, %322 : vector<128x128xf32>
    %cst_68 = arith.constant 0.000000e+00 : f32
    %324 = vector.broadcast %cst_68 : f32 to vector<128x128xf32>
    %325 = arith.maximumf %323, %324 : vector<128x128xf32>
    %326 = vector.extract_strided_slice %98 {offsets = [16, 0], sizes = [8, 128], strides = [1, 1]} : vector<32x128xbf16> to vector<8x128xbf16>
    %327 = arith.truncf %325 : vector<128x128xf32> to vector<128x128xbf16>
    %cst_69 = arith.constant dense<0.000000e+00> : vector<8x128xf32>
    %328 = tpu.matmul %326, %327, %cst_69 {dimension_numbers = #tpu.dot_dimension_numbers<[1], [0], [0], [1], [0, 0, 1, 1], [], []>} : vector<8x128xbf16>, vector<128x128xbf16>, vector<8x128xf32> -> vector<8x128xf32>
    %329 = vector.extract_strided_slice %100 {offsets = [16, 0], sizes = [8, 1], strides = [1, 1]} : vector<32x1xf32> to vector<8x1xf32>
    %330 = vector.broadcast %329 : vector<8x1xf32> to vector<8x128xf32>
    %331 = arith.addf %328, %330 : vector<8x128xf32>
    %cst_70 = arith.constant 0.000000e+00 : f32
    %332 = vector.broadcast %cst_70 : f32 to vector<8x128xf32>
    %333 = arith.minimumf %331, %332 : vector<8x128xf32>
    %334 = math.exp %333 : vector<8x128xf32>
    %335 = vector.extract_strided_slice %334 {offsets = [0, 0], sizes = [3, 128], strides = [1, 1]} : vector<8x128xf32> to vector<3x128xf32>
    %336 = tpu.concatenate %92, %93, %94, %95, %96 in 0 : vector<3x128xbf16>, vector<48x128xbf16>, vector<3x128xbf16>, vector<36x128xbf16>, vector<1x128xbf16> -> vector<91x128xbf16>
    %c0_71 = arith.constant 0 : index
    %c0_72 = arith.constant 0 : index
    %337 = vector.load %arg14[%c0_71, %c0_72] : memref<128x91xbf16, #tpu.memory_space<vmem>>, vector<128x91xbf16>
    %cst_73 = arith.constant dense<0.000000e+00> : vector<128x128xf32>
    %338 = tpu.matmul %337, %336, %cst_73 {dimension_numbers = #tpu.dot_dimension_numbers<[1], [0], [0], [1], [0, 0, 1, 1], [], []>} : vector<128x91xbf16>, vector<91x128xbf16>, vector<128x128xf32> -> vector<128x128xf32>
    %cst_74 = arith.constant 0.000000e+00 : f32
    %339 = vector.broadcast %cst_74 : f32 to vector<128x128xf32>
    %340 = arith.maximumf %338, %339 : vector<128x128xf32>
    %341 = vector.extract_strided_slice %97 {offsets = [384, 0], sizes = [128, 128], strides = [1, 1]} : vector<512x128xbf16> to vector<128x128xbf16>
    %342 = arith.truncf %340 : vector<128x128xf32> to vector<128x128xbf16>
    %cst_75 = arith.constant dense<0.000000e+00> : vector<128x128xf32>
    %343 = tpu.matmul %341, %342, %cst_75 {dimension_numbers = #tpu.dot_dimension_numbers<[1], [0], [0], [1], [0, 0, 1, 1], [], []>} : vector<128x128xbf16>, vector<128x128xbf16>, vector<128x128xf32> -> vector<128x128xf32>
    %344 = vector.extract_strided_slice %99 {offsets = [0, 3], sizes = [128, 1], strides = [1, 1]} : vector<128x4xf32> to vector<128x1xf32>
    %345 = vector.broadcast %344 : vector<128x1xf32> to vector<128x128xf32>
    %346 = arith.addf %343, %345 : vector<128x128xf32>
    %cst_76 = arith.constant 0.000000e+00 : f32
    %347 = vector.broadcast %cst_76 : f32 to vector<128x128xf32>
    %348 = arith.maximumf %346, %347 : vector<128x128xf32>
    %349 = vector.extract_strided_slice %98 {offsets = [24, 0], sizes = [8, 128], strides = [1, 1]} : vector<32x128xbf16> to vector<8x128xbf16>
    %350 = arith.truncf %348 : vector<128x128xf32> to vector<128x128xbf16>
    %cst_77 = arith.constant dense<0.000000e+00> : vector<8x128xf32>
    %351 = tpu.matmul %349, %350, %cst_77 {dimension_numbers = #tpu.dot_dimension_numbers<[1], [0], [0], [1], [0, 0, 1, 1], [], []>} : vector<8x128xbf16>, vector<128x128xbf16>, vector<8x128xf32> -> vector<8x128xf32>
    %352 = vector.extract_strided_slice %100 {offsets = [24, 0], sizes = [8, 1], strides = [1, 1]} : vector<32x1xf32> to vector<8x1xf32>
    %353 = vector.broadcast %352 : vector<8x1xf32> to vector<8x128xf32>
    %354 = arith.addf %351, %353 : vector<8x128xf32>
    %355 = vector.extract_strided_slice %354 {offsets = [0, 0], sizes = [1, 128], strides = [1, 1]} : vector<8x128xf32> to vector<1x128xf32>
    %cst_78 = arith.constant 5.000000e-01 : f32
    %356 = vector.broadcast %cst_78 : f32 to vector<1x128xf32>
    %357 = arith.mulf %355, %356 : vector<1x128xf32>
    %cst_79 = arith.constant 5.000000e-01 : f32
    %358 = vector.broadcast %cst_79 : f32 to vector<1x128xf32>
    %359 = arith.addf %357, %358 : vector<1x128xf32>
    %cst_80 = arith.constant 0.000000e+00 : f32
    %cst_81 = arith.constant 1.000000e+00 : f32
    %360 = vector.broadcast %cst_80 : f32 to vector<1x128xf32>
    %361 = arith.maximumf %360, %359 : vector<1x128xf32>
    %362 = vector.broadcast %cst_81 : f32 to vector<1x128xf32>
    %363 = arith.minimumf %362, %361 : vector<1x128xf32>
    %364 = vector.broadcast %363 : vector<1x128xf32> to vector<3x128xf32>
    %365 = arith.mulf %335, %364 : vector<3x128xf32>
    %cst_82 = arith.constant 1.000000e+00 : f32
    %366 = vector.broadcast %cst_82 : f32 to vector<1x128xf32>
    %367 = arith.subf %366, %363 : vector<1x128xf32>
    %368 = vector.broadcast %367 : vector<1x128xf32> to vector<3x128xf32>
    %369 = arith.mulf %296, %368 : vector<3x128xf32>
    %370 = arith.addf %365, %369 : vector<3x128xf32>
    %371 = tpu.iota {dimensions = array<i32: 0>} : vector<256x1xi32>
    %372 = arith.sitofp %371 : vector<256x1xi32> to vector<256x1xf32>
    %cst_83 = arith.constant 0.000000e+00 : f32
    %cst_84 = arith.constant 1.000000e+00 : f32
    %373 = vector.broadcast %cst_83 : f32 to vector<1x128xf32>
    %374 = arith.maximumf %373, %42 : vector<1x128xf32>
    %375 = vector.broadcast %cst_84 : f32 to vector<1x128xf32>
    %376 = arith.minimumf %375, %374 : vector<1x128xf32>
    %cst_85 = arith.constant 2.560000e+02 : f32
    %377 = vector.broadcast %cst_85 : f32 to vector<1x128xf32>
    %378 = arith.mulf %376, %377 : vector<1x128xf32>
    %cst_86 = arith.constant 5.000000e-01 : f32
    %379 = vector.broadcast %cst_86 : f32 to vector<1x128xf32>
    %380 = arith.subf %378, %379 : vector<1x128xf32>
    %cst_87 = arith.constant 0.000000e+00 : f32
    %cst_88 = arith.constant 2.550000e+02 : f32
    %381 = vector.broadcast %cst_87 : f32 to vector<1x128xf32>
    %382 = arith.maximumf %381, %380 : vector<1x128xf32>
    %383 = vector.broadcast %cst_88 : f32 to vector<1x128xf32>
    %384 = arith.minimumf %383, %382 : vector<1x128xf32>
    %385 = vector.broadcast %372 : vector<256x1xf32> to vector<256x128xf32>
    %386 = vector.broadcast %384 : vector<1x128xf32> to vector<256x128xf32>
    %387 = arith.subf %385, %386 : vector<256x128xf32>
    %388 = math.absf %387 : vector<256x128xf32>
    %cst_89 = arith.constant 1.000000e+00 : f32
    %389 = vector.broadcast %cst_89 : f32 to vector<256x128xf32>
    %390 = arith.subf %389, %388 : vector<256x128xf32>
    %cst_90 = arith.constant 0.000000e+00 : f32
    %cst_91 = arith.constant 1.000000e+00 : f32
    %391 = vector.broadcast %cst_90 : f32 to vector<256x128xf32>
    %392 = arith.maximumf %391, %390 : vector<256x128xf32>
    %393 = vector.broadcast %cst_91 : f32 to vector<256x128xf32>
    %394 = arith.minimumf %393, %392 : vector<256x128xf32>
    %cst_92 = arith.constant 0.000000e+00 : f32
    %cst_93 = arith.constant 1.000000e+00 : f32
    %395 = vector.broadcast %cst_92 : f32 to vector<1x128xf32>
    %396 = arith.maximumf %395, %127 : vector<1x128xf32>
    %397 = vector.broadcast %cst_93 : f32 to vector<1x128xf32>
    %398 = arith.minimumf %397, %396 : vector<1x128xf32>
    %cst_94 = arith.constant 2.560000e+02 : f32
    %399 = vector.broadcast %cst_94 : f32 to vector<1x128xf32>
    %400 = arith.mulf %398, %399 : vector<1x128xf32>
    %cst_95 = arith.constant 5.000000e-01 : f32
    %401 = vector.broadcast %cst_95 : f32 to vector<1x128xf32>
    %402 = arith.subf %400, %401 : vector<1x128xf32>
    %cst_96 = arith.constant 0.000000e+00 : f32
    %cst_97 = arith.constant 2.550000e+02 : f32
    %403 = vector.broadcast %cst_96 : f32 to vector<1x128xf32>
    %404 = arith.maximumf %403, %402 : vector<1x128xf32>
    %405 = vector.broadcast %cst_97 : f32 to vector<1x128xf32>
    %406 = arith.minimumf %405, %404 : vector<1x128xf32>
    %407 = vector.broadcast %372 : vector<256x1xf32> to vector<256x128xf32>
    %408 = vector.broadcast %406 : vector<1x128xf32> to vector<256x128xf32>
    %409 = arith.subf %407, %408 : vector<256x128xf32>
    %410 = math.absf %409 : vector<256x128xf32>
    %cst_98 = arith.constant 1.000000e+00 : f32
    %411 = vector.broadcast %cst_98 : f32 to vector<256x128xf32>
    %412 = arith.subf %411, %410 : vector<256x128xf32>
    %cst_99 = arith.constant 0.000000e+00 : f32
    %cst_100 = arith.constant 1.000000e+00 : f32
    %413 = vector.broadcast %cst_99 : f32 to vector<256x128xf32>
    %414 = arith.maximumf %413, %412 : vector<256x128xf32>
    %415 = vector.broadcast %cst_100 : f32 to vector<256x128xf32>
    %416 = arith.minimumf %415, %414 : vector<256x128xf32>
    %417 = arith.truncf %416 : vector<256x128xf32> to vector<256x128xbf16>
    %c0_101 = arith.constant 0 : index
    %c0_102 = arith.constant 0 : index
    %418 = vector.load %arg10[%c0_101, %c0_102] : memref<512x256xbf16, #tpu.memory_space<vmem>>, vector<512x256xbf16>
    %cst_103 = arith.constant dense<0.000000e+00> : vector<512x128xf32>
    %419 = tpu.matmul %418, %417, %cst_103 {dimension_numbers = #tpu.dot_dimension_numbers<[1], [0], [0], [1], [0, 0, 1, 1], [], []>} : vector<512x256xbf16>, vector<256x128xbf16>, vector<512x128xf32> -> vector<512x128xf32>
    %cst_104 = arith.constant 1.000000e+00 : f32
    %420 = vector.broadcast %cst_104 : f32 to vector<1x256xf32>
    %421 = vector.extract_strided_slice %419 {offsets = [0, 0], sizes = [256, 128], strides = [1, 1]} : vector<512x128xf32> to vector<256x128xf32>
    %422 = arith.mulf %421, %394 : vector<256x128xf32>
    %cst_105 = arith.constant dense<0.000000e+00> : vector<1x128xf32>
    %423 = tpu.matmul %420, %422, %cst_105 {dimension_numbers = #tpu.dot_dimension_numbers<[1], [0], [0], [1], [0, 0, 1, 1], [], []>} : vector<1x256xf32>, vector<256x128xf32>, vector<1x128xf32> -> vector<1x128xf32>
    %424 = vector.extract_strided_slice %419 {offsets = [256, 0], sizes = [256, 128], strides = [1, 1]} : vector<512x128xf32> to vector<256x128xf32>
    %425 = arith.mulf %424, %394 : vector<256x128xf32>
    %cst_106 = arith.constant dense<0.000000e+00> : vector<1x128xf32>
    %426 = tpu.matmul %420, %425, %cst_106 {dimension_numbers = #tpu.dot_dimension_numbers<[1], [0], [0], [1], [0, 0, 1, 1], [], []>} : vector<1x256xf32>, vector<256x128xf32>, vector<1x128xf32> -> vector<1x128xf32>
    %427 = vector.broadcast %423 : vector<1x128xf32> to vector<3x128xf32>
    %428 = arith.mulf %312, %427 : vector<3x128xf32>
    %429 = vector.broadcast %426 : vector<1x128xf32> to vector<3x128xf32>
    %430 = arith.addf %428, %429 : vector<3x128xf32>
    %431 = arith.mulf %430, %370 : vector<3x128xf32>
    %432 = arith.addf %304, %431 : vector<3x128xf32>
    %cst_107 = arith.constant 1.292000e+01 : f32
    %433 = vector.broadcast %cst_107 : f32 to vector<3x128xf32>
    %434 = arith.mulf %432, %433 : vector<3x128xf32>
    %cst_108 = arith.constant 1.1920929E-7 : f32
    %435 = vector.broadcast %cst_108 : f32 to vector<3x128xf32>
    %436 = arith.maximumf %432, %435 : vector<3x128xf32>
    %437 = math.log %436 : vector<3x128xf32>
    %cst_109 = arith.constant 0.416666657 : f32
    %438 = vector.broadcast %cst_109 : f32 to vector<3x128xf32>
    %439 = arith.mulf %438, %437 : vector<3x128xf32>
    %440 = math.exp %439 : vector<3x128xf32>
    %cst_110 = arith.constant 2.110000e+02 : f32
    %441 = vector.broadcast %cst_110 : f32 to vector<3x128xf32>
    %442 = arith.mulf %441, %440 : vector<3x128xf32>
    %cst_111 = arith.constant 1.100000e+01 : f32
    %443 = vector.broadcast %cst_111 : f32 to vector<3x128xf32>
    %444 = arith.subf %442, %443 : vector<3x128xf32>
    %cst_112 = arith.constant 2.000000e+02 : f32
    %445 = vector.broadcast %cst_112 : f32 to vector<3x128xf32>
    %446 = arith.divf %444, %445 : vector<3x128xf32>
    %cst_113 = arith.constant 3.130800e-03 : f32
    %447 = vector.broadcast %cst_113 : f32 to vector<3x128xf32>
    %448 = arith.cmpf ole, %432, %447 : vector<3x128xf32>
    %449 = arith.select %448, %434, %446 : vector<3x128xi1>, vector<3x128xf32>
    %cst_114 = arith.constant 0.000000e+00 : f32
    %cst_115 = arith.constant 1.000000e+00 : f32
    %450 = vector.broadcast %cst_114 : f32 to vector<3x128xf32>
    %451 = arith.maximumf %450, %449 : vector<3x128xf32>
    %452 = vector.broadcast %cst_115 : f32 to vector<3x128xf32>
    %453 = arith.minimumf %452, %451 : vector<3x128xf32>
    %c0_116 = arith.constant 0 : index
    %c0_117 = arith.constant 0 : index
    %454 = vector.load %arg19[%c0_116, %c0_117] : memref<8x128xf32, #tpu.memory_space<vmem>>, vector<3x128xf32>
    tpu.vector_store %arg19[%c0_116, %c0_117], %453 {strides = array<i32>} : memref<8x128xf32, #tpu.memory_space<vmem>>, vector<3x128xf32>,
    %c3 = arith.constant 3 : index
    %c0_118 = arith.constant 0 : index
    %455 = vector.load %arg19[%c3, %c0_118] : memref<8x128xf32, #tpu.memory_space<vmem>>, vector<3x128xf32>
    tpu.vector_store %arg19[%c3, %c0_118], %47 {strides = array<i32>} : memref<8x128xf32, #tpu.memory_space<vmem>>, vector<3x128xf32>,
    %c6 = arith.constant 6 : index
    %c0_119 = arith.constant 0 : index
    %456 = vector.load %arg19[%c6, %c0_119] : memref<8x128xf32, #tpu.memory_space<vmem>>, vector<1x128xf32>
    tpu.vector_store %arg19[%c6, %c0_119], %359 {strides = array<i32>} : memref<8x128xf32, #tpu.memory_space<vmem>>, vector<1x128xf32>,
    %c7 = arith.constant 7 : index
    %c0_120 = arith.constant 0 : index
    %457 = vector.load %arg19[%c7, %c0_120] : memref<8x128xf32, #tpu.memory_space<vmem>>, vector<1x128xf32>
    tpu.vector_store %arg19[%c7, %c0_120], %127 {strides = array<i32>} : memref<8x128xf32, #tpu.memory_space<vmem>>, vector<1x128xf32>,
    return
  }
  func.func @transform_0(%arg0: i32) -> (i32, i32) {
    %c0_i32 = arith.constant 0 : i32
    %c0_i32_0 = arith.constant 0 : i32
    return %c0_i32, %arg0 : i32, i32
  }
  func.func @transform_1(%arg0: i32) -> (i32, i32) {
    %c0_i32 = arith.constant 0 : i32
    %c0_i32_0 = arith.constant 0 : i32
    return %c0_i32, %arg0 : i32, i32
  }
  func.func @transform_2(%arg0: i32) -> (i32, i32) {
    %c0_i32 = arith.constant 0 : i32
    %c0_i32_0 = arith.constant 0 : i32
    return %c0_i32, %arg0 : i32, i32
  }
  func.func @transform_3(%arg0: i32) -> (i32, i32) {
    %c0_i32 = arith.constant 0 : i32
    %c0_i32_0 = arith.constant 0 : i32
    return %c0_i32, %arg0 : i32, i32
  }
  func.func @transform_4(%arg0: i32) -> (i32, i32) {
    %c0_i32 = arith.constant 0 : i32
    %c0_i32_0 = arith.constant 0 : i32
    %c0_i32_1 = arith.constant 0 : i32
    return %c0_i32, %c0_i32_0 : i32, i32
  }
  func.func @transform_5(%arg0: i32) -> (i32, i32) {
    %c0_i32 = arith.constant 0 : i32
    %c0_i32_0 = arith.constant 0 : i32
    %c0_i32_1 = arith.constant 0 : i32
    return %c0_i32, %c0_i32_0 : i32, i32
  }
  func.func @transform_6(%arg0: i32) -> (i32, i32) {
    %c0_i32 = arith.constant 0 : i32
    %c0_i32_0 = arith.constant 0 : i32
    %c0_i32_1 = arith.constant 0 : i32
    return %c0_i32, %c0_i32_0 : i32, i32
  }
  func.func @transform_7(%arg0: i32) -> (i32, i32) {
    %c0_i32 = arith.constant 0 : i32
    %c0_i32_0 = arith.constant 0 : i32
    %c0_i32_1 = arith.constant 0 : i32
    return %c0_i32, %c0_i32_0 : i32, i32
  }
  func.func @transform_8(%arg0: i32) -> (i32, i32) {
    %c0_i32 = arith.constant 0 : i32
    %c0_i32_0 = arith.constant 0 : i32
    %c0_i32_1 = arith.constant 0 : i32
    return %c0_i32, %c0_i32_0 : i32, i32
  }
  func.func @transform_9(%arg0: i32) -> (i32, i32) {
    %c0_i32 = arith.constant 0 : i32
    %c0_i32_0 = arith.constant 0 : i32
    %c0_i32_1 = arith.constant 0 : i32
    return %c0_i32, %c0_i32_0 : i32, i32
  }
  func.func @transform_10(%arg0: i32) -> (i32, i32) {
    %c0_i32 = arith.constant 0 : i32
    %c0_i32_0 = arith.constant 0 : i32
    %c0_i32_1 = arith.constant 0 : i32
    return %c0_i32, %c0_i32_0 : i32, i32
  }
  func.func @transform_11(%arg0: i32) -> (i32, i32) {
    %c0_i32 = arith.constant 0 : i32
    %c0_i32_0 = arith.constant 0 : i32
    %c0_i32_1 = arith.constant 0 : i32
    return %c0_i32, %c0_i32_0 : i32, i32
  }
  func.func @transform_12(%arg0: i32) -> (i32, i32) {
    %c0_i32 = arith.constant 0 : i32
    %c0_i32_0 = arith.constant 0 : i32
    %c0_i32_1 = arith.constant 0 : i32
    return %c0_i32, %c0_i32_0 : i32, i32
  }
  func.func @transform_13(%arg0: i32) -> (i32, i32) {
    %c0_i32 = arith.constant 0 : i32
    %c0_i32_0 = arith.constant 0 : i32
    %c0_i32_1 = arith.constant 0 : i32
    return %c0_i32, %c0_i32_0 : i32, i32
  }
  func.func @transform_14(%arg0: i32) -> (i32, i32) {
    %c0_i32 = arith.constant 0 : i32
    %c0_i32_0 = arith.constant 0 : i32
    %c0_i32_1 = arith.constant 0 : i32
    return %c0_i32, %c0_i32_0 : i32, i32
  }
  func.func @transform_15(%arg0: i32) -> (i32, i32) {
    %c0_i32 = arith.constant 0 : i32
    %c0_i32_0 = arith.constant 0 : i32
    %c0_i32_1 = arith.constant 0 : i32
    return %c0_i32, %c0_i32_0 : i32, i32
  }
  func.func @transform_16(%arg0: i32) -> (i32, i32) {
    %c0_i32 = arith.constant 0 : i32
    %c0_i32_0 = arith.constant 0 : i32
    %c0_i32_1 = arith.constant 0 : i32
    return %c0_i32, %c0_i32_0 : i32, i32
  }
  func.func @transform_17(%arg0: i32) -> (i32, i32) {
    %c0_i32 = arith.constant 0 : i32
    %c0_i32_0 = arith.constant 0 : i32
    %c0_i32_1 = arith.constant 0 : i32
    return %c0_i32, %c0_i32_0 : i32, i32
  }
  func.func @transform_18(%arg0: i32) -> (i32, i32) {
    %c0_i32 = arith.constant 0 : i32
    %c0_i32_0 = arith.constant 0 : i32
    return %c0_i32, %arg0 : i32, i32
  }
}

</mosaic_0001>

<bundles_post_ra>
// kernel: tpu_custom_call.1
= control target key start
LH: loop header
LB: loop body
LE: loop exit
PB: predicated region body
PF: predicated region fallthrough
CT: control target
= control target key end

     0   :  { %s12259_s0 = inlined_call_operand.vmem [shape: f32[3,128], index: 0, kind: input, shape index: {}]   ;;  %s12260_s1 = inlined_call_operand.vmem [shape: f32[3,128], index: 1, kind: input, shape index: {}]   ;;  %s12261_s2 = inlined_call_operand.vmem [shape: f32[3,128], index: 2, kind: input, shape index: {}]   ;;  %s12262_s3 = inlined_call_operand.vmem [shape: bf16[128,128], index: 3, kind: input, shape index: {}]   ;;  %s12263_s4 = inlined_call_operand.vmem [shape: f32[48,4], index: 4, kind: input, shape index: {}]   ;;  %s12264_s5 = inlined_call_operand.vmem [shape: f32[36,4], index: 5, kind: input, shape index: {}]   ;;  %s12265_s6 = inlined_call_operand.vmem [shape: f32[36,17], index: 6, kind: input, shape index: {}]   ;;  %s12266_s7 = inlined_call_operand.vmem [shape: f32[36,17], index: 7, kind: input, shape index: {}]   ;;  %s12267_s8 = inlined_call_operand.vmem [shape: f32[36,1], index: 8, kind: input, shape index: {}]   ;;  %s12268_s9 = inlined_call_operand.hbm [shape: bf16[512,256], index: 9, kind: input, shape index: {}]   ;;  %s12269_s10 = inlined_call_operand.vmem [shape: bf16[128,150], index: 10, kind: input, shape index: {}]   ;;  %s12270_s11 = inlined_call_operand.vmem [shape: bf16[128,73], index: 11, kind: input, shape index: {}]   ;;  %s12271_s12 = inlined_call_operand.vmem [shape: bf16[128,124], index: 12, kind: input, shape index: {}]   ;;  %s12272_s13 = inlined_call_operand.vmem [shape: bf16[128,91], index: 13, kind: input, shape index: {}]   ;;  %s12273_s14 = inlined_call_operand.vmem [shape: bf16[512,128], index: 14, kind: input, shape index: {}]   ;;  %s12274_s15 = inlined_call_operand.vmem [shape: bf16[32,128], index: 15, kind: input, shape index: {}]   ;;  %s12275_s16 = inlined_call_operand.vmem [shape: f32[128,4], index: 16, kind: input, shape index: {}]   ;;  %s12276_s17 = inlined_call_operand.vmem [shape: f32[32,1], index: 17, kind: input, shape index: {}]   ;;  %s12277_s18 = inlined_call_operand.hbm [shape: f32[8,128], index: 18, kind: output, shape index: {}]  }
   0x1   :  { %12487 = sst [smem:[#allocation74_spill]] %s12259_s0 }
   0x2   :  { %12488 = sst [smem:[#allocation75_spill]] %s12260_s1 }
   0x3   :  { %12489 = sst [smem:[#allocation76_spill]] %s12261_s2 }
   0x4   :  { %23 = vsyncpa [#allocation3], 0 }
   0x5   :  { %24 = vsyncpa [#allocation4], 0  ;;  %s47_s29 = sshll.u32 %s12268_s9, 4  ;;  %s7601_s30 = smov [#allocation2]   ;;  %s48_s29 = int_to_ptr.hbm [resolvable:$true] %s47_s29 }
   0x6   :  { %s49_s0 = sshll.u32 %s7601_s30, 4  ;;  %s7602_s19 = smov 128   ;;  %s50_s0 = int_to_ptr.vmem [resolvable:$true] %s49_s0 }
   0x7   :  { %s7603_s1 = smov 8  }
   0x8   :  { %55 = dma.hbm_to_vmem [thread:$0]  %s48_s29, 8192, %s50_s0, [#allocation3], %s7602_s19, %s7602_s19, %s7603_s1  }
   0x9   :  { %7597 = dma.done.wait [#allocation3], 8192  }
   0xa   :  { %7598 = vsyncadd [#allocation3], 4294959104  ;;  %v12310_v0 = vmov 0   ;;  %v12293_v1 = vmov 1   ;;  %v198_v2 = vld [vmem:[%s12263_s4 + $0x10] sm:$0xff]  ;;  %v196_v3 = vld [vmem:[%s12263_s4] sm:$0xff] }
   0xb   :  { %7438 = vset.pattern.permute.xlu1 %v12310_v0  ;;  %7437 = vset.pattern.permute.xlu0 %v12310_v0  ;;  %v197_v4 = vld [vmem:[%s12263_s4 + $0x8] sm:$0xff]  ;;  %v12291_v5 = vmov 2   ;;  %v12289_v6 = vmov 3   ;;  %v2266_v7 = vld [vmem:[%s12275_s16 + $0x70] sm:$0xff]  ;;  %v2267_v8 = vld [vmem:[%s12275_s16 + $0x78] sm:$0xff]  ;;  %s12490_s26 = sld [smem:[#allocation74_spill]] }
   0xc   :  { %7440 = vset.pattern.permute.xlu2 %v12293_v1  ;;  %214 = vperm.xlu1 %7438, %v198_v2   ;;  %v2262_v9 = vld [vmem:[%s12275_s16 + $0x50] sm:$0xff]  ;;  %v2264_v10 = vld [vmem:[%s12275_s16 + $0x60] sm:$0xff]  ;;  %v2265_v11 = vld [vmem:[%s12275_s16 + $0x68] sm:$0xff]  ;;  %s12519_s0 = sld [smem:[#allocation75_spill]]  ;;  %s6554_s22 = sshll.u32 %s12277_s18, 4  ;;  %s6555_s22 = int_to_ptr.hbm [resolvable:$true] %s6554_s22 }
   0xd   :  { %204 = vperm.xlu0 %7437, %v196_v3   ;;  %244 = vperm.xlu2 %7440, %v197_v4   ;;  %v2259_v12 = vld [vmem:[%s12275_s16 + $0x38] sm:$0xff]  ;;  %v2260_v14 = vld [vmem:[%s12275_s16 + $0x40] sm:$0xff]  ;;  %v2254_v15 = vld [vmem:[%s12275_s16 + $0x10] sm:$0xff] }
   0xe   :  { %v2263_v13 = vld [vmem:[%s12275_s16 + $0x58] sm:$0xff]  ;;  %v2261_v16 = vld [vmem:[%s12275_s16 + $0x48] sm:$0xff]  ;;  %v2258_v17 = vld [vmem:[%s12275_s16 + $0x30] sm:$0xff] }
   0xf   :  { %v2253_v18 = vld [vmem:[%s12275_s16 + $0x8] sm:$0xff]  ;;  %v2256_v19 = vld [vmem:[%s12275_s16 + $0x20] sm:$0xff]  ;;  %v2844_v21 = vld [vmem:[%s12267_s8 + $0x18] sm:$0xff] }
  0x10   :  { %v2257_v20 = vld [vmem:[%s12275_s16 + $0x28] sm:$0xff]  ;;  %v3509_v22 = vsub.f32 0.0, %v2844_v21  ;;  %v2255_v23 = vld [vmem:[%s12275_s16 + $0x18] sm:$0xff]  ;;  %v2252_v24 = vld [vmem:[%s12275_s16] sm:$0xff] }
  0x11   :  { %v2842_v25 = vld [vmem:[%s12267_s8 + $0x8] sm:$0xff]  ;;  %v2268_v27 = vld [vmem:[%s12276_s17] sm:$0xff]  ;;  %v2843_v28 = vld [vmem:[%s12267_s8 + $0x10] sm:$0xff] }
  0x12   :  { %v3507_v26 = vsub.f32 0.0, %v2842_v25  ;;  %v3508_v29 = vsub.f32 0.0, %v2843_v28  ;;  %v2845_v30 = vld [vmem:[%s12267_s8 + $0x20] sm:$0xf]  ;;  %v199_v35 = vld [vmem:[%s12263_s4 + $0x18] sm:$0xff]  ;;  %v201_v36 = vld [vmem:[%s12263_s4 + $0x28] sm:$0xff] }
  0x13   :  { %v200_v31 = vld [vmem:[%s12263_s4 + $0x20] sm:$0xff]  ;;  %v3510_v32 = vsub.f32 0.0, %v2845_v30 }
  0x14   :  { %7439 = vset.pattern.permute.xlu1 %v12293_v1  ;;  %v2841_v33 = vld [vmem:[%s12267_s8] sm:$0xff] }
  0x15   :  { %209 = vperm.xlu0 %7437, %v197_v4   ;;  %240 = vperm.xlu1 %7439, %v196_v3   ;;  %v3506_v34 = vsub.f32 0.0, %v2841_v33  ;;  %v78_v42 = vld [vmem:[%s12490_s26] sm:$0x7]  ;;  %v12279_v33 = vmov 2131351028  }
  0x16   :  { %248 = vperm.xlu2 %7440, %v198_v2   ;;  %v7828_v44 = vperm.slane %v78_v42, 1  ;;  %v7830_v45 = vperm.slane %v78_v42, 0  ;;  %v7832_v48 = vperm.slane %v78_v42, 2  ;;  %v12283_v42 = vmov 2475754826  }
  0x18   :  { %12491 = vst [vmem:[#allocation8_spill] sm:$0xff] %v7828_v44 }
  0x19   :  { %12492 = vst [vmem:[#allocation9_spill] sm:$0xff] %v7830_v45 }
  0x1a   :  { %12493 = vst [vmem:[#allocation10_spill] sm:$0xff] %v7832_v48 }
  0x1d   :  { %7441 = vset.pattern.permute.xlu0 %v12291_v5  ;;  %7442 = vset.pattern.permute.xlu1 %v12291_v5 }
  0x1e   :  { %277 = vperm.xlu0 %7441, %v196_v3   ;;  %281 = vperm.xlu1 %7442, %v197_v4  }
  0x1f   :  { %7443 = vset.pattern.permute.xlu2 %v12291_v5 }
  0x20   :  { %285 = vperm.xlu2 %7443, %v198_v2  }
  0x26   :  { %7446 = vset.pattern.permute.xlu0 %v12289_v6  ;;  %7444 = vset.pattern.permute.xlu1 %v12289_v6 }
  0x27   :  { %322 = vperm.xlu0 %7446, %v198_v2   ;;  %314 = vperm.xlu1 %7444, %v196_v3  }
  0x28   :  { %7445 = vset.pattern.permute.xlu2 %v12289_v6 }
  0x29   :  { %318 = vperm.xlu2 %7445, %v197_v4  }
  0x2f   :  { %7449 = vset.pattern.permute.xlu0 %v12310_v0  ;;  %7447 = vset.pattern.permute.xlu1 %v12310_v0 }
  0x30   :  { %2665 = vperm.xlu1 %7447, %v2266_v7   ;;  %2645 = vperm.xlu0 %7449, %v2262_v9  }
  0x31   :  { %7448 = vset.pattern.permute.xlu2 %v12310_v0 }
  0x32   :  { %2670 = vperm.xlu2 %7448, %v2267_v8  }
  0x38   :  { %2655 = vperm.xlu1 %7447, %v2264_v10   ;;  %2630 = vperm.xlu0 %7449, %v2259_v12  }
  0x3a   :  { %2660 = vperm.xlu2 %7448, %v2265_v11  }
  0x40   :  { %2650 = vperm.xlu1 %7447, %v2263_v13   ;;  %2605 = vperm.xlu0 %7449, %v2254_v15  }
  0x42   :  { %2635 = vperm.xlu2 %7448, %v2260_v14  }
  0x48   :  { %2640 = vperm.xlu1 %7447, %v2261_v16   ;;  %2600 = vperm.xlu0 %7449, %v2253_v18  }
  0x4a   :  { %2625 = vperm.xlu2 %7448, %v2258_v17  }
  0x50   :  { %2615 = vperm.xlu1 %7447, %v2256_v19   ;;  %3528 = vperm.xlu0 %7449, %v3509_v22  }
  0x52   :  { %2620 = vperm.xlu2 %7448, %v2257_v20  }
  0x58   :  { %2610 = vperm.xlu1 %7447, %v2255_v23   ;;  %3518 = vperm.xlu0 %7449, %v3507_v26  }
  0x5a   :  { %2595 = vperm.xlu2 %7448, %v2252_v24  }
  0x60   :  { %2796 = vperm.xlu1 %7447, %v2268_v27   ;;  %7450 = vset.pattern.permute.xlu0 %v12293_v1 }
  0x61   :  { %256 = vperm.xlu0 %7450, %v200_v31  }
  0x62   :  { %3523 = vperm.xlu2 %7448, %v3508_v29   ;;  %v12285_v29 = vmov 1326507024  }
  0x67   :  { %v245_v37 = vpop.permute.xlu2 %244 }
  0x68   :  { %3533 = vperm.xlu1 %7447, %v3510_v32   ;;  %v265_v50 = vmul.f32 %v7828_v44, %v245_v37  ;;  %v12287_v37 = vmov 920167782  }
  0x69   :  { %252 = vperm.xlu0 %7450, %v199_v35  }
  0x6a   :  { %3513 = vperm.xlu2 %7448, %v3506_v34  }
  0x70   :  { %224 = vperm.xlu1 %7447, %v200_v31   ;;  %v249_v40 = vpop.permute.xlu2 %248 }
  0x71   :  { %7456 = vset.pattern.permute.xlu0 %v12289_v6  ;;  %v266_v61 = vmul.f32 %v7828_v44, %v249_v40 }
  0x72   :  { %229 = vperm.xlu2 %7448, %v201_v36   ;;  %334 = vperm.xlu0 %7456, %v201_v36  }
  0x78   :  { %7451 = vset.pattern.permute.xlu1 %v12293_v1 }
  0x79   :  { %260 = vperm.xlu1 %7451, %v201_v36  }
  0x7a   :  { %7452 = vset.pattern.permute.xlu2 %v12291_v5  ;;  %7460 = vset.pattern.permute.xlu0 %v12293_v1  ;;  %v286_v46 = vpop.permute.xlu2 %285 }
  0x7b   :  { %293 = vperm.xlu2 %7452, %v200_v31   ;;  %v303_v8 = vmul.f32 %v7832_v48, %v286_v46 }
  0x7e   :  { %v215_v38 = vpop.permute.xlu1 %214 }
  0x7f   :  { %v205_v39 = vpop.permute.xlu0 %204  ;;  %v235_v62 = vmul.f32 %v7830_v45, %v215_v38 }
  0x80   :  { %v233_v58 = vmul.f32 %v7830_v45, %v205_v39 }
  0x81   :  { %7453 = vset.pattern.permute.xlu1 %v12291_v5  ;;  %v272_v7 = vadd.f32 %v266_v61, %v235_v62 }
  0x82   :  { %297 = vperm.xlu1 %7453, %v201_v36  }
  0x83   :  { %7454 = vset.pattern.permute.xlu2 %v12310_v0  ;;  %v319_v54 = vpop.permute.xlu2 %318  ;;  %v309_v12 = vadd.f32 %v303_v8, %v272_v7 }
  0x84   :  { %219 = vperm.xlu2 %7454, %v199_v35  }
  0x87   :  { %v241_v41 = vpop.permute.xlu1 %240  ;;  %v210_v43 = vpop.permute.xlu0 %209 }
  0x88   :  { %v234_v49 = vmul.f32 %v7830_v45, %v210_v43  ;;  %v264_v57 = vmul.f32 %v7828_v44, %v241_v41 }
  0x8a   :  { %289 = vperm.xlu1 %7453, %v199_v35   ;;  %v271_v52 = vadd.f32 %v265_v50, %v234_v49  ;;  %v270_v63 = vadd.f32 %v264_v57, %v233_v58 }
  0x8c   :  { %7455 = vset.pattern.permute.xlu2 %v12289_v6 }
  0x8d   :  { %330 = vperm.xlu2 %7455, %v200_v31  }
  0x90   :  { %v282_v47 = vpop.permute.xlu1 %281  ;;  %v278_v55 = vpop.permute.xlu0 %277 }
  0x91   :  { %v302_v51 = vmul.f32 %v7832_v48, %v282_v47  ;;  %v301_v59 = vmul.f32 %v7832_v48, %v278_v55 }
  0x92   :  { %7457 = vset.pattern.permute.xlu1 %v12289_v6 }
  0x93   :  { %326 = vperm.xlu1 %7457, %v199_v35   ;;  %v308_v53 = vadd.f32 %v302_v51, %v271_v52  ;;  %v307_v3 = vadd.f32 %v301_v59, %v270_v63  ;;  %v12281_v35 = vmov 2102212464   ;;  %v12298_v59 = vmov 683565275  }
  0x95   :  { %7458 = vset.pattern.permute.xlu2 %v12310_v0  ;;  %v7837_v56 = vadd.f32 %v319_v54, %v308_v53 }
  0x97   :  { %12494 = vst [vmem:[#allocation11_spill] sm:$0xff] %v7837_v56  ;;  %v501_v60 = vand.u32 2139095040, %v7837_v56  ;;  %v12296_v24 = vand.u32 2147483647, %v7837_v56 }
  0x99   :  { %v315_v2 = vpop.permute.xlu1 %314  ;;  %v502_v4 = vshrl.u32 %v501_v60, 23  ;;  %v323_v11 = vpop.permute.xlu0 %322  ;;  %v505_v28 = vand.u32 8388607, %v12296_v24 }
  0x9a   :  { %v7846_v9 = vadd.f32 %v315_v2, %v307_v3  ;;  %v7849_v14 = vadd.f32 %v323_v11, %v309_v12 }
  0x9b   :  { %7459 = vset.pattern.permute.xlu1 %v12310_v0  ;;  %v6567_v10 = vadd.s32 4294967169, %v502_v4  ;;  %v506_v40 = vor.u32 8388608, %v505_v28 }
  0x9c   :  { %v346_v13 = vand.u32 2139095040, %v7846_v9  ;;  %12495 = vst [vmem:[#allocation12_spill] sm:$0xff] %v7849_v14  ;;  %v656_v17 = vand.u32 2139095040, %v7849_v14  ;;  %v12297_v31 = vand.u32 2147483647, %v7846_v9 }
  0x9d   :  { %v508_v15 = vadd.s32 1, %v6567_v10  ;;  %v12295_v46 = vand.u32 2147483647, %v7849_v14  ;;  %v7890_v63 = vshll.u32 %v506_v40, 8  ;;  %v12499_v14 = vmov 0  }
  0x9e   :  { %v347_v16 = vshrl.u32 %v346_v13, 23  ;;  %v657_v20 = vshrl.u32 %v656_v17, 23  ;;  %v7878_v53 = vand.u32 8388607, %v12297_v31 }
  0x9f   :  { %vm509_vm0 = vcmp.gt.s32.totalorder %v508_v15, 0  ;;  %v7894_v2 = vand.u32 8388607, %v12295_v46 }
  0xa0   :  { %v6564_v18 = vadd.s32 4294967169, %v347_v16  ;;  %v510_v19 = vsel %vm509_vm0, %v508_v15, 0  ;;  %v6570_v23 = vadd.s32 4294967169, %v657_v20  ;;  %v351_v4 = vor.u32 8388608, %v7878_v53 }
  0xa1   :  { %v512_v22 = vand.u32 31, %v510_v19  ;;  %v7867_v41 = vshrl.u32 %v510_v19, 5 }
  0xa2   :  { %v353_v21 = vadd.s32 1, %v6564_v18  ;;  %v663_v26 = vadd.s32 1, %v6570_v23 }
  0xa3   :  { %v7853_v25 = vsub.s32 32, %v512_v22  ;;  %v527_v39 = vshll.u32 %v12287_v37, %v512_v22  ;;  %v518_v43 = vshll.u32 %v12283_v42, %v512_v22  ;;  %v521_v47 = vshll.u32 %v12279_v33, %v512_v22 }
  0xa4   :  { %vm354_vm1 = vcmp.gt.s32.totalorder %v353_v21, 0  ;;  %vm664_vm2 = vcmp.gt.s32.totalorder %v663_v26, 0  ;;  %v524_v49 = vshll.u32 %v12281_v35, %v512_v22  ;;  %v515_v60 = vshll.u32 %v12298_v59, %v512_v22 }
  0xa5   :  { %v355_v27 = vsel %vm354_vm1, %v353_v21, 0  ;;  %v528_v30 = vshrl.u32 %v12285_v29, %v7853_v25  ;;  %v519_v34 = vshrl.u32 %v12279_v33, %v7853_v25  ;;  %v522_v36 = vshrl.u32 %v12281_v35, %v7853_v25 }
  0xa6   :  { %v357_v32 = vand.u32 31, %v355_v27  ;;  %v525_v38 = vshrl.u32 %v12287_v37, %v7853_v25  ;;  %v665_v51 = vsel %vm664_vm2, %v663_v26, 0  ;;  %v516_v52 = vshrl.u32 %v12283_v42, %v7853_v25 }
  0xa7   :  { %v529_v50 = vor.u32 %v528_v30, %v527_v39  ;;  %v7882_v55 = vor.u32 %v519_v34, %v518_v43  ;;  %v7884_v57 = vor.u32 %v522_v36, %v521_v47  ;;  %vm533_vm3 = vcmp.lt.s32.totalorder %v7867_v41, 4 }
  0xa8   :  { %v7880_v54 = vsub.s32 32, %v357_v32  ;;  %v526_v58 = vor.u32 %v525_v38, %v524_v49  ;;  %v667_v61 = vand.u32 31, %v665_v51  ;;  %v7896_v3 = vor.u32 %v516_v52, %v515_v60 }
  0xa9   :  { %v543_v62 = vsel %vm533_vm3, %v529_v50, 1326507024  ;;  %vm530_vm4 = vcmp.lt.s32.totalorder %v7867_v41, 1  ;;  %vm532_vm5 = vcmp.lt.s32.totalorder %v7867_v41, 3  ;;  %v7915_v15 = vshrl.u32 %v355_v27, 5 }
  0xaa   :  { %v370_v7 = vshrl.u32 %v12287_v37, %v7880_v54  ;;  %v539_v8 = vsel %vm533_vm3, %v526_v58, 920167782  ;;  %v542_v10 = vsel %vm530_vm4, %v7882_v55, %v7884_v57  ;;  %v373_v11 = vshrl.u32 %v12285_v29, %v7880_v54 }
  0xab   :  { %v544_v12 = vsel %vm532_vm5, %v526_v58, %v543_v62  ;;  %v7913_v13 = vsub.s32 32, %v667_v61  ;;  %v369_v16 = vshll.u32 %v12281_v35, %v357_v32  ;;  %v361_v17 = vshrl.u32 %v12283_v42, %v7880_v54 }
  0xac   :  { %v364_v18 = vshrl.u32 %v12279_v33, %v7880_v54  ;;  %v367_v19 = vshrl.u32 %v12281_v35, %v7880_v54  ;;  %v372_v20 = vshll.u32 %v12287_v37, %v357_v32  ;;  %vm531_vm6 = vcmp.lt.s32.totalorder %v7867_v41, 2 }
  0xad   :  { %v538_v21 = vsel %vm530_vm4, %v7896_v3, %v7882_v55  ;;  %v7930_v22 = vshrl.u32 %v665_v51, 5  ;;  %v371_v23 = vor.u32 %v370_v7, %v369_v16  ;;  %v360_v26 = vshll.u32 %v12298_v59, %v357_v32 }
  0xae   :  { %v363_v27 = vshll.u32 %v12283_v42, %v357_v32  ;;  %v366_v28 = vshll.u32 %v12279_v33, %v357_v32  ;;  %v374_v30 = vor.u32 %v373_v11, %v372_v20  ;;  %v540_v34 = vsel %vm532_vm5, %v7884_v57, %v539_v8 }
  0xaf   :  { %v7940_v36 = vsel %vm531_vm6, %v542_v10, %v544_v12  ;;  %v680_v38 = vshrl.u32 %v12287_v37, %v7913_v13  ;;  %v683_v39 = vshrl.u32 %v12285_v29, %v7913_v13  ;;  %v7946_v40 = vor.u32 %v361_v17, %v360_v26 }
  0xb0   :  { %v7948_v43 = vor.u32 %v364_v18, %v363_v27  ;;  %v7950_v32 = vor.u32 %v367_v19, %v366_v28  ;;  %vm378_vm7 = vcmp.lt.s32.totalorder %v7915_v15, 4  ;;  %v670_v47 = vshll.u32 %v12298_v59, %v667_v61 }
  0xb1   :  { %v671_v49 = vshrl.u32 %v12283_v42, %v7913_v13  ;;  %v679_v50 = vshll.u32 %v12281_v35, %v667_v61  ;;  %v384_v51 = vsel %vm378_vm7, %v371_v23, 920167782  ;;  %v674_v52 = vshrl.u32 %v12279_v33, %v7913_v13 }
  0xb2   :  { %v677_v53 = vshrl.u32 %v12281_v35, %v7913_v13  ;;  %v682_v58 = vshll.u32 %v12287_v37, %v667_v61  ;;  %v388_v60 = vsel %vm378_vm7, %v374_v30, 1326507024  ;;  %v673_v62 = vshll.u32 %v12283_v42, %v667_v61 }
  0xb3   :  { %v681_v7 = vor.u32 %v680_v38, %v679_v50  ;;  %vm375_vm8 = vcmp.lt.s32.totalorder %v7915_v15, 1  ;;  %vm377_vm9 = vcmp.lt.s32.totalorder %v7915_v15, 3  ;;  %v676_v8 = vshll.u32 %v12279_v33, %v667_v61 }
  0xb4   :  { %v684_v10 = vor.u32 %v683_v39, %v682_v58  ;;  %v383_v11 = vsel %vm375_vm8, %v7946_v40, %v7948_v43  ;;  %v385_v12 = vsel %vm377_vm9, %v7950_v32, %v384_v51  ;;  %v541_v16 = vsel %vm531_vm6, %v538_v21, %v540_v34 }
  0xb5   :  { %v7979_v17 = vor.u32 %v671_v49, %v670_v47  ;;  %v387_v61 = vsel %vm375_vm8, %v7948_v43, %v7950_v32  ;;  %v389_v18 = vsel %vm377_vm9, %v371_v23, %v388_v60  ;;  %v7987_v19 = vor.u32 %v674_v52, %v673_v62 }
  0xb6   :  { %v7989_v20 = vor.u32 %v677_v53, %v676_v8  ;;  %vm688_vm10 = vcmp.lt.s32.totalorder %v7930_v22, 4  ;;  %vm376_vm11 = vcmp.lt.s32.totalorder %v7915_v15, 2  ;;  %v550_v21 = vshrl.u32 %v7940_v36, 16 }
  0xb7   :  { %v661_v26 = vor.u32 8388608, %v7894_v2  ;;  %v694_v27 = vsel %vm688_vm10, %v681_v7, 920167782  ;;  %v7999_v28 = vsel %vm376_vm11, %v383_v11, %v385_v12  ;;  %v572_v23 = vshrl.u32 %v541_v16, 16 }
  0xb8   :  { %v698_v30 = vsel %vm688_vm10, %v684_v10, 1326507024  ;;  %v8005_v34 = vsel %vm376_vm11, %v387_v61, %v389_v18  ;;  %v8007_v38 = vshll.u32 %v351_v4, 8  ;;  %v547_v39 = vand.u32 65535, %v7890_v63 }
  0xb9   :  { %v549_v2 = vand.u32 65535, %v7940_v36  ;;  %vm685_vm12 = vcmp.lt.s32.totalorder %v7930_v22, 1  ;;  %vm12307_vm13 = vcmp.lt.s32.totalorder %v7930_v22, 3  ;;  %v571_v47 = vand.u32 65535, %v541_v16 }
  0xba   :  { %v693_v49 = vsel %vm685_vm12, %v7979_v17, %v7987_v19  ;;  %v695_v50 = vsel %vm12307_vm13, %v7989_v20, %v694_v27  ;;  %v417_v4 = vshrl.u32 %v7999_v28, 16  ;;  %v8021_v51 = vmul.u32 %v550_v21, %v547_v39 }
  0xbb   :  { %v697_v36 = vsel %vm685_vm12, %v7987_v19, %v7989_v20  ;;  %v699_v52 = vsel %vm12307_vm13, %v681_v7, %v698_v30  ;;  %v395_v53 = vshrl.u32 %v8005_v34, 16  ;;  %v8030_v58 = vmul.u32 %v572_v23, %v547_v39 }
  0xbc   :  { %vm12306_vm14 = vcmp.lt.s32.totalorder %v7930_v22, 2  ;;  %v8033_v60 = vshll.u32 %v661_v26, 8  ;;  %v392_v62 = vand.u32 65535, %v8007_v38  ;;  %v548_v8 = vshrl.u32 %v7890_v63, 16 }
  0xbd   :  { %v8039_v10 = vsel %vm12306_vm14, %v693_v49, %v695_v50  ;;  %v8043_v11 = vsel %vm12306_vm14, %v697_v36, %v699_v52  ;;  %v555_v16 = vshll.u32 %v8021_v51, 16  ;;  %v577_v26 = vshll.u32 %v8030_v58, 16 }
  0xbe   :  { %v8045_v7 = vmul.u32 %v417_v4, %v392_v62  ;;  %v8047_v12 = vmul.u32 %v549_v2, %v548_v8  ;;  %v8050_v61 = vmul.u32 %v571_v47, %v548_v8  ;;  %v8052_v18 = vmul.u32 %v395_v53, %v392_v62 }
  0xbf   :  { %v702_v27 = vand.u32 65535, %v8033_v60  ;;  %v12300_v30 = vshrl.u32 %v8039_v10, 16  ;;  %v416_v49 = vand.u32 65535, %v7999_v28  ;;  %v551_v50 = vmul.u32 %v549_v2, %v547_v39 }
  0xc0   :  { %v554_v36 = vmul.u32 %v550_v21, %v548_v8  ;;  %v12301_v52 = vshrl.u32 %v8043_v11, 16  ;;  %v394_v33 = vand.u32 65535, %v8005_v34  ;;  %v573_v35 = vmul.u32 %v571_v47, %v547_v39 }
  0xc1   :  { %v576_v42 = vmul.u32 %v572_v23, %v548_v8  ;;  %v393_v29 = vshrl.u32 %v8007_v38, 16  ;;  %v422_v37 = vshll.u32 %v8045_v7, 16  ;;  %v557_v6 = vshll.u32 %v8047_v12, 16 }
  0xc2   :  { %vm559_vm15 = vc.u32 %v551_v50, %v555_v16  ;;  %v400_v1 = vshll.u32 %v8052_v18, 16  ;;  %vm8065_vm0 = vc.u32 %v573_v35, %v577_v26  ;;  %v8071_v21 = vmul.u32 %v12300_v30, %v702_v27 }
  0xc3   :  { %v418_v23 = vmul.u32 %v416_v49, %v392_v62  ;;  %v8073_v34 = vmul.u32 %v416_v49, %v393_v29  ;;  %v8077_v39 = vmul.u32 %v12301_v52, %v702_v27  ;;  %v726_v2 = vand.u32 65535, %v8039_v10 }
  0xc4   :  { %v396_v47 = vmul.u32 %v394_v33, %v392_v62  ;;  %v8080_v8 = vmul.u32 %v394_v33, %v393_v29  ;;  %v560_v46 = vsel %vm559_vm15, 1, %v12310_v0  ;;  %v561_v24 = vadd.s32 %v555_v16, %v551_v50 }
  0xc5   :  { %vm426_vm1 = vc.u32 %v418_v23, %v422_v37  ;;  %v8083_v31 = vadd.s32 %v422_v37, %v418_v23  ;;  %v8085_v59 = vadd.s32 %v577_v26, %v573_v35  ;;  %v704_v49 = vand.u32 65535, %v8043_v11 }
  0xc6   :  { %vm404_vm2 = vc.u32 %v396_v47, %v400_v1  ;;  %v406_v30 = vadd.s32 %v400_v1, %v396_v47  ;;  %v582_v52 = vsel %vm8065_vm0, 1, %v12310_v0  ;;  %v703_v62 = vshrl.u32 %v8033_v60, 16 }
  0xc7   :  { %v732_v33 = vshll.u32 %v8071_v21, 16  ;;  %v12316_v5 = vshll.u32 %v8073_v34, 16  ;;  %v710_v16 = vshll.u32 %v8077_v39, 16  ;;  %v728_v37 = vmul.u32 %v726_v2, %v702_v27 }
  0xc8   :  { %v402_v35 = vshll.u32 %v8080_v8, 16  ;;  %v427_v26 = vsel %vm426_vm1, 1, %v12310_v0  ;;  %v8097_v50 = vmul.u32 %v726_v2, %v703_v62  ;;  %v405_v1 = vsel %vm404_vm2, 1, %v12310_v0 }
  0xc9   :  { %v421_v23 = vmul.u32 %v417_v4, %v393_v29  ;;  %vm430_vm15 = vc.u32 %v8083_v31, %v12316_v5  ;;  %v706_v28 = vmul.u32 %v704_v49, %v702_v27  ;;  %v8103_v47 = vmul.u32 %v704_v49, %v703_v62 }
  0xca   :  { %v399_v48 = vmul.u32 %v395_v53, %v393_v29  ;;  %vm408_vm0 = vc.u32 %v406_v30, %v402_v35  ;;  %v12498_v44 = vshll.u32 %v8050_v61, 16  ;;  %vm736_vm13 = vc.u32 %v728_v37, %v732_v33 }
  0xcb   :  { %v8108_v45 = vadd.s32 %v732_v33, %v728_v37  ;;  %v429_v2 = vadd.s32 %v427_v26, %v421_v23  ;;  %vm714_vm1 = vc.u32 %v706_v28, %v710_v16  ;;  %v716_v0 = vadd.s32 %v710_v16, %v706_v28  ;;  %v7260_v33 = vld [vmem:[%s12262_s3 + $0x38] sm:$0xff] }
  0xcc   :  { %vm585_vm14 = vc.u32 %v8085_v59, %v12498_v44  ;;  %v407_v4 = vadd.s32 %v405_v1, %v399_v48  ;;  %v431_v56 = vsel %vm430_vm15, 1, %v12499_v14  ;;  %vm563_vm2 = vc.u32 %v561_v24, %v557_v6  ;;  %2471 = vmatpush.bf16.msra.mxu0 %v7260_v33 }
  0xcd   :  { %v584_v5 = vadd.s32 %v582_v52, %v576_v42  ;;  %v734_v27 = vshll.u32 %v8097_v50, 16  ;;  %v409_v29 = vsel %vm408_vm0, 1, %v12499_v14  ;;  %v562_v53 = vadd.s32 %v560_v46, %v554_v36 }
  0xce   :  { %v586_v30 = vsel %vm585_vm14, 1, %v12499_v14  ;;  %v712_v44 = vshll.u32 %v8103_v47, 16  ;;  %v737_v49 = vsel %vm736_vm13, 1, %v12499_v14  ;;  %v715_v48 = vsel %vm714_vm1, 1, %v12499_v14 }
  0xcf   :  { %v12500_v6 = vshrl.u32 %v8039_v10, 16  ;;  %vm740_vm15 = vc.u32 %v8108_v45, %v734_v27  ;;  %v433_v42 = vadd.s32 %v431_v56, %v429_v2  ;;  %v564_v46 = vsel %vm563_vm2, 1, %v12499_v14  ;;  %v7259_v56 = vld [vmem:[%s12262_s3 + $0x30] sm:$0xff] }
  0xd0   :  { %v12501_v36 = vshrl.u32 %v8043_v11, 16  ;;  %vm718_vm13 = vc.u32 %v716_v0, %v712_v44  ;;  %v411_v16 = vadd.s32 %v409_v29, %v407_v4  ;;  %v588_v37 = vadd.s32 %v586_v30, %v584_v5  ;;  %2472 = vmatpush.bf16.msra.mxu0 %v7259_v56  ;;  %v7258_v5 = vld [vmem:[%s12262_s3 + $0x28] sm:$0xff] }
  0xd1   :  { %v731_v24 = vmul.u32 %v12500_v6, %v703_v62  ;;  %v423_v26 = vshrl.u32 %v8045_v7, 16  ;;  %v741_v10 = vsel %vm740_vm15, 1, %v12499_v14  ;;  %v401_v23 = vshrl.u32 %v8052_v18, 16 }
  0xd2   :  { %v709_v52 = vmul.u32 %v12501_v36, %v703_v62  ;;  %v566_v28 = vadd.s32 %v564_v46, %v562_v53  ;;  %v578_v11 = vshrl.u32 %v8030_v58, 16  ;;  %v719_v0 = vsel %vm718_vm13, 1, %v12499_v14 }
  0xd3   :  { %v739_v35 = vadd.s32 %v737_v49, %v731_v24  ;;  %v434_v62 = vadd.s32 %v433_v42, %v423_v26  ;;  %v412_v2 = vadd.s32 %v411_v16, %v401_v23  ;;  %v556_v7 = vshrl.u32 %v8021_v51, 16 }
  0xd4   :  { %v717_v1 = vadd.s32 %v715_v48, %v709_v52  ;;  %v589_v4 = vadd.s32 %v588_v37, %v578_v11  ;;  %v425_v29 = vshrl.u32 %v8073_v34, 16  ;;  %v580_v30 = vshrl.u32 %v8050_v61, 16  ;;  %2473 = vmatpush.bf16.msra.mxu0 %v7258_v5 }
  0xd5   :  { %v743_v18 = vadd.s32 %v741_v10, %v739_v35  ;;  %v403_v58 = vshrl.u32 %v8080_v8, 16  ;;  %v567_v44 = vadd.s32 %v566_v28, %v556_v7  ;;  %v733_v49 = vshrl.u32 %v8071_v21, 16  ;;  %v7257_v21 = vld [vmem:[%s12262_s3 + $0x20] sm:$0xff]  ;;  %v7255_v28 = vld [vmem:[%s12262_s3 + $0x10] sm:$0xff] }
  0xd6   :  { %v721_v53 = vadd.s32 %v719_v0, %v717_v1  ;;  %v380_v33 = vsel %vm378_vm7, %v7950_v32, 2102212464  ;;  %v435_v48 = vadd.s32 %v434_v62, %v425_v29  ;;  %v12502_v6 = vmov 683565275  }
  0xd7   :  { %v514_v51 = vshrl.u32 %v12502_v6, %v7853_v25  ;;  %v711_v24 = vshrl.u32 %v8077_v39, 16  ;;  %v359_v42 = vshrl.u32 %v12502_v6, %v7880_v54  ;;  %v8152_v46 = vadd.s32 %v412_v2, %v403_v58 }
  0xd8   :  { %v535_v32 = vsel %vm533_vm3, %v7884_v57, 2102212464  ;;  %v558_v8 = vshrl.u32 %v8047_v12, 16  ;;  %v590_v36 = vadd.s32 %v589_v4, %v580_v30  ;;  %v744_v25 = vadd.s32 %v743_v18, %v733_v49  ;;  %2474 = vmatpush.bf16.msra.mxu0 %v7257_v21 }
  0xd9   :  { %v722_v52 = vadd.s32 %v721_v53, %v711_v24  ;;  %v379_v54 = vsel %vm375_vm8, %v359_v42, %v7946_v40  ;;  %v381_v39 = vsel %vm377_vm9, %v7948_v43, %v380_v33  ;;  %v12503_v16 = vshll.u32 %v8073_v34, 16 }
  0xda   :  { %v8172_v35 = vadd.s32 %v567_v44, %v558_v8  ;;  %v735_v57 = vshrl.u32 %v8097_v50, 16  ;;  %v439_v12 = vadd.s32 1, %v435_v48  ;;  %v534_v26 = vsel %vm530_vm4, %v514_v51, %v7896_v3 }
  0xdb   :  { %v8170_v37 = vadd.s32 %v8083_v31, %v12503_v16  ;;  %v536_v40 = vsel %vm532_vm5, %v7882_v55, %v535_v32  ;;  %v713_v43 = vshrl.u32 %v8103_v47, 16  ;;  %v7256_v31 = vld [vmem:[%s12262_s3 + $0x18] sm:$0xff]  ;;  %v12504_v34 = vshll.u32 %v8050_v61, 16 }
  0xdc   :  { %v690_v3 = vsel %vm688_vm10, %v7989_v20, 2102212464  ;;  %v745_v55 = vadd.s32 %v744_v25, %v735_v57  ;;  %v382_v47 = vsel %vm376_vm11, %v379_v54, %v381_v39  ;;  %v594_v10 = vadd.s32 1, %v590_v36  ;;  %2475 = vmatpush.bf16.msra.mxu0 %v7256_v31 }
  0xdd   :  { %vm438_vm3 = vc.u32 %v8152_v46, %v8170_v37  ;;  %v8190_v1 = vadd.s32 %v8085_v59, %v12504_v34  ;;  %v669_v23 = vshrl.u32 %v12502_v6, %v7913_v13  ;;  %v8199_v56 = vadd.s32 %v722_v52, %v713_v43  ;;  %v7253_v52 = vld [vmem:[%s12262_s3] sm:$0xff] }
  0xde   :  { %v537_v61 = vsel %vm531_vm6, %v534_v26, %v536_v40  ;;  %v440_v59 = vsel %vm438_vm3, %v439_v12, %v435_v48  ;;  %vm12505_vm5 = vcmp.lt.s32.totalorder %v7930_v22, 3  ;;  %v8214_v13 = vadd.s32 %v8108_v45, %v734_v27  ;;  %v7254_v45 = vld [vmem:[%s12262_s3 + $0x8] sm:$0xff]  ;;  %s12525_s3 = sld [smem:[#allocation76_spill]] }
  0xdf   :  { %vm593_vm4 = vc.u32 %v8172_v35, %v8190_v1  ;;  %v689_v20 = vsel %vm685_vm12, %v669_v23, %v7979_v17  ;;  %v691_v15 = vsel %vm12505_vm5, %v7987_v19, %v690_v3  ;;  %v436_v41 = vmul.u32 %v8007_v38, %v382_v47 }
  0xe0   :  { %v749_v11 = vadd.s32 1, %v745_v55  ;;  %v595_v0 = vsel %vm593_vm4, %v594_v10, %v590_v36  ;;  %vm748_vm6 = vc.u32 %v8199_v56, %v8214_v13  ;;  %v591_v19 = vmul.u32 %v7890_v63, %v537_v61  ;;  %2476 = vmatpush.bf16.msra.mxu0 %v7255_v28 }
  0xe1   :  { %v441_v17 = vadd.s32 %v440_v59, %v436_v41  ;;  %vm12506_vm7 = vcmp.lt.s32.totalorder %v7930_v22, 2  ;;  %v437_v3 = vadd.s32 %v8170_v37, %v8152_v46  ;;  %v592_v61 = vadd.s32 %v8190_v1, %v8172_v35 }
  0xe2   :  { %v692_v50 = vsel %vm12506_vm7, %v689_v20, %v691_v15  ;;  %v596_v38 = vadd.s32 %v595_v0, %v591_v19  ;;  %v750_v27 = vsel %vm748_vm6, %v749_v11, %v745_v55  ;;  %v747_v11 = vadd.s32 %v8214_v13, %v8199_v56  ;;  %v7294_v56 = vld [vmem:[%s12269_s10 + $0x4] sm:$0xf0] }
  0xe3   :  { %v746_v62 = vmul.u32 %v8033_v60, %v692_v50  ;;  %v442_v2 = vadd.s32 536870912, %v441_v17  ;;  %vm345_vm0 = vcmp.lt.s32.totalorder %v7846_v9, 0 }
  0xe4   :  { %2477 = vmatpush.bf16.msra.mxu0 %v7254_v45  ;;  %v597_v7 = vadd.s32 536870912, %v596_v38 }
  0xe5   :  { %v751_v5 = vadd.s32 %v750_v27, %v746_v62  ;;  %v8229_v4 = vshrl.u32 %v442_v2, 30 }
  0xe6   :  { %v8231_v63 = vshrl.u32 %v597_v7, 30 }
  0xe7   :  { %v752_v18 = vadd.s32 536870912, %v751_v5  ;;  %v444_v22 = vshll.u32 %v8229_v4, 30 }
  0xe8   :  { %v599_v30 = vshll.u32 %v8231_v63, 30  ;;  %2478 = vmatpush.bf16.msra.mxu0 %v7253_v52 }
  0xe9   :  { %v8234_v29 = vshrl.u32 %v752_v18, 30  ;;  %v445_v53 = vsub.s32 %v441_v17, %v444_v22 }
  0xea   :  { %v600_v44 = vsub.s32 %v596_v38, %v599_v30 }
  0xeb   :  { %v754_v58 = vshll.u32 %v8234_v29, 30  ;;  %v447_v60 = vsub.s32 0, %v445_v53  ;;  %vm446_vm8 = vcmp.lt.s32.totalorder %v445_v53, 0 }
  0xec   :  { %v602_v33 = vsub.s32 0, %v600_v44  ;;  %vm601_vm9 = vcmp.lt.s32.totalorder %v600_v44, 0 }
  0xed   :  { %v755_v49 = vsub.s32 %v751_v5, %v754_v58  ;;  %v448_v48 = vsel %vm446_vm8, %v447_v60, %v445_v53  ;;  %v6631_v5 = vld [vmem:[%s12269_s10] sm:$0xf] }
  0xee   :  { %v603_v24 = vsel %vm601_vm9, %v602_v33, %v600_v44  ;;  %v449_v42 = vclz %v448_v48  ;;  %v6632_v22 = vor.u32 %v7294_v56, %v6631_v5  ;;  %v12508_v48 = vand.u32 2147483647, %v7846_v9 }
  0xef   :  { %v757_v51 = vsub.s32 0, %v755_v49  ;;  %vm756_vm10 = vcmp.lt.s32.totalorder %v755_v49, 0  ;;  %v604_v21 = vclz %v603_v24  ;;  %vm486_vm9 = vweird.f32 %v7846_v9 }
  0xf0   :  { %v6565_v8 = vadd.s32 4294967294, %v449_v42  ;;  %2479 = vmatmul.bf16.vlgmr.msra.gmra.mxu0 %v6632_v22  ;;  %vm8259_vm2 = vcmp.le.f32.partialorder %v12508_v48, 0.7853982 }
  0xf1   :  { %v758_v32 = vsel %vm756_vm10, %v757_v51, %v755_v49  ;;  %v6568_v25 = vadd.s32 4294967294, %v604_v21 }
  0xf2   :  { %v759_v36 = vclz %v758_v32  ;;  %vm6566_vm11 = vcmp.lt.s32.totalorder %v6565_v8, 0 }
  0xf3   :  { %vm6569_vm12 = vcmp.lt.s32.totalorder %v6568_v25, 0  ;;  %v452_v39 = vsel %vm6566_vm11, 0, %v6565_v8  ;;  %v12514_v8 = vld [vmem:[#allocation12_spill] sm:$0xff] }
  0xf4   :  { %v6571_v54 = vadd.s32 4294967294, %v759_v36  ;;  %v607_v16 = vsel %vm6569_vm12, 0, %v6568_v25  ;;  %v457_v57 = vsub.s32 4294967266, %v452_v39  ;;  %v453_v31 = vsub.s32 32, %v452_v39 }
  0xf5   :  { %v612_v12 = vsub.s32 4294967266, %v607_v16  ;;  %v608_v47 = vsub.s32 32, %v607_v16  ;;  %v454_v15 = vshll.u32 %v445_v53, %v452_v39  ;;  %v609_v19 = vshll.u32 %v600_v44, %v607_v16 }
  0xf6   :  { %vm6572_vm14 = vcmp.lt.s32.totalorder %v6571_v54, 0  ;;  %v458_v40 = vadd.s32 127, %v457_v57  ;;  %v455_v23 = vshrl.u32 %v437_v3, %v453_v31  ;;  %vm655_vm13 = vcmp.lt.s32.totalorder %v12514_v8, 0 }
  0xf7   :  { %v762_v26 = vsel %vm6572_vm14, 0, %v6571_v54  ;;  %v613_v34 = vadd.s32 127, %v612_v12  ;;  %v610_v28 = vshrl.u32 %v592_v61, %v608_v47  ;;  %v12515_v54 = vand.u32 2147483647, %v12514_v8 }
  0xf8   :  { %v767_v43 = vsub.s32 4294967266, %v762_v26  ;;  %v459_v55 = vshll.u32 %v458_v40, 23  ;;  %v763_v20 = vsub.s32 32, %v762_v26  ;;  %v456_v17 = vor.u32 %v455_v23, %v454_v15 }
  0xf9   :  { %v614_v59 = vshll.u32 %v613_v34, 23  ;;  %v611_v45 = vor.u32 %v610_v28, %v609_v19  ;;  %v764_v38 = vshll.u32 %v755_v49, %v762_v26  ;;  %v12507_v49 = vld [vmem:[#allocation11_spill] sm:$0xff]  ;;  %vm8282_vm3 = vcmp.le.f32.partialorder %v12515_v54, 0.7853982 }
  0xfa   :  { %v768_v10 = vadd.s32 127, %v767_v43  ;;  %v460_v41 = vor.u32 4788187, %v459_v55  ;;  %v765_v46 = vshrl.u32 %v747_v11, %v763_v20  ;;  %v463_v62 = vcvt.s32.f32 %v456_v17 }
  0xfb   :  { %v615_v50 = vor.u32 4788187, %v614_v59  ;;  %v618_v13 = vcvt.s32.f32 %v611_v45  ;;  %vm500_vm1 = vcmp.lt.s32.totalorder %v12507_v49, 0  ;;  %v12511_v21 = vand.u32 2147483647, %v12507_v49 }
  0xfc   :  { %v769_v0 = vshll.u32 %v768_v10, 23  ;;  %v461_v37 = vand.u32 2147483647, %v460_v41  ;;  %v766_v35 = vor.u32 %v765_v46, %v764_v38  ;;  %v467_v59 = vsub.s32 4, %v8229_v4 }
  0xfd   :  { %v616_v2 = vand.u32 2147483647, %v615_v50  ;;  %vm8270_vm15 = vcmp.le.f32.partialorder %v12511_v21, 0.7853982  ;;  %v622_v41 = vsub.s32 4, %v8231_v63  ;;  %vm641_vm11 = vweird.f32 %v12507_v49 }
  0xfe   :  { %v770_v27 = vor.u32 4788187, %v769_v0  ;;  %v464_v1 = vmul.f32 %v463_v62, %v461_v37  ;;  %v773_v30 = vcvt.s32.f32 %v766_v35  ;;  %v468_v0 = vsel %vm345_vm0, %v467_v59, %v8229_v4 }
  0xff   :  { %v619_v18 = vmul.f32 %v618_v13, %v616_v2  ;;  %v623_v50 = vsel %vm500_vm1, %v622_v41, %v8231_v63  ;;  %v777_v37 = vsub.s32 4, %v8234_v29  ;;  %v470_v45 = vsel %vm8259_vm2, 0, %v468_v0 }
 0x100   :  { %v771_v7 = vand.u32 2147483647, %v770_v27  ;;  %v465_v53 = vxor.u32 2147483648, %v464_v1  ;;  %v625_v27 = vsel %vm8270_vm15, 0, %v623_v50 }
 0x101   :  { %v620_v44 = vxor.u32 2147483648, %v619_v18  ;;  %v778_v35 = vsel %vm655_vm13, %v777_v37, %v8234_v29  ;;  %v642_v13 = vadd.s32 3, %v625_v27 }
 0x102   :  { %v774_v58 = vmul.f32 %v773_v30, %v771_v7  ;;  %v466_v60 = vsel %vm345_vm0, %v465_v53, %v464_v1  ;;  %v487_v1 = vadd.s32 3, %v470_v45  ;;  %v780_v7 = vsel %vm8282_vm3, 0, %v778_v35 }
 0x103   :  { %v621_v24 = vsel %vm500_vm1, %v620_v44, %v619_v18  ;;  %v469_v42 = vsel %vm8259_vm2, %v7846_v9, %v466_v60  ;;  %v643_v29 = vand.u32 3, %v642_v13  ;;  %vm796_vm1 = vweird.f32 %v12514_v8 }
 0x104   :  { %v775_v33 = vxor.u32 2147483648, %v774_v58  ;;  %v624_v36 = vsel %vm8270_vm15, %v12507_v49, %v621_v24  ;;  %v471_v52 = vmul.f32 %v469_v42, %v469_v42  ;;  %v488_v53 = vand.u32 3, %v487_v1 }
 0x105   :  { %v626_v16 = vmul.f32 %v624_v36, %v624_v36  ;;  %vm645_vm7 = vcmp.eq.s32.totalorder %v643_v29, 0  ;;  %vm648_vm8 = vcmp.eq.s32.totalorder %v643_v29, 2  ;;  %vm644_vm10 = vcmp.lt.s32.totalorder %v643_v29, 2 }
 0x106   :  { %v776_v25 = vsel %vm655_vm13, %v775_v33, %v774_v58  ;;  %v479_v12 = vmul.f32 -0.00019511016, %v471_v52  ;;  %v472_v34 = vmul.f32 -0.001358992, %v471_v52  ;;  %v797_v33 = vadd.s32 3, %v780_v7 }
 0x107   :  { %v779_v57 = vsel %vm8282_vm3, %v12514_v8, %v776_v25  ;;  %v634_v40 = vmul.f32 -0.00019511016, %v626_v16  ;;  %v627_v63 = vmul.f32 -0.001358992, %v626_v16  ;;  %vm490_vm4 = vcmp.eq.s32.totalorder %v488_v53, 0 }
 0x108   :  { %v8289_v26 = vmul.f32 %v779_v57, %v779_v57  ;;  %v480_v43 = vadd.f32 0.008332121, %v479_v12  ;;  %v473_v10 = vadd.f32 0.041655596, %v472_v34  ;;  %v798_v54 = vand.u32 3, %v797_v33 }
 0x109   :  { %v635_v3 = vadd.f32 0.008332121, %v634_v40  ;;  %v628_v56 = vadd.f32 0.041655596, %v627_v63  ;;  %vm493_vm5 = vcmp.eq.s32.totalorder %v488_v53, 2  ;;  %vm489_vm6 = vcmp.lt.s32.totalorder %v488_v53, 2 }
 0x10a   :  { %v789_v31 = vmul.f32 -0.00019511016, %v8289_v26  ;;  %v481_v55 = vmul.f32 %v480_v43, %v471_v52  ;;  %v474_v15 = vmul.f32 %v473_v10, %v471_v52  ;;  %v782_v44 = vmul.f32 -0.001358992, %v8289_v26  ;;  %v8325_v8 = vld [vmem:[%s12519_s0] sm:$0x7] }
 0x10b   :  { %v636_v23 = vmul.f32 %v635_v3, %v626_v16  ;;  %v629_v58 = vmul.f32 %v628_v56, %v626_v16  ;;  %vm800_vm12 = vcmp.eq.s32.totalorder %v798_v54, 0  ;;  %vm803_vm14 = vcmp.eq.s32.totalorder %v798_v54, 2 }
 0x10c   :  { %v790_v47 = vadd.f32 0.008332121, %v789_v31  ;;  %v482_v61 = vadd.f32 -0.16666654, %v481_v55  ;;  %v475_v19 = vadd.f32 -0.4999988, %v474_v15  ;;  %v80_v27 = vmul.f32 %v8325_v8, %v8325_v8 }
 0x10d   :  { %v637_v28 = vadd.f32 -0.16666654, %v636_v23  ;;  %v630_v48 = vadd.f32 -0.4999988, %v629_v58  ;;  %v783_v51 = vadd.f32 0.041655596, %v782_v44 }
 0x10e   :  { %v791_v20 = vmul.f32 %v790_v47, %v8289_v26  ;;  %v483_v11 = vmul.f32 %v482_v61, %v471_v52  ;;  %v476_v2 = vmul.f32 %v475_v19, %v471_v52  ;;  %vm799_vm0 = vcmp.lt.s32.totalorder %v798_v54, 2  ;;  %v7293_v58 = vld [vmem:[%s12269_s10 + $0x4] sm:$0xf]  ;;  %v6633_v44 = vld [vmem:[%s12269_s10 + $0x8] sm:$0xf0] }
 0x10f   :  { %v638_v46 = vmul.f32 %v637_v28, %v626_v16  ;;  %v631_v32 = vmul.f32 %v630_v48, %v626_v16  ;;  %v784_v25 = vmul.f32 %v783_v51, %v8289_v26  ;;  %vm12341_vm2 = vcmask 1042432  }
 0x110   :  { %v792_v17 = vadd.f32 -0.16666654, %v791_v20  ;;  %v484_v38 = vadd.f32 1.0, %v483_v11  ;;  %v477_v22 = vadd.f32 1.0, %v476_v2  ;;  %vm12342_vm15 = vsmask.f32 1280 }
 0x111   :  { %v639_v4 = vadd.f32 1.0, %v638_v46  ;;  %v785_v39 = vadd.f32 -0.4999988, %v784_v25  ;;  %vm2352_vm13 = vsmask.f32 2304  ;;  %v82_v35 = vsel %vm12341_vm2, %v80_v27, 0.0 }
 0x112   :  { %v793_v62 = vmul.f32 %v792_v17, %v8289_v26  ;;  %v485_v5 = vmul.f32 %v484_v38, %v469_v42  ;;  %v494_v21 = vxor.u32 2147483648, %v477_v22  ;;  %vm2353_vm3 = vmand %vm12341_vm2, %vm2352_vm13  ;;  %v83_v63 = vrot.slane %v82_v35, 4 }
 0x113   :  { %v640_v30 = vmul.f32 %v639_v4, %v624_v36  ;;  %v632_v36 = vadd.f32 1.0, %v631_v32  ;;  %v12521_v53 = vmov 0  ;;  %v6636_v48 = vor.u32 %v7293_v58, %v6633_v44 }
 0x114   :  { %v794_v18 = vadd.f32 1.0, %v793_v62  ;;  %v491_v60 = vxor.u32 2147483648, %v485_v5  ;;  %v495_v40 = vsel %vm493_vm5, %v494_v21, %v485_v5  ;;  %v84_v56 = vadd.f32 %v83_v63, %v82_v35  ;;  %v7296_v21 = vld [vmem:[%s12269_s10 + $0x14] sm:$0xf0] }
 0x115   :  { %v646_v42 = vxor.u32 2147483648, %v640_v30  ;;  %v649_v34 = vxor.u32 2147483648, %v632_v36  ;;  %v7300_v35 = vld [vmem:[%s12269_s10 + $0x34] sm:$0xf0] }
 0x116   :  { %v795_v24 = vmul.f32 %v794_v18, %v779_v57  ;;  %v492_v52 = vsel %vm490_vm4, %v477_v22, %v491_v60  ;;  %v786_v57 = vmul.f32 %v785_v39, %v8289_v26  ;;  %vm2348_vm4 = vcmask 1041408   ;;  %v7532_v18 = vld [vmem:[%s12490_s26] sm:$0x7]  ;;  %v7295_v39 = vld [vmem:[%s12269_s10 + $0x14] sm:$0xf] }
 0x117   :  { %v496_v43 = vsel %vm489_vm6, %v492_v52, %v495_v40  ;;  %v647_v31 = vsel %vm645_vm7, %v632_v36, %v646_v42  ;;  %v650_v16 = vsel %vm648_vm8, %v649_v34, %v640_v30  ;;  %v2171_v22 = vpack.c.bf16 %v7532_v18, %v7532_v18  ;;  %vm8341_vm5 = vmand %vm2348_vm4, %vm12342_vm15  ;;  %v8367_v52 = vld [vmem:[%s12525_s3] sm:$0x7] }
 0x118   :  { %v801_v12 = vxor.u32 2147483648, %v795_v24  ;;  %v787_v3 = vadd.f32 1.0, %v786_v57  ;;  %v497_v55 = vsel %vm486_vm9, nan, %v496_v43  ;;  %v651_v47 = vsel %vm644_vm10, %v647_v31, %v650_v16 }
 0x119   :  { %v652_v10 = vsel %vm641_vm11, nan, %v651_v47  ;;  %v2172_v15 = vpack.c.bf16 %v497_v55, %v497_v55  ;;  %v85_v30 = vrot.slane %v84_v56, 2  ;;  %v12522_v53 = vsel %vm8341_vm5, 4294967295, %v12521_v53 }
 0x11a   :  { %v802_v23 = vsel %vm800_vm12, %v787_v3, %v801_v12  ;;  %v804_v61 = vxor.u32 2147483648, %v787_v3  ;;  %v2173_v59 = vpack.c.bf16 %v652_v10, %v652_v10  ;;  %12523 = vst [vmem:[#allocation13_spill] sm:$0xff] %v12522_v53  ;;  %vm2443_vm6 = vcmask 179200   ;;  %v6641_v12 = vld [vmem:[%s12269_s10 + $0x18] sm:$0xf0] }
 0x11b   :  { %v2323_v41 = vunpack.c.l.b16 %v2172_v15  ;;  %v86_v60 = vadd.f32 %v85_v30, %v84_v56  ;;  %v118_v36 = vmul.f32 %v8367_v52, %v8367_v52  ;;  %v6644_v31 = vor.u32 %v7295_v39, %v6641_v12  ;;  %v7302_v39 = vld [vmem:[%s12269_s10 + $0x44] sm:$0xf0] }
 0x11c   :  { %v805_v20 = vsel %vm803_vm14, %v804_v61, %v795_v24  ;;  %v2324_v28 = vunpack.c.l.b16 %v2173_v59  ;;  %v6639_v24 = vld [vmem:[%s12269_s10 + $0x10] sm:$0xf]  ;;  %v7298_v61 = vld [vmem:[%s12269_s10 + $0x24] sm:$0xf0] }
 0x11d   :  { %v806_v26 = vsel %vm799_vm0, %v802_v23, %v805_v20  ;;  %v87_v51 = vrot.slane %v86_v60, 1  ;;  %v6640_v42 = vor.u32 %v7296_v21, %v6639_v24  ;;  %v119_v43 = vsel %vm12341_vm2, %v118_v36, 0.0  ;;  %v6647_v23 = vld [vmem:[%s12269_s10 + $0x20] sm:$0xf] }
 0x11e   :  { %v807_v9 = vsel %vm796_vm1, nan, %v806_v26  ;;  %v2326_v0 = vpack.c.b16 %v2324_v28, %v2323_v41  ;;  %v120_v34 = vrot.slane %v119_v43, 4  ;;  %v6648_v20 = vor.u32 %v7298_v61, %v6647_v23  ;;  %v6665_v23 = vld [vmem:[%s12269_s10 + $0x48] sm:$0xf0] }
 0x11f   :  { %v2174_v11 = vpack.c.bf16 %v807_v9, %v807_v9  ;;  %v88_v29 = vadd.f32 %v87_v51, %v86_v60  ;;  %2484 = vmatmul.bf16.gmra.mxu0 %v6640_v42  ;;  %v6657_v51 = vld [vmem:[%s12269_s10 + $0x38] sm:$0xf0] }
 0x120   :  { %v2330_v17 = vshrl.u32 %v2326_v0, 16  ;;  %v2333_v19 = vshll.u32 %v2326_v0, 16  ;;  %v121_v16 = vadd.f32 %v120_v34, %v119_v43  ;;  %v6649_v0 = vld [vmem:[%s12269_s10 + $0x28] sm:$0xf0] }
 0x121   :  { %v8318_v49 = vunpack.c.l.b16 %v2174_v11  ;;  %7488 = vrsqrt.f32 %v88_v29  ;;  %vm96_vm7 = vcmp.eq.f32.partialorder %v88_v29, inf  ;;  %v99_v55 = vand.u32 2147483648, %v88_v29  ;;  %v7297_v11 = vld [vmem:[%s12269_s10 + $0x24] sm:$0xf] }
 0x122   :  { %v2332_v46 = vrot.slane %v2330_v17, 6  ;;  %v2335_v37 = vrot.slane %v2333_v19, 7  ;;  %v122_v47 = vrot.slane %v121_v16, 2  ;;  %vm98_vm8 = vcmp.eq.f32.partialorder %v88_v29, 0.0 }
 0x123   :  { %12518 = vst [vmem:[#allocation11_spill] sm:$0xff] %v8318_v49  ;;  %v2327_v50 = vpack.c.b16 %v8318_v49, %v8318_v49  ;;  %v6652_v17 = vor.u32 %v7297_v11, %v6649_v0 }
 0x124   :  { %v8329_v62 = vor.u32 %v2335_v37, %v2332_v46  ;;  %v123_v59 = vadd.f32 %v122_v47, %v121_v16 }
 0x125   :  { %v2338_v45 = vshrl.u32 %v2327_v50, 16  ;;  %v2341_v38 = vshll.u32 %v2327_v50, 16 }
 0x126   :  { %12520 = vst [vmem:[#allocation12_spill] sm:$0xff] %v8329_v62  ;;  %v8354_v33 = vsel %vm8341_vm5, %v2171_v22, %v8329_v62  ;;  %v124_v9 = vrot.slane %v123_v59, 1 }
 0x127   :  { %v2340_v2 = vrot.slane %v2338_v45, 6  ;;  %v2343_v4 = vrot.slane %v2341_v38, 7  ;;  %12524 = vst [vmem:[#allocation14_spill] sm:$0xff] %v8354_v33  ;;  %v7489_v32 = vpop.eup %7488 }
 0x128   :  { %v90_v25 = vmul.f32 %v7489_v32, %v88_v29  ;;  %v125_v28 = vadd.f32 %v124_v9, %v123_v59 }
 0x129   :  { %v2344_v1 = vor.u32 %v2343_v4, %v2340_v2  ;;  %v6655_v4 = vld [vmem:[%s12269_s10 + $0x30] sm:$0xf] }
 0x12a   :  { %v91_v54 = vmul.f32 %v7489_v32, %v90_v25  ;;  %v6656_v63 = vor.u32 %v7300_v35, %v6655_v4  ;;  %vm133_vm14 = vcmp.eq.f32.partialorder %v125_v28, inf  ;;  %v136_v44 = vand.u32 2147483648, %v125_v28 }
 0x12b   :  { %v2345_v5 = vsel %vm12342_vm15, %v8329_v62, %v2344_v1  ;;  %vm135_vm0 = vcmp.eq.f32.partialorder %v125_v28, 0.0  ;;  %v170_v25 = vlaneseq }
 0x12c   :  { %v2354_v13 = vsel %vm2353_vm3, %v2345_v5, 1065369472  ;;  %v92_v40 = vmul.f32 0.5, %v91_v54 }
 0x12d   :  { %v2469_v7 = vsel %vm12341_vm2, %v2354_v13, 0  ;;  %v8409_v36 = vshrl.u32 %v170_v25, 7 }
 0x12e   :  { %2526 = vmatpush.bf16.msra.mxu1 %v2469_v7  ;;  %v93_v57 = vsub.f32 1.5, %v92_v40 }
 0x12f   :  { %2489 = vmatmul.bf16.gmra.mxu0 %v6648_v20  ;;  %12526 = vst [vmem:[#allocation15_spill] sm:$0xff] %v8409_v36  ;;  %vm173_vm13 = vcmp.eq.s32.totalorder %v8409_v36, 2 }
 0x130   :  { %v94_v3 = vmul.f32 %v7489_v32, %v93_v57 }
 0x132   :  { %2527 = vmatpush.bf16.msra.mxu1 %v8354_v33  ;;  %v95_v10 = vmul.f32 %v94_v3, %v88_v29 }
 0x134   :  { %v97_v15 = vsel %vm96_vm7, %v88_v29, %v95_v10  ;;  %v7301_v10 = vld [vmem:[%s12269_s10 + $0x44] sm:$0xf] }
 0x135   :  { %6693 = vmatmul.msk.bf16.vlgmr.msra.gmra.mxu1 %vm2443_vm6, %v6636_v48  ;;  %v100_v26 = vsel %vm98_vm8, %v99_v55, %v97_v15  ;;  %v7299_v48 = vld [vmem:[%s12269_s10 + $0x34] sm:$0xf]  ;;  %vm172_vm8 = vcmp.eq.s32.totalorder %v8409_v36, 1  ;;  %v7614_v55 = vmov 0.0   ;;  %v6668_v20 = vor.u32 %v7301_v10, %v6665_v23 }
 0x136   :  { %v101_v41 = vmax.f32 %v100_v26, 1e-12  ;;  %v6660_v21 = vor.u32 %v7299_v48, %v6657_v51  ;;  %v174_v47 = vsel %vm173_vm13, 1.0, %v7614_v55  ;;  %v7307_v51 = vld [vmem:[%s12269_s10 + $0x74] sm:$0xf]  ;;  %vm3422_vm13 = vcmask 138240  }
 0x137   :  { %v175_v26 = vsel %vm172_vm8, 1e-06, %v174_v47 }
 0x138   :  { %7490 = vrcp.f32 %v101_v41  ;;  %v113_v37 = vand.u32 2147483648, %v101_v41  ;;  %vm107_vm9 = vweird.f32 %v101_v41  ;;  %v111_v27 = vand.u32 2147483647, %v101_v41 }
 0x139   :  { %7492 = vrsqrt.f32 %v125_v28 }
 0x13a   :  { %v114_v5 = vor.u32 1.1754944e-38, %v113_v37  ;;  %vm112_vm12 = vcmp.eq.f32.partialorder %v111_v27, 8.507059e+37  ;;  %v6673_v27 = vld [vmem:[%s12269_s10 + $0x58] sm:$0xf0] }
 0x13e   :  { %v7491_v19 = vpop.eup %7490 }
 0x13f   :  { %v7493_v50 = vpop.eup %7492  ;;  %v103_v46 = vmul.f32 %v7491_v19, %v101_v41  ;;  %vm108_vm10 = vweird.f32 %v7491_v19  ;;  %2494 = vmatmul.bf16.gmra.mxu0 %v6656_v63  ;;  %v6671_v41 = vld [vmem:[%s12269_s10 + $0x50] sm:$0xf]  ;;  %v7306_v63 = vld [vmem:[%s12269_s10 + $0x64] sm:$0xf0] }
 0x140   :  { %v127_v45 = vmul.f32 %v7493_v50, %v125_v28  ;;  %vm109_vm11 = vmor %vm107_vm9, %vm108_vm10 }
 0x141   :  { %v104_v38 = vsub.f32 1.0, %v103_v46 }
 0x142   :  { %v128_v2 = vmul.f32 %v7493_v50, %v127_v45 }
 0x143   :  { %v105_v1 = vmul.f32 %v7491_v19, %v104_v38  ;;  %v7303_v38 = vld [vmem:[%s12269_s10 + $0x54] sm:$0xf] }
 0x144   :  { %v129_v56 = vmul.f32 0.5, %v128_v2  ;;  %v6676_v35 = vor.u32 %v7303_v38, %v6673_v27 }
 0x145   :  { %6694 = vmatmul.msk.bf16.gmra.mxu1 %vm2443_vm6, %v6644_v31  ;;  %v106_v13 = vadd.f32 %v7491_v19, %v105_v1  ;;  %v6679_v1 = vld [vmem:[%s12269_s10 + $0x60] sm:$0xf] }
 0x146   :  { %v130_v7 = vsub.f32 1.5, %v129_v56 }
 0x147   :  { %v110_v18 = vsel %vm109_vm11, %v7491_v19, %v106_v13  ;;  %v6680_v13 = vor.u32 %v7306_v63, %v6679_v1 }
 0x148   :  { %v115_v22 = vsel %vm112_vm12, %v114_v5, %v110_v18  ;;  %v131_v30 = vmul.f32 %v7493_v50, %v130_v7  ;;  %vm3174_vm12 = vcmask 1043456  }
 0x149   :  { %v116_v58 = vmul.f32 %v115_v22, %v8325_v8  ;;  %v6663_v8 = vld [vmem:[%s12269_s10 + $0x40] sm:$0xf]  ;;  %v7305_v22 = vld [vmem:[%s12269_s10 + $0x64] sm:$0xf] }
 0x14a   :  { %v132_v60 = vmul.f32 %v131_v30, %v125_v28  ;;  %v6664_v12 = vor.u32 %v7302_v39, %v6663_v8  ;;  %v6681_v30 = vld [vmem:[%s12269_s10 + $0x68] sm:$0xf0] }
 0x14b   :  { %v177_v29 = vrot.slane %v116_v58, 1 }
 0x14c   :  { %v134_v24 = vsel %vm133_vm14, %v125_v28, %v132_v60  ;;  %v7304_v28 = vld [vmem:[%s12269_s10 + $0x54] sm:$0xf0]  ;;  %vm12340_vm14 = vcmask 1044480  }
 0x14d   :  { %v137_v42 = vsel %vm135_vm0, %v136_v44, %v134_v24  ;;  %v179_v54 = vadd.f32 %v177_v29, %v116_v58  ;;  %v6672_v19 = vor.u32 %v7304_v28, %v6671_v41  ;;  %v6687_v44 = vld [vmem:[%s12269_s10 + $0x70] sm:$0xf]  ;;  %v7308_v60 = vld [vmem:[%s12269_s10 + $0x74] sm:$0xf0]  ;;  %v6689_v29 = vld [vmem:[%s12269_s10 + $0x78] sm:$0xf0] }
 0x14e   :  { %v138_v32 = vmax.f32 %v137_v42, 1e-12  ;;  %v6688_v48 = vor.u32 %v7308_v60, %v6687_v44  ;;  %v6692_v24 = vor.u32 %v7307_v51, %v6689_v29  ;;  %v1277_v60 = vld [vmem:[%s12264_s5 + $0x20] sm:$0xf]  ;;  %v12531_v29 = vmov 3  }
 0x14f   :  { %vm180_vm1 = vcmp.eq.f32.partialorder %v179_v54, 0.0  ;;  %2499 = vmatmul.bf16.gmra.mxu0 %v6664_v12  ;;  %vm12343_vm0 = vcmask 1045504  }
 0x150   :  { %7494 = vrcp.f32 %v138_v32  ;;  %v181_v43 = vsel %vm180_vm1, 1, %v12499_v14  ;;  %vm144_vm3 = vweird.f32 %v138_v32  ;;  %v150_v34 = vand.u32 2147483648, %v138_v32 }
 0x151   :  { %v148_v16 = vand.u32 2147483647, %v138_v32  ;;  %v182_v3 = vperm.slane %v181_v43, 0  ;;  %vm3183_vm1 = vcmask 1046528  }
 0x152   :  { %v151_v59 = vor.u32 1.1754944e-38, %v150_v34 }
 0x153   :  { %vm149_vm10 = vcmp.eq.f32.partialorder %v148_v16, 8.507059e+37  ;;  %vm183_vm11 = vcmp.eq.s32.totalorder %v182_v3, 1 }
 0x154   :  { %v8429_v0 = vsel %vm183_vm11, %v175_v26, %v116_v58  ;;  %v6684_v58 = vor.u32 %v7305_v22, %v6681_v30 }
 0x155   :  { %6695 = vmatmul.msk.bf16.gmra.mxu1 %vm2443_vm6, %v6652_v17 }
 0x156   :  { %v7495_v40 = vpop.eup %7494 }
 0x157   :  { %v140_v31 = vmul.f32 %v7495_v40, %v138_v32  ;;  %vm145_vm7 = vweird.f32 %v7495_v40 }
 0x158   :  { %vm146_vm9 = vmor %vm144_vm3, %vm145_vm7 }
 0x159   :  { %v141_v57 = vsub.f32 1.0, %v140_v31 }
 0x15b   :  { %v142_v61 = vmul.f32 %v7495_v40, %v141_v57 }
 0x15d   :  { %v143_v15 = vadd.f32 %v7495_v40, %v142_v61 }
 0x15f   :  { %v147_v9 = vsel %vm146_vm9, %v7495_v40, %v143_v15  ;;  %2504 = vmatmul.bf16.gmra.mxu0 %v6672_v19 }
 0x160   :  { %v152_v11 = vsel %vm149_vm10, %v151_v59, %v147_v9  ;;  %vm4428_vm10 = vsmask.f32 3328 }
 0x161   :  { %v153_v17 = vmul.f32 %v152_v11, %v8367_v52  ;;  %vm9420_vm11 = vmand %vm3174_vm12, %vm4428_vm10 }
 0x163   :  { %v185_v50 = vmul.f32 %v8429_v0, %v153_v17 }
 0x165   :  { %6696 = vmatmul.msk.bf16.gmra.mxu1 %vm2443_vm6, %v6660_v21  ;;  %v186_v46 = vsel %vm12341_vm2, %v185_v50, 0.0  ;;  %v8498_v50 = vld [vmem:[%s12264_s5 + $0x18] sm:$0xff] }
 0x166   :  { %v187_v37 = vrot.slane %v186_v46, 4  ;;  %1295 = vperm.xlu1 %7459, %v8498_v50  }
 0x168   :  { %v188_v45 = vadd.f32 %v187_v37, %v186_v46 }
 0x16a   :  { %v189_v2 = vrot.slane %v188_v45, 2 }
 0x16c   :  { %v190_v4 = vadd.f32 %v189_v2, %v188_v45  ;;  %v12529_v45 = vmov 1   ;;  %v12530_v2 = vmov 2  }
 0x16d   :  { %v8474_v21 = vpop.f32.mrf.mxu0 }
 0x16e   :  { %v191_v52 = vrot.slane %v190_v4, 1  ;;  %7461 = vset.pattern.permute.xlu1 %v12529_v45 }
 0x16f   :  { %2509 = vmatmul.bf16.gmra.mxu0 %v6680_v13  ;;  %1322 = vperm.xlu1 %7461, %v8498_v50  }
 0x170   :  { %v8447_v5 = vadd.f32 %v191_v52, %v190_v4 }
 0x172   :  { %12527 = vst [vmem:[#allocation16_spill] sm:$0xff] %v8447_v5  ;;  %v193_v56 = vmul.f32 %v8447_v5, %v8429_v0 }
 0x174   :  { %v194_v7 = vmul.f32 2.0, %v193_v56 }
 0x175   :  { %6697 = vmatmul.msk.bf16.gmra.mxu1 %vm2443_vm6, %v6668_v20  ;;  %v2482_v42 = vpop.f32.mrf.mxu0 }
 0x176   :  { %v8452_v18 = vsub.f32 %v194_v7, %v153_v17 }
 0x177   :  { %7463 = vset.pattern.permute.xlu1 %v12530_v2 }
 0x178   :  { %12528 = vst [vmem:[#allocation17_spill] sm:$0xff] %v8452_v18 }
 0x179   :  { %6544 = vst [vmem:[#allocation5 + $0x3] sm:$0x7] %v8452_v18 }
 0x17f   :  { %2514 = vmatmul.bf16.gmra.mxu0 %v6688_v48 }
 0x185   :  { %6698 = vmatmul.msk.bf16.gmra.mxu1 %vm2443_vm6, %v6676_v35  ;;  %v1275_v35 = vld [vmem:[%s12264_s5 + $0x10] sm:$0xff] }
 0x186   :  { %1349 = vperm.xlu1 %7463, %v1275_v35   ;;  %1290 = vperm.xlu2 %7458, %v1275_v35  }
 0x187   :  { %1318 = vperm.xlu0 %7460, %v1275_v35  }
 0x18e   :  { %7466 = vset.pattern.permute.xlu1 %v12531_v29  ;;  %1300 = vperm.xlu2 %7458, %v1277_v60  }
 0x18f   :  { %1380 = vperm.xlu1 %7466, %v1275_v35   ;;  %7465 = vset.pattern.permute.xlu0 %v12530_v2  ;;  %v7540_v35 = vld [vmem:[%s12275_s16 + $0x70] sm:$0xff] }
 0x190   :  { %1357 = vperm.xlu0 %7465, %v1277_v60  }
 0x195   :  { %6699 = vmatmul.msk.bf16.gmra.mxu1 %vm2443_vm6, %v6684_v58 }
 0x196   :  { %7462 = vset.pattern.permute.xlu2 %v12529_v45 }
 0x197   :  { %1388 = vperm.xlu1 %7466, %v1277_v60   ;;  %1326 = vperm.xlu2 %7462, %v1277_v60   ;;  %v7267_v60 = vld [vmem:[%s12273_s14 + $0x30] sm:$0xff] }
 0x198   :  { %7469 = vset.pattern.permute.xlu0 %v12499_v14 }
 0x19c   :  { %v8479_v25 = vpop.f32.mrf.mxu0 }
 0x19f   :  { %7470 = vset.pattern.permute.xlu1 %v12529_v45  ;;  %7464 = vset.pattern.permute.xlu2 %v12530_v2 }
 0x1a0   :  { %1353 = vperm.xlu2 %7464, %v8498_v50  }
 0x1a4   :  { %v2487_v39 = vpop.f32.mrf.mxu0 }
 0x1a5   :  { %6700 = vmatmul.msk.bf16.gmra.mxu1 %vm2443_vm6, %v6692_v24  ;;  %vm3166_vm6 = vcmask 1040384  }
 0x1a8   :  { %7467 = vset.pattern.permute.xlu2 %v12531_v29 }
 0x1a9   :  { %1384 = vperm.xlu2 %7467, %v8498_v50   ;;  %v8563_v50 = vld [vmem:[%s12275_s16 + $0x78] sm:$0xff] }
 0x1ac   :  { %v8485_v40 = vpop.f32.mrf.mxu0 }
 0x1b1   :  { %7468 = vset.pattern.permute.xlu2 %v12499_v14 }
 0x1b2   :  { %v8477_v32 = vpop.f32.mrf.mxu1 }
 0x1b4   :  { %v2492_v34 = vpop.f32.mrf.mxu0 }
 0x1ba   :  { %v2531_v54 = vpop.f32.mrf.mxu1 }
 0x1bb   :  { %v8481_v8 = vadd.f32 %v2531_v54, %v2482_v42 }
 0x1bc   :  { %v2495_v16 = vpop.f32.mrf.mxu0 }
 0x1c2   :  { %v8483_v12 = vpop.f32.mrf.mxu1 }
 0x1c4   :  { %v2497_v47 = vpop.f32.mrf.mxu0 }
 0x1ca   :  { %v2536_v43 = vpop.f32.mrf.mxu1 }
 0x1cb   :  { %v8487_v31 = vadd.f32 %v2536_v43, %v2487_v39 }
 0x1cc   :  { %v2500_v23 = vpop.f32.mrf.mxu0 }
 0x1d2   :  { %v8489_v57 = vpop.f32.mrf.mxu1 }
 0x1d4   :  { %v2502_v20 = vpop.f32.mrf.mxu0 }
 0x1da   :  { %v2541_v3 = vpop.f32.mrf.mxu1 }
 0x1db   :  { %v8491_v55 = vadd.f32 %v2541_v3, %v2492_v34 }
 0x1dc   :  { %v2505_v26 = vpop.f32.mrf.mxu0 }
 0x1e2   :  { %v2544_v10 = vpop.f32.mrf.mxu1 }
 0x1e4   :  { %v2507_v41 = vpop.f32.mrf.mxu0 }
 0x1ea   :  { %v2546_v61 = vpop.f32.mrf.mxu1 }
 0x1eb   :  { %v8493_v59 = vadd.f32 %v2546_v61, %v2497_v47  ;;  %v2545_v47 = vadd.f32 %v2544_v10, %v2495_v16  ;;  %v1274_v16 = vld [vmem:[%s12264_s5 + $0x8] sm:$0xff]  ;;  %v2535_v10 = vadd.f32 %v8483_v12, %v8479_v25  ;;  %v2530_v25 = vadd.f32 %v8477_v32, %v8474_v21  ;;  %v8552_v32 = vld [vmem:[%s12275_s16 + $0x30] sm:$0xff] }
 0x1ec   :  { %v2510_v17 = vpop.f32.mrf.mxu0  ;;  %1285 = vperm.xlu0 %7469, %v1274_v16   ;;  %v8544_v21 = vld [vmem:[%s12275_s16 + $0x68] sm:$0xff] }
 0x1ed   :  { %v2571_v12 = vmax.f32 %v2535_v10, 0.0 }
 0x1f2   :  { %v2549_v15 = vpop.f32.mrf.mxu1 }
 0x1f3   :  { %v2550_v39 = vadd.f32 %v2549_v15, %v2500_v23  ;;  %v2575_v23 = vmax.f32 %v2545_v47, 0.0  ;;  %v2574_v15 = vmax.f32 %v8491_v55, 0.0  ;;  %v2570_v55 = vmax.f32 %v8481_v8, 0.0  ;;  %v7262_v8 = vld [vmem:[%s12273_s14 + $0x8] sm:$0xff] }
 0x1f4   :  { %v2512_v46 = vpop.f32.mrf.mxu0  ;;  %7474 = vset.pattern.permute.xlu0 %v12531_v29 }
 0x1f5   :  { %v2577_v61 = vmax.f32 %v2550_v39, 0.0 }
 0x1fa   :  { %v2551_v9 = vpop.f32.mrf.mxu1 }
 0x1fb   :  { %v2552_v24 = vadd.f32 %v2551_v9, %v2502_v20  ;;  %v2540_v20 = vadd.f32 %v8489_v57, %v8485_v40  ;;  %v2572_v40 = vmax.f32 %v8487_v31, 0.0 }
 0x1fc   :  { %v2515_v38 = vpop.f32.mrf.mxu0 }
 0x1fd   :  { %v2578_v34 = vmax.f32 %v2552_v24, 0.0 }
 0x202   :  { %v2554_v28 = vpop.f32.mrf.mxu1 }
 0x203   :  { %v2555_v48 = vadd.f32 %v2554_v28, %v2505_v26  ;;  %v2576_v26 = vmax.f32 %v8493_v59, 0.0  ;;  %v2573_v59 = vmax.f32 %v2540_v20, 0.0  ;;  %v1273_v28 = vld [vmem:[%s12264_s5] sm:$0xff] }
 0x204   :  { %v2517_v52 = vpop.f32.mrf.mxu0  ;;  %1310 = vperm.xlu1 %7470, %v1273_v28   ;;  %1372 = vperm.xlu0 %7474, %v1273_v28  }
 0x205   :  { %v2579_v43 = vmax.f32 %v2555_v48, 0.0  ;;  %v2588_v9 = vpack.c.bf16 %v2576_v26, %v2575_v23  ;;  %v2587_v57 = vpack.c.bf16 %v2574_v15, %v2573_v59  ;;  %1280 = vperm.xlu2 %7468, %v1273_v28   ;;  %v2666_v26 = vpop.permute.xlu1 %2665 }
 0x20a   :  { %v2556_v11 = vpop.f32.mrf.mxu1 }
 0x20b   :  { %v2557_v30 = vadd.f32 %v2556_v11, %v2507_v41  ;;  %v2589_v41 = vpack.c.bf16 %v2578_v34, %v2577_v61  ;;  %v2586_v11 = vpack.c.bf16 %v2572_v40, %v2571_v12  ;;  %v2671_v61 = vpop.permute.xlu2 %2670 }
 0x20c   :  { %7472 = vset.pattern.permute.xlu1 %v12530_v2  ;;  %7478 = vset.pattern.permute.xlu0 %v12529_v45 }
 0x20d   :  { %v2580_v42 = vmax.f32 %v2557_v30, 0.0  ;;  %1341 = vperm.xlu1 %7472, %v1273_v28   ;;  %4120 = vperm.xlu0 %7478, %v8544_v21   ;;  %v7547_v30 = vld [vmem:[%s12275_s16 + $0x20] sm:$0xff]  ;;  %v2656_v15 = vpop.permute.xlu1 %2655 }
 0x20e   :  { %7471 = vset.pattern.permute.xlu2 %v12529_v45 }
 0x20f   :  { %v2590_v3 = vpack.c.bf16 %v2580_v42, %v2579_v43  ;;  %1314 = vperm.xlu2 %7471, %v1274_v16  }
 0x212   :  { %v2559_v19 = vpop.f32.mrf.mxu1 }
 0x213   :  { %v2560_v13 = vadd.f32 %v2559_v19, %v2510_v17  ;;  %v2569_v17 = vmax.f32 %v2530_v25, 0.0  ;;  %v7261_v19 = vld [vmem:[%s12273_s14] sm:$0xff]  ;;  %v2661_v20 = vpop.permute.xlu2 %2660 }
 0x215   :  { %v2581_v51 = vmax.f32 %v2560_v13, 0.0  ;;  %v2585_v31 = vpack.c.bf16 %v2570_v55, %v2569_v17  ;;  %7475 = vset.pattern.permute.xlu1 %v12531_v29  ;;  %4092 = vperm.xlu0 %7478, %v8552_v32   ;;  %v7545_v13 = vld [vmem:[%s12275_s16 + $0x8] sm:$0xff]  ;;  %v2651_v59 = vpop.permute.xlu1 %2650 }
 0x216   :  { %1376 = vperm.xlu1 %7475, %v1274_v16  }
 0x217   :  { %7473 = vset.pattern.permute.xlu2 %v12530_v2 }
 0x218   :  { %1345 = vperm.xlu2 %7473, %v1274_v16  }
 0x21a   :  { %v2561_v37 = vpop.f32.mrf.mxu1 }
 0x21b   :  { %v2562_v63 = vadd.f32 %v2561_v37, %v2512_v46  ;;  %v8569_v46 = vld [vmem:[%s12275_s16 + $0x28] sm:$0xff]  ;;  %v8575_v37 = vld [vmem:[%s12275_s16 + $0x50] sm:$0xff]  ;;  %v2636_v16 = vpop.permute.xlu2 %2635 }
 0x21d   :  { %v2582_v58 = vmax.f32 %v2562_v63, 0.0  ;;  %4088 = vperm.xlu0 %7478, %v8569_v46   ;;  %v7543_v63 = vld [vmem:[%s12275_s16 + $0x10] sm:$0xff]  ;;  %v2641_v25 = vpop.permute.xlu1 %2640 }
 0x21e   :  { %7477 = vset.pattern.permute.xlu1 %v12529_v45 }
 0x21f   :  { %v2591_v54 = vpack.c.bf16 %v2582_v58, %v2581_v51  ;;  %4128 = vperm.xlu1 %7477, %v8563_v50   ;;  %v7548_v58 = vld [vmem:[%s12275_s16 + $0x18] sm:$0xff] }
 0x220   :  { %7476 = vset.pattern.permute.xlu2 %v12529_v45  ;;  %v7264_v45 = vld [vmem:[%s12273_s14 + $0x18] sm:$0xff] }
 0x221   :  { %4124 = vperm.xlu2 %7476, %v7540_v35  }
 0x222   :  { %v2564_v27 = vpop.f32.mrf.mxu1 }
 0x223   :  { %v2565_v4 = vadd.f32 %v2564_v27, %v2515_v38  ;;  %v8582_v38 = vld [vmem:[%s12275_s16] sm:$0xff]  ;;  %v7263_v27 = vld [vmem:[%s12273_s14 + $0x10] sm:$0xff] }
 0x225   :  { %v2583_v22 = vmax.f32 %v2565_v4, 0.0  ;;  %4068 = vperm.xlu0 %7478, %v8582_v38   ;;  %v8591_v4 = vld [vmem:[%s12275_s16 + $0x40] sm:$0xff] }
 0x227   :  { %4108 = vperm.xlu1 %7477, %v8575_v37  }
 0x22a   :  { %v2566_v1 = vpop.f32.mrf.mxu1 }
 0x22b   :  { %v2567_v56 = vadd.f32 %v2566_v1, %v2517_v52  ;;  %v7541_v52 = vld [vmem:[%s12275_s16 + $0x38] sm:$0xff]  ;;  %v7542_v1 = vld [vmem:[%s12275_s16 + $0x60] sm:$0xff] }
 0x22c   :  { %4116 = vperm.xlu2 %7476, %v7542_v1  }
 0x22d   :  { %v2584_v7 = vmax.f32 %v2567_v56, 0.0  ;;  %7480 = vset.pattern.permute.xlu0 %v12530_v2  ;;  %v7544_v56 = vld [vmem:[%s12275_s16 + $0x58] sm:$0xff] }
 0x22e   :  { %4684 = vperm.xlu0 %7480, %v8563_v50  }
 0x22f   :  { %v2592_v44 = vpack.c.bf16 %v2584_v7, %v2583_v22  ;;  %4100 = vperm.xlu1 %7477, %v8591_v4   ;;  %v7546_v7 = vld [vmem:[%s12275_s16 + $0x48] sm:$0xff]  ;;  %v7265_v22 = vld [vmem:[%s12273_s14 + $0x20] sm:$0xff] }
 0x231   :  { %2721 = vmatpush.bf16.msra.mxu2 %v2592_v44  ;;  %v7266_v44 = vld [vmem:[%s12273_s14 + $0x28] sm:$0xff] }
 0x234   :  { %4112 = vperm.xlu2 %7476, %v7544_v56  }
 0x235   :  { %2722 = vmatpush.bf16.msra.mxu2 %v2591_v54 }
 0x236   :  { %4656 = vperm.xlu0 %7480, %v8591_v4  }
 0x237   :  { %4096 = vperm.xlu1 %7477, %v7541_v52  }
 0x239   :  { %2723 = vmatpush.bf16.msra.mxu2 %v2590_v3 }
 0x23c   :  { %4104 = vperm.xlu2 %7476, %v7546_v7  }
 0x23d   :  { %2724 = vmatpush.bf16.msra.mxu2 %v2589_v41 }
 0x23e   :  { %4652 = vperm.xlu0 %7480, %v7541_v52  }
 0x23f   :  { %4076 = vperm.xlu1 %7477, %v7543_v63  }
 0x241   :  { %2725 = vmatpush.bf16.msra.mxu2 %v2588_v9  ;;  %v2646_v9 = vpop.permute.xlu0 %2645 }
 0x244   :  { %4084 = vperm.xlu2 %7476, %v7547_v30  }
 0x245   :  { %2726 = vmatpush.bf16.msra.mxu2 %v2587_v57  ;;  %v2626_v57 = vpop.permute.xlu2 %2625 }
 0x246   :  { %4632 = vperm.xlu0 %7480, %v7543_v63  }
 0x247   :  { %4072 = vperm.xlu1 %7477, %v7545_v13  }
 0x249   :  { %2727 = vmatpush.bf16.msra.mxu2 %v2586_v11  ;;  %v2631_v28 = vpop.permute.xlu0 %2630 }
 0x24c   :  { %4080 = vperm.xlu2 %7476, %v7548_v58  }
 0x24d   :  { %2728 = vmatpush.bf16.msra.mxu2 %v2585_v31 }
 0x24e   :  { %4628 = vperm.xlu0 %7480, %v7545_v13  }
 0x24f   :  { %7481 = vset.pattern.permute.xlu1 %v12530_v2 }
 0x250   :  { %2729 = vmatmul.bf16.vlgmr.msra.gmra.mxu2 %v7261_v19  ;;  %4672 = vperm.xlu1 %7481, %v7542_v1   ;;  %v2621_v19 = vpop.permute.xlu2 %2620 }
 0x251   :  { %v2606_v55 = vpop.permute.xlu0 %2605 }
 0x254   :  { %7479 = vset.pattern.permute.xlu2 %v12530_v2  ;;  %v7268_v2 = vld [vmem:[%s12273_s14 + $0x38] sm:$0xff] }
 0x255   :  { %4680 = vperm.xlu2 %7479, %v7540_v35  }
 0x256   :  { %7484 = vset.pattern.permute.xlu0 %v12531_v29 }
 0x257   :  { %5074 = vperm.xlu0 %7484, %v7542_v1  }
 0x258   :  { %4664 = vperm.xlu1 %7481, %v8575_v37  }
 0x25d   :  { %4676 = vperm.xlu2 %7479, %v8544_v21  }
 0x25f   :  { %5062 = vperm.xlu0 %7484, %v7546_v7  }
 0x260   :  { %2734 = vmatmul.bf16.gmra.mxu2 %v7262_v8  ;;  %4660 = vperm.xlu1 %7481, %v7546_v7  }
 0x265   :  { %4668 = vperm.xlu2 %7479, %v7544_v56  }
 0x267   :  { %5042 = vperm.xlu0 %7484, %v7547_v30  }
 0x268   :  { %4640 = vperm.xlu1 %7481, %v7547_v30  }
 0x26d   :  { %4648 = vperm.xlu2 %7479, %v8552_v32  }
 0x26f   :  { %5038 = vperm.xlu0 %7484, %v7548_v58  }
 0x270   :  { %2739 = vmatmul.bf16.gmra.mxu2 %v7263_v27  ;;  %4636 = vperm.xlu1 %7481, %v7548_v58   ;;  %v2616_v27 = vpop.permute.xlu1 %2615 }
 0x275   :  { %4644 = vperm.xlu2 %7479, %v8569_v46  }
 0x277   :  { %7485 = vset.pattern.permute.xlu0 %v12499_v14 }
 0x278   :  { %7482 = vset.pattern.permute.xlu1 %v12531_v29 }
 0x279   :  { %5082 = vperm.xlu1 %7482, %v7540_v35  }
 0x27d   :  { %4624 = vperm.xlu2 %7479, %v8582_v38  }
 0x280   :  { %2744 = vmatmul.bf16.gmra.mxu2 %v7264_v45 }
 0x281   :  { %5078 = vperm.xlu1 %7482, %v8544_v21  }
 0x285   :  { %7483 = vset.pattern.permute.xlu2 %v12531_v29 }
 0x286   :  { %5086 = vperm.xlu2 %7483, %v8563_v50  }
 0x289   :  { %5070 = vperm.xlu1 %7482, %v7544_v56   ;;  %v2601_v56 = vpop.permute.xlu0 %2600 }
 0x28e   :  { %5066 = vperm.xlu2 %7483, %v8575_v37  }
 0x290   :  { %2749 = vmatmul.bf16.gmra.mxu2 %v7265_v22 }
 0x291   :  { %5050 = vperm.xlu1 %7482, %v8552_v32  }
 0x296   :  { %5058 = vperm.xlu2 %7483, %v8591_v4  }
 0x299   :  { %5046 = vperm.xlu1 %7482, %v8569_v46  }
 0x29e   :  { %5054 = vperm.xlu2 %7483, %v7541_v52  }
 0x2a0   :  { %2754 = vmatmul.bf16.gmra.mxu2 %v7266_v44 }
 0x2a1   :  { %5026 = vperm.xlu1 %7482, %v8582_v38   ;;  %v8668_v38 = vmul.f32 %v8452_v18, %v8452_v18 }
 0x2a3   :  { %v8672_v52 = vmul.f32 %v8668_v38, %v8452_v18 }
 0x2a6   :  { %5034 = vperm.xlu2 %7483, %v7543_v63  }
 0x2a9   :  { %7486 = vset.pattern.permute.xlu1 %v12499_v14 }
 0x2ae   :  { %5030 = vperm.xlu2 %7483, %v7545_v13   ;;  %v8676_v13 = vmul.f32 %v8672_v52, %v8452_v18 }
 0x2b0   :  { %2759 = vmatmul.bf16.gmra.mxu2 %v7267_v60  ;;  %v8682_v60 = vmul.f32 %v8676_v13, %v8452_v18 }
 0x2b6   :  { %7487 = vset.pattern.permute.xlu2 %v12499_v14 }
 0x2c0   :  { %2764 = vmatmul.bf16.gmra.mxu2 %v7268_v2  ;;  %v2846_v2 = vmul.f32 0.0, %v8452_v18 }
 0x2d3   :  { %v2730_v48 = vpop.f32.mrf.mxu2 }
 0x2db   :  { %v2732_v51 = vpop.f32.mrf.mxu2 }
 0x2dc   :  { %v8678_v7 = vadd.f32 %v2732_v51, %v2601_v56  ;;  %v8689_v51 = vmul.f32 %v8682_v60, %v8452_v18 }
 0x2e3   :  { %v8660_v29 = vpop.f32.mrf.mxu2 }
 0x2eb   :  { %v8662_v24 = vpop.f32.mrf.mxu2 }
 0x2f3   :  { %v8664_v42 = vpop.f32.mrf.mxu2 }
 0x2fb   :  { %v2742_v54 = vpop.f32.mrf.mxu2 }
 0x303   :  { %v2745_v39 = vpop.f32.mrf.mxu2 }
 0x304   :  { %v2746_v44 = vadd.f32 %v2745_v39, %v2626_v57 }
 0x30b   :  { %v2747_v43 = vpop.f32.mrf.mxu2 }
 0x30c   :  { %v2748_v22 = vadd.f32 %v2747_v43, %v2631_v28  ;;  %v2856_v43 = vrot.slane %v2846_v2, 7 }
 0x30e   :  { %v2777_v39 = vmax.f32 %v2748_v22, 0.0  ;;  %v8701_v28 = vadd.f32 %v2856_v43, %v8452_v18 }
 0x313   :  { %v2750_v34 = vpop.f32.mrf.mxu2 }
 0x314   :  { %v2751_v30 = vadd.f32 %v2750_v34, %v2636_v16  ;;  %v2771_v34 = vmax.f32 %v8678_v7, 0.0  ;;  %v2611_v16 = vpop.permute.xlu1 %2610 }
 0x31b   :  { %v2752_v3 = vpop.f32.mrf.mxu2 }
 0x31c   :  { %v2753_v1 = vadd.f32 %v2752_v3, %v2641_v25  ;;  %v2596_v3 = vpop.permute.xlu2 %2595 }
 0x323   :  { %v2755_v47 = vpop.f32.mrf.mxu2 }
 0x324   :  { %v2756_v4 = vadd.f32 %v2755_v47, %v2646_v9  ;;  %v2779_v47 = vmax.f32 %v2753_v1, 0.0  ;;  %v8695_v9 = vmul.f32 %v8689_v51, %v8452_v18 }
 0x326   :  { %v2780_v58 = vmax.f32 %v2756_v4, 0.0  ;;  %v2968_v57 = vmul.f32 %v8695_v9, %v8452_v18 }
 0x32b   :  { %v2757_v41 = vpop.f32.mrf.mxu2 }
 0x32c   :  { %v2758_v50 = vadd.f32 %v2757_v41, %v2651_v59  ;;  %v2743_v41 = vadd.f32 %v2742_v54, %v2621_v19  ;;  %v8698_v59 = vrot.slane %v8452_v18, 1  ;;  %v2884_v54 = vrot.slane %v8452_v18, 7 }
 0x32e   :  { %v2781_v45 = vmax.f32 %v2758_v50, 0.0  ;;  %v3167_v19 = vsel %vm3166_vm6, 1.0, %v8698_v59 }
 0x333   :  { %v2760_v23 = vpop.f32.mrf.mxu2 }
 0x334   :  { %v2761_v21 = vadd.f32 %v2760_v23, %v2656_v15  ;;  %v2736_v23 = vadd.f32 %v8660_v29, %v2606_v55  ;;  %v2776_v15 = vmax.f32 %v2746_v44, 0.0  ;;  %v2741_v29 = vadd.f32 %v8664_v42, %v2616_v27 }
 0x336   :  { %v2782_v35 = vmax.f32 %v2761_v21, 0.0  ;;  %v2789_v55 = vpack.c.bf16 %v2777_v39, %v2776_v15  ;;  %v2772_v4 = vmax.f32 %v2736_v23, 0.0 }
 0x33b   :  { %v2762_v10 = vpop.f32.mrf.mxu2 }
 0x33c   :  { %v2763_v17 = vadd.f32 %v2762_v10, %v2661_v20  ;;  %v2778_v20 = vmax.f32 %v2751_v30, 0.0  ;;  %v3170_v30 = vsel %vm2348_vm4, %v3167_v19, %v8668_v38  ;;  %v3102_v38 = vrot.slane %v8676_v13, 6 }
 0x33e   :  { %v2783_v46 = vmax.f32 %v2763_v17, 0.0  ;;  %v2790_v10 = vpack.c.bf16 %v2779_v47, %v2778_v20  ;;  %v2888_v17 = vmul.f32 %v2884_v54, %v8701_v28 }
 0x340   :  { %v2792_v63 = vpack.c.bf16 %v2783_v46, %v2782_v35  ;;  %v2774_v46 = vmax.f32 %v2741_v29, 0.0  ;;  %v3096_v35 = vrot.slane %v8672_v52, 7 }
 0x343   :  { %v2765_v40 = vpop.f32.mrf.mxu2 }
 0x344   :  { %v2766_v12 = vadd.f32 %v2765_v40, %v2666_v26  ;;  %v8685_v26 = vadd.f32 %v2730_v48, %v2596_v3  ;;  %v2850_v48 = vrot.slane %v2846_v2, 1  ;;  %v2738_v40 = vadd.f32 %v8662_v24, %v2611_v16 }
 0x345   :  { %v3126_v24 = vrot.slane %v2968_v57, 2  ;;  %v3108_v16 = vrot.slane %v8682_v60, 5 }
 0x346   :  { %v2784_v32 = vmax.f32 %v2766_v12, 0.0  ;;  %v8709_v25 = vsub.f32 %v8452_v18, %v2850_v48  ;;  %v2775_v12 = vmax.f32 %v2743_v41, 0.0  ;;  %v2773_v50 = vmax.f32 %v2738_v40, 0.0 }
 0x347   :  { %v3172_v41 = vsel %vm12341_vm2, %v3170_v30, %v3096_v35 }
 0x348   :  { %v2864_v42 = vmul.f32 %v8709_v25, %v8452_v18  ;;  %v2787_v3 = vpack.c.bf16 %v2773_v50, %v2772_v4  ;;  %v3175_v60 = vsel %vm3174_vm12, %v3172_v41, %v3102_v38  ;;  %v3120_v4 = vrot.slane %v8695_v9, 3 }
 0x34b   :  { %v2767_v11 = vpop.f32.mrf.mxu2 }
 0x34c   :  { %v2768_v31 = vadd.f32 %v2767_v11, %v2671_v61  ;;  %v2791_v61 = vpack.c.bf16 %v2781_v45, %v2780_v58  ;;  %v2866_v11 = vmul.f32 %v8701_v28, %v8452_v18 }
 0x34e   :  { %v2785_v8 = vmax.f32 %v2768_v31, 0.0  ;;  %v2982_v31 = vmul.f32 %v2968_v57, %v8452_v18  ;;  %v2870_v21 = vrot.slane %v2866_v11, 1 }
 0x350   :  { %v2793_v37 = vpack.c.bf16 %v2785_v8, %v2784_v32  ;;  %v2882_v32 = vmul.f32 %v8698_v59, %v8709_v25  ;;  %v2892_v8 = vrot.slane %v2888_v17, 1  ;;  %v3132_v27 = vrot.slane %v2982_v31, 1 }
 0x351   :  { %v8723_v1 = vsub.f32 %v2864_v42, %v2870_v21 }
 0x352   :  { %2799 = vmatpush.bf16.msra.mxu3 %v2793_v37  ;;  %v2996_v37 = vmul.f32 %v2982_v31, %v8452_v18  ;;  %v8725_v45 = vadd.f32 %v2892_v8, %v2882_v32  ;;  %v3186_v22 = vsel %vm3166_vm6, %v3126_v24, %v3132_v27  ;;  %v3178_v8 = vsel %vm12340_vm14, %v3175_v60, %v3108_v16 }
 0x353   :  { %v2900_v44 = vmul.f32 %v8723_v1, %v8452_v18  ;;  %v2906_v2 = vmul.f32 %v8698_v59, %v8723_v1  ;;  %v2885_v60 = vrot.slane %v8429_v0, 7 }
 0x354   :  { %v3010_v56 = vmul.f32 %v2996_v37, %v8452_v18  ;;  %v3188_v58 = vsel %vm2348_vm4, %v3186_v22, %v2996_v37  ;;  %v2902_v52 = vmul.f32 %v8725_v45, %v8698_v59  ;;  %v2908_v43 = vmul.f32 %v8725_v45, %v8452_v18 }
 0x356   :  { %2800 = vmatpush.bf16.msra.mxu3 %v2792_v63  ;;  %v2788_v63 = vpack.c.bf16 %v2775_v12, %v2774_v46  ;;  %v3024_v47 = vmul.f32 %v3010_v56, %v8452_v18  ;;  %v8743_v39 = vsub.f32 %v2900_v44, %v2902_v52  ;;  %v8747_v48 = vadd.f32 %v2908_v43, %v2906_v2  ;;  %v2248_v46 = vld [vmem:[%s12274_s15] sm:$0xf] }
 0x357   :  { %v2770_v12 = vmax.f32 %v8685_v26, 0.0  ;;  %v3114_v26 = vrot.slane %v8689_v51, 4 }
 0x358   :  { %v3038_v20 = vmul.f32 %v3024_v47, %v8452_v18  ;;  %v3144_v23 = vrot.slane %v3024_v47, 6  ;;  %v2920_v13 = vmul.f32 %v8743_v39, %v8698_v59  ;;  %v2916_v57 = vmul.f32 %v8747_v48, %v8698_v59 }
 0x359   :  { %v2786_v42 = vpack.c.bf16 %v2771_v34, %v2770_v12  ;;  %v3181_v35 = vsel %vm12343_vm0, %v3178_v8, %v3114_v26 }
 0x35a   :  { %2801 = vmatpush.bf16.msra.mxu3 %v2791_v61  ;;  %v3138_v61 = vrot.slane %v3010_v56, 7  ;;  %v3052_v54 = vmul.f32 %v3038_v20, %v8452_v18  ;;  %v3150_v40 = vrot.slane %v3038_v20, 5  ;;  %v3184_v52 = vsel %vm3183_vm1, %v3181_v35, %v3120_v4 }
 0x35c   :  { %v3190_v15 = vsel %vm12341_vm2, %v3188_v58, %v3138_v61  ;;  %v3066_v11 = vmul.f32 %v3052_v54, %v8452_v18  ;;  %v3156_v17 = vrot.slane %v3052_v54, 4 }
 0x35d   :  { %v3192_v29 = vsel %vm3174_vm12, %v3190_v15, %v3144_v23  ;;  %v2847_v23 = vmul.f32 0.0, %v8429_v0 }
 0x35e   :  { %2802 = vmatpush.bf16.msra.mxu3 %v2790_v10  ;;  %v2914_v10 = vmul.f32 %v8743_v39, %v8452_v18  ;;  %v3194_v31 = vsel %vm12340_vm14, %v3192_v29, %v3150_v40  ;;  %v3080_v21 = vmul.f32 %v3066_v11, %v8452_v18  ;;  %v3162_v32 = vrot.slane %v3066_v11, 3 }
 0x35f   :  { %v3196_v7 = vsel %vm12343_vm0, %v3194_v31, %v3156_v17  ;;  %v2857_v54 = vrot.slane %v2847_v23, 7 }
 0x360   :  { %v8764_v24 = vsub.f32 %v2914_v10, %v2916_v57  ;;  %v3202_v27 = vrot.slane %v3080_v21, 2  ;;  %v3198_v22 = vsel %vm3183_vm1, %v3196_v7, %v3162_v32  ;;  %v2851_v57 = vrot.slane %v2847_v23, 1  ;;  %v8881_v23 = vld [vmem:[%s12265_s6 + $0x8] sm:$0xff] }
 0x361   :  { %v8830_v12 = vadd.f32 %v2857_v54, %v8429_v0 }
 0x362   :  { %2803 = vmatpush.bf16.msra.mxu3 %v2789_v55  ;;  %v2922_v55 = vmul.f32 %v8747_v48, %v8452_v18  ;;  %v2928_v50 = vmul.f32 %v8764_v24, %v8452_v18  ;;  %v2934_v34 = vmul.f32 %v8764_v24, %v8698_v59  ;;  %v8845_v26 = vsub.f32 %v8429_v0, %v2851_v57 }
 0x363   :  { %v2867_v21 = vmul.f32 %v8830_v12, %v8429_v0 }
 0x364   :  { %v8769_v19 = vadd.f32 %v2922_v55, %v2920_v13  ;;  %v8836_v55 = vld [vmem:[%s12265_s6] sm:$0xff]  ;;  %v2865_v4 = vmul.f32 %v8845_v26, %v8429_v0 }
 0x365   :  { %v2871_v35 = vrot.slane %v2867_v21, 1 }
 0x366   :  { %2804 = vmatpush.bf16.msra.mxu3 %v2788_v63  ;;  %v2930_v51 = vmul.f32 %v8769_v19, %v8698_v59  ;;  %v2936_v37 = vmul.f32 %v8769_v19, %v8452_v18 }
 0x368   :  { %v8787_v63 = vsub.f32 %v2928_v50, %v2930_v51  ;;  %v8789_v56 = vadd.f32 %v2936_v37, %v2934_v34  ;;  %v8852_v50 = vrot.slane %v8429_v0, 1 }
 0x36a   :  { %2805 = vmatpush.bf16.msra.mxu3 %v2787_v3  ;;  %v2942_v30 = vmul.f32 %v8787_v63, %v8452_v18  ;;  %v2944_v58 = vmul.f32 %v8789_v56, %v8698_v59  ;;  %v2948_v9 = vmul.f32 %v8787_v63, %v8698_v59  ;;  %v2950_v44 = vmul.f32 %v8789_v56, %v8452_v18 }
 0x36b   :  { %v3168_v33 = vsel %vm3166_vm6, 1.0, %v8852_v50 }
 0x36c   :  { %v8802_v2 = vsub.f32 %v2942_v30, %v2944_v58  ;;  %v8804_v3 = vadd.f32 %v2950_v44, %v2948_v9  ;;  %v2883_v58 = vmul.f32 %v8852_v50, %v8845_v26  ;;  %v8870_v44 = vsub.f32 %v2865_v4, %v2871_v35 }
 0x36e   :  { %2806 = vmatpush.bf16.msra.mxu3 %v2786_v42  ;;  %v2956_v47 = vmul.f32 %v8802_v2, %v8452_v18  ;;  %v2958_v61 = vmul.f32 %v8804_v3, %v8698_v59  ;;  %v2962_v43 = vmul.f32 %v8802_v2, %v8698_v59  ;;  %v2964_v38 = vmul.f32 %v8804_v3, %v8452_v18 }
 0x36f   :  { %v2907_v57 = vmul.f32 %v8852_v50, %v8870_v44 }
 0x370   :  { %v8814_v41 = vsub.f32 %v2956_v47, %v2958_v61  ;;  %v8816_v20 = vadd.f32 %v2964_v38, %v2962_v43 }
 0x371   :  { %2807 = vmatmul.bf16.vlgmr.msra.gmra.mxu3 %v2248_v46  ;;  %v2889_v46 = vmul.f32 %v2885_v60, %v8830_v12 }
 0x372   :  { %6734 = vmatpush.msk.msrb.mxu3 %vm3166_vm6, %v3202_v27  ;;  %v2970_v15 = vmul.f32 %v8814_v41, %v8452_v18  ;;  %v2972_v16 = vmul.f32 %v8816_v20, %v8698_v59  ;;  %v2976_v10 = vmul.f32 %v8814_v41, %v8698_v59  ;;  %v2978_v13 = vmul.f32 %v8816_v20, %v8452_v18 }
 0x374   :  { %3456 = vmatpush.msrb.mxu3 %v3198_v22  ;;  %v8827_v40 = vsub.f32 %v2970_v15, %v2972_v16  ;;  %v2980_v29 = vadd.f32 %v2978_v13, %v2976_v10  ;;  %v2901_v10 = vmul.f32 %v8870_v44, %v8429_v0 }
 0x376   :  { %3457 = vmatpush.msrb.mxu3 %v3184_v52  ;;  %v2984_v11 = vmul.f32 %v8827_v40, %v8452_v18  ;;  %v2986_v17 = vmul.f32 %v2980_v29, %v8698_v59  ;;  %v2990_v31 = vmul.f32 %v8827_v40, %v8698_v59  ;;  %v2992_v42 = vmul.f32 %v2980_v29, %v8452_v18 }
 0x377   :  { %v2893_v52 = vrot.slane %v2889_v46, 1 }
 0x378   :  { %v8849_v32 = vsub.f32 %v2984_v11, %v2986_v17  ;;  %v2994_v8 = vadd.f32 %v2992_v42, %v2990_v31  ;;  %v3394_v11 = vsel %vm3166_vm6, 0.0, %v8701_v28 }
 0x379   :  { %v8883_v16 = vadd.f32 %v2893_v52, %v2883_v58 }
 0x37a   :  { %v2998_v7 = vmul.f32 %v8849_v32, %v8452_v18  ;;  %v3000_v51 = vmul.f32 %v2994_v8, %v8698_v59  ;;  %v3004_v34 = vmul.f32 %v8849_v32, %v8698_v59  ;;  %v3006_v37 = vmul.f32 %v2994_v8, %v8452_v18 }
 0x37b   :  { %v3354_v27 = vrot.slane %v2994_v8, 7  ;;  %v2903_v17 = vmul.f32 %v8883_v16, %v8852_v50  ;;  %v2909_v31 = vmul.f32 %v8883_v16, %v8429_v0 }
 0x37c   :  { %v8865_v22 = vsub.f32 %v2998_v7, %v3000_v51  ;;  %v3008_v30 = vadd.f32 %v3006_v37, %v3004_v34  ;;  %v3324_v37 = vrot.slane %v8747_v48, 5 }
 0x37d   :  { %v3408_v9 = vsel %vm3166_vm6, %v2980_v29, %v3354_v27  ;;  %v3318_v29 = vrot.slane %v8725_v45, 6  ;;  %v8907_v46 = vsub.f32 %v2901_v10, %v2903_v17  ;;  %v8909_v7 = vadd.f32 %v2909_v31, %v2907_v57 }
 0x37e   :  { %v3012_v47 = vmul.f32 %v8865_v22, %v8452_v18  ;;  %v3014_v61 = vmul.f32 %v3008_v30, %v8698_v59  ;;  %v3018_v43 = vmul.f32 %v8865_v22, %v8698_v59  ;;  %v3020_v38 = vmul.f32 %v3008_v30, %v8452_v18 }
 0x37f   :  { %v3360_v15 = vrot.slane %v3008_v30, 6  ;;  %v3396_v27 = vsel %vm2348_vm4, %v3394_v11, %v3318_v29  ;;  %v2915_v35 = vmul.f32 %v8907_v46, %v8429_v0  ;;  %v2917_v30 = vmul.f32 %v8909_v7, %v8852_v50 }
 0x380   :  { %v8887_v13 = vsub.f32 %v3012_v47, %v3014_v61  ;;  %v3022_v54 = vadd.f32 %v3020_v38, %v3018_v43  ;;  %v2921_v58 = vmul.f32 %v8907_v46, %v8852_v50  ;;  %v8931_v61 = vld [vmem:[%s12265_s6 + $0x10] sm:$0xff]  ;;  %v3330_v29 = vrot.slane %v8769_v19, 4 }
 0x381   :  { %6735 = vmatmul.msk.f32.vlgmr.msrb.gmra.mxu3 %vm3422_vm13, %v8836_v55  ;;  %v3410_v60 = vsel %vm2348_vm4, %v3408_v9, %v3360_v15  ;;  %12532 = vst [vmem:[#allocation18_spill] sm:$0xff] %v8931_v61  ;;  %v8933_v38 = vsub.f32 %v2915_v35, %v2917_v30  ;;  %v2923_v15 = vmul.f32 %v8909_v7, %v8429_v0 }
 0x382   :  { %v3026_v45 = vmul.f32 %v8887_v13, %v8452_v18  ;;  %v3028_v42 = vmul.f32 %v3022_v54, %v8698_v59  ;;  %v3032_v21 = vmul.f32 %v8887_v13, %v8698_v59  ;;  %v3034_v8 = vmul.f32 %v3022_v54, %v8452_v18 }
 0x383   :  { %v3366_v28 = vrot.slane %v3022_v54, 5  ;;  %v3398_v57 = vsel %vm12341_vm2, %v3396_v27, %v3324_v37  ;;  %v8944_v11 = vadd.f32 %v2923_v15, %v2921_v58  ;;  %v2929_v17 = vmul.f32 %v8933_v38, %v8429_v0 }
 0x384   :  { %v8911_v51 = vsub.f32 %v3026_v45, %v3028_v42  ;;  %v3036_v34 = vadd.f32 %v3034_v8, %v3032_v21  ;;  %v2935_v31 = vmul.f32 %v8933_v38, %v8852_v50  ;;  %v3400_v30 = vsel %vm3174_vm12, %v3398_v57, %v3330_v29 }
 0x385   :  { %v3412_v4 = vsel %vm12341_vm2, %v3410_v60, %v3366_v28  ;;  %v2931_v28 = vmul.f32 %v8944_v11, %v8852_v50 }
 0x386   :  { %v3040_v9 = vmul.f32 %v8911_v51, %v8452_v18  ;;  %v3042_v52 = vmul.f32 %v3036_v34, %v8698_v59  ;;  %v3046_v48 = vmul.f32 %v8911_v51, %v8698_v59  ;;  %v3048_v47 = vmul.f32 %v3036_v34, %v8452_v18 }
 0x387   :  { %v3372_v43 = vrot.slane %v3036_v34, 4  ;;  %v2937_v34 = vmul.f32 %v8944_v11, %v8429_v0  ;;  %v8965_v58 = vsub.f32 %v2929_v17, %v2931_v28 }
 0x388   :  { %v8937_v10 = vsub.f32 %v3040_v9, %v3042_v52  ;;  %v3050_v54 = vadd.f32 %v3048_v47, %v3046_v48 }
 0x389   :  { %6736 = vmatmul.msk.f32.gmra.mxu3 %vm3422_vm13, %v8881_v23  ;;  %v3414_v60 = vsel %vm3174_vm12, %v3412_v4, %v3372_v43  ;;  %v3336_v4 = vrot.slane %v8789_v56, 3  ;;  %v8967_v9 = vadd.f32 %v2937_v34, %v2935_v31  ;;  %v8978_v56 = vld [vmem:[%s12265_s6 + $0x18] sm:$0xff]  ;;  %v2949_v57 = vmul.f32 %v8965_v58, %v8852_v50 }
 0x38a   :  { %v3054_v45 = vmul.f32 %v8937_v10, %v8452_v18  ;;  %v3056_v19 = vmul.f32 %v3050_v54, %v8698_v59  ;;  %v3060_v42 = vmul.f32 %v8937_v10, %v8698_v59  ;;  %v3062_v21 = vmul.f32 %v3050_v54, %v8452_v18  ;;  %12533 = vst [vmem:[#allocation19_spill] sm:$0xff] %v8978_v56 }
 0x38b   :  { %v3378_v8 = vrot.slane %v3050_v54, 3  ;;  %v2943_v54 = vmul.f32 %v8965_v58, %v8429_v0  ;;  %v2945_v29 = vmul.f32 %v8967_v9, %v8852_v50  ;;  %v3342_v31 = vrot.slane %v8804_v3, 2 }
 0x38c   :  { %v8960_v37 = vsub.f32 %v3054_v45, %v3056_v19  ;;  %v3064_v27 = vadd.f32 %v3062_v21, %v3060_v42  ;;  %v2951_v45 = vmul.f32 %v8967_v9, %v8429_v0  ;;  %v3402_v42 = vsel %vm12340_vm14, %v3400_v30, %v3336_v4 }
 0x38d   :  { %v3416_v35 = vsel %vm12340_vm14, %v3414_v60, %v3378_v8  ;;  %v8997_v21 = vsub.f32 %v2943_v54, %v2945_v29  ;;  %v2863_v4 = vmul.f32 %v8429_v0, %v8429_v0  ;;  %v9024_v54 = vld [vmem:[%s12265_s6 + $0x20] sm:$0xf] }
 0x38e   :  { %v3068_v52 = vmul.f32 %v8960_v37, %v8452_v18  ;;  %v3070_v48 = vmul.f32 %v3064_v27, %v8698_v59  ;;  %v3074_v47 = vmul.f32 %v8960_v37, %v8698_v59  ;;  %v3076_v43 = vmul.f32 %v3064_v27, %v8452_v18  ;;  %12534 = vst [vmem:[#allocation20_spill] sm:$0xff] %v9024_v54 }
 0x38f   :  { %v3384_v15 = vrot.slane %v3064_v27, 2  ;;  %v9004_v34 = vadd.f32 %v2951_v45, %v2949_v57  ;;  %v3348_v27 = vrot.slane %v8816_v20, 1  ;;  %v2963_v30 = vmul.f32 %v8997_v21, %v8852_v50 }
 0x390   :  { %v8986_v60 = vsub.f32 %v3068_v52, %v3070_v48  ;;  %v8988_v17 = vadd.f32 %v3076_v43, %v3074_v47  ;;  %v3404_v48 = vsel %vm12343_vm0, %v3402_v42, %v3342_v31  ;;  %v3171_v49 = vsel %vm2348_vm4, %v3168_v33, %v2863_v4 }
 0x391   :  { %6737 = vmatmul.msk.f32.gmra.mxu3 %vm3422_vm13, %v8931_v61  ;;  %v3418_v19 = vsel %vm12343_vm0, %v3416_v35, %v3384_v15  ;;  %v2957_v35 = vmul.f32 %v8997_v21, %v8429_v0  ;;  %v2959_v47 = vmul.f32 %v9004_v34, %v8852_v50  ;;  %v2965_v43 = vmul.f32 %v9004_v34, %v8429_v0 }
 0x392   :  { %v3088_v8 = vmul.f32 %v8986_v60, %v8698_v59  ;;  %v3090_v28 = vmul.f32 %v8988_v17, %v8452_v18  ;;  %v3390_v3 = vrot.slane %v8988_v17, 1  ;;  %v2899_v15 = vmul.f32 %v2863_v4, %v8429_v0 }
 0x393   :  { %v9026_v29 = vsub.f32 %v2957_v35, %v2959_v47  ;;  %v9028_v57 = vadd.f32 %v2965_v43, %v2963_v30  ;;  %v3406_v31 = vsel %vm3183_vm1, %v3404_v48, %v3348_v27 }
 0x394   :  { %v3092_v52 = vadd.f32 %v3090_v28, %v3088_v8  ;;  %v3420_v20 = vsel %vm3183_vm1, %v3418_v19, %v3390_v3  ;;  %v2913_v45 = vmul.f32 %v2899_v15, %v8429_v0  ;;  %v9035_v19 = vld [vmem:[%s12266_s7] sm:$0xff] }
 0x395   :  { %v2971_v42 = vmul.f32 %v9026_v29, %v8429_v0  ;;  %v2973_v8 = vmul.f32 %v9028_v57, %v8852_v50  ;;  %v2977_v28 = vmul.f32 %v9026_v29, %v8852_v50  ;;  %v2979_v3 = vmul.f32 %v9028_v57, %v8429_v0 }
 0x396   :  { %6758 = vmatpush.msk.msrb.mxu0 %vm3166_vm6, %v3092_v52  ;;  %v2927_v27 = vmul.f32 %v2913_v45, %v8429_v0 }
 0x397   :  { %v9048_v35 = vsub.f32 %v2971_v42, %v2973_v8  ;;  %v2981_v30 = vadd.f32 %v2979_v3, %v2977_v28  ;;  %v3097_v42 = vrot.slane %v2899_v15, 7  ;;  %v3103_v8 = vrot.slane %v2913_v45, 6  ;;  %v9070_v15 = vld [vmem:[%s12266_s7 + $0x8] sm:$0xff] }
 0x398   :  { %3693 = vmatpush.msrb.mxu0 %v3420_v20  ;;  %v2941_v52 = vmul.f32 %v2927_v27, %v8429_v0  ;;  %v3109_v28 = vrot.slane %v2927_v27, 5  ;;  %12535 = vst [vmem:[#allocation21_spill] sm:$0xff] %v9070_v15 }
 0x399   :  { %6738 = vmatmul.msk.f32.gmra.mxu3 %vm3422_vm13, %v8978_v56  ;;  %v2985_v48 = vmul.f32 %v9048_v35, %v8429_v0  ;;  %v2987_v47 = vmul.f32 %v2981_v30, %v8852_v50  ;;  %v2991_v43 = vmul.f32 %v9048_v35, %v8852_v50  ;;  %v2993_v20 = vmul.f32 %v2981_v30, %v8429_v0 }
 0x39a   :  { %3694 = vmatpush.msrb.mxu0 %v3406_v31  ;;  %v2955_v31 = vmul.f32 %v2941_v52, %v8429_v0  ;;  %v3115_v36 = vrot.slane %v2941_v52, 4  ;;  %v3173_v4 = vsel %vm12341_vm2, %v3171_v49, %v3097_v42 }
 0x39b   :  { %6759 = vmatmul.msk.f32.vlgmr.msrb.gmra.mxu0 %vm3422_vm13, %v9035_v19  ;;  %v9060_v3 = vsub.f32 %v2985_v48, %v2987_v47  ;;  %v2995_v5 = vadd.f32 %v2993_v20, %v2991_v43  ;;  %v3176_v14 = vsel %vm3174_vm12, %v3173_v4, %v3103_v8 }
 0x39c   :  { %v2969_v62 = vmul.f32 %v2955_v31, %v8429_v0  ;;  %v3121_v53 = vrot.slane %v2955_v31, 3  ;;  %v3179_v61 = vsel %vm12340_vm14, %v3176_v14, %v3109_v28 }
 0x39d   :  { %v2999_v45 = vmul.f32 %v9060_v3, %v8429_v0  ;;  %v3001_v27 = vmul.f32 %v2995_v5, %v8852_v50  ;;  %v3005_v52 = vmul.f32 %v9060_v3, %v8852_v50  ;;  %v3007_v48 = vmul.f32 %v2995_v5, %v8429_v0 }
 0x39e   :  { %v2983_v47 = vmul.f32 %v2969_v62, %v8429_v0  ;;  %v3127_v33 = vrot.slane %v2969_v62, 2  ;;  %v3355_v43 = vrot.slane %v2995_v5, 7 }
 0x39f   :  { %v9080_v20 = vsub.f32 %v2999_v45, %v3001_v27  ;;  %v3009_v31 = vadd.f32 %v3007_v48, %v3005_v52  ;;  %v3182_v52 = vsel %vm12343_vm0, %v3179_v61, %v3115_v36  ;;  %v9110_v36 = vld [vmem:[%s12266_s7 + $0x10] sm:$0xff] }
 0x3a0   :  { %v3133_v56 = vrot.slane %v2983_v47, 1  ;;  %v3409_v62 = vsel %vm3166_vm6, %v2981_v30, %v3355_v43  ;;  %12536 = vst [vmem:[#allocation22_spill] sm:$0xff] %v9110_v36 }
 0x3a1   :  { %6739 = vmatmul.msk.f32.gmra.mxu3 %vm3422_vm13, %v9024_v54  ;;  %v2997_v54 = vmul.f32 %v2983_v47, %v8429_v0  ;;  %v3013_v49 = vmul.f32 %v9080_v20, %v8429_v0  ;;  %v3015_v5 = vmul.f32 %v3009_v31, %v8852_v50  ;;  %v3019_v42 = vmul.f32 %v9080_v20, %v8852_v50 }
 0x3a2   :  { %v3021_v8 = vmul.f32 %v3009_v31, %v8429_v0  ;;  %v3187_v27 = vsel %vm3166_vm6, %v3127_v33, %v3133_v56  ;;  %v3361_v48 = vrot.slane %v3009_v31, 6  ;;  %v9102_v47 = vsel %vm3183_vm1, %v3182_v52, %v3121_v53 }
 0x3a3   :  { %6760 = vmatmul.msk.f32.gmra.mxu0 %vm3422_vm13, %v9070_v15  ;;  %v3011_v45 = vmul.f32 %v2997_v54, %v8429_v0  ;;  %v3189_v14 = vsel %vm2348_vm4, %v3187_v27, %v2997_v54  ;;  %v9099_v30 = vsub.f32 %v3013_v49, %v3015_v5  ;;  %v3331_v15 = vrot.slane %v8944_v11, 4 }
 0x3a4   :  { %v3023_v28 = vadd.f32 %v3021_v8, %v3019_v42  ;;  %v3411_v6 = vsel %vm2348_vm4, %v3409_v62, %v3361_v48  ;;  %v3337_v42 = vrot.slane %v8967_v9, 3  ;;  %v3343_v8 = vrot.slane %v9004_v34, 2 }
 0x3a5   :  { %v3025_v4 = vmul.f32 %v3011_v45, %v8429_v0  ;;  %v3139_v43 = vrot.slane %v3011_v45, 7  ;;  %v3027_v61 = vmul.f32 %v9099_v30, %v8429_v0  ;;  %v3033_v53 = vmul.f32 %v9099_v30, %v8852_v50 }
 0x3a6   :  { %v3029_v56 = vmul.f32 %v3023_v28, %v8852_v50  ;;  %v3035_v54 = vmul.f32 %v3023_v28, %v8429_v0  ;;  %v3367_v62 = vrot.slane %v3023_v28, 5 }
 0x3a7   :  { %v3039_v33 = vmul.f32 %v3025_v4, %v8429_v0  ;;  %v3145_v31 = vrot.slane %v3025_v4, 6  ;;  %v3191_v11 = vsel %vm12341_vm2, %v3189_v14, %v3139_v43 }
 0x3a8   :  { %v9120_v49 = vsub.f32 %v3027_v61, %v3029_v56  ;;  %v3037_v5 = vadd.f32 %v3035_v54, %v3033_v53  ;;  %v3413_v48 = vsel %vm12341_vm2, %v3411_v6, %v3367_v62  ;;  %v3349_v6 = vrot.slane %v9028_v57, 1 }
 0x3a9   :  { %v3053_v45 = vmul.f32 %v3039_v33, %v8429_v0  ;;  %v3151_v27 = vrot.slane %v3039_v33, 5  ;;  %v3193_v52 = vsel %vm3174_vm12, %v3191_v11, %v3145_v31  ;;  %v3395_v33 = vsel %vm3166_vm6, 0.0, %v8830_v12 }
 0x3aa   :  { %v3041_v14 = vmul.f32 %v9120_v49, %v8429_v0  ;;  %v3043_v28 = vmul.f32 %v3037_v5, %v8852_v50  ;;  %v3047_v9 = vmul.f32 %v9120_v49, %v8852_v50  ;;  %v3049_v34 = vmul.f32 %v3037_v5, %v8429_v0 }
 0x3ab   :  { %6761 = vmatmul.msk.f32.gmra.mxu0 %vm3422_vm13, %v9110_v36  ;;  %v3067_v4 = vmul.f32 %v3053_v45, %v8429_v0  ;;  %v3157_v43 = vrot.slane %v3053_v45, 4  ;;  %v3195_v61 = vsel %vm12340_vm14, %v3193_v52, %v3151_v27  ;;  %v3373_v56 = vrot.slane %v3037_v5, 4  ;;  %v9148_v45 = vld [vmem:[%s12266_s7 + $0x18] sm:$0xff] }
 0x3ac   :  { %v9137_v53 = vsub.f32 %v3041_v14, %v3043_v28  ;;  %v3051_v54 = vadd.f32 %v3049_v34, %v3047_v9 }
 0x3ad   :  { %v3081_v31 = vmul.f32 %v3067_v4, %v8429_v0  ;;  %v3163_v11 = vrot.slane %v3067_v4, 3  ;;  %v3197_v62 = vsel %vm12343_vm0, %v3195_v61, %v3157_v43  ;;  %v3415_v36 = vsel %vm3174_vm12, %v3413_v48, %v3373_v56 }
 0x3ae   :  { %v3055_v5 = vmul.f32 %v9137_v53, %v8429_v0  ;;  %v3057_v57 = vmul.f32 %v3051_v54, %v8852_v50  ;;  %v3061_v12 = vmul.f32 %v9137_v53, %v8852_v50  ;;  %v3063_v27 = vmul.f32 %v3051_v54, %v8429_v0 }
 0x3af   :  { %v3203_v52 = vrot.slane %v3081_v31, 2  ;;  %v3199_v14 = vsel %vm3183_vm1, %v3197_v62, %v3163_v11  ;;  %v3379_v28 = vrot.slane %v3051_v54, 3  ;;  %v12537_v48 = vrot.slane %v8883_v16, 6 }
 0x3b0   :  { %v3059_v34 = vsub.f32 %v3055_v5, %v3057_v57  ;;  %v3065_v4 = vadd.f32 %v3063_v27, %v3061_v12  ;;  %v12538_v43 = vrot.slane %v8909_v7, 5  ;;  %v3249_v56 = vrot.slane %v9060_v3, 7 }
 0x3b1   :  { %v3397_v9 = vsel %vm2348_vm4, %v3395_v33, %v12537_v48  ;;  %6740 = vmatpush.msk.msra.mxu3 %vm3166_vm6, %v3203_v52  ;;  %v3417_v31 = vsel %vm12340_vm14, %v3415_v36, %v3379_v28  ;;  %v3255_v16 = vrot.slane %v9080_v20, 6  ;;  %v3261_v33 = vrot.slane %v9099_v30, 5 }
 0x3b2   :  { %v3399_v61 = vsel %vm12341_vm2, %v3397_v9, %v12538_v43  ;;  %v3069_v11 = vmul.f32 %v3059_v34, %v8429_v0  ;;  %v3071_v7 = vmul.f32 %v3065_v4, %v8852_v50  ;;  %v3075_v62 = vmul.f32 %v3059_v34, %v8852_v50 }
 0x3b3   :  { %6762 = vmatmul.msk.f32.gmra.mxu0 %vm3422_vm13, %v9148_v45  ;;  %v3401_v54 = vsel %vm3174_vm12, %v3399_v61, %v3331_v15  ;;  %v3077_v3 = vmul.f32 %v3065_v4, %v8429_v0  ;;  %3488 = vmatpush.msra.mxu3 %v3199_v14  ;;  %v3385_v5 = vrot.slane %v3065_v4, 2  ;;  %v3267_v36 = vrot.slane %v9120_v49, 4 }
 0x3b4   :  { %v3403_v57 = vsel %vm12340_vm14, %v3401_v54, %v3337_v42  ;;  %v3273_v15 = vrot.slane %v9137_v53, 3  ;;  %v3073_v12 = vsub.f32 %v3069_v11, %v3071_v7  ;;  %v3279_v27 = vrot.slane %v3059_v34, 2 }
 0x3b5   :  { %v3079_v20 = vadd.f32 %v3077_v3, %v3075_v62  ;;  %v3405_v30 = vsel %vm12343_vm0, %v3403_v57, %v3343_v8  ;;  %3489 = vmatpush.msra.mxu3 %v9102_v47  ;;  %v3419_v52 = vsel %vm12343_vm0, %v3417_v31, %v3385_v5  ;;  %v3303_v14 = vsel %vm3166_vm6, %v9048_v35, %v3249_v56  ;;  %v9194_v47 = vld [vmem:[%s12266_s7 + $0x20] sm:$0xf] }
 0x3b6   :  { %v9182_v28 = vsel %vm3183_vm1, %v3405_v30, %v3349_v6  ;;  %v3207_v42 = vrot.slane %v8845_v26, 7  ;;  %v3089_v49 = vmul.f32 %v3073_v12, %v8852_v50  ;;  %6741 = vmatmul.msk.f32.vlgmr.msra.gmra.mxu3 %vm3422_vm13, %v8836_v55  ;;  %v3083_v8 = vmul.f32 %v3073_v12, %v8429_v0 }
 0x3b7   :  { %v3091_v53 = vmul.f32 %v3079_v20, %v8429_v0  ;;  %v3391_v48 = vrot.slane %v3079_v20, 1  ;;  %v3085_v6 = vmul.f32 %v3079_v20, %v8852_v50  ;;  %v3285_v35 = vrot.slane %v3073_v12, 1 }
 0x3b8   :  { %v3305_v26 = vsel %vm2348_vm4, %v3303_v14, %v3255_v16  ;;  %v3213_v9 = vrot.slane %v8870_v44, 6  ;;  %v3219_v43 = vrot.slane %v8907_v46, 5  ;;  %v3225_v61 = vrot.slane %v8933_v38, 4 }
 0x3b9   :  { %v9200_v34 = vadd.f32 %v3091_v53, %v3089_v49  ;;  %v9203_v4 = vsel %vm3183_vm1, %v3419_v52, %v3391_v48  ;;  %v3307_v55 = vsel %vm12341_vm2, %v3305_v26, %v3261_v33  ;;  %v3087_v0 = vsub.f32 %v3083_v8, %v3085_v6  ;;  %v12539_v49 = vld [vmem:[#allocation18_spill] sm:$0xff]  ;;  %v12540_v53 = vld [vmem:[#allocation21_spill] sm:$0xff]  ;;  %v12543_v6 = vld [vmem:[#allocation20_spill] sm:$0xff] }
 0x3ba   :  { %v3309_v50 = vsel %vm3174_vm12, %v3307_v55, %v3267_v36  ;;  %v3231_v56 = vrot.slane %v8965_v58, 3  ;;  %v3237_v31 = vrot.slane %v8997_v21, 2  ;;  %v3243_v54 = vrot.slane %v9026_v29, 1  ;;  %v12542_v8 = vld [vmem:[#allocation22_spill] sm:$0xff] }
 0x3bb   :  { %6763 = vmatmul.msk.f32.gmra.mxu0 %vm3422_vm13, %v9194_v47  ;;  %6764 = vmatpush.msk.msrb.mxu2 %vm3166_vm6, %v9200_v34  ;;  %v3311_v44 = vsel %vm12340_vm14, %v3309_v50, %v3273_v15  ;;  %v3289_v46 = vsel %vm3166_vm6, 1.0, %v3207_v42  ;;  %v3082_v38 = vmul.f32 %v8986_v60, %v8452_v18  ;;  %v3084_v58 = vmul.f32 %v8988_v17, %v8698_v59 }
 0x3bc   :  { %6752 = vmatpush.msk.msrb.mxu1 %vm3166_vm6, %v3087_v0  ;;  %v3313_v16 = vsel %vm12343_vm0, %v3311_v44, %v3279_v27  ;;  %v3291_v33 = vsel %vm2348_vm4, %v3289_v46, %v3213_v9  ;;  %v3248_v11 = vrot.slane %v8849_v32, 7  ;;  %v3254_v7 = vrot.slane %v8865_v22, 6 }
 0x3bd   :  { %3725 = vmatpush.msrb.mxu2 %v9203_v4  ;;  %v3315_v21 = vsel %vm3183_vm1, %v3313_v16, %v3285_v35  ;;  %v3293_v29 = vsel %vm12341_vm2, %v3291_v33, %v3219_v43  ;;  %v3086_v3 = vsub.f32 %v3082_v38, %v3084_v58  ;;  %v3260_v5 = vrot.slane %v8887_v13, 5  ;;  %v2797_v35 = vpop.permute.xlu1 %2796 }
 0x3be   :  { %3645 = vmatpush.msrb.mxu1 %v3315_v21  ;;  %v3295_v62 = vsel %vm3174_vm12, %v3293_v29, %v3225_v61  ;;  %6742 = vmatmul.msk.f32.gmra.mxu3 %vm3422_vm13, %v8881_v23  ;;  %v3266_v17 = vrot.slane %v8911_v51, 4  ;;  %v3272_v57 = vrot.slane %v8937_v10, 3  ;;  %v3302_v22 = vsel %vm3166_vm6, %v8827_v40, %v3248_v11 }
 0x3bf   :  { %3726 = vmatpush.msrb.mxu2 %v9182_v28  ;;  %v3297_v59 = vsel %vm12340_vm14, %v3295_v62, %v3231_v56  ;;  %6746 = vmatpush.msk.msrb.mxu3 %vm3166_vm6, %v3086_v3  ;;  %v3206_v13 = vrot.slane %v8709_v25, 7  ;;  %v3212_v36 = vrot.slane %v8723_v1, 6  ;;  %v3278_v51 = vrot.slane %v8960_v37, 2 }
 0x3c0   :  { %6765 = vmatmul.msk.f32.vlgmr.msrb.gmra.mxu2 %vm3422_vm13, %v9035_v19  ;;  %v3299_v32 = vsel %vm12343_vm0, %v3297_v59, %v3237_v31  ;;  %v3304_v10 = vsel %vm2348_vm4, %v3302_v22, %v3254_v7  ;;  %v3218_v15 = vrot.slane %v8743_v39, 5  ;;  %v3284_v12 = vrot.slane %v8986_v60, 1 }
 0x3c1   :  { %v3301_v23 = vsel %vm3183_vm1, %v3299_v32, %v3243_v54  ;;  %v3306_v20 = vsel %vm12341_vm2, %v3304_v10, %v3260_v5  ;;  %v3224_v30 = vrot.slane %v8764_v24, 4  ;;  %v3230_v1 = vrot.slane %v8787_v63, 3 }
 0x3c2   :  { %3646 = vmatpush.msrb.mxu1 %v3301_v23  ;;  %v3308_v25 = vsel %vm3174_vm12, %v3306_v20, %v3266_v17  ;;  %v3288_v40 = vsel %vm3166_vm6, 1.0, %v3206_v13  ;;  %v3236_v39 = vrot.slane %v8802_v2, 2  ;;  %v3242_v52 = vrot.slane %v8814_v41, 1  ;;  %v12541_v41 = vld [vmem:[#allocation19_spill] sm:$0xff] }
 0x3c3   :  { %6753 = vmatmul.msk.f32.vlgmr.msrb.gmra.mxu1 %vm3422_vm13, %v9035_v19  ;;  %v3310_v37 = vsel %vm12340_vm14, %v3308_v25, %v3272_v57  ;;  %v3290_v27 = vsel %vm2348_vm4, %v3288_v40, %v3212_v36  ;;  %v12335_v7 = vmov 1.0  }
 0x3c4   :  { %v3312_v60 = vsel %vm12343_vm0, %v3310_v37, %v3278_v51  ;;  %v3292_v24 = vsel %vm12341_vm2, %v3290_v27, %v3218_v15  ;;  %v9319_v62 = vperm.slane %v12335_v7, 3 }
 0x3c5   :  { %v3314_v14 = vsel %vm3183_vm1, %v3312_v60, %v3284_v12  ;;  %v3294_v42 = vsel %vm3174_vm12, %v3292_v24, %v3224_v30 }
 0x3c6   :  { %6743 = vmatmul.msk.f32.gmra.mxu3 %vm3422_vm13, %v12539_v49  ;;  %v3296_v63 = vsel %vm12340_vm14, %v3294_v42, %v3230_v1 }
 0x3c7   :  { %3613 = vmatpush.msrb.mxu3 %v3314_v14  ;;  %v3298_v2 = vsel %vm12343_vm0, %v3296_v63, %v3236_v39 }
 0x3c8   :  { %6766 = vmatmul.msk.f32.gmra.mxu2 %vm3422_vm13, %v12540_v53  ;;  %v3300_v48 = vsel %vm3183_vm1, %v3298_v2, %v3242_v52 }
 0x3c9   :  { %3614 = vmatpush.msrb.mxu3 %v3300_v48 }
 0x3cb   :  { %6754 = vmatmul.msk.f32.gmra.mxu1 %vm3422_vm13, %v12540_v53  ;;  %7397 = vmatpush.msk.msra.mxu3 %vm3166_vm6, %v3087_v0 }
 0x3cd   :  { %7398 = vmatpush.msra.mxu3 %v3315_v21  ;;  %v3524_v21 = vpop.permute.xlu2 %3523 }
 0x3ce   :  { %6744 = vmatmul.msk.f32.gmra.mxu3 %vm3422_vm13, %v12541_v41  ;;  %v3543_v30 = vmul.f32 %v9319_v62, %v3524_v21 }
 0x3cf   :  { %7399 = vmatpush.msra.mxu3 %v3301_v23 }
 0x3d0   :  { %6767 = vmatmul.msk.f32.gmra.mxu2 %vm3422_vm13, %v12542_v8  ;;  %v3558_v52 = vmul.f32 1.442695, %v3543_v30 }
 0x3d3   :  { %6755 = vmatmul.msk.f32.gmra.mxu1 %vm3422_vm13, %v12542_v8 }
 0x3d5   :  { %v3514_v3 = vpop.permute.xlu2 %3513 }
 0x3d6   :  { %6745 = vmatmul.msk.f32.gmra.mxu3 %vm3422_vm13, %v12543_v6  ;;  %v3539_v5 = vmul.f32 %v9319_v62, %v3514_v3 }
 0x3d8   :  { %6768 = vmatmul.msk.f32.gmra.mxu2 %vm3422_vm13, %v9148_v45  ;;  %v3550_v57 = vmul.f32 1.442695, %v3539_v5 }
 0x3de   :  { %6747 = vmatmul.msk.f32.vlgmr.msrb.gmra.mxu3 %vm3422_vm13, %v9035_v19 }
 0x3df   :  { %7400 = vmatpush.msk.msrb.mxu3 %vm3166_vm6, %v9200_v34 }
 0x3e1   :  { %7401 = vmatpush.msrb.mxu3 %v9203_v4 }
 0x3e3   :  { %7402 = vmatpush.msrb.mxu3 %v9182_v28 }
 0x3e6   :  { %6748 = vmatmul.msk.f32.gmra.mxu3 %vm3422_vm13, %v12540_v53 }
 0x3ee   :  { %6749 = vmatmul.msk.f32.gmra.mxu3 %vm3422_vm13, %v12542_v8 }
 0x3f4   :  { %v2808_v26 = vpop.f32.mrf.mxu3 }
 0x3f5   :  { %v2809_v9 = vadd.f32 %v2808_v26, %v2797_v35 }
 0x3f6   :  { %6750 = vmatmul.msk.f32.gmra.mxu3 %vm3422_vm13, %v9148_v45 }
 0x3f7   :  { %v6733_v55 = vmul.f32 -1.442695, %v2809_v9 }
 0x3f9   :  { %7496 = vpow2.f32 %v6733_v55 }
 0x3fc   :  { %v2810_v43 = vpop.f32.mrf.mxu3 }
 0x3fe   :  { %6751 = vmatmul.msk.f32.gmra.mxu3 %vm3422_vm13, %v9194_v47 }
 0x3ff   :  { %v7497_v19 = vpop.eup %7496 }
 0x400   :  { %v2815_v34 = vadd.f32 1.0, %v7497_v19 }
 0x402   :  { %7498 = vrcp.f32 %v2815_v34  ;;  %v2827_v50 = vand.u32 2147483648, %v2815_v34  ;;  %v2825_v56 = vand.u32 2147483647, %v2815_v34  ;;  %vm2821_vm7 = vweird.f32 %v2815_v34 }
 0x403   :  { %7500 = vpow2.f32 %v3550_v57 }
 0x404   :  { %v2828_v31 = vor.u32 1.1754944e-38, %v2827_v50  ;;  %vm2826_vm9 = vcmp.eq.f32.partialorder %v2825_v56, 8.507059e+37  ;;  %v3459_v46 = vpop.f32.mrf.mxu3 }
 0x406   :  { %6756 = vmatmul.msk.f32.vlgmr.msra.gmra.mxu3 %vm3422_vm13, %v9148_v45  ;;  %v3529_v45 = vpop.permute.xlu0 %3528 }
 0x407   :  { %v3545_v49 = vmul.f32 %v9319_v62, %v3529_v45 }
 0x408   :  { %v7499_v4 = vpop.eup %7498 }
 0x409   :  { %v2817_v28 = vmul.f32 %v7499_v4, %v2815_v34  ;;  %vm2822_vm3 = vweird.f32 %v7499_v4  ;;  %v7501_v10 = vpop.eup %7500  ;;  %v3562_v26 = vmul.f32 1.442695, %v3545_v49 }
 0x40a   :  { %vm2823_vm8 = vmor %vm2821_vm7, %vm2822_vm3 }
 0x40b   :  { %v2818_v0 = vsub.f32 1.0, %v2817_v28 }
 0x40c   :  { %v3462_v33 = vpop.f32.mrf.mxu3 }
 0x40d   :  { %v2819_v61 = vmul.f32 %v7499_v4, %v2818_v0 }
 0x40e   :  { %6757 = vmatmul.msk.f32.gmra.mxu3 %vm3422_vm13, %v9194_v47  ;;  %v3519_v59 = vpop.permute.xlu0 %3518 }
 0x40f   :  { %v2820_v44 = vadd.f32 %v7499_v4, %v2819_v61  ;;  %v3541_v32 = vmul.f32 %v9319_v62, %v3519_v59 }
 0x411   :  { %v2824_v54 = vsel %vm2823_vm8, %v7499_v4, %v2820_v44  ;;  %v3554_v23 = vmul.f32 1.442695, %v3541_v32 }
 0x412   :  { %v9302_v16 = vsel %vm2826_vm9, %v2828_v31, %v2824_v54 }
 0x413   :  { %12544 = vst [vmem:[#allocation18_spill] sm:$0xff] %v9302_v16  ;;  %v9316_v11 = vperm.slane %v9302_v16, 3 }
 0x414   :  { %6546 = vst [vmem:[#allocation5 + $0x4] sm:$0x8] %v9302_v16  ;;  %v9309_v38 = vpop.f32.mrf.mxu3 }
 0x415   :  { %v3540_v17 = vmul.f32 %v9316_v11, %v3519_v59  ;;  %v3542_v40 = vmul.f32 %v9316_v11, %v3524_v21  ;;  %v3544_v60 = vmul.f32 %v9316_v11, %v3529_v45 }
 0x416   :  { %6769 = vmatmul.msk.f32.vlgmr.msrb.gmra.mxu3 %vm3422_vm13, %v9194_v47  ;;  %v3538_v47 = vmul.f32 %v9316_v11, %v3514_v3 }
 0x417   :  { %v3552_v36 = vmul.f32 1.442695, %v3540_v17  ;;  %v3556_v63 = vmul.f32 1.442695, %v3542_v40  ;;  %v3560_v48 = vmul.f32 1.442695, %v3544_v60 }
 0x418   :  { %v3548_v22 = vmul.f32 1.442695, %v3538_v47  ;;  %v3696_v51 = vpop.f32.mrf.mxu0 }
 0x41a   :  { %7502 = vpow2.f32 %v3548_v22 }
 0x41b   :  { %7504 = vpow2.f32 %v3552_v36 }
 0x41c   :  { %v9311_v58 = vpop.f32.mrf.mxu3  ;;  %7506 = vpow2.f32 %v3554_v23 }
 0x41d   :  { %7508 = vpow2.f32 %v3558_v52 }
 0x41e   :  { %7510 = vpow2.f32 %v3556_v63 }
 0x41f   :  { %7512 = vpow2.f32 %v3560_v48 }
 0x420   :  { %v7503_v12 = vpop.eup %7502  ;;  %v3699_v27 = vpop.f32.mrf.mxu0  ;;  %7514 = vpow2.f32 %v3562_v26 }
 0x421   :  { %v7505_v1 = vpop.eup %7504  ;;  %v3568_v37 = vmul.f32 %v7503_v12, %v3459_v46 }
 0x422   :  { %v7507_v39 = vpop.eup %7506  ;;  %v9330_v24 = vmul.f32 %v7505_v1, %v3462_v33 }
 0x423   :  { %v3743_v53 = vmul.f32 %v3696_v51, %v3568_v37  ;;  %v7509_v28 = vpop.eup %7508 }
 0x424   :  { %v9313_v29 = vpop.f32.mrf.mxu3  ;;  %v3745_v8 = vmul.f32 %v3699_v27, %v9330_v24  ;;  %v7511_v56 = vpop.eup %7510 }
 0x425   :  { %v7513_v54 = vpop.eup %7512  ;;  %v3572_v46 = vmul.f32 %v7511_v56, %v9309_v38 }
 0x426   :  { %v7515_v33 = vpop.eup %7514  ;;  %v9346_v21 = vmul.f32 %v7513_v54, %v9311_v58 }
 0x428   :  { %v3702_v4 = vpop.f32.mrf.mxu0 }
 0x429   :  { %v3747_v5 = vmul.f32 %v3702_v4, %v3572_v46 }
 0x430   :  { %v3705_v59 = vpop.f32.mrf.mxu0 }
 0x431   :  { %v3749_v57 = vmul.f32 %v3705_v59, %v9346_v21 }
 0x439   :  { %v3491_v13 = vpop.f32.mrf.mxu3 }
 0x43a   :  { %v9326_v25 = vmul.f32 %v7501_v10, %v3491_v13 }
 0x440   :  { %v3648_v13 = vpop.f32.mrf.mxu1 }
 0x441   :  { %v3494_v15 = vpop.f32.mrf.mxu3 }
 0x442   :  { %v9333_v42 = vmul.f32 %v7507_v39, %v3494_v15 }
 0x443   :  { %v3728_v20 = vpop.f32.mrf.mxu2 }
 0x444   :  { %v3744_v14 = vmul.f32 %v3728_v20, %v9326_v25 }
 0x446   :  { %v3758_v6 = vpack.c.bf16 %v3744_v14, %v3743_v53 }
 0x448   :  { %v3793_v55 = vunpack.c.l.b16 %v3758_v6  ;;  %v3794_v43 = vunpack.c.h.b16 %v3758_v6 }
 0x449   :  { %v3497_v2 = vpop.f32.mrf.mxu3 }
 0x44a   :  { %v9342_v31 = vmul.f32 %v7509_v28, %v3497_v2 }
 0x44b   :  { %v3731_v41 = vpop.f32.mrf.mxu2 }
 0x44c   :  { %v3746_v35 = vmul.f32 %v3731_v41, %v9333_v42  ;;  %v3651_v41 = vpop.f32.mrf.mxu1 }
 0x44e   :  { %v3759_v9 = vpack.c.bf16 %v3746_v35, %v3745_v8  ;;  %v3664_v35 = vmul.f32 %v3648_v13, %v9326_v25 }
 0x450   :  { %v3795_v19 = vunpack.c.l.b16 %v3759_v9  ;;  %v3796_v34 = vunpack.c.h.b16 %v3759_v9 }
 0x451   :  { %v3500_v50 = vpop.f32.mrf.mxu3 }
 0x452   :  { %v9338_v0 = vpack.c.b16 %v3795_v19, %v3793_v55  ;;  %v9340_v61 = vpack.c.b16 %v3796_v34, %v3794_v43  ;;  %v9349_v3 = vmul.f32 %v7515_v33, %v3500_v50  ;;  %v3666_v55 = vmul.f32 %v3651_v41, %v9333_v42 }
 0x453   :  { %v3734_v44 = vpop.f32.mrf.mxu2 }
 0x454   :  { %v3748_v45 = vmul.f32 %v3734_v44, %v9342_v31  ;;  %v4430_v36 = vshrl.u32 %v9338_v0, 16  ;;  %v4433_v58 = vshll.u32 %v9338_v0, 16  ;;  %v3809_v1 = vrot.slane %v9338_v0, 6 }
 0x455   :  { %v3810_v39 = vrot.slane %v9340_v61, 6  ;;  %v12550_v61 = vmov 0 }
 0x456   :  { %v3760_v32 = vpack.c.bf16 %v3748_v45, %v3747_v5  ;;  %v4432_v27 = vrot.slane %v4430_v36, 4  ;;  %v4435_v60 = vrot.slane %v4433_v58, 5  ;;  %v3534_v45 = vpop.permute.xlu1 %3533  ;;  %v12551_v61 = vsel %vm9420_vm11, 4294967295, %v12550_v61 }
 0x457   :  { %v3547_v5 = vmul.f32 %v9319_v62, %v3534_v45  ;;  %v3546_v59 = vmul.f32 %v9316_v11, %v3534_v45  ;;  %12552 = vst [vmem:[#allocation24_spill] sm:$0xff] %v12551_v61  ;;  %v12565_v61 = vmov 0  }
 0x458   :  { %v3797_v23 = vunpack.c.l.b16 %v3760_v32  ;;  %v3798_v51 = vunpack.c.h.b16 %v3760_v32  ;;  %v9383_v6 = vor.u32 %v4435_v60, %v4432_v27 }
 0x459   :  { %v9351_v47 = vpop.f32.mrf.mxu3 }
 0x45a   :  { %12545 = vst [vmem:[#allocation21_spill] sm:$0xff] %v9383_v6 }
 0x45b   :  { %v3737_v17 = vpop.f32.mrf.mxu2 }
 0x45c   :  { %v3750_v22 = vmul.f32 %v3737_v17, %v9349_v3  ;;  %v3566_v17 = vmul.f32 1.442695, %v3547_v5 }
 0x45e   :  { %v3761_v38 = vpack.c.bf16 %v3750_v22, %v3749_v57  ;;  %v3564_v57 = vmul.f32 1.442695, %v3546_v59  ;;  %7516 = vpow2.f32 %v3566_v17 }
 0x460   :  { %v3799_v10 = vunpack.c.l.b16 %v3761_v38  ;;  %v3800_v15 = vunpack.c.h.b16 %v3761_v38  ;;  %7518 = vpow2.f32 %v3564_v57 }
 0x461   :  { %v3616_v30 = vpop.f32.mrf.mxu3 }
 0x462   :  { %v9357_v12 = vpack.c.b16 %v3799_v10, %v3797_v23  ;;  %v9359_v20 = vpack.c.b16 %v3800_v15, %v3798_v51  ;;  %v3663_v40 = vmul.f32 %v3616_v30, %v3568_v37 }
 0x464   :  { %v3811_v52 = vrot.slane %v9357_v12, 6  ;;  %v3813_v14 = vrot.slane %v9359_v20, 6  ;;  %v4438_v49 = vshrl.u32 %v9357_v12, 16  ;;  %v4441_v63 = vshll.u32 %v9357_v12, 16  ;;  %v7517_v51 = vpop.eup %7516  ;;  %v7309_v12 = vld [vmem:[%s12270_s11] sm:$0xff]  ;;  %v230_v20 = vpop.permute.xlu2 %229 }
 0x465   :  { %v3753_v43 = vpack.c.bf16 %v3664_v35, %v3663_v40 }
 0x466   :  { %v9372_v53 = vsel %vm2348_vm4, %v3809_v1, %v3811_v52  ;;  %v9379_v37 = vsel %vm2348_vm4, %v3810_v39, %v3813_v14  ;;  %v4440_v2 = vrot.slane %v4438_v49, 4  ;;  %v4443_v48 = vrot.slane %v4441_v63, 5  ;;  %v7519_v30 = vpop.eup %7518 }
 0x467   :  { %v3768_v4 = vunpack.c.l.b16 %v3753_v43  ;;  %v3769_v28 = vunpack.c.h.b16 %v3753_v43  ;;  %v3576_v40 = vmul.f32 %v7519_v30, %v9313_v29 }
 0x468   :  { %v9381_v8 = vor.u32 %v4443_v48, %v4440_v2 }
 0x469   :  { %v3619_v26 = vpop.f32.mrf.mxu3 }
 0x46a   :  { %v9389_v9 = vsel %vm4428_vm10, %v9383_v6, %v9381_v8  ;;  %v3665_v19 = vmul.f32 %v3619_v26, %v9330_v24  ;;  %v3654_v24 = vpop.f32.mrf.mxu1 }
 0x46b   :  { %12546 = vst [vmem:[#allocation19_spill] sm:$0xff] %v9389_v9  ;;  %v3668_v22 = vmul.f32 %v3654_v24, %v9342_v31 }
 0x46c   :  { %v3754_v34 = vpack.c.bf16 %v3666_v55, %v3665_v19 }
 0x46e   :  { %v3770_v50 = vunpack.c.l.b16 %v3754_v34  ;;  %v3771_v56 = vunpack.c.h.b16 %v3754_v34 }
 0x470   :  { %v9393_v44 = vpack.c.b16 %v3770_v50, %v3768_v4  ;;  %v9395_v54 = vpack.c.b16 %v3771_v56, %v3769_v28 }
 0x471   :  { %v3622_v25 = vpop.f32.mrf.mxu3 }
 0x472   :  { %12547 = vst [vmem:[#allocation22_spill] sm:$0xff] %v9393_v44  ;;  %v3667_v32 = vmul.f32 %v3622_v25, %v3572_v46  ;;  %v3577_v46 = vmul.f32 %v7517_v51, %v9351_v47 }
 0x474   :  { %v3755_v38 = vpack.c.bf16 %v3668_v22, %v3667_v32  ;;  %v12337_v32 = vmov 65535  }
 0x475   :  { %v3915_v0 = vsel %vm3174_vm12, 4294967295, %v12337_v32 }
 0x476   :  { %v3772_v62 = vunpack.c.l.b16 %v3755_v38  ;;  %v3773_v10 = vunpack.c.h.b16 %v3755_v38 }
 0x479   :  { %v3625_v33 = vpop.f32.mrf.mxu3 }
 0x47a   :  { %v3669_v36 = vmul.f32 %v3625_v33, %v9346_v21 }
 0x481   :  { %v3628_v42 = vpop.f32.mrf.mxu3 }
 0x482   :  { %v3671_v49 = vmul.f32 %v3628_v42, %v3576_v40 }
 0x489   :  { %v3657_v13 = vpop.f32.mrf.mxu3 }
 0x48a   :  { %v3670_v58 = vmul.f32 %v3657_v13, %v9349_v3  ;;  %v3708_v3 = vpop.f32.mrf.mxu0 }
 0x48b   :  { %v3751_v43 = vmul.f32 %v3708_v3, %v3576_v40 }
 0x48c   :  { %v3756_v23 = vpack.c.bf16 %v3670_v58, %v3669_v36  ;;  %v3916_v58 = vsel %vm12340_vm14, %v3915_v0, 0 }
 0x48e   :  { %v3774_v11 = vunpack.c.l.b16 %v3756_v23  ;;  %v3775_v15 = vunpack.c.h.b16 %v3756_v23 }
 0x490   :  { %v3780_v27 = vpack.c.b16 %v3774_v11, %v3772_v62  ;;  %v3781_v31 = vpack.c.b16 %v3775_v15, %v3773_v10 }
 0x491   :  { %v3660_v60 = vpop.f32.mrf.mxu3 }
 0x492   :  { %v3672_v63 = vmul.f32 %v3660_v60, %v3577_v46  ;;  %v4409_v21 = vshrl.u32 %v3780_v27, 16  ;;  %v4412_v48 = vshll.u32 %v3780_v27, 16 }
 0x494   :  { %v3757_v2 = vpack.c.bf16 %v3672_v63, %v3671_v49  ;;  %v4411_v34 = vrot.slane %v4409_v21, 6  ;;  %v4414_v4 = vrot.slane %v4412_v48, 7  ;;  %v12555_v63 = vld [vmem:[#allocation8_spill] sm:$0xff]  ;;  %v12556_v21 = vld [vmem:[#allocation10_spill] sm:$0xff] }
 0x496   :  { %v3776_v41 = vunpack.c.l.b16 %v3757_v2  ;;  %v3777_v35 = vunpack.c.h.b16 %v3757_v2  ;;  %v9410_v42 = vor.u32 %v4414_v4, %v4411_v34 }
 0x498   :  { %v3782_v26 = vpack.c.b16 %v3776_v41, %v3776_v41  ;;  %v3783_v55 = vpack.c.b16 %v3777_v35, %v3777_v35  ;;  %12548 = vst [vmem:[#allocation20_spill] sm:$0xff] %v9410_v42 }
 0x499   :  { %v3740_v19 = vpop.f32.mrf.mxu3 }
 0x49a   :  { %v4417_v29 = vshrl.u32 %v3782_v26, 16  ;;  %v4420_v28 = vshll.u32 %v3782_v26, 16  ;;  %v3752_v47 = vmul.f32 %v3740_v19, %v3577_v46  ;;  %v3823_v50 = vsel %vm2348_vm4, %v3782_v26, %v3809_v1 }
 0x49b   :  { %v3827_v56 = vsel %vm2348_vm4, %v3783_v55, %v3810_v39 }
 0x49c   :  { %v4419_v25 = vrot.slane %v4417_v29, 6  ;;  %v4422_v33 = vrot.slane %v4420_v28, 7  ;;  %v3762_v45 = vpack.c.bf16 %v3752_v47, %v3751_v43  ;;  %v7312_v28 = vld [vmem:[%s12270_s11 + $0x18] sm:$0xff] }
 0x49e   :  { %v3801_v5 = vunpack.c.l.b16 %v3762_v45  ;;  %v3802_v59 = vunpack.c.h.b16 %v3762_v45  ;;  %v4423_v17 = vor.u32 %v4422_v33, %v4419_v25 }
 0x4a0   :  { %v3807_v57 = vpack.c.b16 %v3801_v5, %v3801_v5  ;;  %v3808_v24 = vpack.c.b16 %v3802_v59, %v3802_v59  ;;  %v9416_v1 = vsel %vm12342_vm15, %v9410_v42, %v4423_v17 }
 0x4a1   :  { %12549 = vst [vmem:[#allocation23_spill] sm:$0xff] %v9416_v1 }
 0x4a2   :  { %v3815_v22 = vrot.slane %v3807_v57, 6  ;;  %v3817_v13 = vrot.slane %v3808_v24, 6  ;;  %v4447_v38 = vshrl.u32 %v3807_v57, 16  ;;  %v4450_v36 = vshll.u32 %v3807_v57, 16 }
 0x4a4   :  { %v4449_v23 = vrot.slane %v4447_v38, 4  ;;  %v4452_v51 = vrot.slane %v4450_v36, 5  ;;  %v3816_v62 = vsel %vm2348_vm4, %v3811_v52, %v3815_v22  ;;  %v3818_v10 = vsel %vm2348_vm4, %v3813_v14, %v3817_v13  ;;  %v7310_v52 = vld [vmem:[%s12270_s11 + $0x8] sm:$0xff]  ;;  %v225_v14 = vpop.permute.xlu1 %224 }
 0x4a5   :  { %v3831_v11 = vsel %vm3174_vm12, %v3816_v62, 1065369472  ;;  %v3833_v15 = vsel %vm3174_vm12, %v3818_v10, 1065369472  ;;  %vm3890_vm4 = vcmask 596992  }
 0x4a6   :  { %v3917_v30 = vand.u32 %v3916_v58, %v3831_v11  ;;  %v3919_v40 = vand.u32 %v3916_v58, %v3833_v15  ;;  %v4453_v46 = vor.u32 %v4452_v51, %v4449_v23  ;;  %v7313_v23 = vld [vmem:[%s12270_s11 + $0x20] sm:$0xff] }
 0x4a8   :  { %3924 = vmatpush.bf16.msra.mxu3 %v3917_v30  ;;  %3973 = vmatpush.bf16.msra.mxu1 %v3919_v40  ;;  %v9439_v60 = vsel %vm4428_vm10, %v9381_v8, %v4453_v46  ;;  %v257_v8 = vpop.permute.xlu0 %256 }
 0x4a9   :  { %12553 = vst [vmem:[#allocation25_spill] sm:$0xff] %v9439_v60  ;;  %v268_v2 = vmul.f32 %v12555_v63, %v257_v8 }
 0x4ac   :  { %3925 = vmatpush.bf16.msra.mxu3 %v9372_v53  ;;  %3974 = vmatpush.bf16.msra.mxu1 %v9379_v37  ;;  %v294_v53 = vpop.permute.xlu2 %293  ;;  %v261_v37 = vpop.permute.xlu1 %260 }
 0x4ad   :  { %v305_v48 = vmul.f32 %v12556_v21, %v294_v53  ;;  %v269_v19 = vmul.f32 %v12555_v63, %v261_v37 }
 0x4b0   :  { %3926 = vmatpush.bf16.msra.mxu3 %v3823_v50  ;;  %3975 = vmatpush.bf16.msra.mxu1 %v3827_v56  ;;  %v253_v55 = vpop.permute.xlu0 %252 }
 0x4b1   :  { %v267_v25 = vmul.f32 %v12555_v63, %v253_v55 }
 0x4b4   :  { %3927 = vmatpush.bf16.msra.mxu3 %v3780_v27  ;;  %3976 = vmatpush.bf16.msra.mxu1 %v3781_v31  ;;  %v220_v27 = vpop.permute.xlu2 %219  ;;  %v12554_v31 = vld [vmem:[#allocation9_spill] sm:$0xff]  ;;  %v298_v41 = vpop.permute.xlu1 %297 }
 0x4b5   :  { %v237_v49 = vmul.f32 %v12554_v31, %v225_v14  ;;  %v238_v43 = vmul.f32 %v12554_v31, %v230_v20  ;;  %v306_v29 = vmul.f32 %v12556_v21, %v298_v41  ;;  %v236_v56 = vmul.f32 %v12554_v31, %v220_v27  ;;  %v7314_v31 = vld [vmem:[%s12270_s11 + $0x28] sm:$0xff] }
 0x4b6   :  { %v12557_v20 = vmov 920167782   ;;  %v12558_v14 = vmov 1326507024  }
 0x4b7   :  { %v274_v3 = vadd.f32 %v268_v2, %v237_v49  ;;  %v275_v4 = vadd.f32 %v269_v19, %v238_v43  ;;  %v273_v17 = vadd.f32 %v267_v25, %v236_v56  ;;  %v12559_v49 = vmov 2475754826  }
 0x4b8   :  { %3928 = vmatpush.bf16.msra.mxu3 %v9393_v44  ;;  %3977 = vmatpush.bf16.msra.mxu1 %v9395_v54  ;;  %v7311_v54 = vld [vmem:[%s12270_s11 + $0x10] sm:$0xff]  ;;  %v335_v5 = vpop.permute.xlu0 %334  ;;  %v12560_v2 = vmov 2102212464  }
 0x4b9   :  { %v311_v35 = vadd.f32 %v305_v48, %v274_v3  ;;  %v312_v33 = vadd.f32 %v306_v29, %v275_v4  ;;  %v12561_v3 = vmov 2131351028   ;;  %v12562_v4 = vmov 683565275  }
 0x4bb   :  { %6802 = vmatmul.msk.bf16.vlgmr.msra.gmra.mxu3 %vm3890_vm4, %v7309_v12  ;;  %6810 = vmatmul.msk.bf16.vlgmr.msra.gmra.mxu1 %vm3890_vm4, %v7309_v12  ;;  %v9477_v57 = vadd.f32 %v335_v5, %v312_v33 }
 0x4bc   :  { %v331_v26 = vpop.permute.xlu2 %330  ;;  %v290_v50 = vpop.permute.xlu1 %289 }
 0x4bd   :  { %v9465_v34 = vadd.f32 %v331_v26, %v311_v35  ;;  %v304_v59 = vmul.f32 %v12556_v21, %v290_v50  ;;  %v1121_v13 = vand.u32 2139095040, %v9477_v57 }
 0x4bf   :  { %v966_v47 = vand.u32 2139095040, %v9465_v34  ;;  %v310_v0 = vadd.f32 %v304_v59, %v273_v17  ;;  %v1122_v58 = vshrl.u32 %v1121_v13, 23  ;;  %v12344_v12 = vand.u32 2147483647, %v9465_v34 }
 0x4c1   :  { %v967_v45 = vshrl.u32 %v966_v47, 23  ;;  %v6579_v10 = vadd.s32 4294967169, %v1122_v58  ;;  %v970_v27 = vand.u32 8388607, %v12344_v12 }
 0x4c3   :  { %v6576_v24 = vadd.s32 4294967169, %v967_v45  ;;  %v1128_v30 = vadd.s32 1, %v6579_v10  ;;  %v971_v19 = vor.u32 8388608, %v970_v27 }
 0x4c4   :  { %v327_v22 = vpop.permute.xlu1 %326 }
 0x4c5   :  { %v973_v38 = vadd.s32 1, %v6576_v24  ;;  %v9480_v36 = vadd.f32 %v327_v22, %v310_v0  ;;  %vm1129_vm12 = vcmp.gt.s32.totalorder %v1128_v30, 0  ;;  %v9528_v59 = vshll.u32 %v971_v19, 8  ;;  %v7315_v19 = vld [vmem:[%s12270_s11 + $0x30] sm:$0xff] }
 0x4c6   :  { %v1130_v8 = vsel %vm1129_vm12, %v1128_v30, 0 }
 0x4c7   :  { %vm974_vm6 = vcmp.gt.s32.totalorder %v973_v38, 0  ;;  %v811_v51 = vand.u32 2139095040, %v9480_v36  ;;  %v1132_v55 = vand.u32 31, %v1130_v8  ;;  %v12338_v24 = vand.u32 2147483647, %v9480_v36 }
 0x4c8   :  { %v975_v62 = vsel %vm974_vm6, %v973_v38, 0 }
 0x4c9   :  { %v977_v11 = vand.u32 31, %v975_v62  ;;  %v812_v15 = vshrl.u32 %v811_v51, 23  ;;  %v9520_v33 = vsub.s32 32, %v1132_v55  ;;  %v1144_v38 = vshll.u32 %v12560_v2, %v1132_v55 }
 0x4ca   :  { %v9544_v51 = vshrl.u32 %v1130_v8, 5  ;;  %v1135_v30 = vshll.u32 %v12562_v4, %v1132_v55 }
 0x4cb   :  { %6803 = vmatmul.msk.bf16.gmra.mxu3 %vm3890_vm4, %v7310_v52  ;;  %6811 = vmatmul.msk.bf16.gmra.mxu1 %vm3890_vm4, %v7310_v52  ;;  %v9488_v40 = vsub.s32 32, %v977_v11  ;;  %v6573_v46 = vadd.s32 4294967169, %v812_v15  ;;  %v992_v52 = vshll.u32 %v12557_v20, %v977_v11  ;;  %v983_v63 = vshll.u32 %v12559_v49, %v977_v11 }
 0x4cc   :  { %v989_v21 = vshll.u32 %v12560_v2, %v977_v11  ;;  %v986_v35 = vshll.u32 %v12561_v3, %v977_v11  ;;  %v980_v29 = vshll.u32 %v12562_v4, %v977_v11  ;;  %v1145_v58 = vshrl.u32 %v12557_v20, %v9520_v33 }
 0x4cd   :  { %v993_v53 = vshrl.u32 %v12558_v14, %v9488_v40  ;;  %v818_v37 = vadd.s32 1, %v6573_v46  ;;  %v990_v48 = vshrl.u32 %v12557_v20, %v9488_v40  ;;  %v984_v41 = vshrl.u32 %v12561_v3, %v9488_v40 }
 0x4ce   :  { %v987_v26 = vshrl.u32 %v12560_v2, %v9488_v40  ;;  %v1148_v10 = vshrl.u32 %v12558_v14, %v9520_v33  ;;  %v1138_v46 = vshll.u32 %v12559_v49, %v1132_v55  ;;  %v1142_v8 = vshrl.u32 %v12560_v2, %v9520_v33 }
 0x4cf   :  { %v994_v43 = vor.u32 %v993_v53, %v992_v52  ;;  %vm819_vm1 = vcmp.gt.s32.totalorder %v818_v37, 0  ;;  %v991_v47 = vor.u32 %v990_v48, %v989_v21  ;;  %v9516_v50 = vor.u32 %v984_v41, %v983_v63 }
 0x4d0   :  { %v9518_v56 = vor.u32 %v987_v26, %v986_v35  ;;  %v820_v25 = vsel %vm819_vm1, %v818_v37, 0  ;;  %v1136_v52 = vshrl.u32 %v12559_v49, %v9520_v33  ;;  %v1139_v53 = vshrl.u32 %v12561_v3, %v9520_v33 }
 0x4d1   :  { %v822_v0 = vand.u32 31, %v820_v25  ;;  %v1141_v37 = vshll.u32 %v12561_v3, %v1132_v55  ;;  %v1146_v63 = vor.u32 %v1145_v58, %v1144_v38  ;;  %vm1153_vm9 = vcmp.lt.s32.totalorder %v9544_v51, 4 }
 0x4d2   :  { %v1012_v35 = vand.u32 65535, %v9528_v59  ;;  %v9581_v26 = vand.u32 8388607, %v12338_v24  ;;  %vm1150_vm10 = vcmp.lt.s32.totalorder %v9544_v51, 1  ;;  %vm1152_vm6 = vcmp.lt.s32.totalorder %v9544_v51, 3 }
 0x4d3   :  { %vm1151_vm12 = vcmp.lt.s32.totalorder %v9544_v51, 2 }
 0x4d4   :  { %v816_v32 = vor.u32 8388608, %v9581_v26 }
 0x4d6   :  { %v9705_v1 = vshll.u32 %v816_v32, 8 }
 0x4db   :  { %6804 = vmatmul.msk.bf16.gmra.mxu3 %vm3890_vm4, %v7311_v54  ;;  %6812 = vmatmul.msk.bf16.gmra.mxu1 %vm3890_vm4, %v7311_v54  ;;  %v9496_v54 = vshrl.u32 %v975_v62, 5  ;;  %v1147_v62 = vshll.u32 %v12557_v20, %v1132_v55  ;;  %v9583_v55 = vshrl.u32 %v820_v25, 5  ;;  %v1159_v25 = vsel %vm1153_vm9, %v1146_v63, 920167782 }
 0x4dd   :  { %vm998_vm13 = vcmp.lt.s32.totalorder %v9496_v54, 4  ;;  %vm995_vm3 = vcmp.lt.s32.totalorder %v9496_v54, 1  ;;  %vm997_vm7 = vcmp.lt.s32.totalorder %v9496_v54, 3  ;;  %vm996_vm8 = vcmp.lt.s32.totalorder %v9496_v54, 2 }
 0x4de   :  { %v1008_v45 = vsel %vm998_vm13, %v994_v43, 1326507024  ;;  %v1004_v17 = vsel %vm998_vm13, %v991_v47, 920167782  ;;  %v1007_v22 = vsel %vm995_vm3, %v9516_v50, %v9518_v56  ;;  %v1149_v41 = vor.u32 %v1148_v10, %v1147_v62 }
 0x4df   :  { %v1009_v13 = vsel %vm997_vm7, %v991_v47, %v1008_v45  ;;  %v1005_v15 = vsel %vm997_vm7, %v9518_v56, %v1004_v17  ;;  %v825_v43 = vshll.u32 %v12562_v4, %v822_v0  ;;  %v9592_v47 = vor.u32 %v1139_v53, %v1138_v46 }
 0x4e0   :  { %v9567_v27 = vsel %vm996_vm8, %v1007_v22, %v1009_v13  ;;  %v9594_v45 = vor.u32 %v1142_v8, %v1141_v37  ;;  %v828_v13 = vshll.u32 %v12559_v49, %v822_v0  ;;  %v1163_v58 = vsel %vm1153_vm9, %v1149_v41, 1326507024 }
 0x4e1   :  { %v834_v10 = vshll.u32 %v12560_v2, %v822_v0  ;;  %v831_v41 = vshll.u32 %v12561_v3, %v822_v0  ;;  %v1014_v7 = vand.u32 65535, %v9567_v27  ;;  %vm12351_vm1 = vcmp.lt.s32.totalorder %v9583_v55, 4 }
 0x4e2   :  { %v1162_v8 = vsel %vm1150_vm10, %v9592_v47, %v9594_v45  ;;  %vm840_vm14 = vcmp.lt.s32.totalorder %v9583_v55, 1  ;;  %vm12358_vm2 = vcmp.lt.s32.totalorder %v9583_v55, 3  ;;  %vm12355_vm0 = vcmp.lt.s32.totalorder %v9583_v55, 2 }
 0x4eb   :  { %6805 = vmatmul.msk.bf16.gmra.mxu3 %vm3890_vm4, %v7312_v28  ;;  %6813 = vmatmul.msk.bf16.gmra.mxu1 %vm3890_vm4, %v7312_v28  ;;  %v981_v28 = vshrl.u32 %v12559_v49, %v9488_v40 }
 0x4ed   :  { %v9526_v5 = vor.u32 %v981_v28, %v980_v29  ;;  %v12345_v29 = vshrl.u32 %v9567_v27, 16  ;;  %v9590_v28 = vor.u32 %v1136_v52, %v1135_v30  ;;  %v1160_v52 = vsel %vm1152_vm6, %v9594_v45, %v1159_v25 }
 0x4ef   :  { %v1003_v11 = vsel %vm995_vm3, %v9526_v5, %v9516_v50  ;;  %v1158_v46 = vsel %vm1150_vm10, %v9590_v28, %v9592_v47 }
 0x4f0   :  { %v9573_v21 = vsel %vm996_vm8, %v1003_v11, %v1005_v15  ;;  %v837_v15 = vshll.u32 %v12557_v20, %v822_v0  ;;  %v9643_v24 = vsel %vm1151_vm12, %v1158_v46, %v1160_v52 }
 0x4f1   :  { %v1037_v17 = vshrl.u32 %v9573_v21, 16  ;;  %v1036_v62 = vand.u32 65535, %v9573_v21  ;;  %v1164_v21 = vsel %vm1152_vm6, %v1146_v63, %v1163_v58  ;;  %v9647_v63 = vmul.u32 %v12345_v29, %v1012_v35 }
 0x4f3   :  { %v9623_v53 = vmul.u32 %v1037_v17, %v1012_v35 }
 0x4fb   :  { %6806 = vmatmul.msk.bf16.gmra.mxu3 %vm3890_vm4, %v7313_v23  ;;  %6814 = vmatmul.msk.bf16.gmra.mxu1 %vm3890_vm4, %v7313_v23  ;;  %v12339_v23 = vand.u32 2147483647, %v9477_v57 }
 0x4fd   :  { %v1125_v48 = vand.u32 8388607, %v12339_v23  ;;  %v1042_v23 = vshll.u32 %v9623_v53, 16 }
 0x4ff   :  { %v1126_v38 = vor.u32 8388608, %v1125_v48  ;;  %v1013_v48 = vshrl.u32 %v9528_v59, 16 }
 0x501   :  { %v9637_v25 = vshll.u32 %v1126_v38, 8  ;;  %v1038_v38 = vmul.u32 %v1036_v62, %v1012_v35 }
 0x503   :  { %v1167_v46 = vand.u32 65535, %v9637_v25  ;;  %vm9675_vm15 = vc.u32 %v1038_v38, %v1042_v23 }
 0x50b   :  { %6807 = vmatmul.msk.bf16.gmra.mxu3 %vm3890_vm4, %v7314_v31  ;;  %6815 = vmatmul.msk.bf16.gmra.mxu1 %vm3890_vm4, %v7314_v31  ;;  %v9569_v31 = vsub.s32 32, %v822_v0  ;;  %v9652_v0 = vsel %vm1151_vm12, %v1162_v8, %v1164_v21  ;;  %v1041_v21 = vmul.u32 %v1037_v17, %v1013_v48 }
 0x50c   :  { %v1170_v8 = vshrl.u32 %v9652_v0, 16  ;;  %v1169_v29 = vand.u32 65535, %v9652_v0 }
 0x50d   :  { %v826_v22 = vshrl.u32 %v12559_v49, %v9569_v31  ;;  %v835_v11 = vshrl.u32 %v12557_v20, %v9569_v31  ;;  %v838_v30 = vshrl.u32 %v12558_v14, %v9569_v31  ;;  %v829_v37 = vshrl.u32 %v12561_v3, %v9569_v31 }
 0x50e   :  { %v9698_v16 = vmul.u32 %v1170_v8, %v1167_v46 }
 0x50f   :  { %v836_v39 = vor.u32 %v835_v11, %v834_v10  ;;  %v839_v58 = vor.u32 %v838_v30, %v837_v15  ;;  %v9655_v26 = vor.u32 %v826_v22, %v825_v43  ;;  %v9657_v10 = vor.u32 %v829_v37, %v828_v13 }
 0x510   :  { %v1192_v15 = vshrl.u32 %v9643_v24, 16  ;;  %v1016_v30 = vmul.u32 %v1014_v7, %v1012_v35  ;;  %v9668_v43 = vmul.u32 %v1014_v7, %v1013_v48  ;;  %v1020_v22 = vshll.u32 %v9647_v63, 16 }
 0x511   :  { %v849_v52 = vsel %vm12351_vm1, %v836_v39, 920167782  ;;  %v9671_v13 = vmul.u32 %v1036_v62, %v1013_v48  ;;  %v853_v37 = vsel %vm12351_vm1, %v839_v58, 1326507024  ;;  %v848_v7 = vsel %vm840_vm14, %v9655_v26, %v9657_v10 }
 0x512   :  { %v1168_v62 = vshrl.u32 %v9637_v25, 16  ;;  %v9689_v17 = vmul.u32 %v1192_v15, %v1167_v46  ;;  %v854_v12 = vsel %vm12358_vm2, %v836_v39, %v853_v37  ;;  %v1026_v42 = vadd.s32 %v1020_v22, %v1016_v30 }
 0x513   :  { %vm1024_vm1 = vc.u32 %v1016_v30, %v1020_v22  ;;  %v1047_v39 = vsel %vm9675_vm15, 1, %v12565_v61  ;;  %v9710_v37 = vadd.s32 %v1042_v23, %v1038_v38  ;;  %v12566_v30 = vshrl.u32 %v9567_v27, 16 }
 0x514   :  { %v1197_v32 = vshll.u32 %v9689_v17, 16  ;;  %v9725_v6 = vmul.u32 %v1169_v29, %v1168_v62  ;;  %v1175_v23 = vshll.u32 %v9698_v16, 16  ;;  %v1174_v3 = vmul.u32 %v1170_v8, %v1168_v62 }
 0x515   :  { %v1019_v22 = vmul.u32 %v12566_v30, %v1013_v48  ;;  %v1049_v48 = vadd.s32 %v1047_v39, %v1041_v21  ;;  %v979_v8 = vshrl.u32 %v12562_v4, %v9488_v40  ;;  %v1045_v40 = vshrl.u32 %v9671_v13, 16 }
 0x51b   :  { %6808 = vmatmul.msk.bf16.gmra.mxu3 %vm3890_vm4, %v7315_v19  ;;  %6816 = vmatmul.msk.bf16.gmra.mxu1 %vm3890_vm4, %v7315_v19  ;;  %v832_v19 = vshrl.u32 %v12560_v2, %v9569_v31 }
 0x51d   :  { %v9659_v11 = vor.u32 %v832_v19, %v831_v41  ;;  %v1191_v19 = vand.u32 65535, %v9643_v24  ;;  %v1022_v24 = vshll.u32 %v9668_v43, 16  ;;  %v1171_v41 = vmul.u32 %v1169_v29, %v1167_v46 }
 0x51e   :  { %v12569_v29 = vshll.u32 %v9671_v13, 16 }
 0x51f   :  { %v850_v35 = vsel %vm12358_vm2, %v9659_v11, %v849_v52  ;;  %v852_v58 = vsel %vm840_vm14, %v9657_v10, %v9659_v11  ;;  %v7316_v52 = vld [vmem:[%s12270_s11 + $0x38] sm:$0xff]  ;;  %v1193_v44 = vmul.u32 %v1191_v19, %v1167_v46  ;;  %v9720_v60 = vmul.u32 %v1191_v19, %v1168_v62 }
 0x520   :  { %v9714_v0 = vsel %vm12355_vm0, %v848_v7, %v850_v35  ;;  %v9718_v9 = vsel %vm12355_vm0, %v852_v58, %v854_v12  ;;  %v1025_v12 = vsel %vm1024_vm1, 1, %v12565_v61  ;;  %vm9731_vm15 = vc.u32 %v1026_v42, %v1022_v24 }
 0x521   :  { %v857_v7 = vand.u32 65535, %v9705_v1  ;;  %v882_v27 = vshrl.u32 %v9714_v0, 16  ;;  %vm1050_vm0 = vc.u32 %v9710_v37, %v12569_v29  ;;  %v860_v46 = vshrl.u32 %v9718_v9, 16 }
 0x522   :  { %v881_v35 = vand.u32 65535, %v9714_v0  ;;  %v858_v19 = vshrl.u32 %v9705_v1, 16  ;;  %v9744_v58 = vadd.s32 %v1197_v32, %v1193_v44  ;;  %v1177_v24 = vshll.u32 %v9725_v6, 16 }
 0x523   :  { %vm1179_vm1 = vc.u32 %v1171_v41, %v1175_v23  ;;  %v1181_v21 = vadd.s32 %v1175_v23, %v1171_v41  ;;  %v1051_v39 = vsel %vm1050_vm0, 1, %v12565_v61  ;;  %v9749_v30 = vmul.u32 %v882_v27, %v857_v7 }
 0x524   :  { %v1196_v29 = vmul.u32 %v1192_v15, %v1168_v62  ;;  %v1043_v0 = vshrl.u32 %v9623_v53, 16  ;;  %v9752_v2 = vmul.u32 %v860_v46, %v857_v7  ;;  %v12570_v41 = vshll.u32 %v9720_v60, 16 }
 0x525   :  { %v1053_v23 = vadd.s32 %v1051_v39, %v1049_v48  ;;  %v9764_v53 = vmul.u32 %v881_v35, %v858_v19  ;;  %vm1183_vm2 = vc.u32 %v1181_v21, %v1177_v24  ;;  %v883_v62 = vmul.u32 %v881_v35, %v857_v7 }
 0x526   :  { %vm1205_vm0 = vc.u32 %v9744_v58, %v12570_v41  ;;  %v865_v49 = vshll.u32 %v9752_v2, 16  ;;  %v1000_v48 = vsel %vm998_vm13, %v9518_v56, 2102212464  ;;  %v1021_v39 = vshrl.u32 %v9647_v63, 16 }
 0x527   :  { %v1206_v20 = vsel %vm1205_vm0, 1, %v12565_v61  ;;  %v1184_v21 = vsel %vm1183_vm2, 1, %v12565_v61  ;;  %v1054_v35 = vadd.s32 %v1053_v23, %v1043_v0  ;;  %v1198_v56 = vshrl.u32 %v9689_v17, 16 }
 0x528   :  { %v1023_v41 = vshrl.u32 %v9668_v43, 16  ;;  %v1001_v17 = vsel %vm997_vm7, %v9516_v50, %v1000_v48  ;;  %v1178_v50 = vshrl.u32 %v9725_v6, 16 }
 0x52b   :  { %6809 = vmatmul.msk.bf16.gmra.mxu3 %vm3890_vm4, %v7316_v52  ;;  %6817 = vmatmul.msk.bf16.gmra.mxu1 %vm3890_vm4, %v7316_v52  ;;  %vm1201_vm4 = vc.u32 %v1193_v44, %v1197_v32  ;;  %v859_v52 = vand.u32 65535, %v9718_v9  ;;  %v1027_v44 = vadd.s32 %v1025_v12, %v1019_v22  ;;  %v1029_v9 = vsel %vm9731_vm15, 1, %v12565_v61 }
 0x52c   :  { %v1202_v42 = vsel %vm1201_vm4, 1, %v12565_v61  ;;  %v1180_v32 = vsel %vm1179_vm1, 1, %v12565_v61  ;;  %v887_v22 = vshll.u32 %v9749_v30, 16 }
 0x52d   :  { %v9762_v15 = vmul.u32 %v859_v52, %v858_v19  ;;  %v1204_v12 = vadd.s32 %v1202_v42, %v1196_v29  ;;  %v861_v38 = vmul.u32 %v859_v52, %v857_v7  ;;  %v1182_v14 = vadd.s32 %v1180_v32, %v1174_v3 }
 0x52e   :  { %v1031_v24 = vadd.s32 %v1029_v9, %v1027_v44  ;;  %vm9779_vm15 = vc.u32 %v883_v62, %v887_v22  ;;  %v9783_v52 = vadd.s32 %v887_v22, %v883_v62  ;;  %v1176_v9 = vshrl.u32 %v9698_v16, 16 }
 0x52f   :  { %v867_v42 = vshll.u32 %v9762_v15, 16  ;;  %v1208_v29 = vadd.s32 %v1206_v20, %v1204_v12  ;;  %vm869_vm13 = vc.u32 %v861_v38, %v865_v49  ;;  %v871_v44 = vadd.s32 %v865_v49, %v861_v38 }
 0x530   :  { %v1186_v0 = vadd.s32 %v1184_v21, %v1182_v14  ;;  %v999_v32 = vsel %vm995_vm3, %v979_v8, %v9526_v5  ;;  %v1032_v23 = vadd.s32 %v1031_v24, %v1021_v39  ;;  %v886_v7 = vmul.u32 %v882_v27, %v858_v19 }
 0x531   :  { %v1055_v20 = vadd.s32 %v1054_v35, %v1045_v40  ;;  %v864_v62 = vmul.u32 %v860_v46, %v858_v19  ;;  %v892_v49 = vsel %vm9779_vm15, 1, %v12565_v61  ;;  %v870_v16 = vsel %vm869_vm13, 1, %v12565_v61 }
 0x532   :  { %v12573_v14 = vshll.u32 %v9764_v53, 16  ;;  %v1200_v5 = vshrl.u32 %v9720_v60, 16  ;;  %v1209_v43 = vadd.s32 %v1208_v29, %v1198_v56  ;;  %vm873_vm3 = vc.u32 %v871_v44, %v867_v42 }
 0x533   :  { %v1134_v27 = vshrl.u32 %v12562_v4, %v9520_v33  ;;  %v1187_v46 = vadd.s32 %v1186_v0, %v1176_v9  ;;  %v9807_v19 = vadd.s32 %v1032_v23, %v1023_v41  ;;  %v12574_v8 = vshll.u32 %v9671_v13, 16 }
 0x534   :  { %vm895_vm2 = vc.u32 %v9783_v52, %v12573_v14  ;;  %v894_v12 = vadd.s32 %v892_v49, %v886_v7  ;;  %v1155_v38 = vsel %vm1153_vm9, %v9594_v45, 2102212464  ;;  %v872_v39 = vadd.s32 %v870_v16, %v864_v62 }
 0x535   :  { %v9812_v22 = vadd.s32 %v9710_v37, %v12574_v8  ;;  %v896_v33 = vsel %vm895_vm2, 1, %v12565_v61  ;;  %v1002_v6 = vsel %vm996_vm8, %v999_v32, %v1001_v17  ;;  %v1059_v24 = vadd.s32 1, %v1055_v20 }
 0x536   :  { %v874_v21 = vsel %vm873_vm3, 1, %v12565_v61  ;;  %v1210_v13 = vadd.s32 %v1209_v43, %v1200_v5  ;;  %v1154_v37 = vsel %vm1150_vm10, %v1134_v27, %v9590_v28  ;;  %v1156_v45 = vsel %vm1152_vm6, %v9592_v47, %v1155_v38 }
 0x537   :  { %v9831_v35 = vadd.s32 %v1187_v46, %v1178_v50  ;;  %v12576_v42 = vshll.u32 %v9720_v60, 16  ;;  %vm1058_vm7 = vc.u32 %v9807_v19, %v9812_v22  ;;  %v888_v7 = vshrl.u32 %v9749_v30, 16 }
 0x538   :  { %v9786_v63 = vpop.f32.mrf.mxu1  ;;  %v898_v3 = vadd.s32 %v896_v33, %v894_v12  ;;  %v866_v56 = vshrl.u32 %v9752_v2, 16  ;;  %v876_v28 = vadd.s32 %v874_v21, %v872_v39  ;;  %v1056_v29 = vmul.u32 %v9528_v59, %v1002_v6 }
 0x539   :  { %v9836_v54 = vadd.s32 %v9744_v58, %v12576_v42  ;;  %v1157_v47 = vsel %vm1151_vm12, %v1154_v37, %v1156_v45  ;;  %v1214_v44 = vadd.s32 1, %v1210_v13  ;;  %v1060_v9 = vsel %vm1058_vm7, %v1059_v24, %v1055_v20 }
 0x53a   :  { %v824_v60 = vshrl.u32 %v12562_v4, %v9569_v31  ;;  %v890_v58 = vshrl.u32 %v9764_v53, 16  ;;  %v899_v30 = vadd.s32 %v898_v3, %v888_v7  ;;  %v868_v2 = vshrl.u32 %v9762_v15, 16 }
 0x53b   :  { %vm1213_vm8 = vc.u32 %v9831_v35, %v9836_v54  ;;  %v877_v32 = vadd.s32 %v876_v28, %v866_v56  ;;  %v1211_v59 = vmul.u32 %v9637_v25, %v1157_v47  ;;  %v1061_v51 = vadd.s32 %v1060_v9, %v1056_v29 }
 0x53c   :  { %vm12578_vm9 = vcmp.lt.s32.totalorder %v9583_v55, 4  ;;  %v1215_v23 = vsel %vm1213_vm8, %v1214_v44, %v1210_v13  ;;  %v844_v31 = vsel %vm840_vm14, %v824_v60, %v9655_v26  ;;  %v900_v20 = vadd.s32 %v899_v30, %v890_v58 }
 0x53d   :  { %v845_v41 = vsel %vm12578_vm9, %v9659_v11, 2102212464  ;;  %vm12579_vm10 = vcmp.lt.s32.totalorder %v9583_v55, 3  ;;  %v9865_v62 = vadd.s32 %v877_v32, %v868_v2  ;;  %v12580_v25 = vmov %v12573_v14 }
 0x53e   :  { %v9817_v48 = vpop.f32.mrf.mxu3  ;;  %v846_v15 = vsel %vm12579_vm10, %v9657_v10, %v845_v41  ;;  %v9870_v49 = vadd.s32 %v9783_v52, %v12580_v25  ;;  %v1216_v11 = vadd.s32 %v1215_v23, %v1211_v59  ;;  %v1062_v16 = vadd.s32 536870912, %v1061_v51 }
 0x53f   :  { %12575 = vst [vmem:[#allocation9_spill] sm:$0xff] %v9817_v48  ;;  %vm12581_vm6 = vcmp.lt.s32.totalorder %v9583_v55, 2  ;;  %v904_v5 = vadd.s32 1, %v900_v20  ;;  %vm965_vm2 = vcmp.lt.s32.totalorder %v9465_v34, 0  ;;  %vm1120_vm7 = vcmp.lt.s32.totalorder %v9477_v57, 0 }
 0x540   :  { %v9823_v40 = vpop.f32.mrf.mxu1  ;;  %v847_v14 = vsel %vm12581_vm6, %v844_v31, %v846_v15  ;;  %vm903_vm14 = vc.u32 %v9865_v62, %v9870_v49  ;;  %v1217_v26 = vadd.s32 536870912, %v1216_v11  ;;  %v9878_v10 = vshrl.u32 %v1062_v16, 30 }
 0x541   :  { %v901_v53 = vmul.u32 %v9705_v1, %v847_v14  ;;  %v905_v52 = vsel %vm903_vm14, %v904_v5, %v900_v20  ;;  %v1057_v20 = vadd.s32 %v9812_v22, %v9807_v19  ;;  %v1212_v16 = vadd.s32 %v9836_v54, %v9831_v35 }
 0x542   :  { %v9883_v50 = vshrl.u32 %v1217_v26, 30  ;;  %v1064_v46 = vshll.u32 %v9878_v10, 30  ;;  %vm810_vm9 = vcmp.lt.s32.totalorder %v9480_v36, 0 }
 0x543   :  { %v906_v55 = vadd.s32 %v905_v52, %v901_v53 }
 0x544   :  { %v1219_v12 = vshll.u32 %v9883_v50, 30  ;;  %v1065_v38 = vsub.s32 %v1061_v51, %v1064_v46 }
 0x545   :  { %v907_v33 = vadd.s32 536870912, %v906_v55 }
 0x546   :  { %v9850_v0 = vpop.f32.mrf.mxu3  ;;  %v1220_v6 = vsub.s32 %v1216_v11, %v1219_v12  ;;  %v1067_v24 = vsub.s32 0, %v1065_v38  ;;  %vm1066_vm12 = vcmp.lt.s32.totalorder %v1065_v38, 0 }
 0x547   :  { %12577 = vst [vmem:[#allocation8_spill] sm:$0xff] %v9850_v0  ;;  %v9891_v21 = vshrl.u32 %v907_v33, 30 }
 0x548   :  { %v9857_v17 = vpop.f32.mrf.mxu1  ;;  %v1222_v13 = vsub.s32 0, %v1220_v6  ;;  %v1068_v37 = vsel %vm1066_vm12, %v1067_v24, %v1065_v38  ;;  %vm1221_vm4 = vcmp.lt.s32.totalorder %v1220_v6, 0 }
 0x549   :  { %v909_v42 = vshll.u32 %v9891_v21, 30  ;;  %v1069_v7 = vclz %v1068_v37 }
 0x54a   :  { %v1223_v3 = vsel %vm1221_vm4, %v1222_v13, %v1220_v6 }
 0x54b   :  { %v910_v56 = vsub.s32 %v906_v55, %v909_v42  ;;  %v1224_v28 = vclz %v1223_v3  ;;  %v6577_v47 = vadd.s32 4294967294, %v1069_v7  ;;  %v9916_v42 = vpop.permute.xlu2 %1290 }
 0x54d   :  { %v912_v9 = vsub.s32 0, %v910_v56  ;;  %vm911_vm1 = vcmp.lt.s32.totalorder %v910_v56, 0  ;;  %v6580_v60 = vadd.s32 4294967294, %v1224_v28  ;;  %vm6578_vm0 = vcmp.lt.s32.totalorder %v6577_v47, 0 }
 0x54e   :  { %v9874_v43 = vpop.f32.mrf.mxu3  ;;  %v1072_v30 = vsel %vm6578_vm0, 0, %v6577_v47  ;;  %vm1106_vm0 = vweird.f32 %v9465_v34 }
 0x54f   :  { %12582 = vst [vmem:[#allocation10_spill] sm:$0xff] %v9874_v43  ;;  %v913_v58 = vsel %vm911_vm1, %v912_v9, %v910_v56  ;;  %vm6581_vm15 = vcmp.lt.s32.totalorder %v6580_v60, 0  ;;  %v1077_v51 = vsub.s32 4294967266, %v1072_v30  ;;  %v1073_v15 = vsub.s32 32, %v1072_v30 }
 0x550   :  { %v9880_v27 = vpop.f32.mrf.mxu1  ;;  %v914_v32 = vclz %v913_v58  ;;  %v1227_v41 = vsel %vm6581_vm15, 0, %v6580_v60  ;;  %v1074_v53 = vshll.u32 %v1065_v38, %v1072_v30  ;;  %v902_v38 = vadd.s32 %v9870_v49, %v9865_v62 }
 0x551   :  { %v1232_v31 = vsub.s32 4294967266, %v1227_v41  ;;  %v1078_v25 = vadd.s32 127, %v1077_v51  ;;  %v1228_v14 = vsub.s32 32, %v1227_v41  ;;  %v1075_v52 = vshrl.u32 %v1057_v20, %v1073_v15 }
 0x552   :  { %v6574_v23 = vadd.s32 4294967294, %v914_v32  ;;  %v1229_v12 = vshll.u32 %v1220_v6, %v1227_v41 }
 0x553   :  { %v1233_v5 = vadd.s32 127, %v1232_v31  ;;  %v1079_v46 = vshll.u32 %v1078_v25, 23  ;;  %v1230_v33 = vshrl.u32 %v1212_v16, %v1228_v14  ;;  %v1076_v19 = vor.u32 %v1075_v52, %v1074_v53  ;;  %v9926_v15 = vpop.permute.xlu2 %1300 }
 0x554   :  { %vm6575_vm13 = vcmp.lt.s32.totalorder %v6574_v23, 0  ;;  %12583 = vst [vmem:[#allocation26_spill] sm:$0xff] %v9926_v15  ;;  %v12584_v16 = vand.u32 2147483647, %v9465_v34 }
 0x555   :  { %v917_v55 = vsel %vm6575_vm13, 0, %v6574_v23  ;;  %v1234_v24 = vshll.u32 %v1233_v5, 23  ;;  %v1080_v22 = vor.u32 4788187, %v1079_v46  ;;  %v1231_v7 = vor.u32 %v1230_v33, %v1229_v12 }
 0x556   :  { %v9886_v8 = vpop.f32.mrf.mxu3  ;;  %v922_v13 = vsub.s32 4294967266, %v917_v55  ;;  %v1083_v28 = vcvt.s32.f32 %v1076_v19  ;;  %v918_v47 = vsub.s32 32, %v917_v55  ;;  %v919_v30 = vshll.u32 %v910_v56, %v917_v55  ;;  %v1296_v19 = vpop.permute.xlu1 %1295 }
 0x557   :  { %v1235_v35 = vor.u32 4788187, %v1234_v24  ;;  %v1081_v3 = vand.u32 2147483647, %v1080_v22  ;;  %v1238_v60 = vcvt.s32.f32 %v1231_v7  ;;  %vm9931_vm3 = vcmp.le.f32.partialorder %v12584_v16, 0.7853982 }
 0x558   :  { %v9889_v39 = vpop.f32.mrf.mxu1  ;;  %v923_v6 = vadd.s32 127, %v922_v13  ;;  %v920_v32 = vshrl.u32 %v902_v38, %v918_v47  ;;  %v12587_v55 = vand.u32 2147483647, %v9477_v57 }
 0x559   :  { %v1236_v9 = vand.u32 2147483647, %v1235_v35  ;;  %v1084_v58 = vmul.f32 %v1083_v28, %v1081_v3 }
 0x55a   :  { %v924_v51 = vshll.u32 %v923_v6, 23  ;;  %v921_v25 = vor.u32 %v920_v32, %v919_v30  ;;  %vm9947_vm8 = vcmp.le.f32.partialorder %v12587_v55, 0.7853982  ;;  %v9980_v32 = vperm.slane %v8452_v18, 0 }
 0x55b   :  { %v1239_v23 = vmul.f32 %v1238_v60, %v1236_v9  ;;  %v1085_v20 = vxor.u32 2147483648, %v1084_v58  ;;  %v9962_v35 = vpop.permute.xlu2 %1326  ;;  %v12591_v9 = vand.u32 2147483647, %v9480_v36 }
 0x55c   :  { %v925_v62 = vor.u32 4788187, %v924_v51  ;;  %v928_v53 = vcvt.s32.f32 %v921_v25  ;;  %12590 = vst [vmem:[#allocation27_spill] sm:$0xff] %v9962_v35  ;;  %v9983_v51 = vperm.slane %v8452_v18, 1  ;;  %v1307_v25 = vmul.f32 %v9980_v32, %v1296_v19 }
 0x55d   :  { %v1240_v49 = vxor.u32 2147483648, %v1239_v23  ;;  %v1086_v56 = vsel %vm965_vm2, %v1085_v20, %v1084_v58  ;;  %vm9973_vm10 = vcmp.le.f32.partialorder %v12591_v9, 0.7853982  ;;  %12594 = vst [vmem:[#allocation28_spill] sm:$0xff] %v9980_v32 }
 0x55e   :  { %v9893_v1 = vpop.f32.mrf.mxu3  ;;  %v926_v5 = vand.u32 2147483647, %v925_v62  ;;  %v9943_v46 = vsel %vm9931_vm3, %v9465_v34, %v1086_v56  ;;  %12595 = vst [vmem:[#allocation29_spill] sm:$0xff] %v9983_v51  ;;  %v1323_v20 = vpop.permute.xlu1 %1322 }
 0x55f   :  { %v1241_v33 = vsel %vm1120_vm7, %v1240_v49, %v1239_v23  ;;  %v1091_v13 = vmul.f32 %v9943_v46, %v9943_v46  ;;  %v1333_v62 = vmul.f32 %v9983_v51, %v1323_v20 }
 0x560   :  { %v9895_v45 = vpop.f32.mrf.mxu1  ;;  %v929_v22 = vmul.f32 %v928_v53, %v926_v5  ;;  %v9960_v7 = vsel %vm9947_vm8, %v9477_v57, %v1241_v33  ;;  %v9993_v53 = vperm.slane %v8452_v18, 2 }
 0x561   :  { %v1246_v28 = vmul.f32 %v9960_v7, %v9960_v7  ;;  %v1099_v47 = vmul.f32 -0.00019511016, %v1091_v13  ;;  %v1092_v49 = vmul.f32 -0.001358992, %v1091_v13 }
 0x562   :  { %v930_v3 = vxor.u32 2147483648, %v929_v22  ;;  %12596 = vst [vmem:[#allocation30_spill] sm:$0xff] %v9993_v53 }
 0x563   :  { %v1254_v30 = vmul.f32 -0.00019511016, %v1246_v28  ;;  %v1100_v23 = vadd.f32 0.008332121, %v1099_v47  ;;  %v1354_v56 = vpop.permute.xlu2 %1353  ;;  %v1247_v33 = vmul.f32 -0.001358992, %v1246_v28  ;;  %v1338_v47 = vadd.f32 %v1333_v62, %v1307_v25 }
 0x564   :  { %v931_v58 = vsel %vm810_vm9, %v930_v3, %v929_v22  ;;  %v1087_v22 = vsub.s32 4, %v9878_v10  ;;  %v1364_v9 = vmul.f32 %v9993_v53, %v1354_v56  ;;  %v1093_v20 = vadd.f32 0.041655596, %v1092_v49 }
 0x565   :  { %v9990_v16 = vsel %vm9973_vm10, %v9480_v36, %v931_v58  ;;  %v1255_v5 = vadd.f32 0.008332121, %v1254_v30  ;;  %v1101_v3 = vmul.f32 %v1100_v23, %v1091_v13  ;;  %v1248_v30 = vadd.f32 0.041655596, %v1247_v33 }
 0x566   :  { %v9898_v29 = vpop.f32.mrf.mxu3  ;;  %v10000_v19 = vmul.f32 %v9990_v16, %v9990_v16  ;;  %v1088_v18 = vsel %vm965_vm2, %v1087_v22, %v9878_v10  ;;  %v1242_v23 = vsub.s32 4, %v9883_v50  ;;  %v1369_v48 = vadd.f32 %v1364_v9, %v1338_v47  ;;  %v10035_v60 = vpop.permute.xlu1 %1349 }
 0x567   :  { %v1256_v35 = vmul.f32 %v1255_v5, %v1246_v28  ;;  %v1102_v15 = vadd.f32 -0.16666654, %v1101_v3  ;;  %v1094_v0 = vmul.f32 %v1093_v20, %v1091_v13  ;;  %v1249_v25 = vmul.f32 %v1248_v30, %v1246_v28 }
 0x568   :  { %v9900_v44 = vpop.f32.mrf.mxu1  ;;  %v944_v61 = vmul.f32 -0.00019511016, %v10000_v19  ;;  %v1090_v62 = vsel %vm9931_vm3, 0, %v1088_v18  ;;  %v1243_v10 = vsel %vm1120_vm7, %v1242_v23, %v9883_v50  ;;  %vm1261_vm2 = vweird.f32 %v9477_v57 }
 0x569   :  { %v1257_v51 = vadd.f32 -0.16666654, %v1256_v35  ;;  %v1103_v49 = vmul.f32 %v1102_v15, %v1091_v13  ;;  %v1095_v3 = vadd.f32 -0.4999988, %v1094_v0  ;;  %v1250_v9 = vadd.f32 -0.4999988, %v1249_v25 }
 0x56a   :  { %v945_v5 = vadd.f32 0.008332121, %v944_v61  ;;  %v937_v35 = vmul.f32 -0.001358992, %v10000_v19  ;;  %v1107_v30 = vadd.s32 3, %v1090_v62  ;;  %v1245_v18 = vsel %vm9947_vm8, 0, %v1243_v10 }
 0x56b   :  { %v1385_v56 = vpop.permute.xlu2 %1384  ;;  %v1258_v47 = vmul.f32 %v1257_v51, %v1246_v28  ;;  %v1104_v20 = vadd.f32 1.0, %v1103_v49  ;;  %v932_v15 = vsub.s32 4, %v9891_v21  ;;  %v1096_v50 = vmul.f32 %v1095_v3, %v1091_v13 }
 0x56c   :  { %v10015_v33 = vadd.f32 %v1385_v56, %v1369_v48  ;;  %v946_v61 = vmul.f32 %v945_v5, %v10000_v19  ;;  %v1262_v23 = vadd.s32 3, %v1245_v18  ;;  %v1251_v0 = vmul.f32 %v1250_v9, %v1246_v28 }
 0x56d   :  { %v1259_v48 = vadd.f32 1.0, %v1258_v47  ;;  %v938_v51 = vadd.f32 0.041655596, %v937_v35  ;;  %v1105_v25 = vmul.f32 %v1104_v20, %v9943_v46  ;;  %v1108_v53 = vand.u32 3, %v1107_v30 }
 0x56e   :  { %v9902_v2 = vpop.f32.mrf.mxu3  ;;  %12597 = vst [vmem:[#allocation31_spill] sm:$0xff] %v10015_v33  ;;  %v1864_v14 = vand.u32 2139095040, %v10015_v33  ;;  %v933_v12 = vsel %vm810_vm9, %v932_v15, %v9891_v21  ;;  %v947_v62 = vadd.f32 -0.16666654, %v946_v61  ;;  %v1097_v5 = vadd.f32 1.0, %v1096_v50 }
 0x56f   :  { %v1260_v47 = vmul.f32 %v1259_v48, %v9960_v7  ;;  %v1263_v28 = vand.u32 3, %v1262_v23  ;;  %v1252_v9 = vadd.f32 1.0, %v1251_v0  ;;  %v939_v46 = vmul.f32 %v938_v51, %v10000_v19 }
 0x570   :  { %v9904_v59 = vpop.f32.mrf.mxu1  ;;  %v1865_v10 = vshrl.u32 %v1864_v14, 23  ;;  %v1111_v35 = vxor.u32 2147483648, %v1105_v25  ;;  %v948_v21 = vmul.f32 %v947_v62, %v10000_v19  ;;  %vm1110_vm6 = vcmp.eq.s32.totalorder %v1108_v53, 0 }
 0x571   :  { %v1114_v18 = vxor.u32 2147483648, %v1097_v5  ;;  %vm1113_vm14 = vcmp.eq.s32.totalorder %v1108_v53, 2  ;;  %v1266_v7 = vxor.u32 2147483648, %v1260_v47  ;;  %vm1265_vm12 = vcmp.eq.s32.totalorder %v1263_v28, 0 }
 0x572   :  { %v6591_v30 = vadd.s32 4294967169, %v1865_v10  ;;  %v1269_v61 = vxor.u32 2147483648, %v1252_v9  ;;  %v940_v14 = vadd.f32 -0.4999988, %v939_v46  ;;  %vm1109_vm4 = vcmp.lt.s32.totalorder %v1108_v53, 2 }
 0x573   :  { %vm1268_vm1 = vcmp.eq.s32.totalorder %v1263_v28, 2  ;;  %v949_v62 = vadd.f32 1.0, %v948_v21  ;;  %vm1264_vm15 = vcmp.lt.s32.totalorder %v1263_v28, 2  ;;  %v4024_v28 = vmax.f32 %v9857_v17, 0.0 }
 0x574   :  { %v1871_v23 = vadd.s32 1, %v6591_v30  ;;  %vm951_vm9 = vweird.f32 %v9480_v36  ;;  %v7269_v36 = vld [vmem:[%s12273_s14 + $0x40] sm:$0xff] }
 0x575   :  { %v950_v53 = vmul.f32 %v949_v62, %v9990_v16  ;;  %v4027_v62 = vmax.f32 %v9893_v1, 0.0 }
 0x576   :  { %v9908_v11 = vpop.f32.mrf.mxu3  ;;  %vm1872_vm13 = vcmp.gt.s32.totalorder %v1871_v23, 0 }
 0x578   :  { %v9912_v26 = vpop.f32.mrf.mxu1 }
 0x579   :  { %v4036_v0 = vmax.f32 %v9912_v26, 0.0  ;;  %v941_v26 = vmul.f32 %v940_v14, %v10000_v19 }
 0x57e   :  { %v9914_v37 = vpop.f32.mrf.mxu3 }
 0x57f   :  { %v4035_v57 = vmax.f32 %v9914_v37, 0.0  ;;  %v4031_v37 = vmax.f32 %v9902_v2, 0.0 }
 0x580   :  { %v9918_v54 = vpop.f32.mrf.mxu1 }
 0x586   :  { %v9922_v41 = vpop.f32.mrf.mxu3 }
 0x587   :  { %v4037_v16 = vmax.f32 %v9922_v41, 0.0  ;;  %v4033_v41 = vmax.f32 %v9908_v11, 0.0 }
 0x588   :  { %v9924_v31 = vpop.f32.mrf.mxu1 }
 0x58e   :  { %v9938_v52 = vpop.f32.mrf.mxu3 }
 0x58f   :  { %v4039_v19 = vmax.f32 %v9938_v52, 0.0 }
 0x590   :  { %v9953_v24 = vpop.f32.mrf.mxu1 }
 0x596   :  { %v9966_v38 = vpop.f32.mrf.mxu3 }
 0x597   :  { %v4041_v46 = vmax.f32 %v9966_v38, 0.0  ;;  %v10057_v38 = vpop.permute.xlu1 %1380 }
 0x598   :  { %v9969_v6 = vpop.f32.mrf.mxu1 }
 0x599   :  { %v4044_v32 = vmax.f32 %v9969_v6, 0.0  ;;  %v4040_v6 = vmax.f32 %v9924_v31, 0.0  ;;  %v1112_v31 = vsel %vm1110_vm6, %v1097_v5, %v1111_v35  ;;  %v4034_v5 = vmax.f32 %v9904_v59, 0.0 }
 0x59a   :  { %v4061_v30 = vpack.c.bf16 %v4041_v46, %v4039_v19  ;;  %v12603_v46 = vld [vmem:[#allocation28_spill] sm:$0xff] }
 0x59e   :  { %v9995_v55 = vpop.f32.mrf.mxu3 }
 0x59f   :  { %v4043_v10 = vmax.f32 %v9995_v55, 0.0 }
 0x5a0   :  { %v4011_v58 = vpop.f32.mrf.mxu1 }
 0x5a1   :  { %v4046_v13 = vmax.f32 %v4011_v58, 0.0 }
 0x5a3   :  { %v4064_v58 = vpack.c.bf16 %v4046_v13, %v4044_v32  ;;  %v4038_v32 = vmax.f32 %v9918_v54, 0.0  ;;  %v4032_v54 = vmax.f32 %v9900_v44, 0.0  ;;  %v4028_v44 = vmax.f32 %v9889_v39, 0.0 }
 0x5a5   :  { %v4058_v21 = vpack.c.bf16 %v4034_v5, %v4032_v54 }
 0x5a6   :  { %v10008_v4 = vpop.f32.mrf.mxu3 }
 0x5a8   :  { %v4014_v22 = vpop.f32.mrf.mxu1 }
 0x5a9   :  { %v4048_v49 = vmax.f32 %v4014_v22, 0.0  ;;  %v935_v22 = vsel %vm9973_vm10, 0, %v933_v12  ;;  %vm4463_vm10 = vsmask.f32 5376 }
 0x5ae   :  { %v3965_v56 = vpop.f32.mrf.mxu3 }
 0x5af   :  { %v4047_v50 = vmax.f32 %v3965_v56, 0.0  ;;  %v952_v56 = vadd.s32 3, %v935_v22  ;;  %v1873_v22 = vsel %vm1872_vm13, %v1871_v23, 0  ;;  %v12598_v23 = vmov 920167782  }
 0x5b0   :  { %v4016_v43 = vpop.f32.mrf.mxu1  ;;  %v1875_v52 = vand.u32 31, %v1873_v22 }
 0x5b1   :  { %v4050_v3 = vmax.f32 %v4016_v43, 0.0  ;;  %v4042_v43 = vmax.f32 %v9953_v24, 0.0  ;;  %v1115_v24 = vsel %vm1113_vm14, %v1114_v18, %v1105_v25  ;;  %v1267_v25 = vsel %vm1265_vm12, %v1252_v9, %v1266_v7 }
 0x5b2   :  { %v1116_v13 = vsel %vm1109_vm4, %v1112_v31, %v1115_v24  ;;  %v953_v55 = vand.u32 3, %v952_v56  ;;  %v4030_v9 = vmax.f32 %v9895_v45, 0.0  ;;  %v956_v18 = vxor.u32 2147483648, %v950_v53 }
 0x5b3   :  { %v4066_v20 = vpack.c.bf16 %v4050_v3, %v4048_v49  ;;  %v4062_v51 = vpack.c.bf16 %v4042_v43, %v4040_v6  ;;  %v4045_v49 = vmax.f32 %v10008_v4, 0.0  ;;  %v1270_v4 = vsel %vm1268_vm1, %v1269_v61, %v1260_v47 }
 0x5b4   :  { %v4060_v3 = vpack.c.bf16 %v4038_v32, %v4036_v0  ;;  %v1117_v59 = vsel %vm1106_vm0, nan, %v1116_v13  ;;  %v1271_v47 = vsel %vm1264_vm15, %v1267_v25, %v1270_v4  ;;  %vm955_vm3 = vcmp.eq.s32.totalorder %v953_v55, 0 }
 0x5b5   :  { %4228 = vmatpush.bf16.msra.mxu2 %v4066_v20  ;;  %v4063_v35 = vpack.c.bf16 %v4045_v49, %v4043_v10  ;;  %v942_v20 = vadd.f32 1.0, %v941_v26  ;;  %v10062_v39 = vsel %vm1261_vm2, nan, %v1271_v47  ;;  %v2176_v6 = vpack.c.bf16 %v1117_v59, %v1117_v59  ;;  %v1319_v49 = vpop.permute.xlu0 %1318 }
 0x5b6   :  { %v3967_v15 = vpop.f32.mrf.mxu3  ;;  %vm958_vm7 = vcmp.eq.s32.totalorder %v953_v55, 2  ;;  %v4026_v45 = vmax.f32 %v9880_v27, 0.0  ;;  %v4056_v43 = vpack.c.bf16 %v4030_v9, %v4028_v44  ;;  %v10067_v7 = vsub.s32 32, %v1875_v52  ;;  %v12606_v9 = vld [vmem:[#allocation29_spill] sm:$0xff] }
 0x5b7   :  { %v4049_v48 = vmax.f32 %v3967_v15, 0.0  ;;  %v959_v34 = vxor.u32 2147483648, %v942_v20  ;;  %vm954_vm8 = vcmp.lt.s32.totalorder %v953_v55, 2  ;;  %v957_v15 = vsel %vm955_vm3, %v942_v20, %v956_v18  ;;  %v12604_v20 = vld [vmem:[#allocation10_spill] sm:$0xff]  ;;  %v12607_v18 = vld [vmem:[#allocation8_spill] sm:$0xff] }
 0x5b8   :  { %v2177_v17 = vpack.c.bf16 %v10062_v39, %v10062_v39  ;;  %v4054_v14 = vpack.c.bf16 %v4026_v45, %v4024_v28  ;;  %v4029_v27 = vmax.f32 %v9898_v29, 0.0  ;;  %v10074_v11 = vunpack.c.l.b16 %v2176_v6  ;;  %v12611_v6 = vld [vmem:[#allocation30_spill] sm:$0xff] }
 0x5b9   :  { %v4065_v12 = vpack.c.bf16 %v4049_v48, %v4047_v50  ;;  %4229 = vmatpush.bf16.msra.mxu2 %v4064_v58  ;;  %v4059_v58 = vpack.c.bf16 %v4037_v16, %v4035_v57  ;;  %v960_v61 = vsel %vm958_vm7, %v959_v34, %v950_v53  ;;  %v4057_v50 = vpack.c.bf16 %v4033_v41, %v4031_v37  ;;  %v12612_v41 = vld [vmem:[#allocation9_spill] sm:$0xff] }
 0x5ba   :  { %v12373_v48 = vand.u32 2147483647, %v10015_v33  ;;  %v1890_v2 = vshll.u32 %v12598_v23, %v1875_v52  ;;  %v12599_v0 = vmov 1326507024   ;;  %v961_v24 = vsel %vm954_vm8, %v957_v15, %v960_v61 }
 0x5bb   :  { %4179 = vmatpush.bf16.msra.mxu0 %v4065_v12  ;;  %v1891_v31 = vshrl.u32 %v12599_v0, %v10067_v7  ;;  %v10080_v32 = vshrl.u32 %v1873_v22, 5  ;;  %v4020_v12 = vmax.f32 %v9786_v63, 0.0  ;;  %v4022_v29 = vmax.f32 %v9823_v40, 0.0 }
 0x5bc   :  { %v12600_v56 = vmov 2475754826   ;;  %v12601_v13 = vmov 2131351028   ;;  %v12602_v25 = vmov 2102212464   ;;  %v1888_v63 = vshrl.u32 %v12598_v23, %v10067_v7 }
 0x5bd   :  { %4230 = vmatpush.bf16.msra.mxu2 %v4062_v51  ;;  %v10082_v51 = vpop.permute.xlu1 %1388  ;;  %v1881_v10 = vshll.u32 %v12600_v56, %v1875_v52  ;;  %v1882_v26 = vshrl.u32 %v12601_v13, %v10067_v7  ;;  %v1884_v54 = vshll.u32 %v12601_v13, %v1875_v52  ;;  %v1887_v4 = vshll.u32 %v12602_v25, %v1875_v52 }
 0x5be   :  { %v1885_v5 = vshrl.u32 %v12602_v25, %v10067_v7  ;;  %v4025_v40 = vmax.f32 %v9886_v8, 0.0  ;;  %v4055_v1 = vpack.c.bf16 %v4029_v27, %v4027_v62  ;;  %v1892_v55 = vor.u32 %v1891_v31, %v1890_v2  ;;  %v10148_v31 = vpop.permute.xlu0 %1357 }
 0x5bf   :  { %4180 = vmatpush.bf16.msra.mxu0 %v4063_v35  ;;  %v1306_v35 = vmul.f32 %v12603_v46, %v9916_v42  ;;  %v962_v53 = vsel %vm951_vm9, nan, %v961_v24  ;;  %v1868_v22 = vand.u32 8388607, %v12373_v48  ;;  %vm1896_vm6 = vcmp.lt.s32.totalorder %v10080_v32, 4 }
 0x5c0   :  { %v4052_v19 = vpack.c.bf16 %v4022_v29, %v4020_v12  ;;  %v4023_v44 = vmax.f32 %v12604_v20, 0.0  ;;  %v12605_v8 = vmov 683565275   ;;  %v1879_v47 = vshrl.u32 %v12600_v56, %v10067_v7 }
 0x5c1   :  { %4231 = vmatpush.bf16.msra.mxu2 %v4060_v3  ;;  %v10096_v3 = vpop.permute.xlu2 %1280  ;;  %v1878_v59 = vshll.u32 %v12605_v8, %v1875_v52  ;;  %v10110_v42 = vor.u32 %v1882_v26, %v1881_v10  ;;  %v10116_v16 = vor.u32 %v1885_v5, %v1884_v54  ;;  %v4021_v57 = vmax.f32 %v12607_v18, 0.0  ;;  %v12615_v5 = vld [vmem:[#allocation22_spill] sm:$0xff] }
 0x5c2   :  { %v4053_v39 = vpack.c.bf16 %v4025_v40, %v4023_v44  ;;  %vm12608_vm14 = vcmask 1045504   ;;  %vm1893_vm4 = vcmp.lt.s32.totalorder %v10080_v32, 1  ;;  %vm1895_vm1 = vcmp.lt.s32.totalorder %v10080_v32, 3  ;;  %v12618_v44 = vld [vmem:[#allocation19_spill] sm:$0xff] }
 0x5c3   :  { %4181 = vmatpush.bf16.msra.mxu0 %v4061_v30  ;;  %v1889_v30 = vor.u32 %v1888_v63, %v1887_v4  ;;  %vm10121_vm12 = vmand %vm12608_vm14, %vm4463_vm10  ;;  %v1906_v34 = vsel %vm1896_vm6, %v1892_v55, 1326507024  ;;  %v2175_v28 = vpack.c.bf16 %v962_v53, %v962_v53  ;;  %v1363_v45 = vmul.f32 %v12611_v6, %v10035_v60 }
 0x5c4   :  { %v4376_v37 = vunpack.c.l.b16 %v2177_v17  ;;  %v10132_v15 = vor.u32 %v1879_v47, %v1878_v59  ;;  %vm1894_vm0 = vcmp.lt.s32.totalorder %v10080_v32, 2  ;;  %v1905_v60 = vsel %vm1893_vm4, %v10110_v42, %v10116_v16  ;;  %vm12614_vm15 = vmmov %vm12608_vm14 }
 0x5c5   :  { %4232 = vmatpush.bf16.msra.mxu2 %v4058_v21  ;;  %v1332_v21 = vmul.f32 %v12606_v9, %v1319_v49  ;;  %v1907_v17 = vsel %vm1895_vm1, %v1889_v30, %v1906_v34  ;;  %v10146_v2 = vpop.permute.xlu1 %1310  ;;  %v4374_v49 = vunpack.c.l.b16 %v2175_v28  ;;  %v4401_v63 = vshrl.u32 %v12615_v5, 16 }
 0x5c6   :  { %v1901_v10 = vsel %vm1893_vm4, %v10132_v15, %v10110_v42  ;;  %v1908_v54 = vsel %vm1894_vm0, %v1905_v60, %v1907_v17  ;;  %v4404_v40 = vshll.u32 %v12615_v5, 16  ;;  %v1286_v28 = vpop.permute.xlu0 %1285 }
 0x5c7   :  { %4182 = vmatpush.bf16.msra.mxu0 %v4059_v58  ;;  %v4019_v58 = vmax.f32 %v12612_v41, 0.0  ;;  %v1337_v61 = vadd.f32 %v1332_v21, %v1306_v35  ;;  %v12616_v35 = vld [vmem:[#allocation11_spill] sm:$0xff]  ;;  %v4403_v59 = vrot.slane %v4401_v63, 6 }
 0x5c8   :  { %v4377_v55 = vpack.c.b16 %v4374_v49, %v12616_v35  ;;  %v4406_v47 = vrot.slane %v4404_v40, 7 }
 0x5c9   :  { %4233 = vmatpush.bf16.msra.mxu2 %v4056_v43  ;;  %v1869_v43 = vor.u32 8388608, %v1868_v22  ;;  %v4051_v24 = vpack.c.bf16 %v4021_v57, %v4019_v58  ;;  %v1315_v29 = vpop.permute.xlu2 %1314  ;;  %v1368_v4 = vadd.f32 %v1363_v45, %v1337_v61  ;;  %v12620_v58 = vld [vmem:[#allocation23_spill] sm:$0xff] }
 0x5ca   :  { %v1331_v45 = vmul.f32 %v12606_v9, %v1315_v29 }
 0x5cb   :  { %4183 = vmatpush.bf16.msra.mxu0 %v4057_v50  ;;  %v1902_v50 = vsel %vm1896_vm6, %v1889_v30, 920167782  ;;  %v10150_v12 = vshll.u32 %v1869_v43, 8  ;;  %v10170_v20 = vadd.f32 %v10057_v38, %v1368_v4  ;;  %v1305_v43 = vmul.f32 %v12603_v46, %v1286_v28  ;;  %v12623_v4 = vld [vmem:[#allocation20_spill] sm:$0xff] }
 0x5cc   :  { %v1903_v26 = vsel %vm1895_vm1, %v10116_v16, %v1902_v50  ;;  %v4407_v50 = vor.u32 %v4406_v47, %v4403_v59 }
 0x5cd   :  { %4234 = vmatpush.bf16.msra.mxu2 %v4054_v14  ;;  %v12613_v14 = vld [vmem:[#allocation25_spill] sm:$0xff]  ;;  %v1904_v53 = vsel %vm1894_vm0, %v1901_v10, %v1903_v26  ;;  %v1910_v22 = vand.u32 65535, %v10150_v12  ;;  %12617 = vst [vmem:[#allocation28_spill] sm:$0xff] %v10170_v20  ;;  %v1911_v57 = vshrl.u32 %v10150_v12, 16  ;;  %v10176_v34 = vpop.permute.xlu1 %1341  ;;  %v1709_v38 = vand.u32 2139095040, %v10170_v20 }
 0x5ce   :  { %v4465_v27 = vsel %vm10121_vm12, %v12613_v14, 1065369472  ;;  %v1935_v18 = vshrl.u32 %v1904_v53, 16  ;;  %v7270_v14 = vld [vmem:[%s12273_s14 + $0x48] sm:$0xff]  ;;  %v1336_v40 = vadd.f32 %v1331_v45, %v1305_v43  ;;  %v12627_v45 = vmov 0  }
 0x5cf   :  { %4184 = vmatpush.bf16.msra.mxu0 %v4055_v1  ;;  %v4548_v62 = vsel %vm12614_vm15, %v4465_v27, 0  ;;  %v4378_v1 = vpack.c.b16 %v4376_v37, %v10074_v11  ;;  %v4380_v11 = vshrl.u32 %v4377_v55, 16  ;;  %v12621_v37 = vld [vmem:[#allocation21_spill] sm:$0xff]  ;;  %v1710_v63 = vshrl.u32 %v1709_v38, 23 }
 0x5d0   :  { %v12622_v61 = vsel %vm9420_vm11, %v12620_v58, %v12621_v37  ;;  %v10189_v49 = vmul.u32 %v1935_v18, %v1910_v22  ;;  %vm12624_vm11 = vsmask.f32 1280  ;;  %v1939_v37 = vmul.u32 %v1935_v18, %v1911_v57 }
 0x5d1   :  { %4235 = vmatpush.bf16.msra.mxu2 %v4052_v19  ;;  %v1913_v19 = vshrl.u32 %v1908_v54, 16  ;;  %v4389_v21 = vshrl.u32 %v4378_v1, 16  ;;  %v4392_v30 = vshll.u32 %v4378_v1, 16  ;;  %v1346_v27 = vpop.permute.xlu2 %1345  ;;  %v4382_v29 = vrot.slane %v4380_v11, 6  ;;  %vm12628_vm7 = vmmov %vm12624_vm11 }
 0x5d2   :  { %v4416_v5 = vsel %vm12624_vm11, %v4407_v50, %v12623_v4  ;;  %v1362_v1 = vmul.f32 %v12611_v6, %v1346_v27  ;;  %vm12632_vm9 = vmmov %vm12628_vm7  ;;  %v1361_v4 = vmul.f32 %v12611_v6, %v10176_v34  ;;  %v1898_v34 = vsel %vm1896_vm6, %v10116_v16, 2102212464 }
 0x5d3   :  { %4185 = vmatpush.bf16.msra.mxu0 %v4053_v39  ;;  %v1912_v39 = vand.u32 65535, %v1908_v54  ;;  %v10174_v52 = vmul.u32 %v1913_v19, %v1910_v22  ;;  %v4391_v60 = vrot.slane %v4389_v21, 6  ;;  %v4394_v17 = vrot.slane %v4392_v30, 7 }
 0x5d4   :  { %4236 = vmatmul.bf16.vlgmr.msra.gmra.mxu2 %v7269_v36  ;;  %v1917_v28 = vmul.u32 %v1913_v19, %v1911_v57  ;;  %v1899_v16 = vsel %vm1895_vm1, %v10110_v42, %v1898_v34  ;;  %v1365_v42 = vmul.f32 %v12611_v6, %v10148_v31  ;;  %v7272_v6 = vld [vmem:[%s12273_s14 + $0x58] sm:$0xff] }
 0x5d5   :  { %v1914_v10 = vmul.u32 %v1912_v39, %v1910_v22  ;;  %v10191_v26 = vmul.u32 %v1912_v39, %v1911_v57  ;;  %v1918_v54 = vshll.u32 %v10174_v52, 16  ;;  %v10197_v35 = vor.u32 %v4394_v17, %v4391_v60  ;;  %v1377_v38 = vpop.permute.xlu1 %1376 }
 0x5d6   :  { %v1367_v39 = vadd.f32 %v1362_v1, %v1336_v40  ;;  %v1330_v17 = vmul.f32 %v12606_v9, %v10146_v2 }
 0x5d7   :  { %4186 = vmatpush.bf16.msra.mxu0 %v4051_v24  ;;  %v1934_v24 = vand.u32 65535, %v1904_v53  ;;  %12625 = vst [vmem:[#allocation10_spill] sm:$0xff] %v10197_v35  ;;  %v1920_v47 = vshll.u32 %v10191_v26, 16  ;;  %vm1922_vm13 = vc.u32 %v1914_v10, %v1918_v54  ;;  %v1924_v21 = vadd.s32 %v1918_v54, %v1914_v10 }
 0x5d8   :  { %v4458_v11 = vsel %vm8341_vm5, %v10197_v35, %v4407_v50  ;;  %v10212_v27 = vadd.f32 %v1377_v38, %v1367_v39  ;;  %v1919_v10 = vshrl.u32 %v10174_v52, 16  ;;  %v1877_v52 = vshrl.u32 %v12605_v8, %v10067_v7 }
 0x5d9   :  { %v10199_v53 = vmul.u32 %v1934_v24, %v1911_v57  ;;  %vm1926_vm3 = vc.u32 %v1924_v21, %v1920_v47 }
 0x5da   :  { %4187 = vmatmul.bf16.vlgmr.msra.gmra.mxu0 %v7269_v36  ;;  %v4383_v36 = vshll.u32 %v4377_v55, 16  ;;  %v1936_v55 = vmul.u32 %v1934_v24, %v1910_v22  ;;  %v1923_v22 = vsel %vm1922_vm13, 1, %v12627_v45  ;;  %12630 = vst [vmem:[#allocation8_spill] sm:$0xff] %v10212_v27  ;;  %v1927_v60 = vsel %vm1926_vm3, 1, %v12627_v45  ;;  %v12631_v24 = vld [vmem:[#allocation12_spill] sm:$0xff] }
 0x5db   :  { %4550 = vmatpush.bf16.msrb.mxu0 %v4548_v62  ;;  %v1942_v43 = vshll.u32 %v10199_v53, 16  ;;  %v1925_v19 = vadd.s32 %v1923_v22, %v1917_v28  ;;  %v12635_v28 = vld [vmem:[#allocation26_spill] sm:$0xff]  ;;  %v12636_v22 = vld [vmem:[#allocation27_spill] sm:$0xff] }
 0x5dc   :  { %v4385_v62 = vrot.slane %v4383_v36, 7  ;;  %v6588_v36 = vadd.s32 4294967169, %v1710_v63  ;;  %v1941_v63 = vshrl.u32 %v10189_v49, 16  ;;  %v1308_v38 = vmul.f32 %v12603_v46, %v12635_v28 }
 0x5de   :  { %v4386_v59 = vor.u32 %v4385_v62, %v4382_v29  ;;  %v1554_v29 = vand.u32 2139095040, %v10212_v27  ;;  %v7271_v62 = vld [vmem:[%s12273_s14 + $0x50] sm:$0xff] }
 0x5df   :  { %4551 = vmatpush.bf16.msrb.mxu0 %v12618_v44  ;;  %v1940_v44 = vshll.u32 %v10189_v49, 16  ;;  %v1943_v49 = vshrl.u32 %v10199_v53, 16 }
 0x5e0   :  { %v10210_v58 = vsel %vm12628_vm7, %v4386_v59, %v10197_v35  ;;  %v10223_v18 = vsel %vm12632_vm9, %v12631_v24, %v4386_v59  ;;  %v1555_v1 = vshrl.u32 %v1554_v29, 23 }
 0x5e1   :  { %vm1944_vm2 = vc.u32 %v1936_v55, %v1940_v44  ;;  %v1946_v41 = vadd.s32 %v1940_v44, %v1936_v55  ;;  %12629 = vst [vmem:[#allocation29_spill] sm:$0xff] %v10210_v58  ;;  %v12634_v55 = vld [vmem:[#allocation14_spill] sm:$0xff]  ;;  %v1921_v44 = vshrl.u32 %v10191_v26, 16  ;;  %v1334_v26 = vmul.f32 %v12606_v9, %v12636_v22 }
 0x5e2   :  { %v1945_v50 = vsel %vm1944_vm2, 1, %v12627_v45  ;;  %12633 = vst [vmem:[#allocation30_spill] sm:$0xff] %v10223_v18  ;;  %v6585_v39 = vadd.s32 4294967169, %v1555_v1 }
 0x5e3   :  { %4552 = vmatpush.bf16.msrb.mxu0 %v12622_v61  ;;  %v1716_v61 = vadd.s32 1, %v6588_v36  ;;  %vm1948_vm8 = vc.u32 %v1946_v41, %v1942_v43  ;;  %v1947_v57 = vadd.s32 %v1945_v50, %v1939_v37  ;;  %v10249_v7 = vadd.s32 %v1946_v41, %v1942_v43 }
 0x5e4   :  { %4241 = vmatmul.bf16.gmra.mxu2 %v7270_v14  ;;  %v1949_v54 = vsel %vm1948_vm8, 1, %v12627_v45  ;;  %v1561_v50 = vadd.s32 1, %v6585_v39  ;;  %v1339_v9 = vadd.f32 %v1334_v26, %v1308_v38 }
 0x5e5   :  { %vm1717_vm10 = vcmp.gt.s32.totalorder %v1716_v61, 0  ;;  %v1951_v40 = vadd.s32 %v1949_v54, %v1947_v57  ;;  %12638 = vst [vmem:[#allocation25_spill] sm:$0xff] %v10249_v7 }
 0x5e6   :  { %vm1562_vm14 = vcmp.gt.s32.totalorder %v1561_v50, 0 }
 0x5e7   :  { %4553 = vmatpush.bf16.msrb.mxu0 %v4416_v5  ;;  %v1718_v5 = vsel %vm1717_vm10, %v1716_v61, 0  ;;  %v1952_v36 = vadd.s32 %v1951_v40, %v1941_v63  ;;  %v1897_v61 = vsel %vm1893_vm4, %v1877_v52, %v10132_v15 }
 0x5e8   :  { %v1720_v47 = vand.u32 31, %v1718_v5  ;;  %v1900_v43 = vsel %vm1894_vm0, %v1897_v61, %v1899_v16 }
 0x5e9   :  { %v1954_v63 = vmul.u32 %v10150_v12, %v1900_v43  ;;  %v12372_v43 = vand.u32 2147483647, %v10212_v27 }
 0x5ea   :  { %4192 = vmatmul.bf16.gmra.mxu0 %v7270_v14  ;;  %v1304_v14 = vmul.f32 %v12603_v46, %v10096_v3  ;;  %v1929_v3 = vadd.s32 %v1927_v60, %v1925_v19  ;;  %v10257_v53 = vsub.s32 32, %v1720_v47  ;;  %v1953_v46 = vadd.s32 %v1952_v36, %v1943_v49 }
 0x5eb   :  { %4554 = vmatpush.bf16.msrb.mxu0 %v4458_v11  ;;  %v1373_v11 = vpop.permute.xlu0 %1372  ;;  %v1732_v15 = vshll.u32 %v12602_v25, %v1720_v47  ;;  %v1735_v32 = vshll.u32 %v12598_v23, %v1720_v47  ;;  %v1723_v29 = vshll.u32 %v12605_v8, %v1720_v47 }
 0x5ec   :  { %v1335_v2 = vadd.f32 %v1330_v17, %v1304_v14  ;;  %v1930_v59 = vadd.s32 %v1929_v3, %v1919_v10  ;;  %v1733_v41 = vshrl.u32 %v12598_v23, %v10257_v53  ;;  %v12371_v14 = vand.u32 2147483647, %v10170_v20 }
 0x5ed   :  { %v10272_v17 = vshrl.u32 %v1718_v5, 5  ;;  %v1736_v24 = vshrl.u32 %v12599_v0, %v10257_v53  ;;  %v1957_v57 = vadd.s32 1, %v1953_v46  ;;  %v1724_v31 = vshrl.u32 %v12600_v56, %v10257_v53 }
 0x5ee   :  { %v1366_v21 = vadd.f32 %v1361_v4, %v1335_v2  ;;  %v10247_v37 = vadd.s32 %v1930_v59, %v1921_v44  ;;  %v1727_v10 = vshrl.u32 %v12601_v13, %v10257_v53  ;;  %v1729_v3 = vshll.u32 %v12601_v13, %v1720_v47 }
 0x5ef   :  { %4555 = vmatpush.bf16.msrb.mxu0 %v10210_v58  ;;  %v1730_v54 = vshrl.u32 %v12602_v25, %v10257_v53  ;;  %v1734_v2 = vor.u32 %v1733_v41, %v1732_v15  ;;  %v1370_v4 = vadd.f32 %v1365_v42, %v1339_v9  ;;  %v1713_v40 = vand.u32 8388607, %v12371_v14 }
 0x5f0   :  { %12637 = vst [vmem:[#allocation9_spill] sm:$0xff] %v10247_v37  ;;  %v10259_v19 = vadd.f32 %v1373_v11, %v1366_v21  ;;  %vm1956_vm6 = vc.u32 %v10247_v37, %v10249_v7  ;;  %v1737_v1 = vor.u32 %v1736_v24, %v1735_v32  ;;  %vm1741_vm12 = vcmp.lt.s32.totalorder %v10272_v17, 4 }
 0x5f1   :  { %v1958_v44 = vsel %vm1956_vm6, %v1957_v57, %v1953_v46  ;;  %v1563_v59 = vsel %vm1562_vm14, %v1561_v50, 0  ;;  %v10296_v52 = vor.u32 %v1724_v31, %v1723_v29  ;;  %v10300_v21 = vor.u32 %v1730_v54, %v1729_v3  ;;  %v7273_v31 = vld [vmem:[%s12273_s14 + $0x60] sm:$0xff] }
 0x5f2   :  { %12639 = vst [vmem:[#allocation22_spill] sm:$0xff] %v10259_v19  ;;  %v1399_v60 = vand.u32 2139095040, %v10259_v19  ;;  %vm1738_vm4 = vcmp.lt.s32.totalorder %v10272_v17, 1  ;;  %vm12409_vm1 = vcmp.lt.s32.totalorder %v10272_v17, 3  ;;  %v1747_v12 = vsel %vm1741_vm12, %v1734_v2, 920167782 }
 0x5f3   :  { %4556 = vmatpush.bf16.msrb.mxu0 %v10223_v18  ;;  %12640 = vst [vmem:[#allocation11_spill] sm:$0xff] %v10296_v52  ;;  %v10307_v34 = vadd.f32 %v10082_v51, %v1370_v4  ;;  %v10309_v49 = vadd.s32 %v1958_v44, %v1954_v63  ;;  %v1714_v36 = vor.u32 8388608, %v1713_v40  ;;  %v1751_v39 = vsel %vm1741_vm12, %v1737_v1, 1326507024  ;;  %v7274_v18 = vld [vmem:[%s12273_s14 + $0x68] sm:$0xff] }
 0x5f4   :  { %4246 = vmatmul.bf16.gmra.mxu2 %v7271_v62  ;;  %v1400_v5 = vshrl.u32 %v1399_v60, 23  ;;  %vm12398_vm0 = vcmp.lt.s32.totalorder %v10272_v17, 2  ;;  %v1748_v38 = vsel %vm12409_vm1, %v10300_v21, %v1747_v12  ;;  %v1565_v51 = vand.u32 31, %v1563_v59 }
 0x5f5   :  { %12642 = vst [vmem:[#allocation24_spill] sm:$0xff] %v10307_v34  ;;  %v1752_v26 = vsel %vm12409_vm1, %v1734_v2, %v1751_v39  ;;  %v2019_v61 = vand.u32 2139095040, %v10307_v34  ;;  %v1960_v46 = vadd.s32 536870912, %v10309_v49  ;;  %v10329_v50 = vshll.u32 %v1714_v36, 8 }
 0x5f6   :  { %v6582_v11 = vadd.s32 4294967169, %v1400_v5  ;;  %12643 = vst [vmem:[#allocation23_spill] sm:$0xff] %v10309_v49  ;;  %v1566_v41 = vsub.s32 32, %v1565_v51  ;;  %v10341_v29 = vand.u32 8388607, %v12372_v43  ;;  %v1571_v3 = vshll.u32 %v12600_v56, %v1565_v51 }
 0x5f7   :  { %4557 = vmatpush.bf16.msrb.mxu0 %v12634_v55  ;;  %12644 = vst [vmem:[#allocation21_spill] sm:$0xff] %v10329_v50  ;;  %v2020_v42 = vshrl.u32 %v2019_v61, 23  ;;  %v10336_v60 = vshrl.u32 %v1960_v46, 30  ;;  %v1755_v32 = vand.u32 65535, %v10329_v50  ;;  %v1574_v5 = vshll.u32 %v12601_v13, %v1565_v51 }
 0x5f8   :  { %v1406_v16 = vadd.s32 1, %v6582_v11  ;;  %v1572_v54 = vshrl.u32 %v12601_v13, %v1566_v41  ;;  %v1575_v63 = vshrl.u32 %v12602_v25, %v1566_v41  ;;  %v1578_v40 = vshrl.u32 %v12598_v23, %v1566_v41 }
 0x5f9   :  { %12645 = vst [vmem:[#allocation20_spill] sm:$0xff] %v10336_v60  ;;  %v6594_v4 = vadd.s32 4294967169, %v2020_v42  ;;  %v1756_v1 = vshrl.u32 %v10329_v50, 16  ;;  %v1559_v39 = vor.u32 8388608, %v10341_v29  ;;  %v1580_v61 = vshll.u32 %v12598_v23, %v1565_v51 }
 0x5fa   :  { %4197 = vmatmul.bf16.gmra.mxu0 %v7271_v62  ;;  %v1726_v62 = vshll.u32 %v12600_v56, %v1720_v47  ;;  %vm1407_vm15 = vcmp.gt.s32.totalorder %v1406_v16, 0 }
 0x5fb   :  { %v1408_v2 = vsel %vm1407_vm15, %v1406_v16, 0  ;;  %v1581_v16 = vshrl.u32 %v12599_v0, %v1566_v41  ;;  %v2026_v46 = vadd.s32 1, %v6594_v4 }
 0x5fc   :  { %v10298_v47 = vor.u32 %v1727_v10, %v1726_v62  ;;  %v1568_v62 = vshll.u32 %v12605_v8, %v1565_v51  ;;  %v1569_v10 = vshrl.u32 %v12600_v56, %v1566_v41 }
 0x5fd   :  { %vm2027_vm3 = vcmp.gt.s32.totalorder %v2026_v46, 0 }
 0x5fe   :  { %12641 = vst [vmem:[#allocation19_spill] sm:$0xff] %v10298_v47  ;;  %v1746_v28 = vsel %vm1738_vm4, %v10296_v52, %v10298_v47  ;;  %v1750_v22 = vsel %vm1738_vm4, %v10298_v47, %v10300_v21 }
 0x5ff   :  { %v1749_v9 = vsel %vm12398_vm0, %v1746_v28, %v1748_v38  ;;  %v1753_v15 = vsel %vm12398_vm0, %v1750_v22, %v1752_v26  ;;  %v10360_v28 = vshrl.u32 %v1563_v59, 5  ;;  %v1410_v38 = vand.u32 31, %v1408_v2 }
 0x600   :  { %v1780_v24 = vshrl.u32 %v1749_v9, 16  ;;  %v1758_v57 = vshrl.u32 %v1753_v15, 16  ;;  %v1757_v44 = vand.u32 65535, %v1753_v15  ;;  %v1779_v12 = vand.u32 65535, %v1749_v9 }
 0x601   :  { %v1570_v22 = vor.u32 %v1569_v10, %v1568_v62  ;;  %v10362_v26 = vor.u32 %v1572_v54, %v1571_v3  ;;  %v1567_v9 = vshrl.u32 %v12605_v8, %v1566_v41  ;;  %v10367_v15 = vor.u32 %v1575_v63, %v1574_v5 }
 0x602   :  { %v10355_v11 = vmul.u32 %v1780_v24, %v1755_v32  ;;  %v10357_v36 = vmul.u32 %v1758_v57, %v1755_v32  ;;  %v10369_v14 = vmul.u32 %v1757_v44, %v1756_v1  ;;  %v1781_v29 = vmul.u32 %v1779_v12, %v1755_v32 }
 0x603   :  { %v10371_v59 = vmul.u32 %v1779_v12, %v1756_v1  ;;  %v1759_v62 = vmul.u32 %v1757_v44, %v1755_v32  ;;  %vm1583_vm11 = vcmp.lt.s32.totalorder %v10360_v28, 1  ;;  %v10380_v41 = vshrl.u32 %v12605_v8, %v10257_v53 }
 0x604   :  { %4251 = vmatmul.bf16.gmra.mxu2 %v7272_v6  ;;  %v1785_v43 = vshll.u32 %v10355_v11, 16  ;;  %v1763_v10 = vshll.u32 %v10357_v36, 16  ;;  %v1582_v3 = vor.u32 %v1581_v16, %v1580_v61  ;;  %vm1585_vm13 = vcmp.lt.s32.totalorder %v10360_v28, 3 }
 0x605   :  { %12646 = vst [vmem:[#allocation12_spill] sm:$0xff] %v10380_v41  ;;  %vm1586_vm2 = vcmp.lt.s32.totalorder %v10360_v28, 4  ;;  %v1784_v54 = vmul.u32 %v1780_v24, %v1756_v1  ;;  %v10386_v32 = vsel %vm1583_vm11, %v1567_v9, %v1570_v22  ;;  %vm1584_vm8 = vcmp.lt.s32.totalorder %v10360_v28, 2  ;;  %v12688_v28 = vld [vmem:[#allocation11_spill] sm:$0xff] }
 0x606   :  { %vm10391_vm7 = vc.u32 %v1781_v29, %v1785_v43  ;;  %vm10396_vm9 = vc.u32 %v1759_v62, %v1763_v10  ;;  %v10408_v61 = vshrl.u32 %v1408_v2, 5  ;;  %v1413_v16 = vshll.u32 %v12605_v8, %v1410_v38 }
 0x607   :  { %v1416_v9 = vshll.u32 %v12600_v56, %v1410_v38  ;;  %v1419_v5 = vshll.u32 %v12601_v13, %v1410_v38  ;;  %v1591_v53 = vsel %vm1583_vm11, %v1570_v22, %v10362_v26  ;;  %v1596_v12 = vsel %vm1586_vm2, %v1582_v3, 1326507024 }
 0x608   :  { %v1790_v58 = vsel %vm10391_vm7, 1, %v12627_v45  ;;  %v1595_v22 = vsel %vm1583_vm11, %v10362_v26, %v10367_v15  ;;  %vm1431_vm10 = vcmp.lt.s32.totalorder %v10408_v61, 4  ;;  %v12653_v24 = vand.u32 2147483647, %v10259_v19 }
 0x609   :  { %vm1428_vm6 = vcmp.lt.s32.totalorder %v10408_v61, 1  ;;  %vm1430_vm14 = vcmp.lt.s32.totalorder %v10408_v61, 3  ;;  %vm1429_vm15 = vcmp.lt.s32.totalorder %v10408_v61, 2 }
 0x60a   :  { %4202 = vmatmul.bf16.gmra.mxu0 %v7272_v6  ;;  %v1577_v6 = vshll.u32 %v12602_v25, %v1565_v51  ;;  %v10376_v51 = vsub.s32 32, %v1410_v38 }
 0x60c   :  { %v1579_v42 = vor.u32 %v1578_v40, %v1577_v6  ;;  %v1762_v6 = vmul.u32 %v1758_v57, %v1756_v1  ;;  %v10400_v57 = vadd.s32 %v1785_v43, %v1781_v29  ;;  %v1423_v40 = vshrl.u32 %v12598_v23, %v10376_v51 }
 0x60d   :  { %v2028_v1 = vsel %vm2027_vm3, %v2026_v46, 0  ;;  %v1425_v43 = vshll.u32 %v12598_v23, %v1410_v38  ;;  %v1426_v29 = vshrl.u32 %v12599_v0, %v10376_v51  ;;  %v1414_v48 = vshrl.u32 %v12600_v56, %v10376_v51 }
 0x60e   :  { %12651 = vst [vmem:[#allocation26_spill] sm:$0xff] %v10400_v57  ;;  %v1592_v44 = vsel %vm1586_vm2, %v1579_v42, 920167782  ;;  %v1417_v46 = vshrl.u32 %v12601_v13, %v10376_v51  ;;  %v1420_v2 = vshrl.u32 %v12602_v25, %v10376_v51  ;;  %v2030_v4 = vand.u32 31, %v2028_v1 }
 0x60f   :  { %v1593_v3 = vsel %vm1585_vm13, %v10367_v15, %v1592_v44  ;;  %v1427_v30 = vor.u32 %v1426_v29, %v1425_v43  ;;  %v1597_v63 = vsel %vm1585_vm13, %v1579_v42, %v1596_v12  ;;  %v10450_v35 = vor.u32 %v1414_v48, %v1413_v16 }
 0x610   :  { %v10452_v20 = vor.u32 %v1417_v46, %v1416_v9  ;;  %v10454_v27 = vor.u32 %v1420_v2, %v1419_v5  ;;  %v10456_v33 = vsub.s32 32, %v2030_v4  ;;  %v10462_v44 = vadd.s32 %v1763_v10, %v1759_v62 }
 0x611   :  { %v10466_v48 = vadd.s32 %v1790_v58, %v1784_v54  ;;  %v10471_v42 = vsel %vm1586_vm2, %v10367_v15, 2102212464  ;;  %v10475_v5 = vsel %vm1584_vm8, %v1591_v53, %v1593_v3  ;;  %v10479_v12 = vsel %vm1584_vm8, %v1595_v22, %v1597_v63 }
 0x612   :  { %12654 = vst [vmem:[#allocation32_spill] sm:$0xff] %v10456_v33  ;;  %v1441_v62 = vsel %vm1431_vm10, %v1427_v30, 1326507024  ;;  %v1436_v15 = vsel %vm1428_vm6, %v10450_v35, %v10452_v20  ;;  %v2042_v54 = vshll.u32 %v12602_v25, %v2030_v4  ;;  %v2043_v30 = vshrl.u32 %v12598_v23, %v10456_v33 }
 0x613   :  { %v1440_v53 = vsel %vm1428_vm6, %v10452_v20, %v10454_v27  ;;  %v10500_v9 = vshrl.u32 %v2028_v1, 5  ;;  %v2045_v29 = vshll.u32 %v12598_v23, %v2030_v4  ;;  %v2046_v46 = vshrl.u32 %v12599_v0, %v10456_v33 }
 0x614   :  { %4256 = vmatmul.bf16.gmra.mxu2 %v7273_v31  ;;  %v2036_v22 = vshll.u32 %v12600_v56, %v2030_v4  ;;  %v2034_v23 = vshrl.u32 %v12600_v56, %v10456_v33  ;;  %v2037_v0 = vshrl.u32 %v12601_v13, %v10456_v33  ;;  %v2039_v1 = vshll.u32 %v12601_v13, %v2030_v4 }
 0x615   :  { %12655 = vst [vmem:[#allocation33_spill] sm:$0xff] %v10500_v9  ;;  %v2044_v63 = vor.u32 %v2043_v30, %v2042_v54  ;;  %v12657_v56 = vshll.u32 %v10371_v59, 16  ;;  %vm2051_vm2 = vcmp.lt.s32.totalorder %v10500_v9, 4  ;;  %vm12403_vm3 = vcmp.lt.s32.totalorder %v10500_v9, 1 }
 0x616   :  { %vm12400_vm7 = vcmp.lt.s32.totalorder %v10500_v9, 3 }
 0x617   :  { %vm10533_vm11 = vc.u32 %v10400_v57, %v12657_v56 }
 0x61a   :  { %4207 = vmatmul.bf16.gmra.mxu0 %v7273_v31  ;;  %v1422_v31 = vshll.u32 %v12602_v25, %v1410_v38  ;;  %v1768_v38 = vsel %vm10396_vm9, 1, %v12627_v45  ;;  %vm12399_vm9 = vcmp.lt.s32.totalorder %v10500_v9, 2  ;;  %v10646_v9 = vpop.permute.xlu2 %4124 }
 0x61b   :  { %v10464_v43 = vadd.s32 %v1768_v38, %v1762_v6  ;;  %v12383_v6 = vand.u32 2147483647, %v10307_v34  ;;  %v2033_v38 = vshll.u32 %v12605_v8, %v2030_v4  ;;  %v1625_v4 = vshrl.u32 %v10475_v5, 16  ;;  %12672 = vst [vmem:[#allocation40_spill] sm:$0xff] %v10646_v9 }
 0x61c   :  { %v1424_v55 = vor.u32 %v1423_v40, %v1422_v31  ;;  %v10444_v31 = vshll.u32 %v1559_v39, 8  ;;  %v1403_v40 = vand.u32 8388607, %v12653_v24 }
 0x61d   :  { %v2023_v13 = vand.u32 8388607, %v12383_v6 }
 0x61e   :  { %12652 = vst [vmem:[#allocation27_spill] sm:$0xff] %v10444_v31  ;;  %v1437_v39 = vsel %vm1431_vm10, %v1424_v55, 920167782  ;;  %v1404_v16 = vor.u32 8388608, %v1403_v40  ;;  %v1600_v58 = vand.u32 65535, %v10444_v31  ;;  %v1442_v2 = vsel %vm1430_vm14, %v1424_v55, %v1441_v62  ;;  %v10522_v40 = vpop.permute.xlu1 %4128 }
 0x61f   :  { %v1438_v10 = vsel %vm1430_vm14, %v10454_v27, %v1437_v39  ;;  %v2040_v55 = vshrl.u32 %v12602_v25, %v10456_v33  ;;  %12656 = vst [vmem:[#allocation34_spill] sm:$0xff] %v10522_v40  ;;  %v1602_v39 = vand.u32 65535, %v10479_v12  ;;  %v2047_v25 = vor.u32 %v2046_v46, %v2045_v29 }
 0x620   :  { %v10511_v3 = vsel %vm1429_vm15, %v1436_v15, %v1438_v10  ;;  %v10513_v24 = vshll.u32 %v1404_v16, 8  ;;  %v12385_v16 = vshrl.u32 %v10479_v12, 16  ;;  %v10542_v15 = vshrl.u32 %v10444_v31, 16 }
 0x621   :  { %v1624_v10 = vand.u32 65535, %v10475_v5  ;;  %v1470_v30 = vshrl.u32 %v10511_v3, 16  ;;  %v10551_v56 = vor.u32 %v2040_v55, %v2039_v1  ;;  %v2057_v46 = vsel %vm2051_vm2, %v2044_v63, 920167782 }
 0x622   :  { %v1445_v54 = vand.u32 65535, %v10513_v24  ;;  %v10560_v5 = vmul.u32 %v12385_v16, %v1600_v58  ;;  %v10567_v1 = vmul.u32 %v1625_v4, %v1600_v58  ;;  %v1446_v55 = vshrl.u32 %v10513_v24, 16 }
 0x623   :  { %12662 = vst [vmem:[#allocation37_spill] sm:$0xff] %v10551_v56  ;;  %v1469_v6 = vand.u32 65535, %v10511_v3  ;;  %v10591_v7 = vmul.u32 %v1602_v39, %v10542_v15 }
 0x624   :  { %4261 = vmatmul.bf16.gmra.mxu2 %v7274_v18  ;;  %v10572_v40 = vmul.u32 %v1470_v30, %v1445_v54  ;;  %v1608_v37 = vshll.u32 %v10560_v5, 16  ;;  %v1630_v49 = vshll.u32 %v10567_v1, 16  ;;  %v1474_v62 = vmul.u32 %v1470_v30, %v1446_v55 }
 0x62a   :  { %4212 = vmatmul.bf16.gmra.mxu0 %v7274_v18  ;;  %v10528_v18 = vsel %vm1429_vm15, %v1440_v53, %v1442_v2  ;;  %v10547_v53 = vor.u32 %v2034_v23, %v2033_v38  ;;  %v10549_v2 = vor.u32 %v2037_v0, %v2036_v22  ;;  %v7275_v38 = vld [vmem:[%s12273_s14 + $0x70] sm:$0xff]  ;;  %v2024_v22 = vor.u32 8388608, %v2023_v13 }
 0x62b   :  { %v1448_v29 = vshrl.u32 %v10528_v18, 16  ;;  %v2061_v23 = vsel %vm2051_vm2, %v2047_v25, 1326507024  ;;  %v1604_v0 = vmul.u32 %v1602_v39, %v1600_v58  ;;  %v2058_v13 = vsel %vm12400_vm7, %v10551_v56, %v2057_v46 }
 0x62c   :  { %12660 = vst [vmem:[#allocation35_spill] sm:$0xff] %v10547_v53  ;;  %v2056_v16 = vsel %vm12403_vm3, %v10547_v53, %v10549_v2  ;;  %v1447_v25 = vand.u32 65535, %v10528_v18  ;;  %v2060_v3 = vsel %vm12403_vm3, %v10549_v2, %v10551_v56  ;;  %v2062_v19 = vsel %vm12400_vm7, %v2044_v63, %v2061_v23  ;;  %v10600_v53 = vpop.permute.xlu1 %4108 }
 0x62d   :  { %12661 = vst [vmem:[#allocation36_spill] sm:$0xff] %v10549_v2  ;;  %v10582_v34 = vmul.u32 %v1448_v29, %v1445_v54  ;;  %v10594_v50 = vshll.u32 %v2024_v22, 8  ;;  %v1626_v46 = vmul.u32 %v1624_v10, %v1600_v58  ;;  %v10597_v18 = vmul.u32 %v1624_v10, %v10542_v15 }
 0x62e   :  { %12664 = vst [vmem:[#allocation39_spill] sm:$0xff] %v10600_v53  ;;  %v10604_v2 = vsel %vm12399_vm9, %v2056_v16, %v2058_v13  ;;  %v1471_v63 = vmul.u32 %v1469_v6, %v1445_v54  ;;  %v10606_v39 = vmul.u32 %v1469_v6, %v1446_v55  ;;  %v1475_v23 = vshll.u32 %v10572_v40, 16 }
 0x62f   :  { %12663 = vst [vmem:[#allocation38_spill] sm:$0xff] %v10594_v50  ;;  %v10611_v22 = vsel %vm12399_vm9, %v2060_v3, %v2062_v19  ;;  %v1449_v58 = vmul.u32 %v1447_v25, %v1445_v54  ;;  %v10613_v10 = vmul.u32 %v1447_v25, %v1446_v55  ;;  %v1453_v60 = vshll.u32 %v10582_v34, 16 }
 0x630   :  { %v12665_v53 = vshll.u32 %v10369_v14, 16  ;;  %v10626_v6 = vsel %vm10533_vm11, 1, %v12627_v45  ;;  %v1610_v19 = vshll.u32 %v10591_v7, 16  ;;  %vm10629_vm9 = vc.u32 %v1604_v0, %v1608_v37 }
 0x631   :  { %v1614_v13 = vadd.s32 %v1608_v37, %v1604_v0  ;;  %v2065_v25 = vand.u32 65535, %v10594_v50  ;;  %v2090_v3 = vshrl.u32 %v10604_v2, 16  ;;  %vm10636_vm7 = vc.u32 %v1626_v46, %v1630_v49  ;;  %v10658_v37 = vpop.permute.xlu0 %4120 }
 0x632   :  { %vm10619_vm0 = vc.u32 %v10462_v44, %v12665_v53  ;;  %v1629_v44 = vmul.u32 %v1625_v4, %v10542_v15  ;;  %vm1479_vm11 = vc.u32 %v1471_v63, %v1475_v23  ;;  %v10642_v47 = vadd.s32 %v1475_v23, %v1471_v63  ;;  %12673 = vst [vmem:[#allocation41_spill] sm:$0xff] %v10658_v37 }
 0x633   :  { %v1455_v0 = vshll.u32 %v10613_v10, 16  ;;  %vm1457_vm3 = vc.u32 %v1449_v58, %v1453_v60  ;;  %v1459_v31 = vadd.s32 %v1453_v60, %v1449_v58  ;;  %v2066_v4 = vshrl.u32 %v10594_v50, 16 }
 0x634   :  { %4266 = vmatmul.bf16.gmra.mxu2 %v7275_v38  ;;  %v2089_v56 = vand.u32 65535, %v10604_v2  ;;  %v10650_v41 = vadd.s32 %v1630_v49, %v1626_v46  ;;  %v10652_v57 = vmul.u32 %v2090_v3, %v2065_v25  ;;  %v1452_v63 = vmul.u32 %v1448_v29, %v1446_v55  ;;  %v10679_v53 = vpop.permute.xlu1 %4100 }
 0x635   :  { %v1480_v23 = vsel %vm1479_vm11, 1, %v12627_v45  ;;  %v2067_v60 = vand.u32 65535, %v10611_v22  ;;  %v12674_v58 = vshrl.u32 %v10611_v22, 16  ;;  %v1458_v49 = vsel %vm1457_vm3, 1, %v12627_v45  ;;  %12679 = vst [vmem:[#allocation42_spill] sm:$0xff] %v10679_v53 }
 0x636   :  { %v12675_v30 = vshll.u32 %v10606_v39, 16  ;;  %v12676_v2 = vshrl.u32 %v10479_v12, 16  ;;  %v1613_v55 = vsel %vm10629_vm9, 1, %v12627_v45  ;;  %vm1461_vm11 = vc.u32 %v1459_v31, %v1455_v0 }
 0x637   :  { %v10663_v9 = vmul.u32 %v12674_v58, %v2065_v25  ;;  %v10681_v58 = vmul.u32 %v2089_v56, %v2066_v4  ;;  %v1482_v12 = vadd.s32 %v1480_v23, %v1474_v62  ;;  %v2091_v54 = vmul.u32 %v2089_v56, %v2065_v25 }
 0x638   :  { %vm1483_vm1 = vc.u32 %v10642_v47, %v12675_v30  ;;  %v1607_v29 = vmul.u32 %v12676_v2, %v10542_v15  ;;  %v12680_v30 = vshll.u32 %v10597_v18, 16  ;;  %v7276_v15 = vld [vmem:[%s12273_s14 + $0x78] sm:$0xff]  ;;  %v2069_v0 = vmul.u32 %v2067_v60, %v2065_v25 }
 0x639   :  { %v1484_v31 = vsel %vm1483_vm1, 1, %v12627_v45  ;;  %v10691_v2 = vmul.u32 %v2067_v60, %v2066_v4  ;;  %v1772_v62 = vsel %vm10619_vm0, 1, %v12627_v45  ;;  %v1476_v60 = vshrl.u32 %v10572_v40, 16 }
 0x63a   :  { %4217 = vmatmul.bf16.gmra.mxu0 %v7275_v38  ;;  %v1635_v38 = vsel %vm10636_vm7, 1, %v12627_v45  ;;  %vm10675_vm7 = vc.u32 %v1614_v13, %v1610_v19  ;;  %vm1638_vm3 = vc.u32 %v10650_v41, %v12680_v30  ;;  %v2095_v19 = vshll.u32 %v10652_v57, 16 }
 0x63b   :  { %v1637_v37 = vadd.s32 %v1635_v38, %v1629_v44  ;;  %v1460_v13 = vadd.s32 %v1458_v49, %v1452_v63  ;;  %v2073_v44 = vshll.u32 %v10663_v9, 16  ;;  %v1462_v38 = vsel %vm1461_vm11, 1, %v12627_v45 }
 0x63c   :  { %v1615_v23 = vadd.s32 %v1613_v55, %v1607_v29  ;;  %v1631_v30 = vshrl.u32 %v10567_v1, 16  ;;  %v1639_v56 = vsel %vm1638_vm3, 1, %v12627_v45  ;;  %v1617_v25 = vsel %vm10675_vm7, 1, %v12627_v45  ;;  %v10708_v55 = vpop.permute.xlu2 %4116 }
 0x63d   :  { %v1486_v49 = vadd.s32 %v1484_v31, %v1482_v12  ;;  %vm2099_vm1 = vc.u32 %v2091_v54, %v2095_v19  ;;  %v10705_v53 = vadd.s32 %v2095_v19, %v2091_v54  ;;  %v1454_v16 = vshrl.u32 %v10582_v34, 16  ;;  %v10714_v12 = vpop.permute.xlu0 %4092 }
 0x63e   :  { %v1464_v29 = vadd.s32 %v1462_v38, %v1460_v13  ;;  %v2075_v1 = vshll.u32 %v10691_v2, 16  ;;  %vm2077_vm0 = vc.u32 %v2069_v0, %v2073_v44  ;;  %v2079_v63 = vadd.s32 %v2073_v44, %v2069_v0 }
 0x63f   :  { %v1641_v50 = vadd.s32 %v1639_v56, %v1637_v37  ;;  %v2094_v52 = vmul.u32 %v2090_v3, %v2066_v4  ;;  %v1609_v46 = vshrl.u32 %v10560_v5, 16  ;;  %v1619_v33 = vadd.s32 %v1617_v25, %v1615_v23 }
 0x640   :  { %v1412_v40 = vshrl.u32 %v12605_v8, %v10376_v51  ;;  %v12681_v54 = vshrl.u32 %v10611_v22, 16  ;;  %v2100_v19 = vsel %vm2099_vm1, 1, %v12627_v45  ;;  %v1478_v13 = vshrl.u32 %v10606_v39, 16  ;;  %v10725_v51 = vpop.permute.xlu1 %4096 }
 0x641   :  { %v1487_v31 = vadd.s32 %v1486_v49, %v1476_v60  ;;  %v2078_v0 = vsel %vm2077_vm0, 1, %v12627_v45  ;;  %v12682_v3 = vshll.u32 %v10681_v58, 16  ;;  %v1456_v5 = vshrl.u32 %v10613_v10, 16 }
 0x642   :  { %v2072_v34 = vmul.u32 %v12681_v54, %v2066_v4  ;;  %v1465_v37 = vadd.s32 %v1464_v29, %v1454_v16  ;;  %vm2081_vm7 = vc.u32 %v2079_v63, %v2075_v1  ;;  %v1633_v22 = vshrl.u32 %v10597_v18, 16 }
 0x643   :  { %vm2103_vm9 = vc.u32 %v10705_v53, %v12682_v3  ;;  %v1642_v4 = vadd.s32 %v1641_v50, %v1631_v30  ;;  %v1433_v44 = vsel %vm1431_vm10, %v10454_v27, 2102212464  ;;  %v1796_v38 = vadd.s32 %v10626_v6, %v10466_v48 }
 0x644   :  { %4271 = vmatmul.bf16.gmra.mxu2 %v7276_v15  ;;  %v2102_v23 = vadd.s32 %v2100_v19, %v2094_v52  ;;  %v1611_v56 = vshrl.u32 %v10591_v7, 16  ;;  %v1620_v25 = vadd.s32 %v1619_v33, %v1609_v46  ;;  %v2080_v10 = vadd.s32 %v2078_v0, %v2072_v34  ;;  %v10763_v16 = vpop.permute.xlu2 %4112  ;;  %v12687_v34 = vld [vmem:[#allocation32_spill] sm:$0xff] }
 0x645   :  { %v2104_v60 = vsel %vm2103_vm9, 1, %v12627_v45  ;;  %v1432_v63 = vsel %vm1428_vm6, %v1412_v40, %v10450_v35  ;;  %v1488_v50 = vadd.s32 %v1487_v31, %v1478_v13  ;;  %v2082_v30 = vsel %vm2081_vm7, 1, %v12627_v45 }
 0x646   :  { %v1434_v27 = vsel %vm1430_vm14, %v10452_v20, %v1433_v44  ;;  %v12683_v52 = vshll.u32 %v10606_v39, 16  ;;  %v1764_v7 = vshrl.u32 %v10357_v36, 16  ;;  %v1774_v48 = vadd.s32 %v1772_v62, %v10464_v43  ;;  %v12693_v44 = vld [vmem:[#allocation19_spill] sm:$0xff] }
 0x647   :  { %v1589_v35 = vsel %vm1585_vm13, %v10362_v26, %v10471_v42  ;;  %v1643_v45 = vadd.s32 %v1642_v4, %v1633_v22  ;;  %v2096_v6 = vshrl.u32 %v10652_v57, 16  ;;  %v2106_v20 = vadd.s32 %v2104_v60, %v2102_v23  ;;  %v12696_v23 = vld [vmem:[#allocation26_spill] sm:$0xff]  ;;  %v12697_v60 = vld [vmem:[#allocation20_spill] sm:$0xff] }
 0x648   :  { %v10747_v33 = vadd.s32 %v10642_v47, %v12683_v52  ;;  %v10756_v49 = vadd.s32 %v1620_v25, %v1611_v56  ;;  %v12684_v39 = vshll.u32 %v10597_v18, 16  ;;  %v2074_v36 = vshrl.u32 %v10663_v9, 16  ;;  %v10786_v54 = vpop.permute.xlu1 %4076 }
 0x649   :  { %v2084_v43 = vadd.s32 %v2082_v30, %v2080_v10  ;;  %v1435_v62 = vsel %vm1429_vm15, %v1432_v63, %v1434_v27  ;;  %v1492_v26 = vadd.s32 1, %v1488_v50  ;;  %v1743_v57 = vsel %vm1741_vm12, %v10300_v21, 2102212464  ;;  %12686 = vst [vmem:[#allocation43_spill] sm:$0xff] %v10786_v54  ;;  %v7317_v10 = vld [vmem:[%s12271_s12] sm:$0xff] }
 0x64a   :  { %4222 = vmatmul.bf16.gmra.mxu0 %v7276_v15  ;;  %v10742_v15 = vadd.s32 %v1465_v37, %v1456_v5  ;;  %v10761_v47 = vadd.s32 %v10650_v41, %v12684_v39  ;;  %v1788_v42 = vshrl.u32 %v10371_v59, 16  ;;  %v12685_v18 = vshrl.u32 %v10355_v11, 16  ;;  %v10776_v41 = vpop.permute.xlu0 %4088  ;;  %v12690_v5 = vld [vmem:[#allocation37_spill] sm:$0xff] }
 0x64b   :  { %v1766_v9 = vshrl.u32 %v10369_v14, 16  ;;  %v1775_v1 = vadd.s32 %v1774_v48, %v1764_v7  ;;  %v1590_v61 = vsel %vm1584_vm8, %v10386_v32, %v1589_v35  ;;  %v1647_v46 = vadd.s32 1, %v1643_v45  ;;  %v12689_v32 = vld [vmem:[#allocation12_spill] sm:$0xff]  ;;  %v12691_v37 = vld [vmem:[#allocation33_spill] sm:$0xff]  ;;  %v12699_v7 = vld [vmem:[#allocation35_spill] sm:$0xff] }
 0x64c   :  { %v1797_v29 = vadd.s32 %v1796_v38, %v12685_v18  ;;  %vm1491_vm13 = vc.u32 %v10742_v15, %v10747_v33  ;;  %v2098_v21 = vshrl.u32 %v10681_v58, 16  ;;  %v2107_v40 = vadd.s32 %v2106_v20, %v2096_v6  ;;  %v12701_v48 = vld [vmem:[#allocation36_spill] sm:$0xff] }
 0x64d   :  { %vm1646_vm12 = vc.u32 %v10756_v49, %v10761_v47  ;;  %v1489_v11 = vmul.u32 %v10513_v24, %v1435_v62  ;;  %v2032_v19 = vshrl.u32 %v12605_v8, %v12687_v34  ;;  %v2076_v14 = vshrl.u32 %v10691_v2, 16  ;;  %v12692_v24 = vld [vmem:[#allocation27_spill] sm:$0xff]  ;;  %v10830_v62 = vpop.permute.xlu2 %4104 }
 0x64e   :  { %v2085_v13 = vadd.s32 %v2084_v43, %v2074_v36  ;;  %v1493_v31 = vsel %vm1491_vm13, %v1492_v26, %v1488_v50  ;;  %v1742_v0 = vsel %vm1738_vm4, %v12689_v32, %v12688_v28  ;;  %v1798_v3 = vadd.s32 %v1797_v29, %v1788_v42  ;;  %v12705_v26 = vld [vmem:[#allocation23_spill] sm:$0xff] }
 0x64f   :  { %v2053_v22 = vsel %vm2051_vm2, %v12690_v5, 2102212464  ;;  %v1644_v4 = vmul.u32 %v12692_v24, %v1590_v61  ;;  %vm12694_vm8 = vcmp.lt.s32.totalorder %v10272_v17, 3  ;;  %v10802_v38 = vadd.s32 %v1775_v1, %v1766_v9 }
 0x650   :  { %v1744_v8 = vsel %vm12694_vm8, %v12693_v44, %v1743_v57  ;;  %v12695_v2 = vshll.u32 %v10371_v59, 16  ;;  %v1648_v25 = vsel %vm1646_vm12, %v1647_v46, %v1643_v45  ;;  %v1962_v63 = vshll.u32 %v12697_v60, 30  ;;  %v10845_v61 = vpop.permute.xlu1 %4072  ;;  %v12710_v46 = vld [vmem:[#allocation38_spill] sm:$0xff] }
 0x651   :  { %v2108_v50 = vadd.s32 %v2107_v40, %v2098_v21  ;;  %v1494_v30 = vadd.s32 %v1493_v31, %v1489_v11  ;;  %vm4522_vm4 = vcmask 1014784   ;;  %vm12700_vm10 = vcmp.lt.s32.totalorder %v12691_v37, 1  ;;  %12709 = vst [vmem:[#allocation12_spill] sm:$0xff] %v10845_v61 }
 0x652   :  { %v10807_v56 = vadd.s32 %v12696_v23, %v12695_v2  ;;  %v2052_v59 = vsel %vm12700_vm10, %v2032_v19, %v12699_v7  ;;  %vm12702_vm6 = vcmp.lt.s32.totalorder %v12691_v37, 3  ;;  %v10821_v45 = vadd.s32 %v2085_v13, %v2076_v14  ;;  %v10840_v18 = vpop.permute.xlu0 %4068 }
 0x653   :  { %v2054_v35 = vsel %vm12702_vm6, %v12701_v48, %v2053_v22  ;;  %v12703_v6 = vshll.u32 %v10681_v58, 16  ;;  %vm12704_vm14 = vcmp.lt.s32.totalorder %v10272_v17, 2  ;;  %v1802_v36 = vadd.s32 1, %v1798_v3  ;;  %12707 = vst [vmem:[#allocation11_spill] sm:$0xff] %v10840_v18  ;;  %v12708_v17 = vld [vmem:[#allocation21_spill] sm:$0xff] }
 0x654   :  { %v1745_v39 = vsel %vm12704_vm14, %v1742_v0, %v1744_v8  ;;  %v1649_v43 = vadd.s32 %v1648_v25, %v1644_v4  ;;  %vm1801_vm15 = vc.u32 %v10802_v38, %v10807_v56  ;;  %v10836_v57 = vsub.s32 %v12705_v26, %v1962_v63  ;;  %v7318_v25 = vld [vmem:[%s12271_s12 + $0x8] sm:$0xff] }
 0x655   :  { %v10826_v20 = vadd.s32 %v10705_v53, %v12703_v6  ;;  %vm12706_vm2 = vcmp.lt.s32.totalorder %v12691_v37, 2  ;;  %v2112_v53 = vadd.s32 1, %v2108_v50  ;;  %v1495_v42 = vadd.s32 536870912, %v1494_v30  ;;  %v10860_v24 = vpop.permute.xlu2 %4084 }
 0x656   :  { %v2055_v58 = vsel %vm12706_vm2, %v2052_v59, %v2054_v35  ;;  %v1799_v29 = vmul.u32 %v12708_v17, %v1745_v39  ;;  %v1803_v9 = vsel %vm1801_vm15, %v1802_v36, %v1798_v3  ;;  %v1650_v1 = vadd.s32 536870912, %v1649_v43 }
 0x657   :  { %v4188_v27 = vpop.f32.mrf.mxu0  ;;  %v10813_v52 = vpop.f32.mrf.mxu2  ;;  %vm2111_vm11 = vc.u32 %v10821_v45, %v10826_v20  ;;  %v2109_v21 = vmul.u32 %v12710_v46, %v2055_v58  ;;  %v1965_v11 = vsub.s32 0, %v10836_v57  ;;  %v10850_v19 = vshrl.u32 %v1495_v42, 30 }
 0x658   :  { %12698 = vst [vmem:[#allocation32_spill] sm:$0xff] %v10813_v52  ;;  %v4189_v40 = vadd.f32 %v4188_v27, %v10840_v18  ;;  %v2113_v34 = vsel %vm2111_vm11, %v2112_v53, %v2108_v50  ;;  %vm1964_vm3 = vcmp.lt.s32.totalorder %v10836_v57, 0  ;;  %v1804_v31 = vadd.s32 %v1803_v9, %v1799_v29 }
 0x659   :  { %v10856_v32 = vshrl.u32 %v1650_v1, 30  ;;  %v2114_v0 = vadd.s32 %v2113_v34, %v2109_v21  ;;  %v1966_v37 = vsel %vm1964_vm3, %v1965_v11, %v10836_v57  ;;  %v1497_v22 = vshll.u32 %v10850_v19, 30 }
 0x65a   :  { %6882 = vmatmul.msk.bf16.vlgmr.msrb.gmra.mxu0 %vm4522_vm4, %v7317_v10  ;;  %v4277_v3 = vmax.f32 %v4189_v40, 0.0  ;;  %v1805_v4 = vadd.s32 536870912, %v1804_v31  ;;  %v1967_v2 = vclz %v1966_v37 }
 0x65b   :  { %v1652_v8 = vshll.u32 %v10856_v32, 30  ;;  %v2115_v23 = vadd.s32 536870912, %v2114_v0  ;;  %v10868_v10 = vsub.s32 %v1494_v30, %v1497_v22  ;;  %v12717_v22 = vld [vmem:[#allocation9_spill] sm:$0xff] }
 0x65c   :  { %v10872_v27 = vshrl.u32 %v1805_v4, 30  ;;  %v6592_v59 = vadd.s32 4294967294, %v1967_v2  ;;  %v12718_v4 = vld [vmem:[#allocation25_spill] sm:$0xff] }
 0x65d   :  { %v10874_v7 = vsub.s32 %v1649_v43, %v1652_v8  ;;  %v10876_v48 = vshrl.u32 %v2115_v23, 30  ;;  %v1500_v35 = vsub.s32 0, %v10868_v10  ;;  %vm1499_vm1 = vcmp.lt.s32.totalorder %v10868_v10, 0  ;;  %v10883_v39 = vpop.permute.xlu2 %4080 }
 0x65e   :  { %v1807_v6 = vshll.u32 %v10872_v27, 30  ;;  %12714 = vst [vmem:[#allocation19_spill] sm:$0xff] %v10883_v39  ;;  %vm6593_vm0 = vcmp.lt.s32.totalorder %v6592_v59, 0  ;;  %v1955_v8 = vadd.s32 %v12718_v4, %v12717_v22 }
 0x65f   :  { %v4190_v14 = vpop.f32.mrf.mxu0  ;;  %v10852_v13 = vpop.f32.mrf.mxu2  ;;  %v1655_v30 = vsub.s32 0, %v10874_v7  ;;  %v2117_v36 = vshll.u32 %v10876_v48, 30  ;;  %vm1654_vm9 = vcmp.lt.s32.totalorder %v10874_v7, 0  ;;  %v1501_v26 = vsel %vm1499_vm1, %v1500_v35, %v10868_v10 }
 0x660   :  { %12711 = vst [vmem:[#allocation37_spill] sm:$0xff] %v10852_v13  ;;  %v4191_v28 = vadd.f32 %v4190_v14, %v10845_v61  ;;  %v10891_v42 = vsub.s32 %v1804_v31, %v1807_v6  ;;  %v1970_v29 = vsel %vm6593_vm0, 0, %v6592_v59  ;;  %v1502_v46 = vclz %v1501_v26 }
 0x661   :  { %v1656_v9 = vsel %vm1654_vm9, %v1655_v30, %v10874_v7  ;;  %v10895_v1 = vsub.s32 %v2114_v0, %v2117_v36  ;;  %v1975_v14 = vsub.s32 4294967266, %v1970_v29  ;;  %v1971_v2 = vsub.s32 32, %v1970_v29 }
 0x662   :  { %v4279_v5 = vmax.f32 %v4191_v28, 0.0  ;;  %v1810_v11 = vsub.s32 0, %v10891_v42  ;;  %vm1809_vm7 = vcmp.lt.s32.totalorder %v10891_v42, 0  ;;  %v1657_v28 = vclz %v1656_v9 }
 0x663   :  { %v2120_v31 = vsub.s32 0, %v10895_v1  ;;  %vm2119_vm13 = vcmp.lt.s32.totalorder %v10895_v1, 0  ;;  %v1972_v6 = vshll.u32 %v10836_v57, %v1970_v29  ;;  %v1973_v30 = vshrl.u32 %v1955_v8, %v1971_v2 }
 0x664   :  { %v10862_v44 = vpack.c.bf16 %v4279_v5, %v4277_v3  ;;  %v6583_v3 = vadd.s32 4294967294, %v1502_v46  ;;  %v7319_v5 = vld [vmem:[%s12271_s12 + $0x10] sm:$0xff]  ;;  %v1811_v23 = vsel %vm1809_vm7, %v1810_v11, %v10891_v42 }
 0x665   :  { %v2121_v59 = vsel %vm2119_vm13, %v2120_v31, %v10895_v1  ;;  %v1812_v35 = vclz %v1811_v23  ;;  %v1645_v23 = vadd.s32 %v10761_v47, %v10756_v49 }
 0x666   :  { %12712 = vst [vmem:[#allocation33_spill] sm:$0xff] %v10862_v44  ;;  %vm6584_vm12 = vcmp.lt.s32.totalorder %v6583_v3, 0 }
 0x667   :  { %v4193_v63 = vpop.f32.mrf.mxu0  ;;  %v10870_v50 = vpop.f32.mrf.mxu2  ;;  %v1505_v26 = vsel %vm6584_vm12, 0, %v6583_v3  ;;  %v1490_v3 = vadd.s32 %v10747_v33, %v10742_v15 }
 0x668   :  { %12713 = vst [vmem:[#allocation27_spill] sm:$0xff] %v10870_v50  ;;  %v4194_v43 = vadd.f32 %v4193_v63, %v10786_v54  ;;  %v6586_v63 = vadd.s32 4294967294, %v1657_v28  ;;  %v1506_v22 = vsub.s32 32, %v1505_v26  ;;  %v1507_v33 = vshll.u32 %v10868_v10, %v1505_v26 }
 0x66a   :  { %6883 = vmatmul.msk.bf16.gmra.mxu0 %vm4522_vm4, %v7318_v25  ;;  %v4281_v21 = vmax.f32 %v4194_v43, 0.0  ;;  %v1976_v25 = vadd.s32 127, %v1975_v14  ;;  %v2122_v43 = vclz %v2121_v59  ;;  %vm6587_vm8 = vcmp.lt.s32.totalorder %v6586_v63, 0 }
 0x66b   :  { %v1974_v14 = vor.u32 %v1973_v30, %v1972_v6 }
 0x66c   :  { %v1977_v36 = vshll.u32 %v1976_v25, 23  ;;  %v6595_v31 = vadd.s32 4294967294, %v2122_v43 }
 0x66d   :  { %v1981_v2 = vcvt.s32.f32 %v1974_v14 }
 0x66e   :  { %v1978_v28 = vor.u32 4788187, %v1977_v36  ;;  %vm6596_vm6 = vcmp.lt.s32.totalorder %v6595_v31, 0  ;;  %v1508_v36 = vshrl.u32 %v1490_v3, %v1506_v22 }
 0x66f   :  { %v4195_v58 = vpop.f32.mrf.mxu0  ;;  %v10889_v53 = vpop.f32.mrf.mxu2  ;;  %v2125_v15 = vsel %vm6596_vm6, 0, %v6595_v31 }
 0x670   :  { %12715 = vst [vmem:[#allocation26_spill] sm:$0xff] %v10889_v53  ;;  %v4196_v17 = vadd.f32 %v4195_v58, %v10883_v39  ;;  %v1979_v8 = vand.u32 2147483647, %v1978_v28  ;;  %v2130_v47 = vsub.s32 4294967266, %v2125_v15  ;;  %v1509_v14 = vor.u32 %v1508_v36, %v1507_v33 }
 0x672   :  { %v4283_v40 = vmax.f32 %v4196_v17, 0.0  ;;  %v6589_v17 = vadd.s32 4294967294, %v1812_v35  ;;  %v2131_v3 = vadd.s32 127, %v2130_v47 }
 0x674   :  { %v10898_v34 = vpack.c.bf16 %v4283_v40, %v4281_v21  ;;  %v1660_v21 = vsel %vm6587_vm8, 0, %v6586_v63  ;;  %v1510_v40 = vsub.s32 4294967266, %v1505_v26  ;;  %vm6590_vm10 = vcmp.lt.s32.totalorder %v6589_v17, 0  ;;  %v7320_v63 = vld [vmem:[%s12271_s12 + $0x18] sm:$0xff] }
 0x675   :  { %v1665_v29 = vsub.s32 4294967266, %v1660_v21  ;;  %v1661_v25 = vsub.s32 32, %v1660_v21  ;;  %v1815_v59 = vsel %vm6590_vm10, 0, %v6589_v17 }
 0x676   :  { %12716 = vst [vmem:[#allocation20_spill] sm:$0xff] %v10898_v34  ;;  %v1816_v31 = vsub.s32 32, %v1815_v59 }
 0x677   :  { %v4198_v0 = vpop.f32.mrf.mxu0  ;;  %v10906_v37 = vpop.f32.mrf.mxu2  ;;  %v1666_v35 = vadd.s32 127, %v1665_v29  ;;  %v1663_v49 = vshrl.u32 %v1645_v23, %v1661_v25  ;;  %v1516_v23 = vcvt.s32.f32 %v1509_v14 }
 0x678   :  { %v4199_v58 = vadd.f32 %v4198_v0, %v10860_v24  ;;  %v1511_v0 = vadd.s32 127, %v1510_v40  ;;  %v1662_v40 = vshll.u32 %v10874_v7, %v1660_v21  ;;  %v2110_v7 = vadd.s32 %v10826_v20, %v10821_v45 }
 0x679   :  { %v2126_v21 = vsub.s32 32, %v2125_v15  ;;  %v1817_v45 = vshll.u32 %v10891_v42, %v1815_v59 }
 0x67a   :  { %6884 = vmatmul.msk.bf16.gmra.mxu0 %vm4522_vm4, %v7319_v5  ;;  %v4285_v5 = vmax.f32 %v4199_v58, 0.0  ;;  %v1512_v43 = vshll.u32 %v1511_v0, 23  ;;  %v1982_v58 = vmul.f32 %v1981_v2, %v1979_v8  ;;  %v1664_v26 = vor.u32 %v1663_v49, %v1662_v40 }
 0x67b   :  { %v2132_v40 = vshll.u32 %v2131_v3, 23 }
 0x67c   :  { %v1513_v17 = vor.u32 4788187, %v1512_v43  ;;  %v1983_v28 = vxor.u32 2147483648, %v1982_v58  ;;  %v2127_v43 = vshll.u32 %v10895_v1, %v2125_v15 }
 0x67e   :  { %v1514_v2 = vand.u32 2147483647, %v1513_v17 }
 0x67f   :  { %v4200_v9 = vpop.f32.mrf.mxu0  ;;  %v10915_v46 = vpop.f32.mrf.mxu2 }
 0x680   :  { %12719 = vst [vmem:[#allocation35_spill] sm:$0xff] %v10915_v46  ;;  %v4201_v11 = vadd.f32 %v4200_v9, %v10776_v41  ;;  %v1820_v9 = vsub.s32 4294967266, %v1815_v59  ;;  %v1517_v47 = vmul.f32 %v1516_v23, %v1514_v2  ;;  %v7321_v59 = vld [vmem:[%s12271_s12 + $0x20] sm:$0xff]  ;;  %v12727_v2 = vld [vmem:[#allocation8_spill] sm:$0xff]  ;;  %v1830_v46 = vsub.s32 4, %v10872_v27 }
 0x681   :  { %vm1553_vm11 = vcmp.lt.s32.totalorder %v12727_v2, 0 }
 0x682   :  { %v4287_v57 = vmax.f32 %v4201_v11, 0.0  ;;  %v1667_v11 = vshll.u32 %v1666_v35, 23  ;;  %v1821_v10 = vadd.s32 127, %v1820_v9  ;;  %v2128_v9 = vshrl.u32 %v2110_v7, %v2126_v21 }
 0x684   :  { %v10920_v4 = vpack.c.bf16 %v4287_v57, %v4285_v5  ;;  %v1800_v5 = vadd.s32 %v10807_v56, %v10802_v38  ;;  %v12721_v57 = vld [vmem:[#allocation31_spill] sm:$0xff]  ;;  %v1668_v22 = vor.u32 4788187, %v1667_v11  ;;  %v1822_v35 = vshll.u32 %v1821_v10, 23 }
 0x685   :  { %vm1863_vm14 = vcmp.lt.s32.totalorder %v12721_v57, 0  ;;  %v12722_v56 = vand.u32 2147483647, %v12721_v57  ;;  %v2129_v17 = vor.u32 %v2128_v9, %v2127_v43  ;;  %v1518_v10 = vxor.u32 2147483648, %v1517_v47 }
 0x686   :  { %12720 = vst [vmem:[#allocation36_spill] sm:$0xff] %v10920_v4  ;;  %v1818_v20 = vshrl.u32 %v1800_v5, %v1816_v31  ;;  %v1669_v49 = vand.u32 2147483647, %v1668_v22  ;;  %v1823_v42 = vor.u32 4788187, %v1822_v35  ;;  %vm2004_vm6 = vweird.f32 %v12721_v57 }
 0x687   :  { %v4203_v6 = vpop.f32.mrf.mxu0  ;;  %v10927_v30 = vpop.f32.mrf.mxu2  ;;  %vm10943_vm15 = vcmp.le.f32.partialorder %v12722_v56, 0.7853982  ;;  %v2136_v3 = vcvt.s32.f32 %v2129_v17 }
 0x688   :  { %v4204_v29 = vadd.f32 %v4203_v6, %v10714_v12  ;;  %v1671_v6 = vcvt.s32.f32 %v1664_v26  ;;  %v12726_v26 = vld [vmem:[#allocation22_spill] sm:$0xff] }
 0x689   :  { %vm1398_vm2 = vcmp.lt.s32.totalorder %v12726_v26, 0  ;;  %v12728_v23 = vand.u32 2147483647, %v12726_v26 }
 0x68a   :  { %6885 = vmatmul.msk.bf16.gmra.mxu0 %vm4522_vm4, %v7320_v63  ;;  %v1984_v63 = vsel %vm1863_vm14, %v1983_v28, %v1982_v58  ;;  %v4289_v33 = vmax.f32 %v4204_v29, 0.0  ;;  %v1819_v58 = vor.u32 %v1818_v20, %v1817_v45  ;;  %v2133_v28 = vor.u32 4788187, %v2132_v40 }
 0x68b   :  { %v10956_v14 = vsel %vm10943_vm15, %v12721_v57, %v1984_v63  ;;  %v1672_v1 = vmul.f32 %v1671_v6, %v1669_v49  ;;  %v1824_v29 = vand.u32 2147483647, %v1823_v42  ;;  %vm10972_vm3 = vcmp.le.f32.partialorder %v12728_v23, 0.7853982  ;;  %v12734_v42 = vld [vmem:[#allocation28_spill] sm:$0xff] }
 0x68c   :  { %v1989_v31 = vmul.f32 %v10956_v14, %v10956_v14  ;;  %v1826_v7 = vcvt.s32.f32 %v1819_v58  ;;  %v2134_v21 = vand.u32 2147483647, %v2133_v28  ;;  %v1519_v56 = vsel %vm1398_vm2, %v1518_v10, %v1517_v47 }
 0x68d   :  { %v1673_v22 = vxor.u32 2147483648, %v1672_v1  ;;  %v12731_v20 = vand.u32 2147483647, %v12727_v2  ;;  %vm1708_vm0 = vcmp.lt.s32.totalorder %v12734_v42, 0 }
 0x68e   :  { %v1827_v63 = vmul.f32 %v1826_v7, %v1824_v29  ;;  %v2137_v45 = vmul.f32 %v2136_v3, %v2134_v21  ;;  %v1990_v9 = vmul.f32 -0.001358992, %v1989_v31  ;;  %v1985_v29 = vsub.s32 4, %v12697_v60 }
 0x68f   :  { %v4205_v0 = vpop.f32.mrf.mxu0  ;;  %v10938_v8 = vpop.f32.mrf.mxu2  ;;  %vm10980_vm1 = vcmp.le.f32.partialorder %v12731_v20, 0.7853982  ;;  %v1674_v6 = vsel %vm1553_vm11, %v1673_v22, %v1672_v1  ;;  %v12735_v1 = vld [vmem:[#allocation24_spill] sm:$0xff]  ;;  %v12736_v7 = vand.u32 2147483647, %v12734_v42 }
 0x690   :  { %v4206_v38 = vadd.f32 %v4205_v0, %v10725_v51  ;;  %v1997_v0 = vmul.f32 -0.00019511016, %v1989_v31  ;;  %v1828_v49 = vxor.u32 2147483648, %v1827_v63  ;;  %v10998_v47 = vsel %vm10980_vm1, %v12727_v2, %v1674_v6 }
 0x691   :  { %v1991_v17 = vadd.f32 0.041655596, %v1990_v9  ;;  %vm2018_vm9 = vcmp.lt.s32.totalorder %v12735_v1, 0  ;;  %v11008_v10 = vmul.f32 %v10998_v47, %v10998_v47  ;;  %vm11013_vm7 = vcmp.le.f32.partialorder %v12736_v7, 0.7853982 }
 0x692   :  { %v4291_v36 = vmax.f32 %v4206_v38, 0.0  ;;  %v1998_v40 = vadd.f32 0.008332121, %v1997_v0  ;;  %v1829_v3 = vsel %vm1708_vm0, %v1828_v49, %v1827_v63  ;;  %v7322_v0 = vld [vmem:[%s12271_s12 + $0x28] sm:$0xff]  ;;  %v12739_v23 = vand.u32 2147483647, %v12735_v1 }
 0x693   :  { %v1992_v63 = vmul.f32 %v1991_v17, %v1989_v31  ;;  %v11038_v49 = vsel %vm11013_vm7, %v12734_v42, %v1829_v3  ;;  %v1687_v7 = vmul.f32 -0.00019511016, %v11008_v10 }
 0x694   :  { %v10951_v11 = vpack.c.bf16 %v4291_v36, %v4289_v33  ;;  %v10989_v33 = vsel %vm10972_vm3, %v12726_v26, %v1519_v56  ;;  %v1999_v28 = vmul.f32 %v1998_v40, %v1989_v31  ;;  %vm11025_vm13 = vcmp.le.f32.partialorder %v12739_v23, 0.7853982 }
 0x695   :  { %v11002_v58 = vmul.f32 %v10989_v33, %v10989_v33  ;;  %v1986_v23 = vsel %vm1863_vm14, %v1985_v29, %v12697_v60  ;;  %v11053_v3 = vmul.f32 %v11038_v49, %v11038_v49  ;;  %v1688_v29 = vadd.f32 0.008332121, %v1687_v7 }
 0x696   :  { %12725 = vst [vmem:[#allocation23_spill] sm:$0xff] %v10951_v11  ;;  %v2000_v40 = vadd.f32 -0.16666654, %v1999_v28  ;;  %v1993_v28 = vadd.f32 -0.4999988, %v1992_v63  ;;  %v1988_v34 = vsel %vm10943_vm15, 0, %v1986_v23 }
 0x697   :  { %v10961_v15 = vpop.f32.mrf.mxu0  ;;  %v10963_v5 = vpop.f32.mrf.mxu2  ;;  %v1532_v22 = vmul.f32 -0.00019511016, %v11002_v58  ;;  %v1525_v17 = vmul.f32 -0.001358992, %v11002_v58  ;;  %v2005_v61 = vadd.s32 3, %v1988_v34  ;;  %v1689_v52 = vmul.f32 %v1688_v29, %v11008_v10 }
 0x698   :  { %v2001_v44 = vmul.f32 %v2000_v40, %v1989_v31  ;;  %v1994_v40 = vmul.f32 %v1993_v28, %v1989_v31  ;;  %v1842_v25 = vmul.f32 -0.00019511016, %v11053_v3  ;;  %v1520_v7 = vsub.s32 4, %v10850_v19 }
 0x699   :  { %v2006_v39 = vand.u32 3, %v2005_v61  ;;  %v1690_v34 = vadd.f32 -0.16666654, %v1689_v52 }
 0x69a   :  { %6886 = vmatmul.msk.bf16.gmra.mxu0 %vm4522_vm4, %v7321_v59  ;;  %v2138_v59 = vxor.u32 2147483648, %v2137_v45  ;;  %v2002_v13 = vadd.f32 1.0, %v2001_v44  ;;  %v1995_v11 = vadd.f32 1.0, %v1994_v40  ;;  %v1843_v50 = vadd.f32 0.008332121, %v1842_v25 }
 0x69b   :  { %v1675_v44 = vsub.s32 4, %v10856_v32  ;;  %v1521_v28 = vsel %vm1398_vm2, %v1520_v7, %v10850_v19  ;;  %vm2011_vm12 = vcmp.eq.s32.totalorder %v2006_v39, 2  ;;  %vm2008_vm8 = vcmp.eq.s32.totalorder %v2006_v39, 0 }
 0x69c   :  { %v2139_v20 = vsel %vm2018_vm9, %v2138_v59, %v2137_v45  ;;  %v1533_v59 = vadd.f32 0.008332121, %v1532_v22  ;;  %v2003_v53 = vmul.f32 %v2002_v13, %v10956_v14  ;;  %v2012_v14 = vxor.u32 2147483648, %v1995_v11 }
 0x69d   :  { %v11047_v45 = vsel %vm11025_vm13, %v12735_v1, %v2139_v20  ;;  %v1526_v20 = vadd.f32 0.041655596, %v1525_v17  ;;  %v1844_v52 = vmul.f32 %v1843_v50, %v11053_v3  ;;  %v1523_v19 = vsel %vm10972_vm3, 0, %v1521_v28 }
 0x69e   :  { %v11059_v60 = vmul.f32 %v11047_v45, %v11047_v45  ;;  %v1534_v22 = vmul.f32 %v1533_v59, %v11002_v58  ;;  %v2009_v40 = vxor.u32 2147483648, %v2003_v53  ;;  %v1676_v25 = vsel %vm1553_vm11, %v1675_v44, %v10856_v32 }
 0x69f   :  { %v10991_v36 = vpop.f32.mrf.mxu0  ;;  %v10993_v43 = vpop.f32.mrf.mxu2  ;;  %v1527_v59 = vmul.f32 %v1526_v20, %v11002_v58  ;;  %v1540_v50 = vadd.s32 3, %v1523_v19  ;;  %vm2007_vm10 = vcmp.lt.s32.totalorder %v2006_v39, 2  ;;  %v2013_v38 = vsel %vm2011_vm12, %v2012_v14, %v2003_v53 }
 0x6a0   :  { %v2152_v23 = vmul.f32 -0.00019511016, %v11059_v60  ;;  %v1535_v18 = vadd.f32 -0.16666654, %v1534_v22  ;;  %v7323_v22 = vld [vmem:[%s12271_s12 + $0x30] sm:$0xff]  ;;  %v2010_v54 = vsel %vm2008_vm8, %v1995_v11, %v2009_v40  ;;  %v1831_v14 = vsel %vm1708_vm0, %v1830_v46, %v10872_v27 }
 0x6a1   :  { %v1528_v20 = vadd.f32 -0.4999988, %v1527_v59  ;;  %v1845_v28 = vadd.f32 -0.16666654, %v1844_v52  ;;  %v2014_v35 = vsel %vm2007_vm10, %v2010_v54, %v2013_v38  ;;  %v1833_v54 = vsel %vm11013_vm7, 0, %v1831_v14 }
 0x6a2   :  { %v2153_v31 = vadd.f32 0.008332121, %v2152_v23  ;;  %v1536_v29 = vmul.f32 %v1535_v18, %v11002_v58  ;;  %v1691_v23 = vmul.f32 %v1690_v34, %v11008_v10  ;;  %v2140_v34 = vsub.s32 4, %v10876_v48 }
 0x6a3   :  { %v1529_v59 = vmul.f32 %v1528_v20, %v11002_v58  ;;  %v1846_v11 = vmul.f32 %v1845_v28, %v11053_v3  ;;  %v2015_v39 = vsel %vm2004_vm6, nan, %v2014_v35  ;;  %vm1849_vm10 = vweird.f32 %v12734_v42  ;;  %v12751_v42 = vld [vmem:[#allocation27_spill] sm:$0xff] }
 0x6a4   :  { %v2154_v18 = vmul.f32 %v2153_v31, %v11059_v60  ;;  %v1537_v7 = vadd.f32 1.0, %v1536_v29  ;;  %v1678_v31 = vsel %vm10980_vm1, 0, %v1676_v25  ;;  %v1692_v44 = vadd.f32 1.0, %v1691_v23 }
 0x6a5   :  { %v1695_v20 = vadd.s32 3, %v1678_v31  ;;  %v1847_v23 = vadd.f32 1.0, %v1846_v11  ;;  %v2182_v28 = vpack.c.bf16 %v2015_v39, %v2015_v39  ;;  %vm1539_vm1 = vweird.f32 %v12726_v26  ;;  %v12743_v11 = vld [vmem:[#allocation17_spill] sm:$0xff]  ;;  %v12744_v26 = vld [vmem:[#allocation40_spill] sm:$0xff] }
 0x6a6   :  { %v2155_v32 = vadd.f32 -0.16666654, %v2154_v18  ;;  %v1538_v29 = vmul.f32 %v1537_v7, %v10989_v33  ;;  %v1693_v52 = vmul.f32 %v1692_v44, %v10998_v47  ;;  %v12742_v7 = vld [vmem:[#allocation18_spill] sm:$0xff]  ;;  %v2178_v35 = vpack.c.bf16 %v12743_v11, %v12743_v11 }
 0x6a7   :  { %v11031_v6 = vpop.f32.mrf.mxu0  ;;  %v11033_v9 = vpop.f32.mrf.mxu2  ;;  %v1696_v57 = vand.u32 3, %v1695_v20  ;;  %v11124_v56 = vmul.f32 %v1847_v23, %v11038_v49  ;;  %v11134_v49 = vunpack.c.l.b16 %v2182_v28 }
 0x6a8   :  { %v2156_v33 = vmul.f32 %v2155_v32, %v11059_v60  ;;  %v1544_v40 = vxor.u32 2147483648, %v1538_v29  ;;  %v1699_v47 = vxor.u32 2147483648, %v1693_v52  ;;  %v1850_v32 = vadd.s32 3, %v1833_v54 }
 0x6a9   :  { %vm1698_vm11 = vcmp.eq.s32.totalorder %v1696_v57, 0  ;;  %vm1701_vm3 = vcmp.eq.s32.totalorder %v1696_v57, 2  ;;  %vm1697_vm0 = vcmp.lt.s32.totalorder %v1696_v57, 2  ;;  %v12745_v57 = vld [vmem:[#allocation41_spill] sm:$0xff]  ;;  %v11153_v23 = vunpack.c.l.b16 %v2178_v35 }
 0x6aa   :  { %6887 = vmatmul.msk.bf16.gmra.mxu0 %vm4522_vm4, %v7322_v0  ;;  %v1680_v0 = vmul.f32 -0.001358992, %v11008_v10  ;;  %v2157_v46 = vadd.f32 1.0, %v2156_v33  ;;  %v11136_v14 = vand.u32 3, %v1850_v32  ;;  %v11184_v35 = vadd.f32 %v10938_v8, %v10725_v51 }
 0x6ab   :  { %v4211_v51 = vadd.f32 %v10991_v36, %v10830_v62 }
 0x6ac   :  { %v1681_v17 = vadd.f32 0.041655596, %v1680_v0  ;;  %vm1852_vm12 = vcmp.lt.s32.totalorder %v11136_v14, 2 }
 0x6ae   :  { %v1682_v0 = vmul.f32 %v1681_v17, %v11008_v10 }
 0x6af   :  { %v11063_v4 = vpop.f32.mrf.mxu0  ;;  %v11065_v63 = vpop.f32.mrf.mxu2 }
 0x6b0   :  { %v1683_v17 = vadd.f32 -0.4999988, %v1682_v0  ;;  %v1541_v0 = vand.u32 3, %v1540_v50 }
 0x6b2   :  { %v1684_v58 = vmul.f32 %v1683_v17, %v11008_v10  ;;  %v2141_v10 = vsel %vm2018_vm9, %v2140_v34, %v10876_v48  ;;  %vm1543_vm14 = vcmp.eq.s32.totalorder %v1541_v0, 0  ;;  %vm1546_vm15 = vcmp.eq.s32.totalorder %v1541_v0, 2  ;;  %v7324_v48 = vld [vmem:[%s12271_s12 + $0x38] sm:$0xff] }
 0x6b3   :  { %v2143_v27 = vsel %vm11025_vm13, 0, %v2141_v10  ;;  %vm1542_vm2 = vcmp.lt.s32.totalorder %v1541_v0, 2  ;;  %v11127_v34 = vmul.f32 %v2157_v46, %v11047_v45  ;;  %v1854_v45 = vxor.u32 2147483648, %v11124_v56 }
 0x6b4   :  { %v1685_v25 = vadd.f32 1.0, %v1684_v58  ;;  %v2160_v44 = vadd.s32 3, %v2143_v27  ;;  %v11157_v27 = vadd.f32 %v10906_v37, %v10860_v24  ;;  %v11161_v46 = vadd.f32 %v10927_v30, %v10714_v12 }
 0x6b5   :  { %v2164_v10 = vxor.u32 2147483648, %v11127_v34  ;;  %v1835_v30 = vmul.f32 -0.001358992, %v11053_v3  ;;  %vm1853_vm9 = vcmp.eq.s32.totalorder %v11136_v14, 0  ;;  %vm1856_vm13 = vcmp.eq.s32.totalorder %v11136_v14, 2  ;;  %v2269_v14 = vld [vmem:[%s12276_s17 + $0x8] sm:$0xff] }
 0x6b6   :  { %v1702_v38 = vxor.u32 2147483648, %v1685_v25  ;;  %v11139_v33 = vand.u32 3, %v2160_v44  ;;  %v12748_v44 = vld [vmem:[#allocation42_spill] sm:$0xff]  ;;  %4327 = vperm.xlu1 %7486, %v2269_v14  }
 0x6b7   :  { %v11082_v13 = vpop.f32.mrf.mxu0  ;;  %v11084_v61 = vpop.f32.mrf.mxu2 }
 0x6b8   :  { %v1703_v20 = vsel %vm1701_vm3, %v1702_v38, %v1693_v52  ;;  %v12747_v38 = vld [vmem:[#allocation34_spill] sm:$0xff]  ;;  %v4219_v12 = vadd.f32 %v11082_v13, %v10708_v55  ;;  %vm2163_vm7 = vcmp.eq.s32.totalorder %v11139_v33, 0  ;;  %vm2166_vm8 = vcmp.eq.s32.totalorder %v11139_v33, 2 }
 0x6b9   :  { %vm2162_vm6 = vcmp.lt.s32.totalorder %v11139_v33, 2  ;;  %vm12770_vm3 = vcmask 1045504  }
 0x6ba   :  { %6888 = vmatmul.msk.bf16.gmra.mxu0 %vm4522_vm4, %v7323_v22  ;;  %v1530_v22 = vadd.f32 1.0, %v1529_v59  ;;  %v5467_v59 = vmax.f32 %v12742_v7, 0.0 }
 0x6bc   :  { %v1547_v18 = vxor.u32 2147483648, %v1530_v22  ;;  %v1545_v17 = vsel %vm1543_vm14, %v1530_v22, %v1544_v40  ;;  %v1700_v22 = vsel %vm1698_vm11, %v1685_v25, %v1699_v47  ;;  %v4268_v40 = vadd.f32 %v11084_v61, %v10708_v55  ;;  %v12746_v61 = vld [vmem:[#allocation39_spill] sm:$0xff] }
 0x6bd   :  { %v11147_v52 = vsel %vm1697_vm0, %v1700_v22, %v1703_v20  ;;  %v4263_v47 = vadd.f32 %v11033_v9, %v12746_v61  ;;  %v2145_v9 = vmul.f32 -0.001358992, %v11059_v60  ;;  %v1836_v22 = vadd.f32 0.041655596, %v1835_v30 }
 0x6be   :  { %v1548_v50 = vsel %vm1546_vm15, %v1547_v18, %v1538_v29  ;;  %v5468_v29 = vmin.f32 %v5467_v59, 1.0  ;;  %v4265_v59 = vadd.f32 %v11065_v63, %v10763_v16  ;;  %v4302_v37 = vmax.f32 %v4268_v40, 0.0 }
 0x6bf   :  { %v11102_v19 = vpop.f32.mrf.mxu0  ;;  %v4269_v53 = vpop.f32.mrf.mxu2  ;;  %v1549_v58 = vsel %vm1542_vm2, %v1545_v17, %v1548_v50  ;;  %v2146_v11 = vadd.f32 0.041655596, %v2145_v9  ;;  %v4301_v40 = vmax.f32 %v4219_v12, 0.0  ;;  %vm2159_vm14 = vweird.f32 %v12735_v1 }
 0x6c0   :  { %v11145_v18 = vsel %vm1539_vm1, nan, %v1549_v58  ;;  %v11149_v25 = vmul.f32 256.0, %v5468_v29  ;;  %v4270_v39 = vadd.f32 %v4269_v53, %v12745_v57  ;;  %v4221_v17 = vadd.f32 %v11102_v19, %v12745_v57 }
 0x6c1   :  { %v4258_v19 = vadd.f32 %v10963_v5, %v12748_v44  ;;  %v4260_v58 = vadd.f32 %v10993_v43, %v10830_v62  ;;  %v4216_v29 = vadd.f32 %v11063_v4, %v10763_v16  ;;  %v4214_v5 = vadd.f32 %v11031_v6, %v12746_v61 }
 0x6c2   :  { %v4303_v55 = vmax.f32 %v4221_v17, 0.0  ;;  %v1837_v43 = vmul.f32 %v1836_v22, %v11053_v3  ;;  %v2147_v4 = vmul.f32 %v2146_v11, %v11059_v60  ;;  %v4209_v57 = vadd.f32 %v10961_v15, %v12748_v44 }
 0x6c3   :  { %v4299_v61 = vmax.f32 %v4216_v29, 0.0  ;;  %v4290_v17 = vmax.f32 %v11161_v46, 0.0  ;;  %vm12763_vm15 = vcmask 1042432   ;;  %vm12765_vm2 = vcmask 1044480  }
 0x6c4   :  { %v1838_v6 = vadd.f32 -0.4999988, %v1837_v43  ;;  %vm12769_vm11 = vmmov %vm12765_vm2 }
 0x6c5   :  { %vm12776_vm1 = vmmov %vm12763_vm15 }
 0x6c6   :  { %v1839_v15 = vmul.f32 %v1838_v6, %v11053_v3  ;;  %v12755_v6 = vld [vmem:[#allocation11_spill] sm:$0xff]  ;;  %vm12779_vm0 = vmmov %vm12776_vm1 }
 0x6c7   :  { %v4223_v31 = vpop.f32.mrf.mxu0  ;;  %v4272_v21 = vpop.f32.mrf.mxu2 }
 0x6c8   :  { %v4273_v0 = vadd.f32 %v4272_v21, %v12744_v26  ;;  %v4224_v54 = vadd.f32 %v4223_v31, %v12744_v26  ;;  %v4304_v31 = vmax.f32 %v4270_v39, 0.0  ;;  %v4298_v26 = vmax.f32 %v4263_v47, 0.0 }
 0x6c9   :  { %v4294_v39 = vmax.f32 %v4258_v19, 0.0  ;;  %v4321_v47 = vpack.c.bf16 %v4303_v55, %v4301_v40  ;;  %v1840_v12 = vadd.f32 1.0, %v1839_v15  ;;  %v12754_v40 = vld [vmem:[#allocation23_spill] sm:$0xff] }
 0x6ca   :  { %6889 = vmatmul.msk.bf16.gmra.mxu0 %vm4522_vm4, %v7324_v48  ;;  %v4306_v50 = vmax.f32 %v4273_v0, 0.0  ;;  %v4305_v63 = vmax.f32 %v4224_v54, 0.0  ;;  %vm1694_vm4 = vweird.f32 %v12727_v2  ;;  %v4300_v0 = vmax.f32 %v4265_v59, 0.0 }
 0x6cb   :  { %v4322_v16 = vpack.c.bf16 %v4304_v31, %v4302_v37  ;;  %v4296_v54 = vmax.f32 %v4260_v58, 0.0  ;;  %v2148_v59 = vadd.f32 -0.4999988, %v2147_v4  ;;  %v1855_v3 = vsel %vm1853_vm9, %v1840_v12, %v1854_v45  ;;  %v12753_v58 = vld [vmem:[#allocation26_spill] sm:$0xff] }
 0x6cc   :  { %v4320_v62 = vpack.c.bf16 %v4300_v0, %v4298_v26  ;;  %v1857_v30 = vxor.u32 2147483648, %v1840_v12  ;;  %v6995_v31 = vadd.f32 -0.5, %v11149_v25  ;;  %v1705_v45 = vsel %vm1694_vm4, nan, %v11147_v52  ;;  %v12752_v25 = vld [vmem:[#allocation19_spill] sm:$0xff] }
 0x6cd   :  { %v2149_v36 = vmul.f32 %v2148_v59, %v11059_v60  ;;  %v4318_v37 = vpack.c.bf16 %v4296_v54, %v4294_v39  ;;  %v4245_v29 = vadd.f32 %v12753_v58, %v12752_v25  ;;  %v4831_v26 = vpack.c.b16 %v11153_v23, %v11153_v23  ;;  %v12756_v54 = vld [vmem:[#allocation32_spill] sm:$0xff]  ;;  %v12759_v23 = vld [vmem:[#allocation15_spill] sm:$0xff] }
 0x6ce   :  { %v11248_v15 = vadd.s32 120, %v12759_v23  ;;  %v11273_v25 = vadd.s32 88, %v12759_v23 }
 0x6cf   :  { %v4225_v48 = vpop.f32.mrf.mxu0  ;;  %v4274_v53 = vpop.f32.mrf.mxu2  ;;  %v2150_v46 = vadd.f32 1.0, %v2149_v36  ;;  %v4284_v0 = vmax.f32 %v4245_v29, 0.0  ;;  %v4833_v36 = vshrl.u32 %v4831_v26, 16 }
 0x6d0   :  { %v4226_v28 = vadd.f32 %v4225_v48, %v12747_v38  ;;  %v4275_v24 = vadd.f32 %v4274_v53, %v12747_v38  ;;  %v12749_v48 = vld [vmem:[#allocation35_spill] sm:$0xff]  ;;  %v4297_v38 = vmax.f32 %v4214_v5, 0.0  ;;  %v2180_v5 = vpack.c.bf16 %v1705_v45, %v1705_v45  ;;  %12761 = vst [vmem:[#allocation38_spill] sm:$0xff] %v11248_v15 }
 0x6d1   :  { %v4250_v53 = vadd.f32 %v12749_v48, %v10776_v41  ;;  %v2165_v60 = vsel %vm2163_vm7, %v2150_v46, %v2164_v10  ;;  %v2167_v9 = vxor.u32 2147483648, %v2150_v46  ;;  %v11257_v46 = vadd.s32 96, %v12759_v23  ;;  %12772 = vst [vmem:[#allocation22_spill] sm:$0xff] %v11273_v25 }
 0x6d2   :  { %v4307_v21 = vmax.f32 %v4226_v28, 0.0  ;;  %v4308_v32 = vmax.f32 %v4275_v24, 0.0  ;;  %v4293_v28 = vmax.f32 %v4209_v57, 0.0  ;;  %v4295_v24 = vmax.f32 %v4211_v51, 0.0 }
 0x6d3   :  { %v4319_v41 = vpack.c.bf16 %v4299_v61, %v4297_v38  ;;  %v2168_v19 = vsel %vm2166_vm8, %v2167_v9, %v11127_v34  ;;  %v4288_v55 = vmax.f32 %v4250_v53, 0.0  ;;  %v4238_v61 = vadd.f32 %v12756_v54, %v12755_v6  ;;  %12766 = vst [vmem:[#allocation9_spill] sm:$0xff] %v11257_v46 }
 0x6d4   :  { %v4323_v13 = vpack.c.bf16 %v4307_v21, %v4305_v63  ;;  %v4324_v20 = vpack.c.bf16 %v4308_v32, %v4306_v50  ;;  %v4292_v50 = vmax.f32 %v11184_v35, 0.0  ;;  %v1858_v21 = vsel %vm1856_vm13, %v1857_v30, %v11124_v56  ;;  %v12750_v32 = vld [vmem:[#allocation43_spill] sm:$0xff] }
 0x6d5   :  { %v4243_v44 = vadd.f32 %v12751_v42, %v12750_v32  ;;  %v4317_v33 = vpack.c.bf16 %v4295_v24, %v4293_v28  ;;  %v1859_v10 = vsel %vm1852_vm12, %v1855_v3, %v1858_v21  ;;  %v4286_v56 = vmax.f32 %v11157_v27, 0.0  ;;  %v12768_v21 = vld [vmem:[#allocation20_spill] sm:$0xff] }
 0x6d6   :  { %4330 = vmatpush.bf16.msrb.mxu3 %v4323_v13  ;;  %4343 = vmatpush.bf16.msrb.mxu1 %v4324_v20  ;;  %v1860_v22 = vsel %vm1849_vm10, nan, %v1859_v10  ;;  %v2169_v1 = vsel %vm2162_vm6, %v2165_v60, %v2168_v19  ;;  %v4316_v2 = vpack.c.bf16 %v4292_v50, %v4290_v17  ;;  %v5471_v20 = vmax.f32 %v6995_v31, 0.0 }
 0x6d7   :  { %v11194_v8 = vpop.f32.mrf.mxu0  ;;  %v2170_v52 = vsel %vm2159_vm14, nan, %v2169_v1  ;;  %v2181_v13 = vpack.c.bf16 %v1860_v22, %v1860_v22  ;;  %v2179_v27 = vpack.c.bf16 %v11145_v18, %v11145_v18  ;;  %v4282_v43 = vmax.f32 %v4243_v44, 0.0  ;;  %v12757_v18 = vld [vmem:[#allocation12_spill] sm:$0xff] }
 0x6d8   :  { %v2183_v11 = vpack.c.bf16 %v2170_v52, %v2170_v52  ;;  %v5472_v57 = vmin.f32 %v5471_v20, 255.0  ;;  %v11245_v53 = vadd.s32 112, %v12759_v23  ;;  %v4836_v28 = vshll.u32 %v4831_v26, 16  ;;  %v2249_v52 = vld [vmem:[%s12274_s15 + $0x4] sm:$0xf] }
 0x6d9   :  { %v4848_v34 = vunpack.c.l.b16 %v2181_v13  ;;  %v4846_v50 = vunpack.c.l.b16 %v2179_v27  ;;  %v4312_v38 = vpack.c.bf16 %v4284_v0, %v4282_v43  ;;  %v4278_v3 = vmax.f32 %v4238_v61, 0.0 }
 0x6da   :  { %4331 = vmatpush.bf16.msrb.mxu3 %v4321_v47  ;;  %4344 = vmatpush.bf16.msrb.mxu1 %v4322_v16  ;;  %v4850_v35 = vunpack.c.l.b16 %v2183_v11  ;;  %v4314_v16 = vpack.c.bf16 %v4288_v55, %v4286_v56  ;;  %v12758_v47 = vld [vmem:[#allocation37_spill] sm:$0xff]  ;;  %12760 = vst [vmem:[#allocation21_spill] sm:$0xff] %v11245_v53  ;;  %v11251_v24 = vperm.slane %v5472_v57, 3  ;;  %v12433_v60 = vcvt.s32.f32 %v11245_v53 }
 0x6db   :  { %v4852_v4 = vpack.c.b16 %v11134_v49, %v4848_v34  ;;  %v4240_v59 = vadd.f32 %v12758_v47, %v12757_v18  ;;  %v12762_v49 = vld [vmem:[#allocation36_spill] sm:$0xff]  ;;  %v11261_v9 = vadd.s32 104, %v12759_v23  ;;  %v12434_v31 = vcvt.s32.f32 %v11248_v15 }
 0x6dc   :  { %v4853_v51 = vpack.c.b16 %v4850_v35, %v4850_v35  ;;  %v4838_v10 = vrot.slane %v4836_v28, 7  ;;  %v11270_v19 = vadd.s32 80, %v12759_v23  ;;  %v5488_v29 = vsub.f32 %v12433_v60, %v11251_v24 }
 0x6dd   :  { %v4855_v48 = vrot.slane %v4852_v4, 5  ;;  %v4280_v30 = vmax.f32 %v4240_v59, 0.0  ;;  %12767 = vst [vmem:[#allocation25_spill] sm:$0xff] %v11261_v9  ;;  %v12431_v56 = vcvt.s32.f32 %v11257_v46  ;;  %v12432_v22 = vcvt.s32.f32 %v11261_v9  ;;  %v4673_v46 = vpop.permute.xlu1 %4672  ;;  %v4685_v9 = vpop.permute.xlu0 %4684 }
 0x6de   :  { %4332 = vmatpush.bf16.msrb.mxu3 %v4319_v41  ;;  %4345 = vmatpush.bf16.msrb.mxu1 %v4320_v62  ;;  %v4857_v17 = vrot.slane %v4853_v51, 5  ;;  %v4847_v62 = vunpack.c.l.b16 %v2180_v5  ;;  %v12764_v41 = vmov 65535   ;;  %12771 = vst [vmem:[#allocation31_spill] sm:$0xff] %v11270_v19  ;;  %v5489_v55 = vsub.f32 %v12434_v31, %v11251_v24 }
 0x6df   :  { %v11214_v63 = vpop.f32.mrf.mxu0  ;;  %v4310_v58 = vpack.c.bf16 %v4280_v30, %v4278_v3  ;;  %v12429_v20 = vcvt.s32.f32 %v11270_v19  ;;  %v12430_v11 = vcvt.s32.f32 %v11273_v25  ;;  %v11290_v34 = vadd.s32 64, %v12759_v23 }
 0x6e0   :  { %v4858_v12 = vsel %vm12763_vm15, %v4855_v48, %v4857_v17  ;;  %v4851_v42 = vpack.c.b16 %v4847_v62, %v4846_v50  ;;  %v5520_v35 = vand.u32 2147483647, %v5488_v29  ;;  %v5486_v27 = vsub.f32 %v12431_v56, %v11251_v24 }
 0x6e1   :  { %v4866_v45 = vsel %vm12769_vm11, %v4858_v12, 1065369472  ;;  %12774 = vst [vmem:[#allocation8_spill] sm:$0xff] %v11290_v34  ;;  %v5487_v5 = vsub.f32 %v12432_v22, %v11251_v24  ;;  %v11299_v26 = vadd.s32 72, %v12759_v23  ;;  %v5521_v43 = vand.u32 2147483647, %v5489_v55 }
 0x6e2   :  { %4333 = vmatpush.bf16.msrb.mxu3 %v4317_v33  ;;  %4346 = vmatpush.bf16.msrb.mxu1 %v4318_v37  ;;  %v4948_v37 = vsel %vm12765_vm2, 4294967295, %v12764_v41  ;;  %v4835_v33 = vrot.slane %v4833_v36, 6  ;;  %v4854_v13 = vrot.slane %v4851_v42, 5  ;;  %v5484_v51 = vsub.f32 %v12429_v20, %v11251_v24 }
 0x6e3   :  { %v4949_v32 = vsel %vm12770_vm3, %v4948_v37, 0  ;;  %12775 = vst [vmem:[#allocation28_spill] sm:$0xff] %v11299_v26  ;;  %v5485_v6 = vsub.f32 %v12430_v11, %v11251_v24  ;;  %v12427_v54 = vcvt.s32.f32 %v11290_v34  ;;  %v5552_v61 = vsub.f32 1.0, %v5520_v35  ;;  %v4681_v34 = vpop.permute.xlu2 %4680 }
 0x6e4   :  { %v4950_v1 = vand.u32 %v4949_v32, %v4866_v45  ;;  %v4839_v14 = vor.u32 %v4838_v10, %v4835_v33  ;;  %v4856_v0 = vsel %vm12776_vm1, %v4854_v13, %v4855_v48  ;;  %v5518_v18 = vand.u32 2147483647, %v5486_v27  ;;  %v12784_v33 = vld [vmem:[#allocation29_spill] sm:$0xff] }
 0x6e5   :  { %v5519_v47 = vand.u32 2147483647, %v5487_v5  ;;  %v12428_v59 = vcvt.s32.f32 %v11299_v26  ;;  %v5553_v48 = vsub.f32 1.0, %v5521_v43  ;;  %v11317_v50 = vadd.s32 48, %v12759_v23 }
 0x6e6   :  { %4334 = vmatpush.bf16.msrb.mxu3 %v12754_v40  ;;  %4347 = vmatpush.bf16.msrb.mxu1 %v4316_v2  ;;  %v12773_v2 = vld [vmem:[#allocation33_spill] sm:$0xff]  ;;  %v5517_v62 = vand.u32 2147483647, %v5485_v6  ;;  %v5482_v36 = vsub.f32 %v12427_v54, %v11251_v24  ;;  %v5584_v28 = vmax.f32 %v5552_v61, 0.0  ;;  %v5550_v12 = vsub.f32 1.0, %v5518_v18 }
 0x6e7   :  { %v11238_v39 = vpop.f32.mrf.mxu0  ;;  %12780 = vst [vmem:[#allocation24_spill] sm:$0xff] %v11317_v50  ;;  %v5551_v41 = vsub.f32 1.0, %v5519_v47  ;;  %v5483_v37 = vsub.f32 %v12428_v59, %v11251_v24  ;;  %v5585_v3 = vmax.f32 %v5553_v48, 0.0  ;;  %v11329_v30 = vadd.s32 32, %v12759_v23 }
 0x6e8   :  { %v12425_v45 = vcvt.s32.f32 %v11317_v50  ;;  %v5514_v29 = vand.u32 2147483647, %v5482_v36  ;;  %v5582_v55 = vmax.f32 %v5550_v12, 0.0  ;;  %v11342_v27 = vadd.s32 16, %v12759_v23  ;;  %v7333_v50 = vld [vmem:[#allocation2 + $0x4] sm:$0xf] }
 0x6e9   :  { %12782 = vst [vmem:[#allocation40_spill] sm:$0xff] %v11329_v30  ;;  %v11365_v12 = vadd.s32 8, %v12759_v23  ;;  %v11445_v20 = vadd.s32 192, %v12759_v23 }
 0x6ea   :  { %4335 = vmatpush.bf16.msrb.mxu3 %v12762_v49  ;;  %4348 = vmatpush.bf16.msrb.mxu1 %v4314_v16  ;;  %v12777_v16 = vld [vmem:[#allocation10_spill] sm:$0xff]  ;;  %v11320_v49 = vadd.s32 56, %v12759_v23  ;;  %12785 = vst [vmem:[#allocation39_spill] sm:$0xff] %v11342_v27  ;;  %v5480_v5 = vsub.f32 %v12425_v45, %v11251_v24 }
 0x6eb   :  { %v4860_v57 = vsel %vm8341_vm5, %v12777_v16, %v4839_v14  ;;  %v12423_v14 = vcvt.s32.f32 %v11329_v30  ;;  %v12787_v16 = vld [vmem:[#allocation30_spill] sm:$0xff]  ;;  %12789 = vst [vmem:[#allocation35_spill] sm:$0xff] %v11365_v12  ;;  %vm4923_vm5 = vcmask 744448   ;;  %v4677_v53 = vpop.permute.xlu2 %4676 }
 0x6ec   :  { %v4863_v17 = vsel %vm12779_vm0, %v4860_v57, %v4854_v13  ;;  %12781 = vst [vmem:[#allocation17_spill] sm:$0xff] %v11320_v49  ;;  %v12426_v32 = vcvt.s32.f32 %v11320_v49  ;;  %v5617_v13 = vmin.f32 %v5585_v3, 1.0  ;;  %v5546_v57 = vsub.f32 1.0, %v5514_v29  ;;  %v7000_v49 = vld [vmem:[#allocation2 + $0x8] sm:$0xf0] }
 0x6ed   :  { %v5478_v48 = vsub.f32 %v12423_v14, %v11251_v24  ;;  %v12420_v3 = vcvt.s32.f32 %v12759_v23  ;;  %12802 = vst [vmem:[#allocation33_spill] sm:$0xff] %v11445_v20  ;;  %v7003_v26 = vor.u32 %v7333_v50, %v7000_v49 }
 0x6ee   :  { %4336 = vmatpush.bf16.msrb.mxu3 %v12768_v21  ;;  %4349 = vmatpush.bf16.msrb.mxu1 %v4312_v38  ;;  %v5516_v38 = vand.u32 2147483647, %v5484_v51  ;;  %v11332_v21 = vadd.s32 40, %v12759_v23  ;;  %v5481_v43 = vsub.f32 %v12426_v32, %v11251_v24  ;;  %v5614_v51 = vmin.f32 %v5582_v55, 1.0 }
 0x6ef   :  { %v11267_v44 = vpop.f32.mrf.mxu0  ;;  %v5510_v55 = vand.u32 2147483647, %v5478_v48  ;;  %v5474_v48 = vsub.f32 %v12420_v3, %v11251_v24 }
 0x6f0   :  { %12783 = vst [vmem:[#allocation41_spill] sm:$0xff] %v11332_v21  ;;  %v5548_v10 = vsub.f32 1.0, %v5516_v38  ;;  %v12424_v35 = vcvt.s32.f32 %v11332_v21  ;;  %v12419_v38 = vcvt.s32.f32 %v11342_v27  ;;  %v5513_v36 = vand.u32 2147483647, %v5481_v43 }
 0x6f2   :  { %4337 = vmatpush.bf16.msrb.mxu3 %v12773_v2  ;;  %4350 = vmatpush.bf16.msrb.mxu1 %v4310_v58  ;;  %v5549_v58 = vsub.f32 1.0, %v5517_v62  ;;  %v5583_v2 = vmax.f32 %v5551_v41, 0.0  ;;  %v5580_v4 = vmax.f32 %v5548_v10, 0.0  ;;  %v5512_v62 = vand.u32 2147483647, %v5480_v5 }
 0x6f3   :  { %v5545_v5 = vsub.f32 1.0, %v5513_v36 }
 0x6f4   :  { %v5615_v6 = vmin.f32 %v5583_v2, 1.0  ;;  %v5581_v61 = vmax.f32 %v5549_v58, 0.0  ;;  %v5578_v58 = vmax.f32 %v5546_v57, 0.0 }
 0x6f5   :  { %4351 = vmatmul.bf16.vlgmr.msrb.gmra.mxu1 %v2249_v52  ;;  %4338 = vmatmul.bf16.vlgmr.msrb.gmra.mxu3 %v2249_v52  ;;  %v5515_v52 = vand.u32 2147483647, %v5483_v37  ;;  %v12790_v37 = vld [vmem:[#allocation14_spill] sm:$0xff] }
 0x6f6   :  { %4954 = vmatpush.bf16.msra.mxu1 %v4950_v1  ;;  %v5616_v1 = vmin.f32 %v5584_v28, 1.0  ;;  %v5613_v10 = vmin.f32 %v5581_v61, 1.0  ;;  %v5610_v57 = vmin.f32 %v5578_v58, 1.0 }
 0x6f7   :  { %v11302_v40 = vpop.f32.mrf.mxu0  ;;  %v5547_v18 = vsub.f32 1.0, %v5515_v52  ;;  %v5476_v52 = vsub.f32 %v12419_v38, %v11251_v24 }
 0x6f8   :  { %v11354_v47 = vpack.c.bf16 %v5617_v13, %v5616_v1  ;;  %v11372_v1 = vpack.c.bf16 %v5615_v6, %v5614_v51  ;;  %v5544_v13 = vsub.f32 1.0, %v5512_v62  ;;  %v5542_v6 = vsub.f32 1.0, %v5510_v55 }
 0x6f9   :  { %v5579_v29 = vmax.f32 %v5547_v18, 0.0  ;;  %v5508_v18 = vand.u32 2147483647, %v5476_v52  ;;  %v5577_v62 = vmax.f32 %v5545_v5, 0.0  ;;  %v5506_v55 = vand.u32 2147483647, %v5474_v48 }
 0x6fa   :  { %4955 = vmatpush.bf16.msra.mxu1 %v4856_v0  ;;  %v11351_v0 = vadd.s32 24, %v12759_v23  ;;  %12788 = vst [vmem:[#allocation42_spill] sm:$0xff] %v11354_v47 }
 0x6fb   :  { %12791 = vst [vmem:[#allocation43_spill] sm:$0xff] %v11372_v1  ;;  %v5611_v51 = vmin.f32 %v5579_v29, 1.0  ;;  %v5540_v29 = vsub.f32 1.0, %v5508_v18  ;;  %v5609_v52 = vmin.f32 %v5577_v62, 1.0 }
 0x6fc   :  { %12786 = vst [vmem:[#allocation34_spill] sm:$0xff] %v11351_v0  ;;  %v12421_v28 = vcvt.s32.f32 %v11351_v0 }
 0x6fe   :  { %4956 = vmatpush.bf16.msra.mxu1 %v4863_v17  ;;  %v5479_v17 = vsub.f32 %v12424_v35, %v11251_v24  ;;  %v5477_v43 = vsub.f32 %v12421_v28, %v11251_v24  ;;  %v5572_v28 = vmax.f32 %v5540_v29, 0.0  ;;  %v5538_v35 = vsub.f32 1.0, %v5506_v55 }
 0x6ff   :  { %v11336_v42 = vpop.f32.mrf.mxu0 }
 0x700   :  { %v5511_v2 = vand.u32 2147483647, %v5479_v17  ;;  %v5576_v17 = vmax.f32 %v5544_v13, 0.0  ;;  %v5509_v36 = vand.u32 2147483647, %v5477_v43  ;;  %v5570_v18 = vmax.f32 %v5538_v35, 0.0 }
 0x702   :  { %4957 = vmatpush.bf16.msra.mxu1 %v12784_v33  ;;  %v5612_v33 = vmin.f32 %v5580_v4, 1.0  ;;  %v5543_v61 = vsub.f32 1.0, %v5511_v2  ;;  %v5608_v2 = vmin.f32 %v5576_v17, 1.0  ;;  %v5541_v3 = vsub.f32 1.0, %v5509_v36 }
 0x703   :  { %v5602_v62 = vmin.f32 %v5570_v18, 1.0 }
 0x704   :  { %v11382_v4 = vpack.c.bf16 %v5613_v10, %v5612_v33  ;;  %v11393_v33 = vpack.c.bf16 %v5611_v51, %v5610_v57  ;;  %v5574_v10 = vmax.f32 %v5542_v6, 0.0  ;;  %v5575_v58 = vmax.f32 %v5543_v61, 0.0 }
 0x705   :  { %v5573_v14 = vmax.f32 %v5541_v3, 0.0  ;;  %v5604_v51 = vmin.f32 %v5572_v28, 1.0 }
 0x706   :  { %4958 = vmatpush.bf16.msra.mxu1 %v12787_v16  ;;  %v12422_v16 = vcvt.s32.f32 %v11365_v12  ;;  %12792 = vst [vmem:[#allocation27_spill] sm:$0xff] %v11382_v4  ;;  %v5606_v5 = vmin.f32 %v5574_v10, 1.0  ;;  %v5607_v43 = vmin.f32 %v5575_v58, 1.0 }
 0x707   :  { %v11367_v41 = vpop.f32.mrf.mxu0  ;;  %12793 = vst [vmem:[#allocation19_spill] sm:$0xff] %v11393_v33  ;;  %v5605_v61 = vmin.f32 %v5573_v14, 1.0 }
 0x708   :  { %v11399_v6 = vpack.c.bf16 %v5607_v43, %v5606_v5 }
 0x709   :  { %v11402_v17 = vpack.c.bf16 %v5605_v61, %v5604_v51  ;;  %v11419_v61 = vadd.s32 232, %v12759_v23 }
 0x70a   :  { %4959 = vmatpush.bf16.msra.mxu1 %v12790_v37  ;;  %v5475_v37 = vsub.f32 %v12422_v16, %v11251_v24  ;;  %v11396_v16 = vpack.c.bf16 %v5609_v52, %v5608_v2  ;;  %12795 = vst [vmem:[#allocation23_spill] sm:$0xff] %v11399_v6  ;;  %v11412_v52 = vadd.s32 248, %v12759_v23 }
 0x70b   :  { %12796 = vst [vmem:[#allocation11_spill] sm:$0xff] %v11402_v17 }
 0x70c   :  { %v5507_v13 = vand.u32 2147483647, %v5475_v37  ;;  %12794 = vst [vmem:[#allocation26_spill] sm:$0xff] %v11396_v16 }
 0x70d   :  { %12798 = vst [vmem:[#allocation12_spill] sm:$0xff] %v11412_v52 }
 0x70e   :  { %7403 = vmatpush.bf16.msrb.mxu1 %v11354_v47  ;;  %v5539_v45 = vsub.f32 1.0, %v5507_v13  ;;  %v11415_v13 = vadd.s32 224, %v12759_v23 }
 0x70f   :  { %v11390_v38 = vpop.f32.mrf.mxu0 }
 0x710   :  { %v5571_v48 = vmax.f32 %v5539_v45, 0.0  ;;  %v11409_v45 = vadd.s32 240, %v12759_v23  ;;  %12799 = vst [vmem:[#allocation37_spill] sm:$0xff] %v11415_v13  ;;  %v4606_v22 = vmax.f32 %v11390_v38, 0.0 }
 0x712   :  { %7404 = vmatpush.bf16.msrb.mxu1 %v11372_v1  ;;  %v5603_v36 = vmin.f32 %v5571_v48, 1.0  ;;  %v12439_v51 = vcvt.s32.f32 %v11409_v45  ;;  %v12435_v48 = vcvt.s32.f32 %v11412_v52  ;;  %v7016_v1 = vld [vmem:[#allocation2 + $0x28] sm:$0xf0] }
 0x714   :  { %v11405_v3 = vpack.c.bf16 %v5603_v36, %v5602_v62  ;;  %v12438_v62 = vcvt.s32.f32 %v11415_v13 }
 0x716   :  { %7405 = vmatpush.bf16.msrb.mxu1 %v11382_v4  ;;  %12797 = vst [vmem:[#allocation32_spill] sm:$0xff] %v11405_v3  ;;  %v7337_v4 = vld [vmem:[#allocation2 + $0x24] sm:$0xf] }
 0x717   :  { %v4579_v57 = vpop.f32.mrf.mxu0 }
 0x71a   :  { %7406 = vmatpush.bf16.msrb.mxu1 %v11393_v33 }
 0x71e   :  { %7407 = vmatpush.bf16.msrb.mxu1 %v11396_v16 }
 0x71f   :  { %v4581_v37 = vpop.f32.mrf.mxu0 }
 0x722   :  { %7408 = vmatpush.bf16.msrb.mxu1 %v11399_v6 }
 0x726   :  { %7409 = vmatpush.bf16.msrb.mxu1 %v11402_v17 }
 0x727   :  { %v4584_v10 = vpop.f32.mrf.mxu0 }
 0x72a   :  { %7410 = vmatpush.bf16.msrb.mxu1 %v11405_v3 }
 0x72f   :  { %v4586_v28 = vpop.f32.mrf.mxu0 }
 0x730   :  { %v4610_v36 = vmax.f32 %v4586_v28, 0.0  ;;  %v5502_v28 = vsub.f32 %v12438_v62, %v11251_v24 }
 0x732   :  { %v5534_v56 = vand.u32 2147483647, %v5502_v28  ;;  %v12440_v28 = vcvt.s32.f32 %v11445_v20 }
 0x737   :  { %v4589_v58 = vpop.f32.mrf.mxu0 }
 0x738   :  { %v4611_v18 = vmax.f32 %v4589_v58, 0.0  ;;  %v11431_v58 = vadd.s32 216, %v12759_v23 }
 0x73a   :  { %12801 = vst [vmem:[#allocation20_spill] sm:$0xff] %v11431_v58  ;;  %v12437_v59 = vcvt.s32.f32 %v11431_v58 }
 0x73f   :  { %v4591_v29 = vpop.f32.mrf.mxu0 }
 0x740   :  { %v4612_v5 = vmax.f32 %v4591_v29, 0.0  ;;  %v12441_v29 = vcvt.s32.f32 %v11419_v61 }
 0x747   :  { %v4594_v14 = vpop.f32.mrf.mxu0 }
 0x748   :  { %v4613_v55 = vmax.f32 %v4594_v14, 0.0  ;;  %v4621_v14 = vpack.c.bf16 %v4612_v5, %v4611_v18  ;;  %v4608_v5 = vmax.f32 %v4581_v37, 0.0 }
 0x74f   :  { %v4596_v35 = vpop.f32.mrf.mxu0 }
 0x750   :  { %v4614_v2 = vmax.f32 %v4596_v35, 0.0  ;;  %v5504_v35 = vsub.f32 %v12439_v51, %v11251_v24 }
 0x752   :  { %v4622_v43 = vpack.c.bf16 %v4614_v2, %v4613_v55  ;;  %v4609_v55 = vmax.f32 %v4584_v10, 0.0  ;;  %v11428_v2 = vadd.s32 208, %v12759_v23  ;;  %v5536_v32 = vand.u32 2147483647, %v5504_v35 }
 0x753   :  { %v5503_v10 = vsub.f32 %v12441_v29, %v11251_v24 }
 0x754   :  { %4735 = vmatpush.bf16.msrb.mxu2 %v4622_v43  ;;  %12800 = vst [vmem:[#allocation36_spill] sm:$0xff] %v11428_v2  ;;  %v5505_v43 = vsub.f32 %v12435_v48, %v11251_v24  ;;  %v4620_v18 = vpack.c.bf16 %v4610_v36, %v4609_v55  ;;  %v12436_v54 = vcvt.s32.f32 %v11428_v2  ;;  %v5568_v36 = vsub.f32 1.0, %v5536_v32 }
 0x755   :  { %v5535_v35 = vand.u32 2147483647, %v5503_v10  ;;  %v11449_v55 = vadd.s32 200, %v12759_v23  ;;  %v11460_v32 = vadd.s32 176, %v12759_v23  ;;  %v11463_v10 = vadd.s32 184, %v12759_v23 }
 0x756   :  { %v5537_v11 = vand.u32 2147483647, %v5505_v43  ;;  %v5501_v43 = vsub.f32 %v12437_v59, %v11251_v24  ;;  %v4603_v48 = vmax.f32 %v11302_v40, 0.0  ;;  %v11478_v40 = vadd.s32 168, %v12759_v23 }
 0x757   :  { %12803 = vst [vmem:[#allocation10_spill] sm:$0xff] %v11449_v55  ;;  %v5567_v60 = vsub.f32 1.0, %v5535_v35  ;;  %v12442_v31 = vcvt.s32.f32 %v11449_v55  ;;  %v12443_v51 = vcvt.s32.f32 %v11460_v32  ;;  %v11475_v35 = vadd.s32 160, %v12759_v23 }
 0x758   :  { %4736 = vmatpush.bf16.msrb.mxu2 %v4621_v14  ;;  %v4607_v14 = vmax.f32 %v4579_v57, 0.0  ;;  %v4605_v57 = vmax.f32 %v11367_v41, 0.0  ;;  %v5569_v38 = vsub.f32 1.0, %v5537_v11  ;;  %12804 = vst [vmem:[#allocation13_spill] sm:$0xff] %v11460_v32  ;;  %v4604_v41 = vmax.f32 %v11336_v42, 0.0 }
 0x759   :  { %12805 = vst [vmem:[#allocation29_spill] sm:$0xff] %v11463_v10  ;;  %v5533_v59 = vand.u32 2147483647, %v5501_v43  ;;  %v12444_v42 = vcvt.s32.f32 %v11463_v10  ;;  %v5499_v43 = vsub.f32 %v12442_v31, %v11251_v24  ;;  %v12445_v31 = vcvt.s32.f32 %v11475_v35  ;;  %v4669_v10 = vpop.permute.xlu2 %4668 }
 0x75a   :  { %v4619_v37 = vpack.c.bf16 %v4608_v5, %v4607_v14  ;;  %v5566_v5 = vsub.f32 1.0, %v5534_v56  ;;  %v4618_v14 = vpack.c.bf16 %v4606_v22, %v4605_v57  ;;  %v5498_v56 = vsub.f32 %v12440_v28, %v11251_v24  ;;  %12806 = vst [vmem:[#allocation30_spill] sm:$0xff] %v11475_v35  ;;  %v4665_v35 = vpop.permute.xlu1 %4664 }
 0x75b   :  { %v5601_v11 = vmax.f32 %v5569_v38, 0.0  ;;  %v4602_v22 = vmax.f32 %v11267_v44, 0.0  ;;  %12807 = vst [vmem:[#allocation14_spill] sm:$0xff] %v11478_v40  ;;  %v4601_v38 = vmax.f32 %v11238_v39, 0.0  ;;  %v5494_v39 = vsub.f32 %v12445_v31, %v11251_v24 }
 0x75c   :  { %4737 = vmatpush.bf16.msrb.mxu2 %v4620_v18  ;;  %v5500_v18 = vsub.f32 %v12436_v54, %v11251_v24  ;;  %v5598_v62 = vmax.f32 %v5566_v5, 0.0  ;;  %v5530_v28 = vand.u32 2147483647, %v5498_v56  ;;  %v11494_v56 = vadd.s32 144, %v12759_v23 }
 0x75d   :  { %v5633_v44 = vmin.f32 %v5601_v11, 1.0  ;;  %v4616_v29 = vpack.c.bf16 %v4602_v22, %v4601_v38  ;;  %v4599_v11 = vmax.f32 %v11194_v8, 0.0  ;;  %v12810_v8 = vcvt.s32.f32 %v11478_v40  ;;  %v4657_v40 = vpop.permute.xlu0 %4656 }
 0x75e   :  { %v5532_v54 = vand.u32 2147483647, %v5500_v18  ;;  %v5599_v18 = vmax.f32 %v5567_v60, 0.0  ;;  %v5497_v60 = vsub.f32 %v12444_v42, %v11251_v24  ;;  %12808 = vst [vmem:[#allocation44_spill] sm:$0xff] %v11494_v56  ;;  %v5562_v42 = vsub.f32 1.0, %v5530_v28 }
 0x75f   :  { %v11512_v28 = vadd.s32 128, %v12759_v23 }
 0x760   :  { %4738 = vmatpush.bf16.msrb.mxu2 %v4619_v37  ;;  %v5600_v37 = vmax.f32 %v5568_v36, 0.0  ;;  %v4617_v36 = vpack.c.bf16 %v4604_v41, %v4603_v48  ;;  %v5564_v5 = vsub.f32 1.0, %v5532_v54  ;;  %v5630_v48 = vmin.f32 %v5598_v62, 1.0 }
 0x761   :  { %v5496_v41 = vsub.f32 %v12443_v51, %v11251_v24  ;;  %v5631_v54 = vmin.f32 %v5599_v18, 1.0  ;;  %v11497_v62 = vadd.s32 152, %v12759_v23  ;;  %v5529_v38 = vand.u32 2147483647, %v5497_v60  ;;  %v7325_v18 = vld [vmem:[%s12272_s13] sm:$0xff]  ;;  %12811 = vst [vmem:[#allocation46_spill] sm:$0xff] %v11512_v28  ;;  %v4649_v47 = vpop.permute.xlu2 %4648 }
 0x762   :  { %v5632_v57 = vmin.f32 %v5600_v37, 1.0  ;;  %v4600_v37 = vmax.f32 %v11214_v63, 0.0  ;;  %6954 = vmatmul.msk.bf16.vlgmr.msra.gmra.mxu1 %vm4923_vm5, %v7325_v18  ;;  %v12814_v18 = vcvt.s32.f32 %v11494_v56  ;;  %v7008_v56 = vld [vmem:[#allocation2 + $0x18] sm:$0xf0] }
 0x763   :  { %12809 = vst [vmem:[#allocation45_spill] sm:$0xff] %v11497_v62  ;;  %v5528_v22 = vand.u32 2147483647, %v5496_v41  ;;  %v11520_v41 = vadd.s32 136, %v12759_v23  ;;  %v11523_v60 = vpack.c.bf16 %v5631_v54, %v5630_v48  ;;  %v12815_v54 = vcvt.s32.f32 %v11497_v62 }
 0x764   :  { %4739 = vmatpush.bf16.msrb.mxu2 %v4618_v14  ;;  %v5565_v14 = vsub.f32 1.0, %v5533_v59  ;;  %v5531_v59 = vand.u32 2147483647, %v5499_v43  ;;  %v11500_v63 = vpack.c.bf16 %v5633_v44, %v5632_v57  ;;  %v4615_v43 = vpack.c.bf16 %v4600_v37, %v4599_v11  ;;  %v7277_v57 = vld [vmem:[%s12273_s14 + $0x80] sm:$0xff] }
 0x765   :  { %12812 = vst [vmem:[#allocation47_spill] sm:$0xff] %v11520_v41  ;;  %v5560_v31 = vsub.f32 1.0, %v5528_v22  ;;  %v12450_v44 = vcvt.s32.f32 %v11512_v28  ;;  %v5492_v48 = vsub.f32 %v12814_v18, %v11251_v24  ;;  %v4653_v17 = vpop.permute.xlu0 %4652 }
 0x766   :  { %v5597_v51 = vmax.f32 %v5565_v14, 0.0  ;;  %v5526_v14 = vand.u32 2147483647, %v5494_v39 }
 0x767   :  { %v5592_v22 = vmax.f32 %v5560_v31, 0.0  ;;  %v5524_v18 = vand.u32 2147483647, %v5492_v48 }
 0x768   :  { %4740 = vmatpush.bf16.msrb.mxu2 %v4617_v36  ;;  %v5596_v36 = vmax.f32 %v5564_v5, 0.0  ;;  %v5563_v5 = vsub.f32 1.0, %v5531_v59  ;;  %v5629_v11 = vmin.f32 %v5597_v51, 1.0  ;;  %v5561_v59 = vsub.f32 1.0, %v5529_v38 }
 0x769   :  { %v12451_v51 = vcvt.s32.f32 %v11520_v41  ;;  %v5556_v27 = vsub.f32 1.0, %v5524_v18  ;;  %v7335_v41 = vld [vmem:[#allocation2 + $0x14] sm:$0xf] }
 0x76a   :  { %v5628_v37 = vmin.f32 %v5596_v36, 1.0  ;;  %v5595_v23 = vmax.f32 %v5563_v5, 0.0  ;;  %v5493_v36 = vsub.f32 %v12815_v54, %v11251_v24  ;;  %v5593_v38 = vmax.f32 %v5561_v59, 0.0 }
 0x76b   :  { %v5491_v54 = vsub.f32 %v12451_v51, %v11251_v24  ;;  %v7011_v62 = vor.u32 %v7335_v41, %v7008_v56  ;;  %v7019_v56 = vor.u32 %v7337_v4, %v7016_v1 }
 0x76c   :  { %4741 = vmatpush.bf16.msrb.mxu2 %v4616_v29  ;;  %v5495_v29 = vsub.f32 %v12810_v8, %v11251_v24  ;;  %v5594_v8 = vmax.f32 %v5562_v42, 0.0  ;;  %v11537_v42 = vpack.c.bf16 %v5629_v11, %v5628_v37  ;;  %v5627_v5 = vmin.f32 %v5595_v23, 1.0  ;;  %v7326_v23 = vld [vmem:[%s12272_s13 + $0x8] sm:$0xff] }
 0x76d   :  { %v5624_v37 = vmin.f32 %v5592_v22, 1.0  ;;  %v5625_v11 = vmin.f32 %v5593_v38, 1.0  ;;  %v7278_v22 = vld [vmem:[%s12273_s14 + $0x88] sm:$0xff]  ;;  %v5588_v38 = vmax.f32 %v5556_v27, 0.0 }
 0x76e   :  { %v5527_v12 = vand.u32 2147483647, %v5495_v29  ;;  %v5626_v39 = vmin.f32 %v5594_v8, 1.0 }
 0x770   :  { %4742 = vmatpush.bf16.msrb.mxu2 %v4615_v43  ;;  %v5558_v43 = vsub.f32 1.0, %v5526_v14  ;;  %v5559_v29 = vsub.f32 1.0, %v5527_v12  ;;  %v11546_v12 = vpack.c.bf16 %v5627_v5, %v5626_v39 }
 0x772   :  { %v11526_v7 = vpop.f32.mrf.mxu1  ;;  %v5590_v8 = vmax.f32 %v5558_v43, 0.0  ;;  %v5591_v31 = vmax.f32 %v5559_v29, 0.0  ;;  %6955 = vmatmul.msk.bf16.gmra.mxu1 %vm4923_vm5, %v7326_v23  ;;  %v7281_v23 = vld [vmem:[%s12273_s14 + $0xa0] sm:$0xff] }
 0x773   :  { %12813 = vst [vmem:[#allocation48_spill] sm:$0xff] %v11526_v7  ;;  %4743 = vmatmul.bf16.vlgmr.msrb.gmra.mxu2 %v7277_v57  ;;  %v5490_v57 = vsub.f32 %v12450_v44, %v11251_v24  ;;  %v5525_v7 = vand.u32 2147483647, %v5493_v36  ;;  %v5523_v44 = vand.u32 2147483647, %v5491_v54  ;;  %v11552_v24 = vpack.c.bf16 %v5625_v11, %v5624_v37 }
 0x774   :  { %6203 = vmatpush.bf16.msra.mxu2 %v11500_v63  ;;  %v5622_v48 = vmin.f32 %v5590_v8, 1.0  ;;  %v5623_v36 = vmin.f32 %v5591_v31, 1.0  ;;  %v7279_v8 = vld [vmem:[%s12273_s14 + $0x90] sm:$0xff]  ;;  %v7328_v31 = vld [vmem:[%s12272_s13 + $0x18] sm:$0xff] }
 0x775   :  { %v5522_v59 = vand.u32 2147483647, %v5490_v57  ;;  %v5557_v0 = vsub.f32 1.0, %v5525_v7  ;;  %v5555_v29 = vsub.f32 1.0, %v5523_v44  ;;  %v5620_v57 = vmin.f32 %v5588_v38, 1.0  ;;  %v7327_v44 = vld [vmem:[%s12272_s13 + $0x10] sm:$0xff] }
 0x776   :  { %v11559_v7 = vpack.c.bf16 %v5623_v36, %v5622_v48  ;;  %v7330_v48 = vld [vmem:[%s12272_s13 + $0x28] sm:$0xff]  ;;  %v7283_v38 = vld [vmem:[%s12273_s14 + $0xb0] sm:$0xff] }
 0x777   :  { %v5589_v39 = vmax.f32 %v5557_v0, 0.0  ;;  %v5554_v43 = vsub.f32 1.0, %v5522_v59  ;;  %v5587_v54 = vmax.f32 %v5555_v29, 0.0  ;;  %v7280_v59 = vld [vmem:[%s12273_s14 + $0x98] sm:$0xff]  ;;  %v7282_v36 = vld [vmem:[%s12273_s14 + $0xa8] sm:$0xff] }
 0x778   :  { %6204 = vmatpush.bf16.msra.mxu2 %v11523_v60 }
 0x779   :  { %v5621_v5 = vmin.f32 %v5589_v39, 1.0  ;;  %v5586_v18 = vmax.f32 %v5554_v43, 0.0  ;;  %v5619_v27 = vmin.f32 %v5587_v54, 1.0  ;;  %v7284_v39 = vld [vmem:[%s12273_s14 + $0xb8] sm:$0xff] }
 0x77a   :  { %v4354_v14 = vpop.f32.mrf.mxu1  ;;  %v7332_v43 = vld [vmem:[%s12272_s13 + $0x38] sm:$0xff] }
 0x77b   :  { %v11562_v37 = vpack.c.bf16 %v5621_v5, %v5620_v57  ;;  %v5618_v11 = vmin.f32 %v5586_v18, 1.0  ;;  %v7329_v14 = vld [vmem:[%s12272_s13 + $0x20] sm:$0xff] }
 0x77c   :  { %6205 = vmatpush.bf16.msra.mxu2 %v11537_v42 }
 0x77d   :  { %v11565_v0 = vpack.c.bf16 %v5619_v27, %v5618_v11 }
 0x780   :  { %6206 = vmatpush.bf16.msra.mxu2 %v11546_v12 }
 0x782   :  { %6956 = vmatmul.msk.bf16.gmra.mxu1 %vm4923_vm5, %v7327_v44 }
 0x783   :  { %4748 = vmatmul.bf16.gmra.mxu2 %v7278_v22  ;;  %v7331_v22 = vld [vmem:[%s12272_s13 + $0x30] sm:$0xff] }
 0x784   :  { %6207 = vmatpush.bf16.msra.mxu2 %v11552_v24 }
 0x788   :  { %6208 = vmatpush.bf16.msra.mxu2 %v11559_v7 }
 0x78c   :  { %6209 = vmatpush.bf16.msra.mxu2 %v11562_v37 }
 0x790   :  { %6210 = vmatpush.bf16.msra.mxu2 %v11565_v0 }
 0x792   :  { %6957 = vmatmul.msk.bf16.gmra.mxu1 %vm4923_vm5, %v7328_v31 }
 0x793   :  { %4753 = vmatmul.bf16.gmra.mxu2 %v7279_v8 }
 0x7a2   :  { %6958 = vmatmul.msk.bf16.gmra.mxu1 %vm4923_vm5, %v7329_v14 }
 0x7a3   :  { %4758 = vmatmul.bf16.gmra.mxu2 %v7280_v59 }
 0x7b2   :  { %6959 = vmatmul.msk.bf16.gmra.mxu1 %vm4923_vm5, %v7330_v48 }
 0x7b3   :  { %4763 = vmatmul.bf16.gmra.mxu2 %v7281_v23 }
 0x7c2   :  { %6960 = vmatmul.msk.bf16.gmra.mxu1 %vm4923_vm5, %v7331_v22 }
 0x7c3   :  { %4768 = vmatmul.bf16.gmra.mxu2 %v7282_v36 }
 0x7d2   :  { %6961 = vmatmul.msk.bf16.gmra.mxu1 %vm4923_vm5, %v7332_v43 }
 0x7d3   :  { %4773 = vmatmul.bf16.gmra.mxu2 %v7283_v38 }
 0x7df   :  { %v11610_v29 = vpop.f32.mrf.mxu1 }
 0x7e3   :  { %4778 = vmatmul.bf16.gmra.mxu2 %v7284_v39 }
 0x7e7   :  { %v11614_v5 = vpop.f32.mrf.mxu1 }
 0x7ef   :  { %v11620_v11 = vpop.f32.mrf.mxu1 }
 0x7f3   :  { %6211 = vmatmul.bf16.vlgmr.msra.gmra.mxu2 %v7003_v26  ;;  %v4661_v26 = vpop.permute.xlu1 %4660 }
 0x7f6   :  { %v11612_v57 = vpop.f32.mrf.mxu2 }
 0x7f7   :  { %v11624_v44 = vpop.f32.mrf.mxu1 }
 0x7fe   :  { %v11616_v18 = vpop.f32.mrf.mxu2 }
 0x7ff   :  { %v11628_v31 = vpop.f32.mrf.mxu1 }
 0x803   :  { %6216 = vmatmul.bf16.gmra.mxu2 %v7011_v62 }
 0x806   :  { %v11618_v54 = vpop.f32.mrf.mxu2 }
 0x807   :  { %v11632_v14 = vpop.f32.mrf.mxu1 }
 0x80e   :  { %v11622_v27 = vpop.f32.mrf.mxu2 }
 0x80f   :  { %v11636_v36 = vpop.f32.mrf.mxu1 }
 0x813   :  { %6221 = vmatmul.bf16.gmra.mxu2 %v7019_v56 }
 0x816   :  { %v11626_v8 = vpop.f32.mrf.mxu2 }
 0x817   :  { %v11638_v38 = vpop.f32.mrf.mxu1 }
 0x81e   :  { %v11630_v59 = vpop.f32.mrf.mxu2 }
 0x81f   :  { %v11640_v43 = vpop.f32.mrf.mxu1 }
 0x826   :  { %v11634_v23 = vpop.f32.mrf.mxu2 }
 0x827   :  { %v11642_v30 = vpop.f32.mrf.mxu1 }
 0x82e   :  { %v4761_v48 = vpop.f32.mrf.mxu2 }
 0x82f   :  { %v11644_v25 = vpop.f32.mrf.mxu1 }
 0x836   :  { %v4764_v22 = vpop.f32.mrf.mxu2 }
 0x837   :  { %v11646_v28 = vpop.f32.mrf.mxu1 }
 0x83e   :  { %v4766_v39 = vpop.f32.mrf.mxu2 }
 0x83f   :  { %v11648_v20 = vpop.f32.mrf.mxu1 }
 0x846   :  { %v4769_v51 = vpop.f32.mrf.mxu2 }
 0x847   :  { %v4770_v62 = vadd.f32 %v4769_v51, %v4665_v35  ;;  %v11650_v13 = vpop.f32.mrf.mxu1 }
 0x84e   :  { %v4771_v21 = vpop.f32.mrf.mxu2 }
 0x84f   :  { %v4772_v41 = vadd.f32 %v4771_v21, %v4669_v10  ;;  %v4645_v21 = vpop.permute.xlu2 %4644  ;;  %v7339_v10 = vld [vmem:[#allocation2 + $0x34] sm:$0xf] }
 0x856   :  { %v4774_v19 = vpop.f32.mrf.mxu2 }
 0x857   :  { %v4775_v6 = vadd.f32 %v4774_v19, %v4673_v46  ;;  %v4765_v46 = vadd.f32 %v4764_v22, %v4657_v40  ;;  %v4794_v19 = vmax.f32 %v4770_v62, 0.0 }
 0x859   :  { %v4796_v58 = vmax.f32 %v4775_v6, 0.0  ;;  %v4792_v4 = vmax.f32 %v4765_v46, 0.0  ;;  %v5013_v46 = vmax.f32 %v11648_v20, 0.0  ;;  %v5009_v20 = vmax.f32 %v11640_v43, 0.0 }
 0x85a   :  { %v5003_v43 = vmax.f32 %v11620_v11, 0.0  ;;  %v7285_v11 = vld [vmem:[%s12273_s14 + $0xc0] sm:$0xff] }
 0x85e   :  { %v4776_v15 = vpop.f32.mrf.mxu2 }
 0x85f   :  { %v4777_v55 = vadd.f32 %v4776_v15, %v4677_v53  ;;  %v4795_v53 = vmax.f32 %v4772_v41, 0.0 }
 0x861   :  { %v4797_v52 = vmax.f32 %v4777_v55, 0.0  ;;  %v4805_v1 = vpack.c.bf16 %v4795_v53, %v4794_v19  ;;  %v5014_v19 = vmax.f32 %v11650_v13, 0.0  ;;  %v5010_v13 = vmax.f32 %v11642_v30, 0.0 }
 0x862   :  { %v5004_v30 = vmax.f32 %v11624_v44, 0.0  ;;  %v7345_v44 = vld [vmem:[#allocation2 + $0x64] sm:$0xf] }
 0x863   :  { %v4806_v15 = vpack.c.bf16 %v4797_v52, %v4796_v58  ;;  %v7024_v52 = vld [vmem:[#allocation2 + $0x38] sm:$0xf0] }
 0x866   :  { %v4779_v32 = vpop.f32.mrf.mxu2 }
 0x867   :  { %v4780_v50 = vadd.f32 %v4779_v32, %v4681_v34  ;;  %v4767_v34 = vadd.f32 %v4766_v39, %v4661_v26  ;;  %v4762_v32 = vadd.f32 %v4761_v48, %v4653_v17  ;;  %v7027_v17 = vor.u32 %v7339_v10, %v7024_v52  ;;  %v7343_v10 = vld [vmem:[#allocation2 + $0x54] sm:$0xf]  ;;  %v7040_v52 = vld [vmem:[#allocation2 + $0x58] sm:$0xf0] }
 0x869   :  { %v4798_v16 = vmax.f32 %v4780_v50, 0.0  ;;  %v4793_v50 = vmax.f32 %v4767_v34, 0.0  ;;  %v4791_v6 = vmax.f32 %v4762_v32, 0.0  ;;  %6226 = vmatmul.bf16.gmra.mxu2 %v7027_v17  ;;  %v7032_v32 = vld [vmem:[#allocation2 + $0x48] sm:$0xf0] }
 0x86a   :  { %v7048_v17 = vld [vmem:[#allocation2 + $0x68] sm:$0xf0] }
 0x86b   :  { %v4804_v55 = vpack.c.bf16 %v4793_v50, %v4792_v4 }
 0x86e   :  { %v4781_v49 = vpop.f32.mrf.mxu2 }
 0x86f   :  { %v4782_v3 = vadd.f32 %v4781_v49, %v4685_v9  ;;  %v4641_v9 = vpop.permute.xlu1 %4640 }
 0x870   :  { %v4755_v58 = vadd.f32 %v11626_v8, %v4641_v9 }
 0x871   :  { %v4799_v33 = vmax.f32 %v4782_v3, 0.0  ;;  %v4633_v3 = vpop.permute.xlu0 %4632 }
 0x872   :  { %v4788_v39 = vmax.f32 %v4755_v58, 0.0  ;;  %v7043_v58 = vor.u32 %v7343_v10, %v7040_v52  ;;  %v7357_v10 = vld [vmem:[#allocation2 + $0xc4] sm:$0xf]  ;;  %v7096_v52 = vld [vmem:[#allocation2 + $0xc8] sm:$0xf0] }
 0x873   :  { %v4807_v2 = vpack.c.bf16 %v4799_v33, %v4798_v16  ;;  %v4760_v16 = vadd.f32 %v11634_v23, %v4649_v47  ;;  %v4757_v33 = vadd.f32 %v11630_v59, %v4645_v21  ;;  %v4750_v23 = vadd.f32 %v11618_v54, %v4633_v3  ;;  %v4625_v59 = vpop.permute.xlu2 %4624 }
 0x874   :  { %v4745_v8 = vadd.f32 %v11612_v57, %v4625_v59  ;;  %v2250_v57 = vld [vmem:[%s12274_s15 + $0x8] sm:$0xf]  ;;  %v5012_v21 = vmax.f32 %v11646_v28, 0.0  ;;  %v5006_v28 = vmax.f32 %v11632_v14, 0.0  ;;  %v5002_v14 = vmax.f32 %v11614_v5, 0.0 }
 0x875   :  { %4813 = vmatpush.bf16.msra.mxu3 %v4807_v2  ;;  %v4996_v2 = vpop.f32.mrf.mxu1  ;;  %v4790_v35 = vmax.f32 %v4760_v16, 0.0  ;;  %v4789_v48 = vmax.f32 %v4757_v33, 0.0  ;;  %v4786_v41 = vmax.f32 %v4750_v23, 0.0  ;;  %v5023_v16 = vpack.c.bf16 %v5014_v19, %v5013_v46  ;;  %v7347_v5 = vld [vmem:[#allocation2 + $0x74] sm:$0xf] }
 0x876   :  { %v5015_v53 = vmax.f32 %v4996_v2, 0.0  ;;  %v4784_v9 = vmax.f32 %v4745_v8, 0.0  ;;  %v5007_v33 = vmax.f32 %v11636_v36, 0.0  ;;  %v5021_v2 = vpack.c.bf16 %v5010_v13, %v5009_v20  ;;  %v2270_v36 = vld [vmem:[%s12276_s17 + $0x10] sm:$0xff]  ;;  %v7110_v23 = vld [vmem:[#allocation2 + $0xe0] sm:$0xf] }
 0x877   :  { %v4637_v40 = vpop.permute.xlu1 %4636  ;;  %v4803_v22 = vpack.c.bf16 %v4791_v6, %v4790_v35  ;;  %v4802_v56 = vpack.c.bf16 %v4789_v48, %v4788_v39  ;;  %v5008_v6 = vmax.f32 %v11638_v38, 0.0  ;;  %v5018_v38 = vpack.c.bf16 %v5004_v30, %v5003_v43  ;;  %4810 = vperm.xlu2 %7487, %v2270_v36   ;;  %v7102_v48 = vld [vmem:[#allocation2 + $0xd0] sm:$0xf]  ;;  %v7362_v59 = vld [vmem:[#allocation2 + $0xe4] sm:$0xf0] }
 0x878   :  { %v4752_v51 = vadd.f32 %v11622_v27, %v4637_v40  ;;  %v7118_v8 = vld [vmem:[#allocation2 + $0xf0] sm:$0xf]  ;;  %v7353_v46 = vld [vmem:[#allocation2 + $0xa4] sm:$0xf]  ;;  %v7080_v19 = vld [vmem:[#allocation2 + $0xa8] sm:$0xf0]  ;;  %v7099_v30 = vor.u32 %v7357_v10, %v7096_v52 }
 0x879   :  { %4814 = vmatpush.bf16.msra.mxu3 %v4806_v15  ;;  %v4629_v47 = vpop.permute.xlu0 %4628  ;;  %v7088_v20 = vld [vmem:[#allocation2 + $0xb8] sm:$0xf0]  ;;  %v7134_v13 = vld [vmem:[#allocation2 + $0x110] sm:$0xf] }
 0x87a   :  { %v4747_v26 = vadd.f32 %v11616_v18, %v4629_v47  ;;  %v4787_v49 = vmax.f32 %v4752_v51, 0.0  ;;  %v7341_v18 = vld [vmem:[#allocation2 + $0x44] sm:$0xf]  ;;  %v7051_v51 = vor.u32 %v7345_v44, %v7048_v17  ;;  %v7360_v47 = vld [vmem:[#allocation2 + $0xd4] sm:$0xf0] }
 0x87b   :  { %v7035_v50 = vor.u32 %v7341_v18, %v7032_v32  ;;  %v7366_v18 = vld [vmem:[#allocation2 + $0x104] sm:$0xf0]  ;;  %v7372_v44 = vld [vmem:[#allocation2 + $0x134] sm:$0xf0] }
 0x87c   :  { %v4785_v34 = vmax.f32 %v4747_v26, 0.0  ;;  %v4801_v27 = vpack.c.bf16 %v4787_v49, %v4786_v41  ;;  %v7111_v26 = vor.u32 %v7362_v59, %v7110_v23  ;;  %v7351_v49 = vld [vmem:[#allocation2 + $0x94] sm:$0xf]  ;;  %v7374_v23 = vld [vmem:[#allocation2 + $0x144] sm:$0xf0] }
 0x87d   :  { %4815 = vmatpush.bf16.msra.mxu3 %v4805_v1  ;;  %v4998_v62 = vpop.f32.mrf.mxu1  ;;  %v5011_v1 = vmax.f32 %v11644_v25, 0.0  ;;  %6231 = vmatmul.bf16.gmra.mxu2 %v7035_v50  ;;  %v5005_v25 = vmax.f32 %v11628_v31, 0.0  ;;  %v5001_v31 = vmax.f32 %v11610_v29, 0.0  ;;  %v7286_v29 = vld [vmem:[%s12273_s14 + $0xc8] sm:$0xff] }
 0x87e   :  { %v5016_v15 = vmax.f32 %v4998_v62, 0.0  ;;  %v4800_v54 = vpack.c.bf16 %v4785_v34, %v4784_v9  ;;  %v7364_v62 = vld [vmem:[#allocation2 + $0xf4] sm:$0xf0]  ;;  %v11703_v34 = vpop.f32.mrf.mxu3  ;;  %v7289_v9 = vld [vmem:[%s12273_s14 + $0xe0] sm:$0xff] }
 0x87f   :  { %v5022_v4 = vpack.c.bf16 %v5012_v21, %v5011_v1  ;;  %v5019_v35 = vpack.c.bf16 %v5006_v28, %v5005_v25  ;;  %v5017_v40 = vpack.c.bf16 %v5002_v14, %v5001_v31  ;;  %v7290_v1 = vld [vmem:[%s12273_s14 + $0xe8] sm:$0xff]  ;;  %v7291_v25 = vld [vmem:[%s12273_s14 + $0xf0] sm:$0xff]  ;;  %v7142_v28 = vld [vmem:[#allocation2 + $0x120] sm:$0xf] }
 0x880   :  { %v5024_v3 = vpack.c.bf16 %v5016_v15, %v5015_v53  ;;  %v7292_v31 = vld [vmem:[%s12273_s14 + $0xf8] sm:$0xff] }
 0x881   :  { %4816 = vmatpush.bf16.msra.mxu3 %v4804_v55  ;;  %v5020_v55 = vpack.c.bf16 %v5008_v6, %v5007_v33  ;;  %v7368_v33 = vld [vmem:[#allocation2 + $0x114] sm:$0xf0] }
 0x882   :  { %v7135_v6 = vor.u32 %v7368_v33, %v7134_v13 }
 0x885   :  { %4817 = vmatpush.bf16.msra.mxu3 %v4803_v22 }
 0x886   :  { %v4341_v15 = vpop.f32.mrf.mxu3 }
 0x889   :  { %4818 = vmatpush.bf16.msra.mxu3 %v4802_v56  ;;  %v7072_v56 = vld [vmem:[#allocation2 + $0x98] sm:$0xf0] }
 0x88a   :  { %v7075_v41 = vor.u32 %v7351_v49, %v7072_v56 }
 0x88d   :  { %4819 = vmatpush.bf16.msra.mxu3 %v4801_v27  ;;  %6236 = vmatmul.bf16.gmra.mxu2 %v7043_v58  ;;  %v7119_v27 = vor.u32 %v7364_v62, %v7118_v8  ;;  %v7160_v62 = vld [vmem:[#allocation2 + $0x148] sm:$0xf0] }
 0x891   :  { %4820 = vmatpush.bf16.msra.mxu3 %v4800_v54 }
 0x894   :  { %4821 = vmatmul.bf16.vlgmr.msra.gmra.mxu3 %v2250_v57  ;;  %v7083_v57 = vor.u32 %v7353_v46, %v7080_v19  ;;  %v7363_v19 = vld [vmem:[#allocation2 + $0xf4] sm:$0xf] }
 0x895   :  { %5137 = vmatpush.bf16.msrb.mxu3 %v5024_v3  ;;  %v7126_v3 = vld [vmem:[#allocation2 + $0x100] sm:$0xf] }
 0x896   :  { %v7127_v32 = vor.u32 %v7366_v18, %v7126_v3  ;;  %v7120_v3 = vld [vmem:[#allocation2 + $0xf8] sm:$0xf0] }
 0x899   :  { %5138 = vmatpush.bf16.msrb.mxu3 %v5023_v16  ;;  %v7355_v16 = vld [vmem:[#allocation2 + $0xb4] sm:$0xf] }
 0x89d   :  { %5139 = vmatpush.bf16.msrb.mxu3 %v5022_v4  ;;  %6241 = vmatmul.bf16.gmra.mxu2 %v7051_v51  ;;  %v7091_v4 = vor.u32 %v7355_v16, %v7088_v20  ;;  %v7123_v16 = vor.u32 %v7363_v19, %v7120_v3  ;;  %v7182_v3 = vld [vmem:[#allocation2 + $0x170] sm:$0xf] }
 0x8a1   :  { %5140 = vmatpush.bf16.msrb.mxu3 %v5021_v2 }
 0x8a5   :  { %5141 = vmatpush.bf16.msrb.mxu3 %v5020_v55  ;;  %v7370_v55 = vld [vmem:[#allocation2 + $0x124] sm:$0xf0] }
 0x8a6   :  { %v7143_v43 = vor.u32 %v7370_v55, %v7142_v28  ;;  %v7375_v28 = vld [vmem:[#allocation2 + $0x154] sm:$0xf]  ;;  %v7168_v55 = vld [vmem:[#allocation2 + $0x158] sm:$0xf0] }
 0x8a9   :  { %5142 = vmatpush.bf16.msrb.mxu3 %v5019_v35 }
 0x8ad   :  { %5143 = vmatpush.bf16.msrb.mxu3 %v5018_v38  ;;  %v7359_v38 = vld [vmem:[#allocation2 + $0xd4] sm:$0xf] }
 0x8b1   :  { %5144 = vmatpush.bf16.msrb.mxu3 %v5017_v40  ;;  %v7104_v40 = vld [vmem:[#allocation2 + $0xd8] sm:$0xf0] }
 0x8b4   :  { %5145 = vmatmul.bf16.vlgmr.msrb.gmra.mxu3 %v7285_v11  ;;  %v7150_v11 = vld [vmem:[#allocation2 + $0x130] sm:$0xf] }
 0x8b5   :  { %7411 = vmatpush.bf16.msra.mxu3 %v11500_v63  ;;  %v7056_v63 = vld [vmem:[#allocation2 + $0x78] sm:$0xf0]  ;;  %v7151_v51 = vor.u32 %v7372_v44, %v7150_v11 }
 0x8b6   :  { %v7059_v22 = vor.u32 %v7347_v5, %v7056_v63  ;;  %v11735_v5 = vpop.permute.xlu2 %5086  ;;  %v11737_v63 = vpop.permute.xlu1 %5082 }
 0x8b8   :  { %6246 = vmatmul.bf16.gmra.mxu2 %v7059_v22  ;;  %v7371_v22 = vld [vmem:[#allocation2 + $0x134] sm:$0xf] }
 0x8b9   :  { %7412 = vmatpush.bf16.msra.mxu3 %v11523_v60  ;;  %v7103_v60 = vor.u32 %v7360_v47, %v7102_v48  ;;  %v7152_v47 = vld [vmem:[#allocation2 + $0x138] sm:$0xf0] }
 0x8bb   :  { %6107 = vmatmul.bf16.vlgmr.msrb.gmra.mxu1 %v7103_v60  ;;  %v7155_v60 = vor.u32 %v7371_v22, %v7152_v47 }
 0x8bd   :  { %7413 = vmatpush.bf16.msra.mxu3 %v11537_v42  ;;  %v7287_v42 = vld [vmem:[%s12273_s14 + $0xd0] sm:$0xff] }
 0x8be   :  { %v11745_v49 = vpop.permute.xlu1 %5078 }
 0x8c1   :  { %7414 = vmatpush.bf16.msra.mxu3 %v11546_v12  ;;  %v7349_v12 = vld [vmem:[#allocation2 + $0x84] sm:$0xf] }
 0x8c4   :  { %5150 = vmatmul.bf16.gmra.mxu3 %v7286_v29  ;;  %v7107_v29 = vor.u32 %v7359_v38, %v7104_v40 }
 0x8c5   :  { %7415 = vmatpush.bf16.msra.mxu3 %v11552_v24  ;;  %v7064_v24 = vld [vmem:[#allocation2 + $0x88] sm:$0xf0] }
 0x8c6   :  { %v7067_v39 = vor.u32 %v7349_v12, %v7064_v24  ;;  %v7112_v12 = vld [vmem:[#allocation2 + $0xe8] sm:$0xf0]  ;;  %v7158_v24 = vld [vmem:[#allocation2 + $0x140] sm:$0xf] }
 0x8c8   :  { %6251 = vmatmul.bf16.gmra.mxu2 %v7067_v39  ;;  %v11741_v39 = vpop.permute.xlu2 %5066 }
 0x8c9   :  { %7416 = vmatpush.bf16.msra.mxu3 %v11559_v7  ;;  %v11696_v7 = vpop.f32.mrf.mxu2 }
 0x8ca   :  { %12816 = vst [vmem:[#allocation49_spill] sm:$0xff] %v11696_v7 }
 0x8cb   :  { %6112 = vmatmul.bf16.gmra.mxu1 %v7111_v26  ;;  %v7159_v26 = vor.u32 %v7374_v23, %v7158_v24 }
 0x8cd   :  { %7417 = vmatpush.bf16.msra.mxu3 %v11562_v37  ;;  %v7288_v37 = vld [vmem:[%s12273_s14 + $0xd8] sm:$0xff] }
 0x8d1   :  { %7418 = vmatpush.bf16.msra.mxu3 %v11565_v0  ;;  %v11701_v0 = vpop.f32.mrf.mxu2 }
 0x8d2   :  { %12817 = vst [vmem:[#allocation50_spill] sm:$0xff] %v11701_v0 }
 0x8d4   :  { %5155 = vmatmul.bf16.gmra.mxu3 %v7287_v42  ;;  %v7361_v42 = vld [vmem:[#allocation2 + $0xe4] sm:$0xf] }
 0x8d8   :  { %6256 = vmatmul.bf16.gmra.mxu2 %v7075_v41  ;;  %v7373_v41 = vld [vmem:[#allocation2 + $0x144] sm:$0xf] }
 0x8d9   :  { %v11705_v53 = vpop.f32.mrf.mxu2  ;;  %v7163_v46 = vor.u32 %v7373_v41, %v7160_v62 }
 0x8da   :  { %12818 = vst [vmem:[#allocation51_spill] sm:$0xff] %v11705_v53 }
 0x8db   :  { %6117 = vmatmul.bf16.gmra.mxu1 %v7119_v27  ;;  %v11749_v27 = vpop.permute.xlu2 %5058 }
 0x8e1   :  { %v11710_v54 = vpop.f32.mrf.mxu2 }
 0x8e2   :  { %12819 = vst [vmem:[#allocation52_spill] sm:$0xff] %v11710_v54 }
 0x8e4   :  { %5160 = vmatmul.bf16.gmra.mxu3 %v7288_v37  ;;  %v7115_v37 = vor.u32 %v7361_v42, %v7112_v12  ;;  %v7377_v42 = vld [vmem:[#allocation2 + $0x164] sm:$0xf]  ;;  %v7176_v12 = vld [vmem:[#allocation2 + $0x168] sm:$0xf0] }
 0x8e5   :  { %v7179_v62 = vor.u32 %v7377_v42, %v7176_v12 }
 0x8e8   :  { %6261 = vmatmul.bf16.gmra.mxu2 %v7083_v57  ;;  %v7166_v57 = vld [vmem:[#allocation2 + $0x150] sm:$0xf] }
 0x8e9   :  { %v11712_v50 = vpop.f32.mrf.mxu2 }
 0x8ea   :  { %12820 = vst [vmem:[#allocation53_spill] sm:$0xff] %v11712_v50 }
 0x8eb   :  { %6122 = vmatmul.bf16.gmra.mxu1 %v7127_v32  ;;  %v7376_v32 = vld [vmem:[#allocation2 + $0x154] sm:$0xf0] }
 0x8ec   :  { %v7167_v20 = vor.u32 %v7376_v32, %v7166_v57  ;;  %v7380_v57 = vld [vmem:[#allocation2 + $0x174] sm:$0xf0] }
 0x8f1   :  { %v11717_v21 = vpop.f32.mrf.mxu2 }
 0x8f2   :  { %12821 = vst [vmem:[#allocation54_spill] sm:$0xff] %v11717_v21 }
 0x8f4   :  { %5165 = vmatmul.bf16.gmra.mxu3 %v7289_v9  ;;  %v11751_v9 = vpop.permute.xlu1 %5070 }
 0x8f8   :  { %6266 = vmatmul.bf16.gmra.mxu2 %v7091_v4  ;;  %v11757_v4 = vpop.permute.xlu2 %5054 }
 0x8f9   :  { %v11719_v2 = vpop.f32.mrf.mxu2 }
 0x8fb   :  { %6127 = vmatmul.bf16.gmra.mxu1 %v7135_v6  ;;  %v11761_v6 = vpop.permute.xlu0 %5074 }
 0x8fc   :  { %v11759_v33 = vpop.permute.xlu1 %5050 }
 0x901   :  { %v11724_v58 = vpop.f32.mrf.mxu2 }
 0x904   :  { %5170 = vmatmul.bf16.gmra.mxu3 %v7290_v1  ;;  %v5047_v38 = vpop.permute.xlu1 %5046 }
 0x908   :  { %6271 = vmatmul.bf16.gmra.mxu2 %v7099_v30  ;;  %v5035_v30 = vpop.permute.xlu2 %5034 }
 0x909   :  { %v11728_v36 = vpop.f32.mrf.mxu2 }
 0x90b   :  { %6132 = vmatmul.bf16.gmra.mxu1 %v7143_v43  ;;  %v7171_v43 = vor.u32 %v7375_v28, %v7168_v55 }
 0x90c   :  { %v5027_v23 = vpop.permute.xlu1 %5026 }
 0x910   :  { %v5031_v22 = vpop.permute.xlu2 %5030 }
 0x911   :  { %v11733_v17 = vpop.f32.mrf.mxu2 }
 0x914   :  { %5175 = vmatmul.bf16.gmra.mxu3 %v7291_v25 }
 0x917   :  { %v11726_v35 = vpop.f32.mrf.mxu3 }
 0x918   :  { %6276 = vmatmul.bf16.gmra.mxu2 %v7107_v29 }
 0x919   :  { %v11739_v48 = vpop.f32.mrf.mxu2 }
 0x91b   :  { %6137 = vmatmul.bf16.gmra.mxu1 %v7151_v51  ;;  %v11771_v51 = vpop.permute.xlu0 %5062 }
 0x91f   :  { %v4824_v14 = vpop.f32.mrf.mxu3 }
 0x920   :  { %v7378_v14 = vld [vmem:[#allocation2 + $0x164] sm:$0xf0] }
 0x921   :  { %v11743_v59 = vpop.f32.mrf.mxu2 }
 0x923   :  { %v5043_v41 = vpop.permute.xlu0 %5042 }
 0x924   :  { %5180 = vmatmul.bf16.gmra.mxu3 %v7292_v31  ;;  %v7174_v31 = vld [vmem:[#allocation2 + $0x160] sm:$0xf] }
 0x925   :  { %v7175_v11 = vor.u32 %v7378_v14, %v7174_v31  ;;  %v7379_v31 = vld [vmem:[#allocation2 + $0x174] sm:$0xf]  ;;  %v7184_v14 = vld [vmem:[#allocation2 + $0x178] sm:$0xf0] }
 0x926   :  { %v7187_v42 = vor.u32 %v7379_v31, %v7184_v14  ;;  %v7381_v31 = vld [vmem:[#allocation2 + $0x184] sm:$0xf]  ;;  %v7192_v14 = vld [vmem:[#allocation2 + $0x188] sm:$0xf0] }
 0x928   :  { %6281 = vmatmul.bf16.gmra.mxu2 %v7115_v37 }
 0x929   :  { %v11747_v8 = vpop.f32.mrf.mxu2 }
 0x92b   :  { %6142 = vmatmul.bf16.gmra.mxu1 %v7159_v26  ;;  %v5039_v55 = vpop.permute.xlu0 %5038 }
 0x931   :  { %v11753_v18 = vpop.f32.mrf.mxu2 }
 0x934   :  { %6306 = vmatmul.bf16.vlgmr.msra.gmra.mxu3 %v7155_v60 }
 0x937   :  { %v5146_v56 = vpop.f32.mrf.mxu3 }
 0x938   :  { %v11755_v1 = vpop.f32.mrf.mxu1  ;;  %6286 = vmatmul.bf16.gmra.mxu2 %v7123_v16  ;;  %v5147_v26 = vadd.f32 %v5146_v56, %v5027_v23  ;;  %v7183_v16 = vor.u32 %v7380_v57, %v7182_v3 }
 0x93a   :  { %v5186_v19 = vmax.f32 %v5147_v26, 0.0  ;;  %v7190_v26 = vld [vmem:[#allocation2 + $0x180] sm:$0xf] }
 0x93b   :  { %6147 = vmatmul.bf16.gmra.mxu1 %v7167_v20  ;;  %v11763_v25 = vpop.f32.mrf.mxu2 }
 0x93f   :  { %v5148_v15 = vpop.f32.mrf.mxu3 }
 0x940   :  { %v11765_v10 = vpop.f32.mrf.mxu1  ;;  %v5149_v60 = vadd.f32 %v5148_v15, %v5031_v22 }
 0x943   :  { %v11767_v40 = vpop.f32.mrf.mxu2 }
 0x944   :  { %6311 = vmatmul.bf16.gmra.mxu3 %v7163_v46  ;;  %v5187_v46 = vmax.f32 %v5149_v60, 0.0 }
 0x946   :  { %v11781_v15 = vpack.c.bf16 %v5187_v46, %v5186_v19 }
 0x947   :  { %v5151_v13 = vpop.f32.mrf.mxu3 }
 0x948   :  { %v11769_v44 = vpop.f32.mrf.mxu1  ;;  %v5152_v22 = vadd.f32 %v5151_v13, %v5035_v30 }
 0x94a   :  { %v5188_v23 = vmax.f32 %v5152_v22, 0.0 }
 0x94b   :  { %6152 = vmatmul.bf16.gmra.mxu1 %v7175_v11  ;;  %v11773_v47 = vpop.f32.mrf.mxu2 }
 0x94c   :  { %12822 = vst [vmem:[#allocation55_spill] sm:$0xff] %v11773_v47  ;;  %v7198_v47 = vld [vmem:[#allocation2 + $0x190] sm:$0xf] }
 0x94f   :  { %v5153_v52 = vpop.f32.mrf.mxu3 }
 0x950   :  { %v11775_v24 = vpop.f32.mrf.mxu1  ;;  %v5154_v56 = vadd.f32 %v5153_v52, %v5039_v55  ;;  %v7128_v55 = vld [vmem:[#allocation2 + $0x108] sm:$0xf0] }
 0x952   :  { %v5189_v12 = vmax.f32 %v5154_v56, 0.0 }
 0x953   :  { %v11777_v32 = vpop.f32.mrf.mxu2 }
 0x954   :  { %6316 = vmatmul.bf16.gmra.mxu3 %v7171_v43  ;;  %12823 = vst [vmem:[#allocation56_spill] sm:$0xff] %v11777_v32  ;;  %v11791_v57 = vpack.c.bf16 %v5189_v12, %v5188_v23  ;;  %v7384_v32 = vld [vmem:[#allocation2 + $0x194] sm:$0xf0] }
 0x957   :  { %v5156_v29 = vpop.f32.mrf.mxu3 }
 0x958   :  { %v11779_v20 = vpop.f32.mrf.mxu1 }
 0x95b   :  { %6157 = vmatmul.bf16.gmra.mxu1 %v7183_v16  ;;  %v11783_v43 = vpop.f32.mrf.mxu2  ;;  %v7365_v16 = vld [vmem:[#allocation2 + $0x104] sm:$0xf] }
 0x95c   :  { %12824 = vst [vmem:[#allocation57_spill] sm:$0xff] %v11783_v43  ;;  %v7131_v13 = vor.u32 %v7365_v16, %v7128_v55  ;;  %v7199_v16 = vor.u32 %v7384_v32, %v7198_v47 }
 0x95e   :  { %6291 = vmatmul.bf16.gmra.mxu2 %v7131_v13  ;;  %v7367_v13 = vld [vmem:[#allocation2 + $0x114] sm:$0xf] }
 0x95f   :  { %v5158_v37 = vpop.f32.mrf.mxu3 }
 0x960   :  { %v11785_v11 = vpop.f32.mrf.mxu1  ;;  %v5159_v56 = vadd.f32 %v5158_v37, %v5047_v38 }
 0x962   :  { %v5191_v12 = vmax.f32 %v5159_v56, 0.0 }
 0x963   :  { %v11787_v46 = vpop.f32.mrf.mxu2 }
 0x964   :  { %6321 = vmatmul.bf16.gmra.mxu3 %v7179_v62  ;;  %v7382_v62 = vld [vmem:[#allocation2 + $0x184] sm:$0xf0]  ;;  %12825 = vst [vmem:[#allocation58_spill] sm:$0xff] %v11787_v46 }
 0x965   :  { %v7191_v19 = vor.u32 %v7382_v62, %v7190_v26  ;;  %v7195_v62 = vor.u32 %v7381_v31, %v7192_v14  ;;  %v7383_v31 = vld [vmem:[#allocation2 + $0x194] sm:$0xf]  ;;  %v7200_v14 = vld [vmem:[#allocation2 + $0x198] sm:$0xf0] }
 0x967   :  { %v5161_v28 = vpop.f32.mrf.mxu3 }
 0x968   :  { %v11789_v3 = vpop.f32.mrf.mxu1  ;;  %v5162_v47 = vadd.f32 %v5161_v28, %v11759_v33  ;;  %v7208_v33 = vld [vmem:[#allocation2 + $0x1a8] sm:$0xf0] }
 0x969   :  { %12826 = vst [vmem:[#allocation59_spill] sm:$0xff] %v11789_v3  ;;  %v7216_v3 = vld [vmem:[#allocation2 + $0x1b8] sm:$0xf0] }
 0x96b   :  { %6162 = vmatmul.bf16.gmra.mxu1 %v7191_v19  ;;  %v11795_v30 = vpop.f32.mrf.mxu2 }
 0x96c   :  { %12827 = vst [vmem:[#allocation60_spill] sm:$0xff] %v11795_v30 }
 0x96f   :  { %v5163_v60 = vpop.f32.mrf.mxu3 }
 0x970   :  { %v11797_v22 = vpop.f32.mrf.mxu1  ;;  %v5164_v56 = vadd.f32 %v5163_v60, %v11757_v4  ;;  %v7386_v4 = vld [vmem:[#allocation2 + $0x1a4] sm:$0xf0] }
 0x971   :  { %12828 = vst [vmem:[#allocation61_spill] sm:$0xff] %v11797_v22 }
 0x973   :  { %v11801_v19 = vpop.f32.mrf.mxu2 }
 0x974   :  { %6326 = vmatmul.bf16.gmra.mxu3 %v7187_v42  ;;  %v5157_v42 = vadd.f32 %v5156_v29, %v5043_v41  ;;  %12829 = vst [vmem:[#allocation62_spill] sm:$0xff] %v11801_v19  ;;  %v7136_v29 = vld [vmem:[#allocation2 + $0x118] sm:$0xf0] }
 0x975   :  { %v7139_v41 = vor.u32 %v7367_v13, %v7136_v29  ;;  %v7206_v29 = vld [vmem:[#allocation2 + $0x1a0] sm:$0xf] }
 0x976   :  { %v5190_v23 = vmax.f32 %v5157_v42, 0.0  ;;  %v7207_v30 = vor.u32 %v7386_v4, %v7206_v29 }
 0x977   :  { %v11793_v52 = vpop.f32.mrf.mxu3  ;;  %6296 = vmatmul.bf16.gmra.mxu2 %v7139_v41  ;;  %v7385_v41 = vld [vmem:[#allocation2 + $0x1a4] sm:$0xf] }
 0x978   :  { %v11803_v55 = vpop.f32.mrf.mxu1  ;;  %v11805_v38 = vpack.c.bf16 %v5191_v12, %v5190_v23  ;;  %v5193_v12 = vmax.f32 %v5164_v56, 0.0  ;;  %v5192_v23 = vmax.f32 %v5162_v47, 0.0  ;;  %v7369_v56 = vld [vmem:[#allocation2 + $0x124] sm:$0xf] }
 0x979   :  { %12830 = vst [vmem:[#allocation63_spill] sm:$0xff] %v11803_v55 }
 0x97a   :  { %v11819_v13 = vpack.c.bf16 %v5193_v12, %v5192_v23 }
 0x97b   :  { %6167 = vmatmul.bf16.gmra.mxu1 %v7199_v16  ;;  %v11809_v43 = vpop.f32.mrf.mxu2 }
 0x97c   :  { %12831 = vst [vmem:[#allocation64_spill] sm:$0xff] %v11809_v43  ;;  %v7214_v43 = vld [vmem:[#allocation2 + $0x1b0] sm:$0xf] }
 0x97f   :  { %v11799_v26 = vpop.f32.mrf.mxu3 }
 0x980   :  { %v11812_v42 = vpop.f32.mrf.mxu1 }
 0x981   :  { %12832 = vst [vmem:[#allocation65_spill] sm:$0xff] %v11812_v42 }
 0x983   :  { %v11815_v16 = vpop.f32.mrf.mxu2 }
 0x984   :  { %6331 = vmatmul.bf16.gmra.mxu3 %v7195_v62  ;;  %v7203_v62 = vor.u32 %v7383_v31, %v7200_v14  ;;  %12833 = vst [vmem:[#allocation66_spill] sm:$0xff] %v11815_v16  ;;  %v7144_v31 = vld [vmem:[#allocation2 + $0x128] sm:$0xf0]  ;;  %v7388_v16 = vld [vmem:[#allocation2 + $0x1b4] sm:$0xf0] }
 0x985   :  { %v7147_v47 = vor.u32 %v7369_v56, %v7144_v31  ;;  %v12838_v31 = vld [vmem:[#allocation16_spill] sm:$0xff] }
 0x987   :  { %v11807_v37 = vpop.f32.mrf.mxu3  ;;  %6301 = vmatmul.bf16.gmra.mxu2 %v7147_v47  ;;  %v5301_v47 = vmax.f32 %v12838_v31, 0.0  ;;  %v7224_v31 = vld [vmem:[#allocation2 + $0x1c8] sm:$0xf0] }
 0x988   :  { %v11817_v46 = vpop.f32.mrf.mxu1 }
 0x989   :  { %12834 = vst [vmem:[#allocation67_spill] sm:$0xff] %v11817_v46 }
 0x98b   :  { %6172 = vmatmul.bf16.gmra.mxu1 %v7207_v30  ;;  %v11821_v19 = vpop.f32.mrf.mxu2  ;;  %v7215_v30 = vor.u32 %v7388_v16, %v7214_v43 }
 0x98c   :  { %12835 = vst [vmem:[#allocation68_spill] sm:$0xff] %v11821_v19  ;;  %v7387_v19 = vld [vmem:[#allocation2 + $0x1b4] sm:$0xf] }
 0x98d   :  { %v7219_v56 = vor.u32 %v7387_v19, %v7216_v3 }
 0x98f   :  { %v5173_v32 = vpop.f32.mrf.mxu3 }
 0x990   :  { %v11823_v28 = vpop.f32.mrf.mxu1  ;;  %v5174_v16 = vadd.f32 %v5173_v32, %v11751_v9  ;;  %v5169_v9 = vadd.f32 %v11799_v26, %v11771_v51 }
 0x991   :  { %12836 = vst [vmem:[#allocation69_spill] sm:$0xff] %v11823_v28 }
 0x993   :  { %v11825_v12 = vpop.f32.mrf.mxu2 }
 0x994   :  { %6336 = vmatmul.bf16.gmra.mxu3 %v7203_v62  ;;  %v7211_v62 = vor.u32 %v7385_v41, %v7208_v33  ;;  %12837 = vst [vmem:[#allocation70_spill] sm:$0xff] %v11825_v12 }
 0x997   :  { %v5176_v60 = vpop.f32.mrf.mxu3 }
 0x998   :  { %v6138_v23 = vpop.f32.mrf.mxu1 }
 0x99b   :  { %6177 = vmatmul.bf16.gmra.mxu1 %v7215_v30  ;;  %v11827_v4 = vpop.f32.mrf.mxu2 }
 0x99f   :  { %v5178_v14 = vpop.f32.mrf.mxu3 }
 0x9a0   :  { %v6140_v22 = vpop.f32.mrf.mxu1  ;;  %v5179_v41 = vadd.f32 %v5178_v14, %v11745_v49  ;;  %v7222_v49 = vld [vmem:[#allocation2 + $0x1c0] sm:$0xf]  ;;  %v7390_v14 = vld [vmem:[#allocation2 + $0x1c4] sm:$0xf0] }
 0x9a2   :  { %v5199_v30 = vmax.f32 %v5179_v41, 0.0 }
 0x9a3   :  { %v11835_v28 = vpop.f32.mrf.mxu2 }
 0x9a4   :  { %6341 = vmatmul.bf16.gmra.mxu3 %v7211_v62  ;;  %v5177_v62 = vadd.f32 %v5176_v60, %v11761_v6  ;;  %v7223_v6 = vor.u32 %v7390_v14, %v7222_v49 }
 0x9a6   :  { %v5198_v3 = vmax.f32 %v5177_v62, 0.0 }
 0x9a7   :  { %v5181_v29 = vpop.f32.mrf.mxu3 }
 0x9a8   :  { %v5182_v55 = vadd.f32 %v5181_v29, %v11737_v63  ;;  %v5302_v63 = vmin.f32 %v5301_v47, 1.0  ;;  %v11837_v29 = vpop.f32.mrf.mxu1 }
 0x9a9   :  { %12839 = vst [vmem:[#allocation16_spill] sm:$0xff] %v11837_v29  ;;  %v7352_v29 = vld [vmem:[#allocation2 + $0x94] sm:$0xf0] }
 0x9aa   :  { %v5200_v12 = vmax.f32 %v5182_v55, 0.0  ;;  %v5197_v55 = vmax.f32 %v5174_v16, 0.0  ;;  %v5303_v60 = vmul.f32 256.0, %v5302_v63  ;;  %v7230_v16 = vld [vmem:[#allocation2 + $0x1d0] sm:$0xf] }
 0x9ab   :  { %6182 = vmatmul.bf16.gmra.mxu1 %v7223_v6 }
 0x9af   :  { %v5183_v42 = vpop.f32.mrf.mxu3 }
 0x9b0   :  { %v5184_v33 = vadd.f32 %v5183_v42, %v11735_v5  ;;  %v5172_v5 = vadd.f32 %v11807_v37, %v11741_v39  ;;  %v5208_v42 = vpack.c.bf16 %v5199_v30, %v5198_v3  ;;  %v11847_v37 = vpop.f32.mrf.mxu2  ;;  %v6145_v47 = vpop.f32.mrf.mxu1  ;;  %v7392_v30 = vld [vmem:[#allocation2 + $0x1d4] sm:$0xf0] }
 0x9b2   :  { %v5201_v43 = vmax.f32 %v5184_v33, 0.0  ;;  %v5196_v41 = vmax.f32 %v5172_v5, 0.0  ;;  %v5195_v33 = vmax.f32 %v5169_v9, 0.0  ;;  %v7231_v5 = vor.u32 %v7392_v30, %v7230_v16  ;;  %v12851_v16 = vld [vmem:[#allocation12_spill] sm:$0xff] }
 0x9b3   :  { %v12852_v30 = vcvt.s32.f32 %v12851_v16 }
 0x9b4   :  { %v5209_v46 = vpack.c.bf16 %v5201_v43, %v5200_v12  ;;  %6346 = vmatmul.bf16.gmra.mxu3 %v7219_v56  ;;  %v5167_v12 = vadd.f32 %v11793_v52, %v11749_v27  ;;  %v5207_v39 = vpack.c.bf16 %v5197_v55, %v5196_v41  ;;  %v7389_v56 = vld [vmem:[#allocation2 + $0x1c4] sm:$0xf]  ;;  %v12845_v55 = vld [vmem:[#allocation37_spill] sm:$0xff] }
 0x9b5   :  { %v7227_v27 = vor.u32 %v7389_v56, %v7224_v31 }
 0x9b6   :  { %5215 = vmatpush.bf16.msra.mxu0 %v5209_v46  ;;  %v6994_v46 = vadd.f32 -0.5, %v5303_v60  ;;  %v5194_v51 = vmax.f32 %v5167_v12, 0.0 }
 0x9b7   :  { %v6307_v19 = vpop.f32.mrf.mxu3 }
 0x9b8   :  { %v11843_v32 = vadd.f32 %v6307_v19, %v6138_v23  ;;  %v2271_v23 = vld [vmem:[%s12276_s17 + $0x18] sm:$0xff]  ;;  %v5206_v62 = vpack.c.bf16 %v5195_v33, %v5194_v51  ;;  %v5305_v52 = vmax.f32 %v6994_v46, 0.0  ;;  %v6284_v63 = vpop.f32.mrf.mxu2  ;;  %v6148_v14 = vpop.f32.mrf.mxu1  ;;  %v12844_v19 = vcvt.s32.f32 %v11409_v45  ;;  %v7391_v51 = vld [vmem:[#allocation2 + $0x1d4] sm:$0xf] }
 0x9b9   :  { %5212 = vperm.xlu0 %7485, %v2271_v23  }
 0x9ba   :  { %12840 = vst [vmem:[#allocation71_spill] sm:$0xff] %v11843_v32  ;;  %5216 = vmatpush.bf16.msra.mxu0 %v5208_v42  ;;  %v11854_v49 = vmin.f32 %v5305_v52, 255.0  ;;  %v12846_v42 = vcvt.s32.f32 %v12845_v55 }
 0x9bb   :  { %6187 = vmatmul.bf16.gmra.mxu1 %v7231_v5 }
 0x9bc   :  { %v5337_v9 = vsub.f32 %v12844_v19, %v11854_v49  ;;  %v5335_v60 = vsub.f32 %v12846_v42, %v11854_v49  ;;  %v5338_v5 = vsub.f32 %v12852_v30, %v11854_v49 }
 0x9be   :  { %5217 = vmatpush.bf16.msra.mxu0 %v5207_v39  ;;  %v5369_v12 = vand.u32 2147483647, %v5337_v9  ;;  %v5367_v31 = vand.u32 2147483647, %v5335_v60  ;;  %v5370_v42 = vand.u32 2147483647, %v5338_v5 }
 0x9bf   :  { %v6309_v26 = vpop.f32.mrf.mxu3  ;;  %v7238_v60 = vld [vmem:[#allocation2 + $0x1e0] sm:$0xf] }
 0x9c0   :  { %v11852_v43 = vadd.f32 %v6309_v26, %v6140_v22  ;;  %v12843_v22 = vcvt.s32.f32 %v11419_v61  ;;  %v12849_v61 = vld [vmem:[#allocation36_spill] sm:$0xff]  ;;  %v6287_v45 = vpop.f32.mrf.mxu2  ;;  %v7232_v26 = vld [vmem:[#allocation2 + $0x1d8] sm:$0xf0]  ;;  %v5401_v23 = vsub.f32 1.0, %v5369_v12 }
 0x9c1   :  { %v12850_v46 = vcvt.s32.f32 %v12849_v61  ;;  %v7235_v9 = vor.u32 %v7391_v51, %v7232_v26  ;;  %v7394_v12 = vld [vmem:[#allocation2 + $0x1e4] sm:$0xf0] }
 0x9c2   :  { %12841 = vst [vmem:[#allocation72_spill] sm:$0xff] %v11852_v43  ;;  %5218 = vmatpush.bf16.msra.mxu0 %v5206_v62  ;;  %v5336_v6 = vsub.f32 %v12843_v22, %v11854_v49  ;;  %v6150_v62 = vpop.f32.mrf.mxu1  ;;  %v5433_v55 = vmax.f32 %v5401_v23, 0.0  ;;  %v7239_v23 = vor.u32 %v7394_v12, %v7238_v60  ;;  %v7240_v60 = vld [vmem:[#allocation2 + $0x1e8] sm:$0xf0] }
 0x9c3   :  { %v5333_v56 = vsub.f32 %v12850_v46, %v11854_v49 }
 0x9c4   :  { %6351 = vmatmul.bf16.gmra.mxu3 %v7227_v27  ;;  %v5368_v39 = vand.u32 2147483647, %v5336_v6  ;;  %v5399_v6 = vsub.f32 1.0, %v5367_v31  ;;  %v11887_v31 = vmin.f32 %v5433_v55, 1.0 }
 0x9c5   :  { %v5365_v22 = vand.u32 2147483647, %v5333_v56 }
 0x9c6   :  { %5219 = vmatpush.bf16.msra.mxu0 %v11819_v13  ;;  %v12847_v13 = vld [vmem:[#allocation20_spill] sm:$0xff]  ;;  %v5431_v46 = vmax.f32 %v5399_v6, 0.0 }
 0x9c7   :  { %v11857_v3 = vpop.f32.mrf.mxu3  ;;  %v12848_v41 = vcvt.s32.f32 %v12847_v13  ;;  %v5397_v61 = vsub.f32 1.0, %v5365_v22 }
 0x9c8   :  { %12842 = vst [vmem:[#allocation73_spill] sm:$0xff] %v11857_v3  ;;  %v6289_v56 = vpop.f32.mrf.mxu2  ;;  %v11898_v22 = vmin.f32 %v5431_v46, 1.0  ;;  %v7070_v3 = vld [vmem:[#allocation2 + $0x90] sm:$0xf] }
 0x9c9   :  { %v5334_v33 = vsub.f32 %v12848_v41, %v11854_v49  ;;  %v12854_v41 = vld [vmem:[#allocation42_spill] sm:$0xff]  ;;  %v6290_v51 = vadd.f32 %v6289_v56, %v11785_v11  ;;  %v6283_v11 = vadd.f32 %v11847_v37, %v11769_v44  ;;  %v6278_v44 = vadd.f32 %v11827_v4, %v11755_v1  ;;  %v12861_v56 = vld [vmem:[#allocation23_spill] sm:$0xff] }
 0x9ca   :  { %5220 = vmatpush.bf16.msra.mxu0 %v11805_v38  ;;  %v5400_v38 = vsub.f32 1.0, %v5368_v39  ;;  %v5402_v39 = vsub.f32 1.0, %v5370_v42  ;;  %v6153_v26 = vpop.f32.mrf.mxu1  ;;  %v7396_v1 = vld [vmem:[#allocation2 + $0x1f4] sm:$0xf0] }
 0x9cb   :  { %v5366_v27 = vand.u32 2147483647, %v5334_v33  ;;  %6192 = vmatmul.bf16.gmra.mxu1 %v7239_v23  ;;  %v6400_v37 = vmul.f32 %v6283_v11, %v11898_v22  ;;  %v12860_v4 = vld [vmem:[#allocation26_spill] sm:$0xff]  ;;  %v6998_v23 = vld [vmem:[#allocation2] sm:$0xf]  ;;  %v12864_v11 = vld [vmem:[#allocation32_spill] sm:$0xff] }
 0x9cc   :  { %v5432_v33 = vmax.f32 %v5400_v38, 0.0  ;;  %v6285_v38 = vadd.f32 %v6284_v63, %v11775_v24  ;;  %v6280_v24 = vadd.f32 %v11835_v28, %v11765_v10  ;;  %v12857_v63 = vld [vmem:[#allocation27_spill] sm:$0xff] }
 0x9cd   :  { %v5398_v13 = vsub.f32 1.0, %v5366_v27  ;;  %v12855_v27 = vld [vmem:[#allocation43_spill] sm:$0xff] }
 0x9ce   :  { %5221 = vmatpush.bf16.msra.mxu0 %v11791_v57  ;;  %v2251_v57 = vld [vmem:[%s12274_s15 + $0xc] sm:$0xf]  ;;  %v11891_v16 = vmin.f32 %v5432_v33, 1.0  ;;  %s7618_s15 = smov [#allocation5]  }
 0x9cf   :  { %v6314_v52 = vpop.f32.mrf.mxu3  ;;  %s6552_s20 = sshll.u32 %s7618_s15, 4  ;;  %s6553_s20 = int_to_ptr.vmem [resolvable:$true] %s6552_s20 }
 0x9d0   :  { %v11879_v19 = vadd.f32 %v6314_v52, %v6145_v47  ;;  %v6288_v47 = vadd.f32 %v6287_v45, %v11779_v20  ;;  %v5430_v52 = vmax.f32 %v5398_v13, 0.0  ;;  %v5429_v20 = vmax.f32 %v5397_v61, 0.0  ;;  %v7246_v61 = vld [vmem:[#allocation2 + $0x1f0] sm:$0xf] }
 0x9d2   :  { %12853 = vst [vmem:[#allocation37_spill] sm:$0xff] %v11879_v19  ;;  %5222 = vmatpush.bf16.msra.mxu0 %v11781_v15  ;;  %v5434_v15 = vmax.f32 %v5402_v39, 0.0  ;;  %v6402_v6 = vmul.f32 %v6288_v47, %v11887_v31  ;;  %v11904_v55 = vmin.f32 %v5430_v52, 1.0  ;;  %v11910_v42 = vmin.f32 %v5429_v20, 1.0  ;;  %v6155_v12 = vpop.f32.mrf.mxu1  ;;  %v7334_v52 = vld [vmem:[#allocation2 + $0x4] sm:$0xf0] }
 0x9d3   :  { %v7247_v47 = vor.u32 %v7396_v1, %v7246_v61  ;;  %v6999_v20 = vor.u32 %v7334_v52, %v6998_v23  ;;  %v7338_v61 = vld [vmem:[#allocation2 + $0x24] sm:$0xf0]  ;;  %v7022_v23 = vld [vmem:[#allocation2 + $0x30] sm:$0xf]  ;;  %v7340_v52 = vld [vmem:[#allocation2 + $0x34] sm:$0xf0] }
 0x9d4   :  { %6356 = vmatmul.bf16.gmra.mxu3 %v7235_v9  ;;  %v11894_v5 = vmin.f32 %v5434_v15, 1.0  ;;  %v6399_v13 = vmul.f32 %v6280_v24, %v11904_v55  ;;  %v6398_v39 = vmul.f32 %v6278_v44, %v11910_v42  ;;  %v7006_v44 = vld [vmem:[#allocation2 + $0x10] sm:$0xf] }
 0x9d5   :  { %5223 = vmatmul.bf16.vlgmr.msra.gmra.mxu0 %v2251_v57  ;;  %v7393_v57 = vld [vmem:[#allocation2 + $0x1e4] sm:$0xf] }
 0x9d6   :  { %6034 = vmatpush.bf16.msrb.mxu0 %v12854_v41  ;;  %v6403_v9 = vmul.f32 %v6290_v51, %v11894_v5  ;;  %v12858_v41 = vld [vmem:[#allocation19_spill] sm:$0xff]  ;;  %v7243_v33 = vor.u32 %v7393_v57, %v7240_v60 }
 0x9d7   :  { %v6317_v30 = vpop.f32.mrf.mxu3 }
 0x9d8   :  { %v11896_v45 = vadd.f32 %v6317_v30, %v6148_v14  ;;  %v6401_v14 = vmul.f32 %v6285_v38, %v11891_v16  ;;  %6424 = vmatpush.msra.mxu1 %v6403_v9  ;;  %v7248_v38 = vld [vmem:[#allocation2 + $0x1f8] sm:$0xf0] }
 0x9da   :  { %6035 = vmatpush.bf16.msrb.mxu0 %v12855_v27  ;;  %12856 = vst [vmem:[#allocation20_spill] sm:$0xff] %v11896_v45  ;;  %6425 = vmatpush.msra.mxu1 %v6402_v6  ;;  %v6158_v46 = vpop.f32.mrf.mxu1  ;;  %v7395_v27 = vld [vmem:[#allocation2 + $0x1f4] sm:$0xf] }
 0x9db   :  { %6197 = vmatmul.bf16.gmra.mxu1 %v7247_v47  ;;  %v7251_v24 = vor.u32 %v7395_v27, %v7248_v38  ;;  %v7023_v27 = vor.u32 %v7340_v52, %v7022_v23  ;;  %v4811_v23 = vpop.permute.xlu2 %4810 }
 0x9dc   :  { %6426 = vmatpush.msra.mxu1 %v6401_v14 }
 0x9de   :  { %6036 = vmatpush.bf16.msrb.mxu0 %v12857_v63  ;;  %6427 = vmatpush.msra.mxu1 %v6400_v37  ;;  %v7336_v37 = vld [vmem:[#allocation2 + $0x14] sm:$0xf0] }
 0x9df   :  { %v6319_v10 = vpop.f32.mrf.mxu3  ;;  %v7007_v60 = vor.u32 %v7336_v37, %v7006_v44 }
 0x9e0   :  { %v11917_v28 = vadd.f32 %v6319_v10, %v6150_v62  ;;  %6428 = vmatpush.msra.mxu1 %v6399_v13  ;;  %v12863_v62 = vld [vmem:[#allocation11_spill] sm:$0xff] }
 0x9e2   :  { %6037 = vmatpush.bf16.msrb.mxu0 %v12858_v41  ;;  %12859 = vst [vmem:[#allocation36_spill] sm:$0xff] %v11917_v28  ;;  %6429 = vmatpush.msra.mxu1 %v6398_v39  ;;  %v6160_v30 = vpop.f32.mrf.mxu1 }
 0x9e4   :  { %6361 = vmatmul.bf16.gmra.mxu3 %v7243_v33 }
 0x9e6   :  { %6038 = vmatpush.bf16.msrb.mxu0 %v12860_v4 }
 0x9e7   :  { %v6322_v15 = vpop.f32.mrf.mxu3 }
 0x9e8   :  { %v11922_v51 = vadd.f32 %v6322_v15, %v6153_v26 }
 0x9ea   :  { %6039 = vmatpush.bf16.msrb.mxu0 %v12861_v56  ;;  %12862 = vst [vmem:[#allocation12_spill] sm:$0xff] %v11922_v51  ;;  %v6163_v63 = vpop.f32.mrf.mxu1 }
 0x9ee   :  { %6040 = vmatpush.bf16.msrb.mxu0 %v12863_v62 }
 0x9ef   :  { %v6324_v6 = vpop.f32.mrf.mxu3 }
 0x9f0   :  { %v11926_v9 = vadd.f32 %v6324_v6, %v6155_v12  ;;  %v7014_v12 = vld [vmem:[#allocation2 + $0x20] sm:$0xf] }
 0x9f1   :  { %v7015_v1 = vor.u32 %v7338_v61, %v7014_v12  ;;  %v7344_v12 = vld [vmem:[#allocation2 + $0x54] sm:$0xf0] }
 0x9f2   :  { %6041 = vmatpush.bf16.msrb.mxu0 %v12864_v11  ;;  %12865 = vst [vmem:[#allocation42_spill] sm:$0xff] %v11926_v9  ;;  %v6165_v57 = vpop.f32.mrf.mxu1 }
 0x9f4   :  { %6366 = vmatmul.bf16.gmra.mxu3 %v7251_v24  ;;  %v7030_v24 = vld [vmem:[#allocation2 + $0x40] sm:$0xf] }
 0x9f5   :  { %6042 = vmatmul.bf16.vlgmr.msrb.gmra.mxu0 %v6999_v20 }
 0x9f7   :  { %v6327_v26 = vpop.f32.mrf.mxu3 }
 0x9f8   :  { %v11928_v14 = vadd.f32 %v6327_v26, %v6158_v46 }
 0x9fa   :  { %12866 = vst [vmem:[#allocation43_spill] sm:$0xff] %v11928_v14  ;;  %v6168_v10 = vpop.f32.mrf.mxu1 }
 0x9ff   :  { %v6329_v13 = vpop.f32.mrf.mxu3 }
 0xa00   :  { %v11930_v41 = vadd.f32 %v6329_v13, %v6160_v30 }
 0xa02   :  { %12867 = vst [vmem:[#allocation27_spill] sm:$0xff] %v11930_v41  ;;  %v6170_v47 = vpop.f32.mrf.mxu1 }
 0xa05   :  { %6047 = vmatmul.bf16.gmra.mxu0 %v7007_v60 }
 0xa07   :  { %v6332_v33 = vpop.f32.mrf.mxu3 }
 0xa08   :  { %v11932_v39 = vadd.f32 %v6332_v33, %v6163_v63  ;;  %v7342_v63 = vld [vmem:[#allocation2 + $0x44] sm:$0xf0]  ;;  %v7038_v33 = vld [vmem:[#allocation2 + $0x50] sm:$0xf] }
 0xa09   :  { %v7031_v44 = vor.u32 %v7342_v63, %v7030_v24  ;;  %v7039_v61 = vor.u32 %v7344_v12, %v7038_v33 }
 0xa0a   :  { %v6173_v62 = vpop.f32.mrf.mxu1 }
 0xa0f   :  { %v6334_v4 = vpop.f32.mrf.mxu3 }
 0xa10   :  { %v11934_v56 = vadd.f32 %v6334_v4, %v6165_v57 }
 0xa12   :  { %v6175_v20 = vpop.f32.mrf.mxu1 }
 0xa15   :  { %6052 = vmatmul.bf16.gmra.mxu0 %v7015_v1 }
 0xa17   :  { %v6337_v46 = vpop.f32.mrf.mxu3 }
 0xa18   :  { %v11936_v15 = vadd.f32 %v6337_v46, %v6168_v10 }
 0xa1a   :  { %v6178_v26 = vpop.f32.mrf.mxu1 }
 0xa1f   :  { %v6339_v38 = vpop.f32.mrf.mxu3 }
 0xa20   :  { %v11938_v30 = vadd.f32 %v6339_v38, %v6170_v47  ;;  %v7346_v38 = vld [vmem:[#allocation2 + $0x64] sm:$0xf0] }
 0xa22   :  { %v6180_v13 = vpop.f32.mrf.mxu1 }
 0xa25   :  { %6057 = vmatmul.bf16.gmra.mxu0 %v7023_v27  ;;  %v7046_v27 = vld [vmem:[#allocation2 + $0x60] sm:$0xf] }
 0xa26   :  { %v7047_v63 = vor.u32 %v7346_v38, %v7046_v27 }
 0xa27   :  { %v6342_v11 = vpop.f32.mrf.mxu3 }
 0xa28   :  { %v11940_v6 = vadd.f32 %v6342_v11, %v6173_v62  ;;  %v11953_v11 = vpop.permute.xlu1 %4327 }
 0xa29   :  { %12868 = vst [vmem:[#allocation19_spill] sm:$0xff] %v11953_v11  ;;  %v4340_v24 = vadd.f32 %v11703_v34, %v11953_v11  ;;  %v7348_v11 = vld [vmem:[#allocation2 + $0x74] sm:$0xf0] }
 0xa2a   :  { %v6183_v47 = vpop.f32.mrf.mxu1 }
 0xa2f   :  { %v6344_v37 = vpop.f32.mrf.mxu3 }
 0xa30   :  { %v11942_v57 = vadd.f32 %v6344_v37, %v6175_v20  ;;  %v4823_v20 = vadd.f32 %v11726_v35, %v4811_v23  ;;  %v5213_v37 = vpop.permute.xlu0 %5212 }
 0xa32   :  { %v11950_v52 = vpop.f32.mrf.mxu1 }
 0xa35   :  { %6062 = vmatmul.bf16.gmra.mxu0 %v7031_v44  ;;  %v4826_v44 = vmin.f32 %v4823_v20, 0.0  ;;  %v7054_v20 = vld [vmem:[#allocation2 + $0x70] sm:$0xf] }
 0xa37   :  { %v6347_v60 = vpop.f32.mrf.mxu3 }
 0xa38   :  { %v11944_v10 = vadd.f32 %v6347_v60, %v6178_v26 }
 0xa3a   :  { %v11959_v60 = vpop.f32.mrf.mxu1 }
 0xa3f   :  { %v6349_v1 = vpop.f32.mrf.mxu3 }
 0xa40   :  { %v11946_v4 = vadd.f32 %v6349_v1, %v6180_v13  ;;  %v4356_v13 = vmin.f32 %v4340_v24, 0.0 }
 0xa42   :  { %v6190_v34 = vpop.f32.mrf.mxu1 }
 0xa45   :  { %6067 = vmatmul.bf16.gmra.mxu0 %v7039_v61  ;;  %v4827_v61 = vmul.f32 1.442695, %v4826_v44 }
 0xa47   :  { %v6352_v46 = vpop.f32.mrf.mxu3  ;;  %7520 = vpow2.f32 %v4827_v61 }
 0xa48   :  { %v11948_v62 = vadd.f32 %v6352_v46, %v6183_v47  ;;  %v4358_v47 = vmul.f32 1.442695, %v4356_v13 }
 0xa4a   :  { %7522 = vpow2.f32 %v4358_v47  ;;  %v6193_v61 = vpop.f32.mrf.mxu1  ;;  %v7062_v47 = vld [vmem:[#allocation2 + $0x80] sm:$0xf] }
 0xa4d   :  { %v7521_v43 = vpop.eup %7520 }
 0xa4f   :  { %v11957_v26 = vpop.f32.mrf.mxu3 }
 0xa52   :  { %v5224_v33 = vpop.f32.mrf.mxu0 }
 0xa53   :  { %v5225_v12 = vadd.f32 %v5224_v33, %v5213_v37  ;;  %v7523_v33 = vpop.eup %7522 }
 0xa55   :  { %6072 = vmatmul.bf16.gmra.mxu0 %v7047_v63  ;;  %v5228_v1 = vmul.f32 0.5, %v5225_v12  ;;  %v7055_v63 = vor.u32 %v7348_v11, %v7054_v20 }
 0xa57   :  { %v5229_v35 = vadd.f32 0.5, %v5228_v1  ;;  %v11961_v46 = vpop.f32.mrf.mxu3 }
 0xa59   :  { %v5230_v23 = vmax.f32 %v5229_v35, 0.0  ;;  %6545 = vst [vmem:[#allocation5 + $0x6] sm:$0x1] %v5229_v35  ;;  %v6195_v35 = vpop.f32.mrf.mxu1 }
 0xa5a   :  { %v5226_v27 = vpop.f32.mrf.mxu0 }
 0xa5b   :  { %v5231_v38 = vmin.f32 %v5230_v23, 1.0  ;;  %v7350_v27 = vld [vmem:[#allocation2 + $0x84] sm:$0xf0] }
 0xa5c   :  { %v7063_v23 = vor.u32 %v7350_v27, %v7062_v47  ;;  %v12875_v47 = vld [vmem:[#allocation29_spill] sm:$0xff] }
 0xa5d   :  { %v5232_v32 = vperm.slane %v5231_v38, 0  ;;  %v5234_v24 = vsub.f32 1.0, %v5231_v38  ;;  %v12876_v27 = vcvt.s32.f32 %v12875_v47 }
 0xa5f   :  { %v11963_v37 = vmul.f32 %v7521_v43, %v5232_v32  ;;  %v5235_v44 = vperm.slane %v5234_v24, 0  ;;  %v6359_v13 = vpop.f32.mrf.mxu3  ;;  %v12871_v43 = vld [vmem:[#allocation10_spill] sm:$0xff]  ;;  %v5330_v28 = vsub.f32 %v12876_v27, %v11854_v49 }
 0xa60   :  { %v12872_v20 = vcvt.s32.f32 %v12871_v43 }
 0xa61   :  { %v11965_v12 = vmul.f32 %v7523_v33, %v5235_v44  ;;  %v6198_v38 = vpop.f32.mrf.mxu1  ;;  %v12873_v44 = vld [vmem:[#allocation33_spill] sm:$0xff]  ;;  %v5362_v53 = vand.u32 2147483647, %v5330_v28 }
 0xa62   :  { %v5332_v24 = vsub.f32 %v12872_v20, %v11854_v49  ;;  %v12879_v20 = vld [vmem:[#allocation14_spill] sm:$0xff] }
 0xa63   :  { %v12880_v0 = vcvt.s32.f32 %v12879_v20 }
 0xa64   :  { %v5364_v51 = vand.u32 2147483647, %v5332_v24  ;;  %v12881_v24 = vld [vmem:[#allocation30_spill] sm:$0xff] }
 0xa65   :  { %6077 = vmatmul.bf16.gmra.mxu0 %v7055_v63  ;;  %v12874_v63 = vcvt.s32.f32 %v12873_v44  ;;  %v5328_v44 = vsub.f32 %v12880_v0, %v11854_v49  ;;  %v12882_v50 = vcvt.s32.f32 %v12881_v24  ;;  %v12883_v0 = vld [vmem:[#allocation45_spill] sm:$0xff] }
 0xa66   :  { %v5396_v54 = vsub.f32 1.0, %v5364_v51  ;;  %v5394_v51 = vsub.f32 1.0, %v5362_v53  ;;  %v12887_v53 = vld [vmem:[#allocation47_spill] sm:$0xff] }
 0xa67   :  { %v6362_v1 = vpop.f32.mrf.mxu3  ;;  %v5331_v33 = vsub.f32 %v12874_v63, %v11854_v49  ;;  %v5360_v28 = vand.u32 2147483647, %v5328_v44 }
 0xa69   :  { %v6200_v41 = vpop.f32.mrf.mxu1  ;;  %v5363_v7 = vand.u32 2147483647, %v5331_v33  ;;  %v6363_v33 = vadd.f32 %v6362_v1, %v6193_v61 }
 0xa6b   :  { %v5395_v21 = vsub.f32 1.0, %v5363_v7  ;;  %v6472_v1 = vmul.f32 %v6363_v33, %v11898_v22  ;;  %v12889_v22 = vld [vmem:[#allocation46_spill] sm:$0xff] }
 0xa6f   :  { %v6364_v45 = vpop.f32.mrf.mxu3 }
 0xa70   :  { %v6365_v47 = vadd.f32 %v6364_v45, %v6195_v35  ;;  %v5428_v45 = vmax.f32 %v5396_v54, 0.0  ;;  %v12888_v54 = vcvt.s32.f32 %v12887_v53 }
 0xa72   :  { %v11967_v19 = vpop.f32.mrf.mxu0  ;;  %v6473_v35 = vmul.f32 %v6365_v47, %v11891_v16  ;;  %v5392_v16 = vsub.f32 1.0, %v5360_v28  ;;  %v12008_v20 = vmin.f32 %v5428_v45, 1.0 }
 0xa73   :  { %12869 = vst [vmem:[#allocation26_spill] sm:$0xff] %v11967_v19  ;;  %v7071_v19 = vor.u32 %v7352_v29, %v7070_v3 }
 0xa75   :  { %6082 = vmatmul.bf16.gmra.mxu0 %v7063_v23  ;;  %v12877_v23 = vld [vmem:[#allocation13_spill] sm:$0xff] }
 0xa76   :  { %v12878_v9 = vcvt.s32.f32 %v12877_v23  ;;  %v5327_v23 = vsub.f32 %v12882_v50, %v11854_v49  ;;  %v12885_v50 = vld [vmem:[#allocation44_spill] sm:$0xff] }
 0xa77   :  { %v6367_v32 = vpop.f32.mrf.mxu3  ;;  %v12886_v7 = vcvt.s32.f32 %v12885_v50 }
 0xa78   :  { %v5329_v14 = vsub.f32 %v12878_v9, %v11854_v49  ;;  %v6368_v43 = vadd.f32 %v6367_v32, %v6198_v38  ;;  %v12884_v38 = vcvt.s32.f32 %v12883_v0 }
 0xa7a   :  { %v11969_v11 = vpop.f32.mrf.mxu0  ;;  %v5361_v9 = vand.u32 2147483647, %v5329_v14  ;;  %v6474_v29 = vmul.f32 %v6368_v43, %v11887_v31  ;;  %v5326_v32 = vsub.f32 %v12884_v38, %v11854_v49  ;;  %v5325_v14 = vsub.f32 %v12886_v7, %v11854_v49 }
 0xa7b   :  { %12870 = vst [vmem:[#allocation23_spill] sm:$0xff] %v11969_v11  ;;  %v5427_v31 = vmax.f32 %v5395_v21, 0.0  ;;  %v5426_v43 = vmax.f32 %v5394_v51, 0.0  ;;  %v6355_v21 = vadd.f32 %v11957_v26, %v11950_v52  ;;  %v5424_v52 = vmax.f32 %v5392_v16, 0.0 }
 0xa7c   :  { %v5393_v61 = vsub.f32 1.0, %v5361_v9  ;;  %v5357_v47 = vand.u32 2147483647, %v5325_v14 }
 0xa7d   :  { %v12019_v26 = vmin.f32 %v5426_v43, 1.0  ;;  %v12028_v7 = vmin.f32 %v5424_v52, 1.0  ;;  %v12052_v43 = vadd.f32 %v11965_v12, %v11963_v37  ;;  %v12891_v37 = vmov 1.0   ;;  %v7094_v12 = vld [vmem:[#allocation2 + $0xc0] sm:$0xf] }
 0xa7e   :  { %v5425_v24 = vmax.f32 %v5393_v61, 0.0 }
 0xa7f   :  { %v6369_v11 = vpop.f32.mrf.mxu3  ;;  %v6467_v14 = vmul.f32 %v11946_v4, %v12019_v26  ;;  %v6465_v53 = vmul.f32 %v11942_v57, %v12028_v7 }
 0xa80   :  { %v6370_v27 = vadd.f32 %v6369_v11, %v6200_v41  ;;  %v6360_v41 = vadd.f32 %v6359_v13, %v6190_v34  ;;  %v5324_v34 = vsub.f32 %v12888_v54, %v11854_v49  ;;  %v5358_v13 = vand.u32 2147483647, %v5326_v32 }
 0xa81   :  { %v5389_v32 = vsub.f32 1.0, %v5357_v47  ;;  %v12022_v51 = vmin.f32 %v5425_v24, 1.0  ;;  %v7358_v47 = vld [vmem:[#allocation2 + $0xc4] sm:$0xf0] }
 0xa82   :  { %v11986_v63 = vpop.f32.mrf.mxu0  ;;  %v6475_v3 = vmul.f32 %v6370_v27, %v11894_v5  ;;  %v6358_v5 = vadd.f32 %v11961_v46, %v11959_v60  ;;  %v6471_v44 = vmul.f32 %v6360_v41, %v11904_v55  ;;  %v12890_v60 = vcvt.s32.f32 %v12889_v22 }
 0xa83   :  { %v5356_v33 = vand.u32 2147483647, %v5324_v34  ;;  %v5390_v0 = vsub.f32 1.0, %v5358_v13  ;;  %v6469_v55 = vmul.f32 %v6355_v21, %v12008_v20  ;;  %v5421_v61 = vmax.f32 %v5389_v32, 0.0 }
 0xa84   :  { %6496 = vmatpush.msrb.mxu3 %v6475_v3  ;;  %v5323_v46 = vsub.f32 %v12890_v60, %v11854_v49  ;;  %v6470_v9 = vmul.f32 %v6358_v5, %v11910_v42  ;;  %v7354_v3 = vld [vmem:[#allocation2 + $0xa4] sm:$0xf0]  ;;  %v6466_v5 = vmul.f32 %v11944_v10, %v12022_v51 }
 0xa85   :  { %6087 = vmatmul.bf16.gmra.mxu0 %v7071_v19  ;;  %v5359_v19 = vand.u32 2147483647, %v5327_v23  ;;  %v12016_v23 = vmin.f32 %v5427_v31, 1.0  ;;  %v5422_v50 = vmax.f32 %v5390_v0, 0.0  ;;  %v12040_v34 = vmin.f32 %v5421_v61, 1.0 }
 0xa86   :  { %6497 = vmatpush.msrb.mxu3 %v6474_v29  ;;  %v7078_v29 = vld [vmem:[#allocation2 + $0xa0] sm:$0xf]  ;;  %v5355_v38 = vand.u32 2147483647, %v5323_v46 }
 0xa87   :  { %v5391_v27 = vsub.f32 1.0, %v5359_v19  ;;  %v6468_v45 = vmul.f32 %v11948_v62, %v12016_v23  ;;  %v7079_v42 = vor.u32 %v7354_v3, %v7078_v29  ;;  %v6462_v21 = vmul.f32 %v11936_v15, %v12040_v34  ;;  %v12892_v3 = vld [vmem:[#allocation38_spill] sm:$0xff] }
 0xa88   :  { %6498 = vmatpush.msrb.mxu3 %v6473_v35  ;;  %v5388_v35 = vsub.f32 1.0, %v5356_v33  ;;  %v5387_v19 = vsub.f32 1.0, %v5355_v38  ;;  %v12893_v0 = vcvt.s32.f32 %v12892_v3 }
 0xa89   :  { %v5423_v28 = vmax.f32 %v5391_v27, 0.0  ;;  %v7095_v27 = vor.u32 %v7358_v47, %v7094_v12 }
 0xa8a   :  { %v12006_v11 = vpop.f32.mrf.mxu0  ;;  %6499 = vmatpush.msrb.mxu3 %v6472_v1  ;;  %v5420_v62 = vmax.f32 %v5388_v35, 0.0  ;;  %v12036_v1 = vmin.f32 %v5422_v50, 1.0  ;;  %v5419_v54 = vmax.f32 %v5387_v19, 0.0  ;;  %v5322_v52 = vsub.f32 %v12893_v0, %v11854_v49  ;;  %v12898_v50 = vld [vmem:[#allocation9_spill] sm:$0xff] }
 0xa8b   :  { %v12032_v31 = vmin.f32 %v5423_v28, 1.0  ;;  %v12896_v28 = vld [vmem:[#allocation25_spill] sm:$0xff] }
 0xa8c   :  { %6500 = vmatpush.msrb.mxu3 %v6471_v44  ;;  %v12046_v16 = vmin.f32 %v5420_v62, 1.0  ;;  %v6463_v10 = vmul.f32 %v11938_v30, %v12036_v1  ;;  %v12054_v57 = vmin.f32 %v5419_v54, 1.0  ;;  %v7356_v44 = vld [vmem:[#allocation2 + $0xb4] sm:$0xf0]  ;;  %v5354_v35 = vand.u32 2147483647, %v5322_v52  ;;  %v12094_v52 = vpop.f32.mrf.mxu2 }
 0xa8d   :  { %v6464_v4 = vmul.f32 %v11940_v6, %v12032_v31  ;;  %v7086_v6 = vld [vmem:[#allocation2 + $0xb0] sm:$0xf] }
 0xa8e   :  { %6501 = vmatpush.msrb.mxu3 %v6470_v9  ;;  %v6461_v22 = vmul.f32 %v11934_v56, %v12046_v16  ;;  %v6460_v30 = vmul.f32 %v11932_v39, %v12054_v57  ;;  %v7087_v60 = vor.u32 %v7356_v44, %v7086_v6 }
 0xa90   :  { %6502 = vmatpush.msrb.mxu3 %v6469_v55  ;;  %v12894_v55 = vld [vmem:[#allocation21_spill] sm:$0xff] }
 0xa91   :  { %v12895_v38 = vcvt.s32.f32 %v12894_v55  ;;  %v12906_v55 = vld [vmem:[#allocation8_spill] sm:$0xff] }
 0xa92   :  { %v12026_v41 = vpop.f32.mrf.mxu0  ;;  %6503 = vmatpush.msrb.mxu3 %v6468_v45  ;;  %v12897_v45 = vcvt.s32.f32 %v12896_v28 }
 0xa93   :  { %v5321_v32 = vsub.f32 %v12895_v38, %v11854_v49  ;;  %v12907_v38 = vcvt.s32.f32 %v12906_v55 }
 0xa94   :  { %6504 = vmatpush.msrb.mxu3 %v6467_v14  ;;  %v12899_v14 = vcvt.s32.f32 %v12898_v50 }
 0xa95   :  { %6092 = vmatmul.bf16.gmra.mxu0 %v7079_v42  ;;  %v5320_v42 = vsub.f32 %v12897_v45, %v11854_v49  ;;  %v5353_v61 = vand.u32 2147483647, %v5321_v32  ;;  %v5315_v32 = vsub.f32 %v12907_v38, %v11854_v49 }
 0xa96   :  { %6505 = vmatpush.msrb.mxu3 %v6466_v5  ;;  %v5319_v19 = vsub.f32 %v12899_v14, %v11854_v49  ;;  %v12900_v5 = vld [vmem:[#allocation22_spill] sm:$0xff] }
 0xa97   :  { %v12901_v62 = vcvt.s32.f32 %v12900_v5 }
 0xa98   :  { %6506 = vmatpush.msrb.mxu3 %v6465_v53 }
 0xa99   :  { %v5318_v53 = vsub.f32 %v12901_v62, %v11854_v49 }
 0xa9a   :  { %v12044_v13 = vpop.f32.mrf.mxu0  ;;  %6507 = vmatpush.msrb.mxu3 %v6464_v4  ;;  %v5352_v4 = vand.u32 2147483647, %v5320_v42 }
 0xa9c   :  { %6508 = vmatpush.msrb.mxu3 %v6463_v10  ;;  %v5386_v10 = vsub.f32 1.0, %v5354_v35  ;;  %v5384_v3 = vsub.f32 1.0, %v5352_v4  ;;  %v12908_v35 = vld [vmem:[#allocation17_spill] sm:$0xff] }
 0xa9d   :  { %v12909_v50 = vcvt.s32.f32 %v12908_v35 }
 0xa9e   :  { %6509 = vmatpush.msrb.mxu3 %v6462_v21  ;;  %v12902_v21 = vld [vmem:[#allocation31_spill] sm:$0xff]  ;;  %v5418_v0 = vmax.f32 %v5386_v10, 0.0  ;;  %v5416_v62 = vmax.f32 %v5384_v3, 0.0 }
 0xa9f   :  { %v12903_v6 = vcvt.s32.f32 %v12902_v21  ;;  %v5314_v14 = vsub.f32 %v12909_v50, %v11854_v49  ;;  %v12910_v21 = vld [vmem:[#allocation24_spill] sm:$0xff] }
 0xaa0   :  { %6510 = vmatpush.msrb.mxu3 %v6461_v22  ;;  %v5351_v22 = vand.u32 2147483647, %v5319_v19  ;;  %v12113_v38 = vmin.f32 %v5416_v62, 1.0  ;;  %v12914_v50 = vld [vmem:[#allocation40_spill] sm:$0xff] }
 0xaa1   :  { %v5317_v44 = vsub.f32 %v12903_v6, %v11854_v49  ;;  %v12911_v6 = vcvt.s32.f32 %v12910_v21  ;;  %v5346_v3 = vand.u32 2147483647, %v5314_v14  ;;  %v12915_v14 = vcvt.s32.f32 %v12914_v50 }
 0xaa2   :  { %v12062_v46 = vpop.f32.mrf.mxu0  ;;  %6511 = vmatpush.msrb.mxu3 %v6460_v30  ;;  %v5385_v30 = vsub.f32 1.0, %v5353_v61  ;;  %v5383_v45 = vsub.f32 1.0, %v5351_v22  ;;  %v5347_v22 = vand.u32 2147483647, %v5315_v32 }
 0xaa3   :  { %6512 = vmatmul.f32.vlgmr.msrb.gmra.mxu3 %v12891_v37  ;;  %v5349_v28 = vand.u32 2147483647, %v5317_v44  ;;  %v5313_v44 = vsub.f32 %v12911_v6, %v11854_v49 }
 0xaa4   :  { %v5417_v42 = vmax.f32 %v5385_v30, 0.0 }
 0xaa5   :  { %6097 = vmatmul.bf16.gmra.mxu0 %v7087_v60  ;;  %v12904_v60 = vld [vmem:[#allocation28_spill] sm:$0xff]  ;;  %v5381_v30 = vsub.f32 1.0, %v5349_v28  ;;  %v5345_v28 = vand.u32 2147483647, %v5313_v44 }
 0xaa6   :  { %v12905_v12 = vcvt.s32.f32 %v12904_v60  ;;  %v5415_v60 = vmax.f32 %v5383_v45, 0.0  ;;  %v5379_v45 = vsub.f32 1.0, %v5347_v22 }
 0xaa8   :  { %v5316_v47 = vsub.f32 %v12905_v12, %v11854_v49  ;;  %v12109_v12 = vmin.f32 %v5417_v42, 1.0  ;;  %v5413_v42 = vmax.f32 %v5381_v30, 0.0 }
 0xaaa   :  { %v12065_v15 = vpop.f32.mrf.mxu0  ;;  %v5348_v19 = vand.u32 2147483647, %v5316_v47 }
 0xab2   :  { %v12067_v24 = vpop.f32.mrf.mxu0 }
 0xab5   :  { %6102 = vmatmul.bf16.gmra.mxu0 %v7095_v27  ;;  %v5350_v27 = vand.u32 2147483647, %v5318_v53  ;;  %v12102_v53 = vmin.f32 %v5418_v0, 1.0  ;;  %v5380_v0 = vsub.f32 1.0, %v5348_v19  ;;  %v5311_v19 = vsub.f32 %v12915_v14, %v11854_v49 }
 0xab7   :  { %v5382_v61 = vsub.f32 1.0, %v5350_v27 }
 0xab9   :  { %v5414_v55 = vmax.f32 %v5382_v61, 0.0 }
 0xaba   :  { %v12069_v56 = vpop.f32.mrf.mxu0 }
 0xabb   :  { %v12129_v62 = vmin.f32 %v5414_v55, 1.0  ;;  %v6235_v55 = vadd.f32 %v11733_v17, %v12069_v56  ;;  %v12922_v56 = vld [vmem:[#allocation15_spill] sm:$0xff] }
 0xabc   :  { %v12923_v14 = vcvt.s32.f32 %v12922_v56 }
 0xac2   :  { %v12071_v39 = vpop.f32.mrf.mxu0 }
 0xac3   :  { %v6238_v22 = vadd.f32 %v11739_v48, %v12071_v39  ;;  %v12920_v39 = vld [vmem:[#allocation35_spill] sm:$0xff] }
 0xaca   :  { %v6070_v9 = vpop.f32.mrf.mxu0 }
 0xacb   :  { %v6240_v61 = vadd.f32 %v11743_v59, %v6070_v9  ;;  %v5377_v59 = vsub.f32 1.0, %v5345_v28  ;;  %v5411_v9 = vmax.f32 %v5379_v45, 0.0  ;;  %v6233_v45 = vadd.f32 %v11728_v36, %v12067_v24 }
 0xacd   :  { %v5409_v50 = vmax.f32 %v5377_v59, 0.0  ;;  %v12155_v17 = vmin.f32 %v5411_v9, 1.0  ;;  %v12924_v9 = vld [vmem:[#allocation54_spill] sm:$0xff] }
 0xad2   :  { %v6073_v33 = vpop.f32.mrf.mxu0 }
 0xad3   :  { %v6243_v35 = vadd.f32 %v11747_v8, %v6073_v33  ;;  %v5378_v8 = vsub.f32 1.0, %v5346_v3  ;;  %v5412_v33 = vmax.f32 %v5380_v0, 0.0  ;;  %v5343_v0 = vand.u32 2147483647, %v5311_v19 }
 0xad4   :  { %v5307_v19 = vsub.f32 %v12923_v14, %v11854_v49 }
 0xad5   :  { %v12147_v48 = vmin.f32 %v5412_v33, 1.0 }
 0xad7   :  { %v6381_v33 = vmul.f32 %v6235_v55, %v12147_v48 }
 0xada   :  { %v6075_v29 = vpop.f32.mrf.mxu0 }
 0xadb   :  { %v6245_v47 = vadd.f32 %v11753_v18, %v6075_v29  ;;  %v12120_v18 = vmin.f32 %v5415_v60, 1.0  ;;  %v12122_v29 = vpop.f32.mrf.mxu2  ;;  %v12139_v60 = vmin.f32 %v5413_v42, 1.0 }
 0xadd   :  { %v6384_v30 = vmul.f32 %v6243_v35, %v12120_v18  ;;  %v6382_v42 = vmul.f32 %v6238_v22, %v12139_v60  ;;  %v6380_v22 = vmul.f32 %v6233_v45, %v12155_v17 }
 0xae2   :  { %v6078_v54 = vpop.f32.mrf.mxu0 }
 0xae3   :  { %v6248_v4 = vadd.f32 %v11763_v25, %v6078_v54  ;;  %v12912_v25 = vld [vmem:[#allocation41_spill] sm:$0xff] }
 0xae5   :  { %v6386_v32 = vmul.f32 %v6248_v4, %v12109_v12 }
 0xaea   :  { %v6080_v5 = vpop.f32.mrf.mxu0 }
 0xaeb   :  { %v6250_v10 = vadd.f32 %v11767_v40, %v6080_v5  ;;  %v12913_v40 = vcvt.s32.f32 %v12912_v25  ;;  %v6385_v5 = vmul.f32 %v6245_v47, %v12113_v38  ;;  %v12918_v47 = vld [vmem:[#allocation39_spill] sm:$0xff]  ;;  %v6383_v25 = vmul.f32 %v6240_v61, %v12129_v62 }
 0xaed   :  { %v6387_v27 = vmul.f32 %v6250_v10, %v12102_v53  ;;  %v5312_v54 = vsub.f32 %v12913_v40, %v11854_v49  ;;  %v12916_v10 = vld [vmem:[#allocation34_spill] sm:$0xff]  ;;  %v5410_v40 = vmax.f32 %v5378_v8, 0.0  ;;  %v6230_v8 = vadd.f32 %v11724_v58, %v12065_v15 }
 0xaee   :  { %v12917_v21 = vcvt.s32.f32 %v12916_v10  ;;  %v5339_v58 = vand.u32 2147483647, %v5307_v19 }
 0xaef   :  { %6404 = vmatpush.msra.mxu0 %v6387_v27  ;;  %v5344_v44 = vand.u32 2147483647, %v5312_v54  ;;  %v12919_v27 = vcvt.s32.f32 %v12918_v47  ;;  %v12921_v54 = vcvt.s32.f32 %v12920_v39  ;;  %v12163_v10 = vmin.f32 %v5410_v40, 1.0 }
 0xaf0   :  { %v5310_v6 = vsub.f32 %v12917_v21, %v11854_v49  ;;  %v12167_v21 = vpop.f32.mrf.mxu2  ;;  %v6225_v47 = vadd.f32 %v12924_v9, %v12044_v13  ;;  %v5371_v40 = vsub.f32 1.0, %v5339_v58  ;;  %v12932_v9 = vld [vmem:[#allocation27_spill] sm:$0xff] }
 0xaf1   :  { %6405 = vmatpush.msra.mxu0 %v6386_v32  ;;  %v5309_v3 = vsub.f32 %v12919_v27, %v11854_v49  ;;  %v5308_v35 = vsub.f32 %v12921_v54, %v11854_v49  ;;  %v5376_v28 = vsub.f32 1.0, %v5344_v44  ;;  %v6228_v49 = vadd.f32 %v11719_v2, %v12062_v46 }
 0xaf2   :  { %v12131_v4 = vpop.f32.mrf.mxu0  ;;  %v5342_v32 = vand.u32 2147483647, %v5310_v6  ;;  %v6379_v27 = vmul.f32 %v6230_v8, %v12163_v10  ;;  %v12929_v8 = vld [vmem:[#allocation50_spill] sm:$0xff] }
 0xaf3   :  { %6406 = vmatpush.msra.mxu0 %v6385_v5  ;;  %v5341_v61 = vand.u32 2147483647, %v5309_v3  ;;  %v5375_v5 = vsub.f32 1.0, %v5343_v0  ;;  %v5340_v36 = vand.u32 2147483647, %v5308_v35  ;;  %v5408_v44 = vmax.f32 %v5376_v28, 0.0 }
 0xaf4   :  { %v5374_v6 = vsub.f32 1.0, %v5342_v32  ;;  %v12926_v35 = vld [vmem:[#allocation52_spill] sm:$0xff] }
 0xaf5   :  { %6407 = vmatpush.msra.mxu0 %v6384_v30  ;;  %v12172_v30 = vmin.f32 %v5409_v50, 1.0  ;;  %v5373_v15 = vsub.f32 1.0, %v5341_v61  ;;  %v5407_v59 = vmax.f32 %v5375_v5, 0.0  ;;  %v5372_v3 = vsub.f32 1.0, %v5340_v36  ;;  %v12927_v50 = vld [vmem:[#allocation51_spill] sm:$0xff] }
 0xaf6   :  { %v5406_v0 = vmax.f32 %v5374_v6, 0.0  ;;  %v5440_v55 = vmin.f32 %v5408_v44, 1.0  ;;  %v6220_v32 = vadd.f32 %v12926_v35, %v12006_v11  ;;  %v6218_v56 = vadd.f32 %v12927_v50, %v11986_v63  ;;  %v12928_v5 = vld [vmem:[#allocation23_spill] sm:$0xff]  ;;  %v12930_v6 = vld [vmem:[#allocation26_spill] sm:$0xff]  ;;  %v12931_v44 = vld [vmem:[#allocation49_spill] sm:$0xff] }
 0xaf7   :  { %6408 = vmatpush.msra.mxu0 %v6383_v25  ;;  %v12925_v25 = vld [vmem:[#allocation53_spill] sm:$0xff]  ;;  %v6378_v46 = vmul.f32 %v6228_v49, %v12172_v30  ;;  %v5405_v39 = vmax.f32 %v5373_v15, 0.0  ;;  %v5439_v54 = vmin.f32 %v5407_v59, 1.0  ;;  %v5404_v45 = vmax.f32 %v5372_v3, 0.0  ;;  %v12936_v35 = vld [vmem:[#allocation36_spill] sm:$0xff] }
 0xaf8   :  { %v6223_v2 = vadd.f32 %v12925_v25, %v12026_v41  ;;  %v6377_v28 = vmul.f32 %v6225_v47, %v5440_v55  ;;  %v5403_v41 = vmax.f32 %v5371_v40, 0.0  ;;  %v6299_v61 = vpop.f32.mrf.mxu2  ;;  %v6213_v49 = vadd.f32 %v12931_v44, %v12930_v6  ;;  %v12934_v25 = vld [vmem:[#allocation42_spill] sm:$0xff] }
 0xaf9   :  { %6409 = vmatpush.msra.mxu0 %v6382_v42  ;;  %v5438_v42 = vmin.f32 %v5406_v0, 1.0  ;;  %v5437_v19 = vmin.f32 %v5405_v39, 1.0  ;;  %v5436_v11 = vmin.f32 %v5404_v45, 1.0  ;;  %v6459_v47 = vmul.f32 %v12932_v9, %v12102_v53  ;;  %v12939_v45 = vld [vmem:[#allocation20_spill] sm:$0xff] }
 0xafa   :  { %v12165_v24 = vpop.f32.mrf.mxu0  ;;  %v6376_v14 = vmul.f32 %v6223_v2, %v5439_v54  ;;  %v5435_v58 = vmin.f32 %v5403_v41, 1.0  ;;  %v6457_v2 = vmul.f32 %v12934_v25, %v12113_v38  ;;  %v6455_v53 = vmul.f32 %v12936_v35, %v12129_v62 }
 0xafb   :  { %6410 = vmatpush.msra.mxu0 %v6381_v33  ;;  %v6215_v33 = vadd.f32 %v12929_v8, %v12928_v5  ;;  %v6375_v36 = vmul.f32 %v6220_v32, %v5438_v42  ;;  %v12937_v32 = vld [vmem:[#allocation16_spill] sm:$0xff]  ;;  %v6454_v50 = vmul.f32 %v12939_v45, %v12139_v60  ;;  %v12942_v8 = vld [vmem:[#allocation69_spill] sm:$0xff]  ;;  %v12944_v60 = vld [vmem:[#allocation67_spill] sm:$0xff] }
 0xafc   :  { %v6372_v59 = vmul.f32 %v6213_v49, %v5435_v58  ;;  %v12941_v5 = vld [vmem:[#allocation72_spill] sm:$0xff]  ;;  %v12945_v49 = vld [vmem:[#allocation65_spill] sm:$0xff] }
 0xafd   :  { %6411 = vmatpush.msra.mxu0 %v6380_v22  ;;  %v6374_v22 = vmul.f32 %v6218_v56, %v5437_v19  ;;  %v6373_v15 = vmul.f32 %v6215_v33, %v5436_v11  ;;  %v12940_v56 = vld [vmem:[#allocation37_spill] sm:$0xff]  ;;  %v6451_v62 = vmul.f32 %v12941_v5, %v12163_v10 }
 0xafe   :  { %v6453_v38 = vmul.f32 %v12940_v56, %v12147_v48  ;;  %v6300_v48 = vadd.f32 %v6299_v61, %v12945_v49  ;;  %v12947_v10 = vld [vmem:[#allocation61_spill] sm:$0xff]  ;;  %v12955_v56 = vld [vmem:[#allocation58_spill] sm:$0xff] }
 0xaff   :  { %6412 = vmatpush.msra.mxu0 %v6379_v27  ;;  %v12933_v27 = vld [vmem:[#allocation43_spill] sm:$0xff] }
 0xb00   :  { %v6458_v3 = vmul.f32 %v12933_v27, %v12109_v12  ;;  %v6302_v0 = vpop.f32.mrf.mxu2  ;;  %v6447_v27 = vmul.f32 %v6300_v48, %v5438_v42 }
 0xb01   :  { %6413 = vmatpush.msra.mxu0 %v6378_v46  ;;  %v12935_v46 = vld [vmem:[#allocation12_spill] sm:$0xff]  ;;  %v6303_v44 = vadd.f32 %v6302_v0, %v12944_v60 }
 0xb02   :  { %v12182_v13 = vpop.f32.mrf.mxu0  ;;  %v6456_v40 = vmul.f32 %v12935_v46, %v12120_v18 }
 0xb03   :  { %6414 = vmatpush.msra.mxu0 %v6377_v28  ;;  %v12938_v28 = vld [vmem:[#allocation73_spill] sm:$0xff] }
 0xb04   :  { %v6313_v12 = vadd.f32 %v12938_v28, %v12937_v32 }
 0xb05   :  { %6415 = vmatpush.msra.mxu0 %v6376_v14 }
 0xb06   :  { %v6452_v18 = vmul.f32 %v6313_v12, %v12155_v17  ;;  %v12954_v12 = vld [vmem:[#allocation60_spill] sm:$0xff] }
 0xb07   :  { %6416 = vmatpush.msra.mxu0 %v6375_v36  ;;  %v12943_v36 = vld [vmem:[#allocation71_spill] sm:$0xff] }
 0xb08   :  { %v6304_v14 = vpop.f32.mrf.mxu2  ;;  %v6450_v6 = vmul.f32 %v12943_v36, %v12172_v30 }
 0xb09   :  { %6417 = vmatpush.msra.mxu0 %v6374_v22  ;;  %v6305_v33 = vadd.f32 %v6304_v14, %v12942_v8  ;;  %v12956_v14 = vld [vmem:[#allocation57_spill] sm:$0xff]  ;;  %v12961_v8 = vld [vmem:[#allocation18_spill] sm:$0xff] }
 0xb0a   :  { %v12190_v63 = vpop.f32.mrf.mxu0 }
 0xb0b   :  { %6418 = vmatpush.msra.mxu0 %v6373_v15  ;;  %v6449_v22 = vmul.f32 %v6305_v33, %v5440_v55  ;;  %v12946_v15 = vld [vmem:[#allocation63_spill] sm:$0xff]  ;;  %v4362_v33 = vsub.f32 1.0, %v12961_v8 }
 0xb0c   :  { %v6298_v17 = vadd.f32 %v12167_v21, %v12946_v15 }
 0xb0d   :  { %6419 = vmatpush.msra.mxu0 %v6372_v59  ;;  %v6448_v59 = vmul.f32 %v6303_v44, %v5439_v54 }
 0xb0e   :  { %6420 = vmatmul.f32.vlgmr.msra.gmra.mxu0 %v12891_v37  ;;  %v6446_v0 = vmul.f32 %v6298_v17, %v5437_v19  ;;  %v12952_v19 = vld [vmem:[#allocation64_spill] sm:$0xff] }
 0xb0f   :  { %6476 = vmatpush.msrb.mxu0 %v6459_v47  ;;  %v6295_v47 = vadd.f32 %v12122_v29, %v12947_v10  ;;  %v12950_v29 = vld [vmem:[#allocation70_spill] sm:$0xff] }
 0xb11   :  { %6477 = vmatpush.msrb.mxu0 %v6458_v3  ;;  %v12948_v3 = vld [vmem:[#allocation59_spill] sm:$0xff]  ;;  %v6445_v25 = vmul.f32 %v6295_v47, %v5436_v11 }
 0xb12   :  { %v6093_v39 = vpop.f32.mrf.mxu0  ;;  %v6293_v30 = vadd.f32 %v12094_v52, %v12948_v3 }
 0xb13   :  { %6478 = vmatpush.msrb.mxu0 %v6457_v2  ;;  %v12949_v2 = vld [vmem:[#allocation68_spill] sm:$0xff]  ;;  %v6263_v45 = vadd.f32 %v12954_v12, %v6093_v39 }
 0xb14   :  { %v6444_v55 = vmul.f32 %v6293_v30, %v5435_v58  ;;  %v12953_v58 = vld [vmem:[#allocation62_spill] sm:$0xff] }
 0xb15   :  { %6479 = vmatpush.msrb.mxu0 %v6456_v40  ;;  %v12951_v40 = vld [vmem:[#allocation66_spill] sm:$0xff] }
 0xb17   :  { %6480 = vmatpush.msrb.mxu0 %v6455_v53 }
 0xb19   :  { %6481 = vmatpush.msrb.mxu0 %v6454_v50 }
 0xb1a   :  { %v6095_v41 = vpop.f32.mrf.mxu0 }
 0xb1b   :  { %6482 = vmatpush.msrb.mxu0 %v6453_v38  ;;  %v6265_v32 = vadd.f32 %v12953_v58, %v6095_v41  ;;  %v6260_v38 = vadd.f32 %v12955_v56, %v12190_v63 }
 0xb1d   :  { %6483 = vmatpush.msrb.mxu0 %v6452_v18  ;;  %v6392_v18 = vmul.f32 %v6263_v45, %v12032_v31  ;;  %v6391_v39 = vmul.f32 %v6260_v38, %v12036_v1 }
 0xb1f   :  { %6484 = vmatpush.msrb.mxu0 %v6451_v62  ;;  %v12960_v62 = vld [vmem:[#allocation48_spill] sm:$0xff] }
 0xb21   :  { %6485 = vmatpush.msrb.mxu0 %v6450_v6 }
 0xb22   :  { %v6098_v9 = vpop.f32.mrf.mxu0 }
 0xb23   :  { %6486 = vmatpush.msrb.mxu0 %v6449_v22  ;;  %v6268_v53 = vadd.f32 %v12952_v19, %v6098_v9  ;;  %v4363_v22 = vperm.slane %v4362_v33, 4 }
 0xb25   :  { %6487 = vmatpush.msrb.mxu0 %v6448_v59  ;;  %v6394_v50 = vmul.f32 %v6268_v53, %v12022_v51  ;;  %v12958_v51 = vld [vmem:[#allocation55_spill] sm:$0xff]  ;;  %v4364_v47 = vmul.f32 %v4363_v22, %v12961_v8 }
 0xb26   :  { %v6253_v5 = vadd.f32 %v12958_v51, %v12131_v4  ;;  %v4366_v4 = vmul.f32 0.04, %v4362_v33  ;;  %v6513_v60 = vpop.f32.mrf.mxu3 }
 0xb27   :  { %6488 = vmatpush.msrb.mxu0 %v6447_v27 }
 0xb28   :  { %v4369_v44 = vperm.slane %v4366_v4, 4 }
 0xb29   :  { %6489 = vmatpush.msrb.mxu0 %v6446_v0 }
 0xb2a   :  { %v6100_v61 = vpop.f32.mrf.mxu0 }
 0xb2b   :  { %6490 = vmatpush.msrb.mxu0 %v6445_v25  ;;  %v6270_v35 = vadd.f32 %v12951_v40, %v6100_v61  ;;  %v7617_v25 = vmov 200.0  }
 0xb2d   :  { %6491 = vmatpush.msrb.mxu0 %v6444_v55  ;;  %v6395_v28 = vmul.f32 %v6270_v35, %v12019_v26  ;;  %v12957_v26 = vld [vmem:[#allocation56_spill] sm:$0xff] }
 0xb2e   :  { %6492 = vmatmul.f32.vlgmr.msrb.gmra.mxu0 %v12891_v37  ;;  %v6255_v41 = vadd.f32 %v12957_v26, %v12165_v24  ;;  %v12959_v24 = vld [vmem:[#allocation19_spill] sm:$0xff] }
 0xb2f   :  { %v4353_v1 = vadd.f32 %v12960_v62, %v12959_v24 }
 0xb31   :  { %v4357_v36 = vmin.f32 %v4353_v1, 0.0 }
 0xb32   :  { %v6103_v21 = vpop.f32.mrf.mxu0 }
 0xb33   :  { %v6273_v46 = vadd.f32 %v12949_v2, %v6103_v21  ;;  %v4360_v6 = vmul.f32 1.442695, %v4357_v36 }
 0xb35   :  { %v6396_v11 = vmul.f32 %v6273_v46, %v12016_v23  ;;  %v6258_v23 = vadd.f32 %v12956_v14, %v12182_v13  ;;  %v6388_v13 = vmul.f32 %v6253_v5, %v12054_v57  ;;  %7524 = vpow2.f32 %v4360_v6 }
 0xb36   :  { %7526 = vrcp.f32 %v7617_v25 }
 0xb37   :  { %v6390_v63 = vmul.f32 %v6258_v23, %v12040_v34 }
 0xb3a   :  { %v6105_v54 = vpop.f32.mrf.mxu0 }
 0xb3b   :  { %v6275_v42 = vadd.f32 %v12950_v29, %v6105_v54  ;;  %v7525_v10 = vpop.eup %7524 }
 0xb3c   :  { %v4365_v3 = vmul.f32 %v7525_v10, %v4364_v47  ;;  %v7527_v61 = vpop.eup %7526 }
 0xb3d   :  { %v6397_v52 = vmul.f32 %v6275_v42, %v12008_v20  ;;  %v6393_v20 = vmul.f32 %v6265_v32, %v12028_v7  ;;  %v6389_v7 = vmul.f32 %v6255_v41, %v12046_v16  ;;  %v4367_v16 = vperm.slane %v12961_v8, 4 }
 0xb3e   :  { %v6532_v21 = vmul.f32 200.0, %v7527_v61  ;;  %vm6536_vm4 = vweird.f32 %v7527_v61 }
 0xb3f   :  { %6430 = vmatpush.msra.mxu1 %v6397_v52  ;;  %v4368_v48 = vmul.f32 %v4367_v16, %v12961_v8 }
 0xb40   :  { %v6533_v29 = vsub.f32 1.0, %v6532_v21 }
 0xb41   :  { %6431 = vmatpush.msra.mxu1 %v6396_v11  ;;  %v4370_v15 = vadd.f32 %v4369_v44, %v4368_v48 }
 0xb42   :  { %v6534_v40 = vmul.f32 %v7527_v61, %v6533_v29 }
 0xb43   :  { %6432 = vmatpush.msra.mxu1 %v6395_v28 }
 0xb44   :  { %v6535_v35 = vadd.f32 %v7527_v61, %v6534_v40 }
 0xb45   :  { %6433 = vmatpush.msra.mxu1 %v6394_v50 }
 0xb46   :  { %v6537_v53 = vsel %vm6536_vm4, %v7527_v61, %v6535_v35 }
 0xb47   :  { %6434 = vmatpush.msra.mxu1 %v6393_v20 }
 0xb49   :  { %6435 = vmatpush.msra.mxu1 %v6392_v18 }
 0xb4b   :  { %6436 = vmatpush.msra.mxu1 %v6391_v39 }
 0xb4d   :  { %6437 = vmatpush.msra.mxu1 %v6390_v63 }
 0xb4f   :  { %6438 = vmatpush.msra.mxu1 %v6389_v7 }
 0xb51   :  { %6439 = vmatpush.msra.mxu1 %v6388_v13 }
 0xb52   :  { %6440 = vmatmul.f32.vlgmr.msra.gmra.mxu1 %v12891_v37 }
 0xb8b   :  { %v6421_v31 = vpop.f32.mrf.mxu0 }
 0xbab   :  { %v6493_v34 = vpop.f32.mrf.mxu0 }
 0xbac   :  { %v6514_v49 = vadd.f32 %v6513_v60, %v6493_v34 }
 0xbae   :  { %v6518_v59 = vperm.slane %v6514_v49, 0 }
 0xbcf   :  { %v6441_v57 = vpop.f32.mrf.mxu1 }
 0xbd0   :  { %v6442_v37 = vadd.f32 %v6441_v57, %v6421_v31 }
 0xbd2   :  { %v6516_v17 = vperm.slane %v6442_v37, 0 }
 0xbd4   :  { %v6517_v9 = vmul.f32 %v6516_v17, %v4370_v15 }
 0xbd6   :  { %v6519_v27 = vadd.f32 %v6518_v59, %v6517_v9 }
 0xbd8   :  { %v6520_v30 = vmul.f32 %v6519_v27, %v12052_v43 }
 0xbda   :  { %v6521_v0 = vadd.f32 %v6520_v30, %v4365_v3 }
 0xbdc   :  { %v6523_v55 = vmax.f32 %v6521_v0, 1.1920929e-07  ;;  %v6522_v11 = vmul.f32 12.92, %v6521_v0  ;;  %vm6539_vm9 = vcmp.le.f32.partialorder %v6521_v0, 0.0031308 }
 0xbde   :  { %7528 = vlog2.f32 %v6523_v55 }
 0xbe4   :  { %v7529_v54 = vpop.eup %7528 }
 0xbe5   :  { %v6525_v2 = vmul.f32 0.6931472, %v7529_v54 }
 0xbe7   :  { %v6526_v46 = vmul.f32 0.41666666, %v6525_v2 }
 0xbe9   :  { %v6527_v42 = vmul.f32 1.442695, %v6526_v46 }
 0xbeb   :  { %7530 = vpow2.f32 %v6527_v42 }
 0xbf1   :  { %v7531_v52 = vpop.eup %7530 }
 0xbf2   :  { %v6529_v19 = vmul.f32 211.0, %v7531_v52 }
 0xbf4   :  { %v7252_v43 = vadd.f32 -11.0, %v6529_v19 }
 0xbf6   :  { %v6538_v58 = vmul.f32 %v7252_v43, %v6537_v53 }
 0xbf8   :  { %v6540_v32 = vsel %vm6539_vm9, %v6522_v11, %v6538_v58 }
 0xbf9   :  { %v6541_v28 = vmax.f32 %v6540_v32, 0.0 }
 0xbfb   :  { %v6542_v12 = vmin.f32 %v6541_v28, 1.0 }
 0xbfd   :  { %6543 = vst [vmem:[#allocation5] sm:$0x7] %v6542_v12 }
 0xbfe   :  { %6557 = dma.vmem_to_hbm [thread:$0]  %s6553_s20, 128, %s6555_s22, [#allocation4]  }
 0xbff   :  { %7599 = dma.done.wait [#allocation4], 128  }
 0xc00   :  { %7600 = vsyncadd [#allocation4], 4294967168 }
 0xc01   :  { %6562 = vsyncpa [#allocation3], 1 }
 0xc02   :  { %6563 = vsyncpa [#allocation4], 1 }

</bundles_post_ra>
